<compile_context>
chip_gen: v7x
topology: tpu7x:2x2x1
jax: 0.10.0
libtpu: 0.0.40
codegen_flags: <defaults>
</compile_context>

<pallas_src>
import functools

import jax
import jax.numpy as jnp
from jax import lax
from jax.experimental import pallas as pl
from jax.experimental.pallas import tpu as pltpu

# ----------------------------- configuration -----------------------------
B = 2            # batch
IN_C = 16        # in_channels
OUT_C = 32       # out_channels
TEMB_C = 32      # temb_channels
H = W = 16       # spatial
NUM_LAYERS = 2   # exercises both the conv-shortcut and identity-shortcut paths
GROUPS = 8       # resnet_groups (PyTorch default 32 does not divide these small channels)
EPS = 1e-6       # resnet_eps
OSF = 1.0        # output_scale_factor
CP = 128         # lane-padded channel width used inside the kernels


# ------------------------------ kernel helpers ------------------------------
def _silu(x):
    return x * jax.nn.sigmoid(x)


def _gn(x, gamma, beta, mask, cnt, eps):
    """GroupNorm over an (HW, CP) activation.  `mask` is a (CP, CP) 0/1 group-membership
    matrix restricted to real channels; padded channels have gamma=beta=0 and stay 0."""
    s1 = jnp.sum(x, axis=0, keepdims=True)                        # (1, CP)
    s2 = jnp.sum(x * x, axis=0, keepdims=True)                    # (1, CP)
    g1 = jnp.dot(s1, mask, preferred_element_type=jnp.float32)    # per-group sums
    g2 = jnp.dot(s2, mask, preferred_element_type=jnp.float32)
    mean = g1 / cnt
    var = jnp.maximum(g2 / cnt - mean * mean, 0.0)                # clamp (review note)
    inv = lax.rsqrt(var + eps)
    return (x - mean) * inv * gamma + beta


def _im2col(pad_ref, x2d, h, w):
    """Write x2d (h*w, CP) into the zero-bordered VMEM scratch and return the
    (h*w, 9*CP) patch matrix of a 3x3 / pad=1 convolution (single MXU matmul)."""
    hw, c = x2d.shape
    # image lives at rows [1, h], sublane-aligned column offset 8; border stays zero
    pad_ref[pl.ds(1, h), pl.ds(8, w), :] = x2d.reshape(h, w, c)
    taps = [pad_ref[pl.ds(dy, h), pl.ds(7 + dx, w), :].reshape(hw, c)
            for dy in range(3) for dx in range(3)]
    return jnp.concatenate(taps, axis=-1)


def _resnet_core(pad_ref, x, temb,
                 n1g, n1b, m1, w1, b1, tw, tb, n2g, n2b, m2, w2, b2, ws, wsb,
                 *, h, w, cnt1, cnt2, eps, inv_osf):
    hs = _silu(_gn(x, n1g, n1b, m1, cnt1, eps))
    hs = jnp.dot(_im2col(pad_ref, hs, h, w), w1,
                 preferred_element_type=jnp.float32) + b1             # conv1
    hs = hs + (jnp.dot(_silu(temb), tw,
                       preferred_element_type=jnp.float32) + tb)      # + time_emb_proj
    hs = _silu(_gn(hs, n2g, n2b, m2, cnt2, eps))
    # dropout(p=0.0), eval mode -> identity
    hs = jnp.dot(_im2col(pad_ref, hs, h, w), w2,
                 preferred_element_type=jnp.float32) + b2             # conv2
    shortcut = jnp.dot(x, ws, preferred_element_type=jnp.float32) + wsb
    return (hs + shortcut) * inv_osf


# --------------------------------- kernels ----------------------------------
def _resnet_kernel(x_ref, t_ref,
                   n1g, n1b, m1, w1, b1, tw, tb, n2g, n2b, m2, w2, b2, ws, wsb,
                   o_ref, pad_ref, *, h, w, cnt1, cnt2, eps, inv_osf):
    pad_ref[...] = jnp.zeros_like(pad_ref)
    out = _resnet_core(pad_ref, x_ref[0], t_ref[0],
                       n1g[...], n1b[...], m1[...], w1[...], b1[...], tw[...], tb[...],
                       n2g[...], n2b[...], m2[...], w2[...], b2[...], ws[...], wsb[...],
                       h=h, w=w, cnt1=cnt1, cnt2=cnt2, eps=eps, inv_osf=inv_osf)
    o_ref[0] = out


def _resnet_down_kernel(x_ref, t_ref,
                        n1g, n1b, m1, w1, b1, tw, tb, n2g, n2b, m2, w2, b2, ws, wsb,
                        wd, bd, sel,
                        o_ref, d_ref, pad_ref, *, h, w, cnt1, cnt2, eps, inv_osf):
    pad_ref[...] = jnp.zeros_like(pad_ref)
    out = _resnet_core(pad_ref, x_ref[0], t_ref[0],
                       n1g[...], n1b[...], m1[...], w1[...], b1[...], tw[...], tb[...],
                       n2g[...], n2b[...], m2[...], w2[...], b2[...], ws[...], wsb[...],
                       h=h, w=w, cnt1=cnt1, cnt2=cnt2, eps=eps, inv_osf=inv_osf)
    o_ref[0] = out
    # Downsample2D: full-res 3x3 conv on the VMEM-resident resnet output, then stride-2
    # pixel selection via a constant 0/1 (Ho*Wo, H*W) matrix (MXU matmul).
    full = jnp.dot(_im2col(pad_ref, out, h, w), wd[...],
                   preferred_element_type=jnp.float32) + bd[...]
    d_ref[0] = jnp.dot(sel[...], full, preferred_element_type=jnp.float32)


# -------------------------------- host wrappers ------------------------------
_WKEYS = ("n1g", "n1b", "m1", "w1", "b1", "tw", "tb",
          "n2g", "n2b", "m2", "w2", "b2", "ws", "wsb")


def _bcast(nd):
    return lambda b: (0,) * nd


def _weight_args(p):
    return tuple(p[k] for k in _WKEYS)


def _weight_specs(p):
    return [pl.BlockSpec(p[k].shape, _bcast(p[k].ndim)) for k in _WKEYS]


def _resnet_call(p, x, temb3, h, w, down=None, sel=None):
    bsz, hw, cp = x.shape
    common = dict(h=h, w=w,
                  cnt1=float(hw * (p["cin"] // GROUPS)),
                  cnt2=float(hw * (OUT_C // GROUPS)),
                  eps=float(EPS), inv_osf=float(1.0 / OSF))
    in_specs = [pl.BlockSpec((1, hw, cp), lambda b: (b, 0, 0)),
                pl.BlockSpec((1, 1, temb3.shape[-1]), lambda b: (b, 0, 0))]
    in_specs += _weight_specs(p)
    args = (x, temb3) + _weight_args(p)
    scratch = [pltpu.VMEM((h + 2, w + 16, cp), jnp.float32)]
    cparams = pltpu.CompilerParams(dimension_semantics=("parallel",),
                                   vmem_limit_bytes=32 * 1024 * 1024)
    if down is None:
        return pl.pallas_call(
            functools.partial(_resnet_kernel, **common),
            out_shape=jax.ShapeDtypeStruct((bsz, hw, cp), jnp.float32),
            grid=(bsz,),
            in_specs=in_specs,
            out_specs=pl.BlockSpec((1, hw, cp), lambda b: (b, 0, 0)),
            scratch_shapes=scratch,
            compiler_params=cparams,
        )(*args)
    hwd = (h // 2) * (w // 2)
    in_specs += [pl.BlockSpec(down["wd"].shape, _bcast(2)),
                 pl.BlockSpec(down["bd"].shape, _bcast(2)),
                 pl.BlockSpec(sel.shape, _bcast(2))]
    args += (down["wd"], down["bd"], sel)
    return pl.pallas_call(
        functools.partial(_resnet_down_kernel, **common),
        out_shape=(jax.ShapeDtypeStruct((bsz, hw, cp), jnp.float32),
                   jax.ShapeDtypeStruct((bsz, hwd, cp), jnp.float32)),
        grid=(bsz,),
        in_specs=in_specs,
        out_specs=(pl.BlockSpec((1, hw, cp), lambda b: (b, 0, 0)),
                   pl.BlockSpec((1, hwd, cp), lambda b: (b, 0, 0))),
        scratch_shapes=scratch,
        compiler_params=cparams,
    )(*args)


def down_block_2d(params, x, temb, h, w, sel):
    """x: (B, H*W, CP) channel-padded NHWC; temb: (B, TEMB_C)."""
    temb3 = temb.reshape(temb.shape[0], 1, temb.shape[1])
    output_states = ()
    hidden = x
    n = len(params["layers"])
    for i, layer in enumerate(params["layers"]):
        if i == n - 1 and params["down"] is not None:
            res_out, down_out = _resnet_call(layer, hidden, temb3, h, w,
                                             down=params["down"], sel=sel)
            output_states += (res_out, down_out)
            hidden = down_out
        else:
            hidden = _resnet_call(layer, hidden, temb3, h, w)
            output_states += (hidden,)
    return hidden, output_states


def make_sel(h, w):
    ho, wo = h // 2, w // 2
    idx = jnp.arange(ho * wo)
    src = 2 * (idx // wo) * w + 2 * (idx % wo)
    return (jnp.arange(h * w)[None, :] == src[:, None]).astype(jnp.float32)


# ------------------------------ parameter init ------------------------------
def init_params(key):
    keys = iter(jax.random.split(key, 64))

    def nrm(shape, scale):
        return scale * jax.random.normal(next(keys), shape, jnp.float32)

    def pad_vec(v):                                   # (1, n_real) -> (1, CP)
        return jnp.zeros((1, CP), jnp.float32).at[:, :v.shape[-1]].set(v)

    def conv_w(cin_real, cout_real):                  # packed im2col weight (9*CP, CP)
        wr = nrm((9, cin_real, cout_real), 1.0 / (3.0 * float(cin_real) ** 0.5))
        return (jnp.zeros((9, CP, CP), jnp.float32)
                .at[:, :cin_real, :cout_real].set(wr).reshape(9 * CP, CP))

    def gn_params(c_real):
        g = pad_vec(1.0 + nrm((1, c_real), 0.05))
        bta = pad_vec(nrm((1, c_real), 0.05))
        cg = c_real // GROUPS
        cidx = jnp.arange(CP)
        real = cidx < c_real
        same = (cidx[:, None] // cg) == (cidx[None, :] // cg)
        m = (same & real[:, None] & real[None, :]).astype(jnp.float32)
        return g, bta, m

    layers = []
    for i in range(NUM_LAYERS):
        cin = IN_C if i == 0 else OUT_C
        n1g, n1b, m1 = gn_params(cin)
        n2g, n2b, m2 = gn_params(OUT_C)
        if cin != OUT_C:                              # 1x1 conv_shortcut
            ws = (jnp.zeros((CP, CP), jnp.float32)
                  .at[:cin, :OUT_C].set(nrm((cin, OUT_C), 1.0 / float(cin) ** 0.5)))
            wsb = pad_vec(nrm((1, OUT_C), 0.02))
        else:                                         # identity shortcut
            ws = jnp.zeros((CP, CP), jnp.float32).at[:OUT_C, :OUT_C].set(jnp.eye(OUT_C))
            wsb = jnp.zeros((1, CP), jnp.float32)
        layers.append(dict(
            cin=cin,
            n1g=n1g, n1b=n1b, m1=m1,
            w1=conv_w(cin, OUT_C), b1=pad_vec(nrm((1, OUT_C), 0.02)),
            tw=(jnp.zeros((TEMB_C, CP), jnp.float32)
                .at[:, :OUT_C].set(nrm((TEMB_C, OUT_C), 1.0 / float(TEMB_C) ** 0.5))),
            tb=pad_vec(nrm((1, OUT_C), 0.02)),
            n2g=n2g, n2b=n2b, m2=m2,
            w2=conv_w(OUT_C, OUT_C), b2=pad_vec(nrm((1, OUT_C), 0.02)),
            ws=ws, wsb=wsb))
    down = dict(wd=conv_w(OUT_C, OUT_C), bd=pad_vec(nrm((1, OUT_C), 0.02)))
    return dict(layers=layers, down=down)


# --------------------------- pure-JAX reference (check) ----------------------
def _ref_group_norm(x, gamma, beta, groups, eps):
    b, h, w, c = x.shape
    xg = x.reshape(b, h * w, groups, c // groups)
    mean = xg.mean(axis=(1, 3), keepdims=True)
    var = xg.var(axis=(1, 3), keepdims=True)
    xn = ((xg - mean) / jnp.sqrt(var + eps)).reshape(b, h, w, c)
    return xn * gamma + beta


def _ref_conv3x3(x, w_packed, bias, stride=1):
    bsz, h, w, c = x.shape
    cout = bias.shape[0]
    wr = w_packed.reshape(9, CP, CP)[:, :c, :cout].reshape(9 * c, cout)
    xp = jnp.pad(x, ((0, 0), (1, 1), (1, 1), (0, 0)))
    ho = (h - 1) // stride + 1
    wo = (w - 1) // stride + 1
    taps = [xp[:, dy:dy + stride * (ho - 1) + 1:stride,
               dx:dx + stride * (wo - 1) + 1:stride, :]
            for dy in range(3) for dx in range(3)]
    patches = jnp.concatenate(taps, axis=-1)
    return jnp.einsum("bhwk,ko->bhwo", patches, wr,
                      precision=lax.Precision.HIGHEST) + bias


def _ref_resnet(p, x, temb):
    cin = p["cin"]
    hs = _ref_group_norm(x, p["n1g"][0, :cin], p["n1b"][0, :cin], GROUPS, EPS)
    hs = hs * jax.nn.sigmoid(hs)
    hs = _ref_conv3x3(hs, p["w1"], p["b1"][0, :OUT_C])
    t = temb * jax.nn.sigmoid(temb)
    tp = t @ p["tw"][:, :OUT_C] + p["tb"][0, :OUT_C]
    hs = hs + tp[:, None, None, :]
    hs = _ref_group_norm(hs, p["n2g"][0, :OUT_C], p["n2b"][0, :OUT_C], GROUPS, EPS)
    hs = hs * jax.nn.sigmoid(hs)
    hs = _ref_conv3x3(hs, p["w2"], p["b2"][0, :OUT_C])
    if cin != OUT_C:
        sc = jnp.einsum("bhwc,co->bhwo", x, p["ws"][:cin, :OUT_C],
                        precision=lax.Precision.HIGHEST) + p["wsb"][0, :OUT_C]
    else:
        sc = x
    return (hs + sc) / OSF


def _ref_down_block(params, x, temb):
    outs = ()
    h = x
    for p in params["layers"]:
        h = _ref_resnet(p, h, temb)
        outs += (h,)
    if params["down"] is not None:
        h = _ref_conv3x3(h, params["down"]["wd"],
                         params["down"]["bd"][0, :OUT_C], stride=2)
        outs += (h,)
    return h, outs


# ----------------------------------- main -----------------------------------
def _to_nhwc(t, h, w):
    return t[:, :, :OUT_C].reshape(t.shape[0], h, w, OUT_C)


if __name__ == "__main__":
    root = jax.random.PRNGKey(0)
    kp, kx, kt = jax.random.split(root, 3)
    params = init_params(kp)

    # PyTorch-style NCHW inputs
    x_nchw = jax.random.normal(kx, (B, IN_C, H, W), jnp.float32)
    temb = jax.random.normal(kt, (B, TEMB_C), jnp.float32)

    # NCHW -> (B, HW, CP) channel-padded kernel layout (one-time boundary glue)
    x_nhwc = jnp.transpose(x_nchw, (0, 2, 3, 1))
    x_in = jnp.pad(x_nhwc.reshape(B, H * W, IN_C), ((0, 0), (0, 0), (0, CP - IN_C)))
    sel = make_sel(H, W)

    hidden, output_states = down_block_2d(params, x_in, temb, H, W, sel)

    # back to PyTorch NCHW
    spatial = [(H, W)] * NUM_LAYERS + [(H // 2, W // 2)]
    outs_nhwc = [_to_nhwc(o, hh, ww) for o, (hh, ww) in zip(output_states, spatial)]
    hidden_nchw = jnp.transpose(_to_nhwc(hidden, H // 2, W // 2), (0, 3, 1, 2))
    outs_nchw = tuple(jnp.transpose(o, (0, 3, 1, 2)) for o in outs_nhwc)
    jax.block_until_ready((hidden_nchw, outs_nchw))

    # shape checks (match DownBlock2D forward)
    assert hidden_nchw.shape == (B, OUT_C, H // 2, W // 2)
    assert len(outs_nchw) == NUM_LAYERS + 1
    for o in outs_nchw[:-1]:
        assert o.shape == (B, OUT_C, H, W)
    assert outs_nchw[-1].shape == (B, OUT_C, H // 2, W // 2)

    # numerical check against a pure-JAX reference of the same module
    _, ref_outs = _ref_down_block(params, x_nhwc, temb)
    for got, ref in zip(outs_nhwc, ref_outs):
        err = float(jnp.max(jnp.abs(got - ref)))
        assert err < 5e-3, f"mismatch vs reference: {err}"

    print("KERNEL_OK")
</pallas_src>

<mosaic_0001>
module attributes {stable_mosaic.version = 11 : i64} {
  func.func @_resnet_kernel(%arg0: i32, %arg1: memref<1x256x128xf32, #tpu.memory_space<vmem>>, %arg2: memref<1x1x32xf32, #tpu.memory_space<vmem>>, %arg3: memref<1x128xf32, #tpu.memory_space<vmem>>, %arg4: memref<1x128xf32, #tpu.memory_space<vmem>>, %arg5: memref<128x128xf32, #tpu.memory_space<vmem>>, %arg6: memref<1152x128xf32, #tpu.memory_space<vmem>>, %arg7: memref<1x128xf32, #tpu.memory_space<vmem>>, %arg8: memref<32x128xf32, #tpu.memory_space<vmem>>, %arg9: memref<1x128xf32, #tpu.memory_space<vmem>>, %arg10: memref<1x128xf32, #tpu.memory_space<vmem>>, %arg11: memref<1x128xf32, #tpu.memory_space<vmem>>, %arg12: memref<128x128xf32, #tpu.memory_space<vmem>>, %arg13: memref<1152x128xf32, #tpu.memory_space<vmem>>, %arg14: memref<1x128xf32, #tpu.memory_space<vmem>>, %arg15: memref<128x128xf32, #tpu.memory_space<vmem>>, %arg16: memref<1x128xf32, #tpu.memory_space<vmem>>, %arg17: memref<1x256x128xf32, #tpu.memory_space<vmem>>, %arg18: memref<18x32x128xf32, #tpu.memory_space<vmem>>) attributes {dimension_semantics = [#tpu.dimension_semantics<parallel>], iteration_bounds = array<i64: 2>, scalar_prefetch = 0 : i64, scratch_operands = 1 : i64, tpu.core_type = #tpu.core_type<tc>, window_params = [{transform_indices = @transform_0, window_bounds = array<i64: 1, 256, 128>}, {transform_indices = @transform_1, window_bounds = array<i64: 1, 1, 32>}, {pipeline_mode = #tpu.pipeline_mode<synchronous>, transform_indices = @transform_2, window_bounds = array<i64: 1, 128>}, {pipeline_mode = #tpu.pipeline_mode<synchronous>, transform_indices = @transform_3, window_bounds = array<i64: 1, 128>}, {pipeline_mode = #tpu.pipeline_mode<synchronous>, transform_indices = @transform_4, window_bounds = array<i64: 128, 128>}, {pipeline_mode = #tpu.pipeline_mode<synchronous>, transform_indices = @transform_5, window_bounds = array<i64: 1152, 128>}, {pipeline_mode = #tpu.pipeline_mode<synchronous>, transform_indices = @transform_6, window_bounds = array<i64: 1, 128>}, {pipeline_mode = #tpu.pipeline_mode<synchronous>, transform_indices = @transform_7, window_bounds = array<i64: 32, 128>}, {pipeline_mode = #tpu.pipeline_mode<synchronous>, transform_indices = @transform_8, window_bounds = array<i64: 1, 128>}, {pipeline_mode = #tpu.pipeline_mode<synchronous>, transform_indices = @transform_9, window_bounds = array<i64: 1, 128>}, {pipeline_mode = #tpu.pipeline_mode<synchronous>, transform_indices = @transform_10, window_bounds = array<i64: 1, 128>}, {pipeline_mode = #tpu.pipeline_mode<synchronous>, transform_indices = @transform_11, window_bounds = array<i64: 128, 128>}, {pipeline_mode = #tpu.pipeline_mode<synchronous>, transform_indices = @transform_12, window_bounds = array<i64: 1152, 128>}, {pipeline_mode = #tpu.pipeline_mode<synchronous>, transform_indices = @transform_13, window_bounds = array<i64: 1, 128>}, {pipeline_mode = #tpu.pipeline_mode<synchronous>, transform_indices = @transform_14, window_bounds = array<i64: 128, 128>}, {pipeline_mode = #tpu.pipeline_mode<synchronous>, transform_indices = @transform_15, window_bounds = array<i64: 1, 128>}, {transform_indices = @transform_16, window_bounds = array<i64: 1, 256, 128>}]} {
    %cst = arith.constant 0.000000e+00 : f32
    %0 = vector.broadcast %cst : f32 to vector<18x32x128xf32>
    %c0 = arith.constant 0 : index
    %c0_0 = arith.constant 0 : index
    %c0_1 = arith.constant 0 : index
    %1 = vector.load %arg18[%c0, %c0_0, %c0_1] : memref<18x32x128xf32, #tpu.memory_space<vmem>>, vector<18x32x128xf32>
    tpu.vector_store %arg18[%c0, %c0_0, %c0_1], %0 {strides = array<i32>} : memref<18x32x128xf32, #tpu.memory_space<vmem>>, vector<18x32x128xf32>,
    %c0_2 = arith.constant 0 : index
    %c0_3 = arith.constant 0 : index
    %c0_4 = arith.constant 0 : index
    %2 = vector.load %arg1[%c0_2, %c0_3, %c0_4] : memref<1x256x128xf32, #tpu.memory_space<vmem>>, vector<1x256x128xf32>
    %3 = vector.shape_cast %2 : vector<1x256x128xf32> to vector<256x128xf32>
    %c0_5 = arith.constant 0 : index
    %c0_6 = arith.constant 0 : index
    %c0_7 = arith.constant 0 : index
    %4 = vector.load %arg2[%c0_5, %c0_6, %c0_7] : memref<1x1x32xf32, #tpu.memory_space<vmem>>, vector<1x1x32xf32>
    %5 = vector.shape_cast %4 : vector<1x1x32xf32> to vector<1x32xf32>
    %c0_8 = arith.constant 0 : index
    %c0_9 = arith.constant 0 : index
    %6 = vector.load %arg3[%c0_8, %c0_9] : memref<1x128xf32, #tpu.memory_space<vmem>>, vector<1x128xf32>
    %c0_10 = arith.constant 0 : index
    %c0_11 = arith.constant 0 : index
    %7 = vector.load %arg4[%c0_10, %c0_11] : memref<1x128xf32, #tpu.memory_space<vmem>>, vector<1x128xf32>
    %c0_12 = arith.constant 0 : index
    %c0_13 = arith.constant 0 : index
    %8 = vector.load %arg5[%c0_12, %c0_13] : memref<128x128xf32, #tpu.memory_space<vmem>>, vector<128x128xf32>
    %c0_14 = arith.constant 0 : index
    %c0_15 = arith.constant 0 : index
    %9 = vector.load %arg6[%c0_14, %c0_15] : memref<1152x128xf32, #tpu.memory_space<vmem>>, vector<1152x128xf32>
    %c0_16 = arith.constant 0 : index
    %c0_17 = arith.constant 0 : index
    %10 = vector.load %arg7[%c0_16, %c0_17] : memref<1x128xf32, #tpu.memory_space<vmem>>, vector<1x128xf32>
    %c0_18 = arith.constant 0 : index
    %c0_19 = arith.constant 0 : index
    %11 = vector.load %arg8[%c0_18, %c0_19] : memref<32x128xf32, #tpu.memory_space<vmem>>, vector<32x128xf32>
    %c0_20 = arith.constant 0 : index
    %c0_21 = arith.constant 0 : index
    %12 = vector.load %arg9[%c0_20, %c0_21] : memref<1x128xf32, #tpu.memory_space<vmem>>, vector<1x128xf32>
    %c0_22 = arith.constant 0 : index
    %c0_23 = arith.constant 0 : index
    %13 = vector.load %arg10[%c0_22, %c0_23] : memref<1x128xf32, #tpu.memory_space<vmem>>, vector<1x128xf32>
    %c0_24 = arith.constant 0 : index
    %c0_25 = arith.constant 0 : index
    %14 = vector.load %arg11[%c0_24, %c0_25] : memref<1x128xf32, #tpu.memory_space<vmem>>, vector<1x128xf32>
    %c0_26 = arith.constant 0 : index
    %c0_27 = arith.constant 0 : index
    %15 = vector.load %arg12[%c0_26, %c0_27] : memref<128x128xf32, #tpu.memory_space<vmem>>, vector<128x128xf32>
    %c0_28 = arith.constant 0 : index
    %c0_29 = arith.constant 0 : index
    %16 = vector.load %arg13[%c0_28, %c0_29] : memref<1152x128xf32, #tpu.memory_space<vmem>>, vector<1152x128xf32>
    %c0_30 = arith.constant 0 : index
    %c0_31 = arith.constant 0 : index
    %17 = vector.load %arg14[%c0_30, %c0_31] : memref<1x128xf32, #tpu.memory_space<vmem>>, vector<1x128xf32>
    %c0_32 = arith.constant 0 : index
    %c0_33 = arith.constant 0 : index
    %18 = vector.load %arg15[%c0_32, %c0_33] : memref<128x128xf32, #tpu.memory_space<vmem>>, vector<128x128xf32>
    %c0_34 = arith.constant 0 : index
    %c0_35 = arith.constant 0 : index
    %19 = vector.load %arg16[%c0_34, %c0_35] : memref<1x128xf32, #tpu.memory_space<vmem>>, vector<1x128xf32>
    %cst_36 = arith.constant dense<0.000000e+00> : vector<128xf32>
    %20 = vector.multi_reduction <add>, %3, %cst_36 [0] : vector<256x128xf32> to vector<128xf32>
    %21 = vector.shape_cast %20 : vector<128xf32> to vector<1x128xf32>
    %22 = arith.mulf %3, %3 : vector<256x128xf32>
    %cst_37 = arith.constant dense<0.000000e+00> : vector<128xf32>
    %23 = vector.multi_reduction <add>, %22, %cst_37 [0] : vector<256x128xf32> to vector<128xf32>
    %24 = vector.shape_cast %23 : vector<128xf32> to vector<1x128xf32>
    %cst_38 = arith.constant dense<0.000000e+00> : vector<1x128xf32>
    %25 = tpu.matmul %21, %8, %cst_38 {dimension_numbers = #tpu.dot_dimension_numbers<[1], [0], [0], [1], [0, 0, 1, 1], [], []>} : vector<1x128xf32>, vector<128x128xf32>, vector<1x128xf32> -> vector<1x128xf32>
    %cst_39 = arith.constant dense<0.000000e+00> : vector<1x128xf32>
    %26 = tpu.matmul %24, %8, %cst_39 {dimension_numbers = #tpu.dot_dimension_numbers<[1], [0], [0], [1], [0, 0, 1, 1], [], []>} : vector<1x128xf32>, vector<128x128xf32>, vector<1x128xf32> -> vector<1x128xf32>
    %cst_40 = arith.constant 5.120000e+02 : f32
    %27 = vector.broadcast %cst_40 : f32 to vector<1x128xf32>
    %28 = arith.divf %25, %27 : vector<1x128xf32>
    %cst_41 = arith.constant 5.120000e+02 : f32
    %29 = vector.broadcast %cst_41 : f32 to vector<1x128xf32>
    %30 = arith.divf %26, %29 : vector<1x128xf32>
    %31 = arith.mulf %28, %28 : vector<1x128xf32>
    %32 = arith.subf %30, %31 : vector<1x128xf32>
    %cst_42 = arith.constant 0.000000e+00 : f32
    %33 = vector.broadcast %cst_42 : f32 to vector<1x128xf32>
    %34 = arith.maximumf %32, %33 : vector<1x128xf32>
    %cst_43 = arith.constant 9.99999997E-7 : f32
    %35 = vector.broadcast %cst_43 : f32 to vector<1x128xf32>
    %36 = arith.addf %34, %35 : vector<1x128xf32>
    %37 = math.rsqrt %36 : vector<1x128xf32>
    %38 = vector.broadcast %28 : vector<1x128xf32> to vector<256x128xf32>
    %39 = arith.subf %3, %38 : vector<256x128xf32>
    %40 = vector.broadcast %37 : vector<1x128xf32> to vector<256x128xf32>
    %41 = arith.mulf %39, %40 : vector<256x128xf32>
    %42 = vector.broadcast %6 : vector<1x128xf32> to vector<256x128xf32>
    %43 = arith.mulf %41, %42 : vector<256x128xf32>
    %44 = vector.broadcast %7 : vector<1x128xf32> to vector<256x128xf32>
    %45 = arith.addf %43, %44 : vector<256x128xf32>
    %46 = arith.negf %45 : vector<256x128xf32>
    %47 = math.exp %46 : vector<256x128xf32>
    %cst_44 = arith.constant 1.000000e+00 : f32
    %48 = vector.broadcast %cst_44 : f32 to vector<256x128xf32>
    %49 = arith.addf %48, %47 : vector<256x128xf32>
    %50 = arith.divf %48, %49 : vector<256x128xf32>
    %51 = arith.mulf %45, %50 : vector<256x128xf32>
    %52 = vector.shape_cast %51 : vector<256x128xf32> to vector<16x16x128xf32>
    %c1 = arith.constant 1 : index
    %c8 = arith.constant 8 : index
    %c0_45 = arith.constant 0 : index
    %53 = vector.load %arg18[%c1, %c8, %c0_45] : memref<18x32x128xf32, #tpu.memory_space<vmem>>, vector<16x16x128xf32>
    tpu.vector_store %arg18[%c1, %c8, %c0_45], %52 {strides = array<i32>} : memref<18x32x128xf32, #tpu.memory_space<vmem>>, vector<16x16x128xf32>,
    %c0_46 = arith.constant 0 : index
    %c7 = arith.constant 7 : index
    %c0_47 = arith.constant 0 : index
    %54 = vector.load %arg18[%c0_46, %c7, %c0_47] : memref<18x32x128xf32, #tpu.memory_space<vmem>>, vector<16x16x128xf32>
    %55 = vector.shape_cast %54 : vector<16x16x128xf32> to vector<256x128xf32>
    %c0_48 = arith.constant 0 : index
    %c8_49 = arith.constant 8 : index
    %c0_50 = arith.constant 0 : index
    %56 = vector.load %arg18[%c0_48, %c8_49, %c0_50] : memref<18x32x128xf32, #tpu.memory_space<vmem>>, vector<16x16x128xf32>
    %57 = vector.shape_cast %56 : vector<16x16x128xf32> to vector<256x128xf32>
    %c0_51 = arith.constant 0 : index
    %c9 = arith.constant 9 : index
    %c0_52 = arith.constant 0 : index
    %58 = vector.load %arg18[%c0_51, %c9, %c0_52] : memref<18x32x128xf32, #tpu.memory_space<vmem>>, vector<16x16x128xf32>
    %59 = vector.shape_cast %58 : vector<16x16x128xf32> to vector<256x128xf32>
    %c1_53 = arith.constant 1 : index
    %c7_54 = arith.constant 7 : index
    %c0_55 = arith.constant 0 : index
    %60 = vector.load %arg18[%c1_53, %c7_54, %c0_55] : memref<18x32x128xf32, #tpu.memory_space<vmem>>, vector<16x16x128xf32>
    %61 = vector.shape_cast %60 : vector<16x16x128xf32> to vector<256x128xf32>
    %c1_56 = arith.constant 1 : index
    %c8_57 = arith.constant 8 : index
    %c0_58 = arith.constant 0 : index
    %62 = vector.load %arg18[%c1_56, %c8_57, %c0_58] : memref<18x32x128xf32, #tpu.memory_space<vmem>>, vector<16x16x128xf32>
    %63 = vector.shape_cast %62 : vector<16x16x128xf32> to vector<256x128xf32>
    %c1_59 = arith.constant 1 : index
    %c9_60 = arith.constant 9 : index
    %c0_61 = arith.constant 0 : index
    %64 = vector.load %arg18[%c1_59, %c9_60, %c0_61] : memref<18x32x128xf32, #tpu.memory_space<vmem>>, vector<16x16x128xf32>
    %65 = vector.shape_cast %64 : vector<16x16x128xf32> to vector<256x128xf32>
    %c2 = arith.constant 2 : index
    %c7_62 = arith.constant 7 : index
    %c0_63 = arith.constant 0 : index
    %66 = vector.load %arg18[%c2, %c7_62, %c0_63] : memref<18x32x128xf32, #tpu.memory_space<vmem>>, vector<16x16x128xf32>
    %67 = vector.shape_cast %66 : vector<16x16x128xf32> to vector<256x128xf32>
    %c2_64 = arith.constant 2 : index
    %c8_65 = arith.constant 8 : index
    %c0_66 = arith.constant 0 : index
    %68 = vector.load %arg18[%c2_64, %c8_65, %c0_66] : memref<18x32x128xf32, #tpu.memory_space<vmem>>, vector<16x16x128xf32>
    %69 = vector.shape_cast %68 : vector<16x16x128xf32> to vector<256x128xf32>
    %c2_67 = arith.constant 2 : index
    %c9_68 = arith.constant 9 : index
    %c0_69 = arith.constant 0 : index
    %70 = vector.load %arg18[%c2_67, %c9_68, %c0_69] : memref<18x32x128xf32, #tpu.memory_space<vmem>>, vector<16x16x128xf32>
    %71 = vector.shape_cast %70 : vector<16x16x128xf32> to vector<256x128xf32>
    %72 = tpu.concatenate %55, %57, %59, %61, %63, %65, %67, %69, %71 in 1 : vector<256x128xf32>, vector<256x128xf32>, vector<256x128xf32>, vector<256x128xf32>, vector<256x128xf32>, vector<256x128xf32>, vector<256x128xf32>, vector<256x128xf32>, vector<256x128xf32> -> vector<256x1152xf32>
    %cst_70 = arith.constant dense<0.000000e+00> : vector<256x128xf32>
    %73 = tpu.matmul %72, %9, %cst_70 {dimension_numbers = #tpu.dot_dimension_numbers<[1], [0], [0], [1], [0, 0, 1, 1], [], []>} : vector<256x1152xf32>, vector<1152x128xf32>, vector<256x128xf32> -> vector<256x128xf32>
    %74 = vector.broadcast %10 : vector<1x128xf32> to vector<256x128xf32>
    %75 = arith.addf %73, %74 : vector<256x128xf32>
    %76 = arith.negf %5 : vector<1x32xf32>
    %77 = math.exp %76 : vector<1x32xf32>
    %cst_71 = arith.constant 1.000000e+00 : f32
    %78 = vector.broadcast %cst_71 : f32 to vector<1x32xf32>
    %79 = arith.addf %78, %77 : vector<1x32xf32>
    %80 = arith.divf %78, %79 : vector<1x32xf32>
    %81 = arith.mulf %5, %80 : vector<1x32xf32>
    %cst_72 = arith.constant dense<0.000000e+00> : vector<1x128xf32>
    %82 = tpu.matmul %81, %11, %cst_72 {dimension_numbers = #tpu.dot_dimension_numbers<[1], [0], [0], [1], [0, 0, 1, 1], [], []>} : vector<1x32xf32>, vector<32x128xf32>, vector<1x128xf32> -> vector<1x128xf32>
    %83 = arith.addf %82, %12 : vector<1x128xf32>
    %84 = vector.broadcast %83 : vector<1x128xf32> to vector<256x128xf32>
    %85 = arith.addf %75, %84 : vector<256x128xf32>
    %cst_73 = arith.constant dense<0.000000e+00> : vector<128xf32>
    %86 = vector.multi_reduction <add>, %85, %cst_73 [0] : vector<256x128xf32> to vector<128xf32>
    %87 = vector.shape_cast %86 : vector<128xf32> to vector<1x128xf32>
    %88 = arith.mulf %85, %85 : vector<256x128xf32>
    %cst_74 = arith.constant dense<0.000000e+00> : vector<128xf32>
    %89 = vector.multi_reduction <add>, %88, %cst_74 [0] : vector<256x128xf32> to vector<128xf32>
    %90 = vector.shape_cast %89 : vector<128xf32> to vector<1x128xf32>
    %cst_75 = arith.constant dense<0.000000e+00> : vector<1x128xf32>
    %91 = tpu.matmul %87, %15, %cst_75 {dimension_numbers = #tpu.dot_dimension_numbers<[1], [0], [0], [1], [0, 0, 1, 1], [], []>} : vector<1x128xf32>, vector<128x128xf32>, vector<1x128xf32> -> vector<1x128xf32>
    %cst_76 = arith.constant dense<0.000000e+00> : vector<1x128xf32>
    %92 = tpu.matmul %90, %15, %cst_76 {dimension_numbers = #tpu.dot_dimension_numbers<[1], [0], [0], [1], [0, 0, 1, 1], [], []>} : vector<1x128xf32>, vector<128x128xf32>, vector<1x128xf32> -> vector<1x128xf32>
    %cst_77 = arith.constant 1.024000e+03 : f32
    %93 = vector.broadcast %cst_77 : f32 to vector<1x128xf32>
    %94 = arith.divf %91, %93 : vector<1x128xf32>
    %cst_78 = arith.constant 1.024000e+03 : f32
    %95 = vector.broadcast %cst_78 : f32 to vector<1x128xf32>
    %96 = arith.divf %92, %95 : vector<1x128xf32>
    %97 = arith.mulf %94, %94 : vector<1x128xf32>
    %98 = arith.subf %96, %97 : vector<1x128xf32>
    %cst_79 = arith.constant 0.000000e+00 : f32
    %99 = vector.broadcast %cst_79 : f32 to vector<1x128xf32>
    %100 = arith.maximumf %98, %99 : vector<1x128xf32>
    %cst_80 = arith.constant 9.99999997E-7 : f32
    %101 = vector.broadcast %cst_80 : f32 to vector<1x128xf32>
    %102 = arith.addf %100, %101 : vector<1x128xf32>
    %103 = math.rsqrt %102 : vector<1x128xf32>
    %104 = vector.broadcast %94 : vector<1x128xf32> to vector<256x128xf32>
    %105 = arith.subf %85, %104 : vector<256x128xf32>
    %106 = vector.broadcast %103 : vector<1x128xf32> to vector<256x128xf32>
    %107 = arith.mulf %105, %106 : vector<256x128xf32>
    %108 = vector.broadcast %13 : vector<1x128xf32> to vector<256x128xf32>
    %109 = arith.mulf %107, %108 : vector<256x128xf32>
    %110 = vector.broadcast %14 : vector<1x128xf32> to vector<256x128xf32>
    %111 = arith.addf %109, %110 : vector<256x128xf32>
    %112 = arith.negf %111 : vector<256x128xf32>
    %113 = math.exp %112 : vector<256x128xf32>
    %cst_81 = arith.constant 1.000000e+00 : f32
    %114 = vector.broadcast %cst_81 : f32 to vector<256x128xf32>
    %115 = arith.addf %114, %113 : vector<256x128xf32>
    %116 = arith.divf %114, %115 : vector<256x128xf32>
    %117 = arith.mulf %111, %116 : vector<256x128xf32>
    %118 = vector.shape_cast %117 : vector<256x128xf32> to vector<16x16x128xf32>
    %c1_82 = arith.constant 1 : index
    %c8_83 = arith.constant 8 : index
    %c0_84 = arith.constant 0 : index
    %119 = vector.load %arg18[%c1_82, %c8_83, %c0_84] : memref<18x32x128xf32, #tpu.memory_space<vmem>>, vector<16x16x128xf32>
    tpu.vector_store %arg18[%c1_82, %c8_83, %c0_84], %118 {strides = array<i32>} : memref<18x32x128xf32, #tpu.memory_space<vmem>>, vector<16x16x128xf32>,
    %c0_85 = arith.constant 0 : index
    %c7_86 = arith.constant 7 : index
    %c0_87 = arith.constant 0 : index
    %120 = vector.load %arg18[%c0_85, %c7_86, %c0_87] : memref<18x32x128xf32, #tpu.memory_space<vmem>>, vector<16x16x128xf32>
    %121 = vector.shape_cast %120 : vector<16x16x128xf32> to vector<256x128xf32>
    %c0_88 = arith.constant 0 : index
    %c8_89 = arith.constant 8 : index
    %c0_90 = arith.constant 0 : index
    %122 = vector.load %arg18[%c0_88, %c8_89, %c0_90] : memref<18x32x128xf32, #tpu.memory_space<vmem>>, vector<16x16x128xf32>
    %123 = vector.shape_cast %122 : vector<16x16x128xf32> to vector<256x128xf32>
    %c0_91 = arith.constant 0 : index
    %c9_92 = arith.constant 9 : index
    %c0_93 = arith.constant 0 : index
    %124 = vector.load %arg18[%c0_91, %c9_92, %c0_93] : memref<18x32x128xf32, #tpu.memory_space<vmem>>, vector<16x16x128xf32>
    %125 = vector.shape_cast %124 : vector<16x16x128xf32> to vector<256x128xf32>
    %c1_94 = arith.constant 1 : index
    %c7_95 = arith.constant 7 : index
    %c0_96 = arith.constant 0 : index
    %126 = vector.load %arg18[%c1_94, %c7_95, %c0_96] : memref<18x32x128xf32, #tpu.memory_space<vmem>>, vector<16x16x128xf32>
    %127 = vector.shape_cast %126 : vector<16x16x128xf32> to vector<256x128xf32>
    %c1_97 = arith.constant 1 : index
    %c8_98 = arith.constant 8 : index
    %c0_99 = arith.constant 0 : index
    %128 = vector.load %arg18[%c1_97, %c8_98, %c0_99] : memref<18x32x128xf32, #tpu.memory_space<vmem>>, vector<16x16x128xf32>
    %129 = vector.shape_cast %128 : vector<16x16x128xf32> to vector<256x128xf32>
    %c1_100 = arith.constant 1 : index
    %c9_101 = arith.constant 9 : index
    %c0_102 = arith.constant 0 : index
    %130 = vector.load %arg18[%c1_100, %c9_101, %c0_102] : memref<18x32x128xf32, #tpu.memory_space<vmem>>, vector<16x16x128xf32>
    %131 = vector.shape_cast %130 : vector<16x16x128xf32> to vector<256x128xf32>
    %c2_103 = arith.constant 2 : index
    %c7_104 = arith.constant 7 : index
    %c0_105 = arith.constant 0 : index
    %132 = vector.load %arg18[%c2_103, %c7_104, %c0_105] : memref<18x32x128xf32, #tpu.memory_space<vmem>>, vector<16x16x128xf32>
    %133 = vector.shape_cast %132 : vector<16x16x128xf32> to vector<256x128xf32>
    %c2_106 = arith.constant 2 : index
    %c8_107 = arith.constant 8 : index
    %c0_108 = arith.constant 0 : index
    %134 = vector.load %arg18[%c2_106, %c8_107, %c0_108] : memref<18x32x128xf32, #tpu.memory_space<vmem>>, vector<16x16x128xf32>
    %135 = vector.shape_cast %134 : vector<16x16x128xf32> to vector<256x128xf32>
    %c2_109 = arith.constant 2 : index
    %c9_110 = arith.constant 9 : index
    %c0_111 = arith.constant 0 : index
    %136 = vector.load %arg18[%c2_109, %c9_110, %c0_111] : memref<18x32x128xf32, #tpu.memory_space<vmem>>, vector<16x16x128xf32>
    %137 = vector.shape_cast %136 : vector<16x16x128xf32> to vector<256x128xf32>
    %138 = tpu.concatenate %121, %123, %125, %127, %129, %131, %133, %135, %137 in 1 : vector<256x128xf32>, vector<256x128xf32>, vector<256x128xf32>, vector<256x128xf32>, vector<256x128xf32>, vector<256x128xf32>, vector<256x128xf32>, vector<256x128xf32>, vector<256x128xf32> -> vector<256x1152xf32>
    %cst_112 = arith.constant dense<0.000000e+00> : vector<256x128xf32>
    %139 = tpu.matmul %138, %16, %cst_112 {dimension_numbers = #tpu.dot_dimension_numbers<[1], [0], [0], [1], [0, 0, 1, 1], [], []>} : vector<256x1152xf32>, vector<1152x128xf32>, vector<256x128xf32> -> vector<256x128xf32>
    %140 = vector.broadcast %17 : vector<1x128xf32> to vector<256x128xf32>
    %141 = arith.addf %139, %140 : vector<256x128xf32>
    %cst_113 = arith.constant dense<0.000000e+00> : vector<256x128xf32>
    %142 = tpu.matmul %3, %18, %cst_113 {dimension_numbers = #tpu.dot_dimension_numbers<[1], [0], [0], [1], [0, 0, 1, 1], [], []>} : vector<256x128xf32>, vector<128x128xf32>, vector<256x128xf32> -> vector<256x128xf32>
    %143 = vector.broadcast %19 : vector<1x128xf32> to vector<256x128xf32>
    %144 = arith.addf %142, %143 : vector<256x128xf32>
    %145 = arith.addf %141, %144 : vector<256x128xf32>
    %cst_114 = arith.constant 1.000000e+00 : f32
    %146 = vector.broadcast %cst_114 : f32 to vector<256x128xf32>
    %147 = arith.mulf %145, %146 : vector<256x128xf32>
    %c0_115 = arith.constant 0 : index
    %c0_116 = arith.constant 0 : index
    %c0_117 = arith.constant 0 : index
    %148 = vector.load %arg17[%c0_115, %c0_116, %c0_117] : memref<1x256x128xf32, #tpu.memory_space<vmem>>, vector<1x256x128xf32>
    %149 = vector.shape_cast %148 : vector<1x256x128xf32> to vector<256x128xf32>
    %150 = vector.shape_cast %147 : vector<256x128xf32> to vector<1x256x128xf32>
    tpu.vector_store %arg17[%c0_115, %c0_116, %c0_117], %150 {strides = array<i32>} : memref<1x256x128xf32, #tpu.memory_space<vmem>>, vector<1x256x128xf32>,
    return
  }
  func.func @transform_0(%arg0: i32) -> (i32, i32, i32) {
    %c0_i32 = arith.constant 0 : i32
    %c0_i32_0 = arith.constant 0 : i32
    %c0_i32_1 = arith.constant 0 : i32
    return %arg0, %c0_i32, %c0_i32_0 : i32, i32, i32
  }
  func.func @transform_1(%arg0: i32) -> (i32, i32, i32) {
    %c0_i32 = arith.constant 0 : i32
    %c0_i32_0 = arith.constant 0 : i32
    %c0_i32_1 = arith.constant 0 : i32
    return %arg0, %c0_i32, %c0_i32_0 : i32, i32, i32
  }
  func.func @transform_2(%arg0: i32) -> (i32, i32) {
    %c0_i32 = arith.constant 0 : i32
    %c0_i32_0 = arith.constant 0 : i32
    %c0_i32_1 = arith.constant 0 : i32
    return %c0_i32, %c0_i32_0 : i32, i32
  }
  func.func @transform_3(%arg0: i32) -> (i32, i32) {
    %c0_i32 = arith.constant 0 : i32
    %c0_i32_0 = arith.constant 0 : i32
    %c0_i32_1 = arith.constant 0 : i32
    return %c0_i32, %c0_i32_0 : i32, i32
  }
  func.func @transform_4(%arg0: i32) -> (i32, i32) {
    %c0_i32 = arith.constant 0 : i32
    %c0_i32_0 = arith.constant 0 : i32
    %c0_i32_1 = arith.constant 0 : i32
    return %c0_i32, %c0_i32_0 : i32, i32
  }
  func.func @transform_5(%arg0: i32) -> (i32, i32) {
    %c0_i32 = arith.constant 0 : i32
    %c0_i32_0 = arith.constant 0 : i32
    %c0_i32_1 = arith.constant 0 : i32
    return %c0_i32, %c0_i32_0 : i32, i32
  }
  func.func @transform_6(%arg0: i32) -> (i32, i32) {
    %c0_i32 = arith.constant 0 : i32
    %c0_i32_0 = arith.constant 0 : i32
    %c0_i32_1 = arith.constant 0 : i32
    return %c0_i32, %c0_i32_0 : i32, i32
  }
  func.func @transform_7(%arg0: i32) -> (i32, i32) {
    %c0_i32 = arith.constant 0 : i32
    %c0_i32_0 = arith.constant 0 : i32
    %c0_i32_1 = arith.constant 0 : i32
    return %c0_i32, %c0_i32_0 : i32, i32
  }
  func.func @transform_8(%arg0: i32) -> (i32, i32) {
    %c0_i32 = arith.constant 0 : i32
    %c0_i32_0 = arith.constant 0 : i32
    %c0_i32_1 = arith.constant 0 : i32
    return %c0_i32, %c0_i32_0 : i32, i32
  }
  func.func @transform_9(%arg0: i32) -> (i32, i32) {
    %c0_i32 = arith.constant 0 : i32
    %c0_i32_0 = arith.constant 0 : i32
    %c0_i32_1 = arith.constant 0 : i32
    return %c0_i32, %c0_i32_0 : i32, i32
  }
  func.func @transform_10(%arg0: i32) -> (i32, i32) {
    %c0_i32 = arith.constant 0 : i32
    %c0_i32_0 = arith.constant 0 : i32
    %c0_i32_1 = arith.constant 0 : i32
    return %c0_i32, %c0_i32_0 : i32, i32
  }
  func.func @transform_11(%arg0: i32) -> (i32, i32) {
    %c0_i32 = arith.constant 0 : i32
    %c0_i32_0 = arith.constant 0 : i32
    %c0_i32_1 = arith.constant 0 : i32
    return %c0_i32, %c0_i32_0 : i32, i32
  }
  func.func @transform_12(%arg0: i32) -> (i32, i32) {
    %c0_i32 = arith.constant 0 : i32
    %c0_i32_0 = arith.constant 0 : i32
    %c0_i32_1 = arith.constant 0 : i32
    return %c0_i32, %c0_i32_0 : i32, i32
  }
  func.func @transform_13(%arg0: i32) -> (i32, i32) {
    %c0_i32 = arith.constant 0 : i32
    %c0_i32_0 = arith.constant 0 : i32
    %c0_i32_1 = arith.constant 0 : i32
    return %c0_i32, %c0_i32_0 : i32, i32
  }
  func.func @transform_14(%arg0: i32) -> (i32, i32) {
    %c0_i32 = arith.constant 0 : i32
    %c0_i32_0 = arith.constant 0 : i32
    %c0_i32_1 = arith.constant 0 : i32
    return %c0_i32, %c0_i32_0 : i32, i32
  }
  func.func @transform_15(%arg0: i32) -> (i32, i32) {
    %c0_i32 = arith.constant 0 : i32
    %c0_i32_0 = arith.constant 0 : i32
    %c0_i32_1 = arith.constant 0 : i32
    return %c0_i32, %c0_i32_0 : i32, i32
  }
  func.func @transform_16(%arg0: i32) -> (i32, i32, i32) {
    %c0_i32 = arith.constant 0 : i32
    %c0_i32_0 = arith.constant 0 : i32
    %c0_i32_1 = arith.constant 0 : i32
    return %arg0, %c0_i32, %c0_i32_0 : i32, i32, i32
  }
}

</mosaic_0001>

<bundles_post_ra>
// kernel: tpu_custom_call.1
= control target key start
LH: loop header
LB: loop body
LE: loop exit
PB: predicated region body
PF: predicated region fallthrough
CT: control target
= control target key end

     0   :  { %s11514_s0 = inlined_call_operand.hbm [shape: f32[2,256,128], index: 0, kind: input, shape index: {}]   ;;  %s11515_s1 = inlined_call_operand.vmem [shape: f32[2,1,32], index: 1, kind: input, shape index: {}]   ;;  %s11516_s2 = inlined_call_operand.vmem [shape: f32[1,128], index: 2, kind: input, shape index: {}]   ;;  %s11517_s3 = inlined_call_operand.vmem [shape: f32[1,128], index: 3, kind: input, shape index: {}]   ;;  %s11518_s4 = inlined_call_operand.hbm [shape: f32[128,128], index: 4, kind: input, shape index: {}]   ;;  %s11519_s5 = inlined_call_operand.hbm [shape: f32[1152,128], index: 5, kind: input, shape index: {}]   ;;  %s11520_s6 = inlined_call_operand.vmem [shape: f32[1,128], index: 6, kind: input, shape index: {}]   ;;  %s11521_s7 = inlined_call_operand.hbm [shape: f32[32,128], index: 7, kind: input, shape index: {}]   ;;  %s11522_s8 = inlined_call_operand.vmem [shape: f32[1,128], index: 8, kind: input, shape index: {}]   ;;  %s11523_s9 = inlined_call_operand.vmem [shape: f32[1,128], index: 9, kind: input, shape index: {}]   ;;  %s11524_s10 = inlined_call_operand.vmem [shape: f32[1,128], index: 10, kind: input, shape index: {}]   ;;  %s11525_s11 = inlined_call_operand.hbm [shape: f32[128,128], index: 11, kind: input, shape index: {}]   ;;  %s11526_s12 = inlined_call_operand.hbm [shape: f32[1152,128], index: 12, kind: input, shape index: {}]   ;;  %s11527_s13 = inlined_call_operand.vmem [shape: f32[1,128], index: 13, kind: input, shape index: {}]   ;;  %s11528_s14 = inlined_call_operand.hbm [shape: f32[128,128], index: 14, kind: input, shape index: {}]   ;;  %s11529_s15 = inlined_call_operand.vmem [shape: f32[1,128], index: 15, kind: input, shape index: {}]   ;;  %s11530_s16 = inlined_call_operand.hbm [shape: f32[2,256,128], index: 16, kind: output, shape index: {}]  }
   0x1   :  { %11561 = sst [smem:[#allocation33_spill]] %s11514_s0 }
   0x2   :  { %11562 = sst [smem:[#allocation34_spill]] %s11518_s4 }
   0x3   :  { %11563 = sst [smem:[#allocation35_spill]] %s11520_s6 }
   0x4   :  { %11564 = sst [smem:[#allocation36_spill]] %s11522_s8 }
   0x5   :  { %11565 = sst [smem:[#allocation37_spill]] %s11523_s9 }
   0x6   :  { %11566 = sst [smem:[#allocation38_spill]] %s11524_s10 }
   0x7   :  { %11567 = sst [smem:[#allocation39_spill]] %s11527_s13 }
   0x8   :  { %11568 = sst [smem:[#allocation40_spill]] %s11529_s15 }
   0x9   :  { %11569 = sst [smem:[#allocation41_spill]] %s11530_s16 }
   0xa   :  { %21 = vsyncpa [#allocation4], 0 }
   0xb   :  { %23 = vsyncpa [#allocation4 + $0x1], 0 }
   0xc   :  { %24 = vsyncpa [#allocation7], 0 }
   0xd   :  { %25 = vsyncpa [#allocation10], 0 }
   0xe   :  { %26 = vsyncpa [#allocation13], 0 }
   0xf   :  { %27 = vsyncpa [#allocation5], 0 }
  0x10   :  { %29 = vsyncpa [#allocation5 + $0x1], 0  ;;  %s8345_s21 = smov 0   ;;  %s8347_s22 = smov 0  }
  0x11   :  { %s8349_s23 = smov 0   ;;  %s8351_s24 = smov 0  }
  0x12 LB: > { %s8245_s25 = smov [#allocation6]   ;;  %s8366_s27 = sadd.s32 4294967295, %s8243_s24   ;;  %s8243_s24 = sphi %s8351_s24, %s11676_s24   ;;  %s8239_s23 = sphi %s8349_s23, %s11675_s23   ;;  %s8235_s22 = sphi %s8347_s22, %s11674_s22   ;;  %s8231_s21 = sphi %s8345_s21, %s11673_s21  }
  0x13   : > { %s430_s26 = sshll.u32 %s8245_s25, 4  ;;  %p5816_p0 = scmp.ge.s32.totalorder %s8243_s24, 1  ;;  %s8371_s26 = int_to_ptr.vmem [resolvable:$true] %s430_s26 }
  0x14   : > { %p11533_p1 = scmp.eq.s32.totalorder %s8366_s27, 0  ;;  %p412_p2 = scmp.lt.s32.totalorder %s8243_s24, 3 }
  0x15   : > { %s8246_s29 = smov [#allocation9]   ;;  %s8247_s17 = smov [#allocation12]  }
  0x16   : > { %p8373_p3 = pnand %p5816_p0, %p412_p2  ;;  %s459_s30 = sshll.u32 %s8246_s29, 4  ;;  %s8386_s30 = int_to_ptr.vmem [resolvable:$true] %s459_s30 }
  0x17   : > { %s494_s18 = sshll.u32 %s8247_s17, 4  ;;  %s11572_s4 = sld [smem:[#allocation34_spill]]  ;;  %s8388_s18 = int_to_ptr.vmem [resolvable:$true] %s494_s18 }
  0x18   : > { %s11570_s28 = scalar_select %p8373_p3, 1, 0 }
  0x19   : > { %p7582_p5 = pneg %p8373_p3 }
  0x1b   : > { %p8382_p6 = pnand %p7582_p5, %p11533_p1 }
  0x1d   : > { %s7967_s25 = scalar_lea.hbm %s11572_s4, 2048  ;;  %p8398_p8 = pneg %p8382_p6 }
  0x1e   : > { %p7968_p7 = scmp.ne.s32.totalorder %s11572_s4, %s7967_s25  ;;  %p7974_p11 = scmp.lt.u32.totalorder %s7967_s25, %s11572_s4 }
  0x20   : > { %p7970_p9 = pnand %p8398_p8, %p7968_p7 }
  0x22   : > { %p7971_p10 = pneg %p7970_p9 }
  0x24   : > { %p7976_p12 = pnand %p7974_p11, %p7971_p10 }
  0x26   : > { %7979 = shalt.err (!%p7976_p12)
}
  0x27   : > { %s7980_s15 = scalar_lea.vmem %s8371_s26, 2048  ;;  %p7988_p5 = scmp.lt.s32.totalorder %s8371_s26, %s8371_s26 }
  0x28   : > { %p7981_p13 = scmp.ne.s32.totalorder %s8371_s26, %s7980_s15  ;;  %p7989_p4 = scmp.lt.s32.totalorder %s7980_s15, %s7980_s15 }
  0x2a   : > { %p7983_p0 = pnand %p7981_p13, %p8398_p8  ;;  %p7990_p7 = por %p7989_p4, %p7988_p5 }
  0x2c   : > { %p7984_p2 = pneg %p7983_p0 }
  0x2e   : > { %p7991_p9 = pnand %p7990_p7, %p7984_p2 }
  0x30   : > { %7994 = shalt.err (!%p7991_p9)
}
  0x31   : > { %s11535_s16 = smov 128   ;;  %s11536_s13 = smov 8  }
  0x32   : > { %7585 = dma.hbm_to_vmem [thread:$0]  (!%p8382_p6), %s11572_s4, 2048, %s8371_s26, [#allocation7], %s11535_s16, %s11535_s16, %s11536_s13  }
  0x33   : > { %s7995_s15 = scalar_lea.hbm %s11521_s7, 512 }
  0x34   : > { %p7996_p4 = scmp.ne.s32.totalorder %s11521_s7, %s7995_s15  ;;  %p8002_p12 = scmp.lt.u32.totalorder %s7995_s15, %s11521_s7 }
  0x36   : > { %p7998_p10 = pnand %p7996_p4, %p8398_p8 }
  0x38   : > { %p7999_p11 = pneg %p7998_p10 }
  0x3a   : > { %p8004_p13 = pnand %p8002_p12, %p7999_p11 }
  0x3c   : > { %8007 = shalt.err (!%p8004_p13)
}
  0x3d   : > { %s8008_s26 = scalar_lea.vmem %s8386_s30, 512  ;;  %p8016_p7 = scmp.lt.s32.totalorder %s8386_s30, %s8386_s30 }
  0x3e   : > { %p8009_p0 = scmp.ne.s32.totalorder %s8386_s30, %s8008_s26  ;;  %p8017_p9 = scmp.lt.s32.totalorder %s8008_s26, %s8008_s26 }
  0x40   : > { %p8011_p2 = pnand %p8009_p0, %p8398_p8  ;;  %p8018_p4 = por %p8017_p9, %p8016_p7 }
  0x42   : > { %p8012_p5 = pneg %p8011_p2 }
  0x44   : > { %p8019_p10 = pnand %p8018_p4, %p8012_p5 }
  0x46   : > { %8022 = shalt.err (!%p8019_p10)
}
  0x47   : > { %7591 = dma.hbm_to_vmem [thread:$0]  (!%p8382_p6), %s11521_s7, 512, %s8386_s30, [#allocation10], %s11535_s16, %s11535_s16, %s11536_s13  }
  0x48   : > { %s8023_s19 = scalar_lea.hbm %s11526_s12, 18432 }
  0x49   : > { %p8024_p11 = scmp.ne.s32.totalorder %s11526_s12, %s8023_s19  ;;  %p8030_p0 = scmp.lt.u32.totalorder %s8023_s19, %s11526_s12 }
  0x4b   : > { %p8026_p12 = pnand %p8024_p11, %p8398_p8 }
  0x4d   : > { %p8027_p13 = pneg %p8026_p12 }
  0x4f   : > { %p8032_p2 = pnand %p8030_p0, %p8027_p13 }
  0x51   : > { %8035 = shalt.err (!%p8032_p2)
}
  0x52   : > { %s8036_s30 = scalar_lea.vmem %s8388_s18, 18432  ;;  %p8044_p4 = scmp.lt.s32.totalorder %s8388_s18, %s8388_s18 }
  0x53   : > { %p8037_p5 = scmp.ne.s32.totalorder %s8388_s18, %s8036_s30  ;;  %p8045_p10 = scmp.lt.s32.totalorder %s8036_s30, %s8036_s30 }
  0x55   : > { %p8039_p7 = pnand %p8037_p5, %p8398_p8  ;;  %p8046_p11 = por %p8045_p10, %p8044_p4 }
  0x57   : > { %p8040_p9 = pneg %p8039_p7 }
  0x59   : > { %p8047_p12 = pnand %p8046_p11, %p8040_p9 }
  0x5b   : > { %8050 = shalt.err (!%p8047_p12)
}
  0x5c   : > { %7597 = dma.hbm_to_vmem [thread:$0]  (!%p8382_p6), %s11526_s12, 18432, %s8388_s18, [#allocation13], %s11535_s16, %s11535_s16, %s11536_s13  }
  0x5d   : > { %s8250_s8 = smov [#allocation8]   ;;  %s8251_s10 = smov [#allocation11]  }
  0x5e   : > { %s443_s9 = sshll.u32 %s8250_s8, 4  ;;  %s481_s19 = sshll.u32 %s8251_s10, 4  ;;  %s444_s9 = int_to_ptr.vmem [resolvable:$true] %s443_s9  ;;  %s482_s19 = int_to_ptr.vmem [resolvable:$true] %s481_s19 }
  0x5f   : > { %s8051_s17 = scalar_lea.hbm %s11519_s5, 18432 }
  0x60   : > { %p8052_p13 = scmp.ne.s32.totalorder %s11519_s5, %s8051_s17  ;;  %p8058_p5 = scmp.lt.u32.totalorder %s8051_s17, %s11519_s5 }
  0x62   : > { %p8054_p0 = pnand %p8052_p13, %p8398_p8 }
  0x64   : > { %p8055_p2 = pneg %p8054_p0 }
  0x66   : > { %p8060_p7 = pnand %p8058_p5, %p8055_p2 }
  0x68   : > { %8063 = shalt.err (!%p8060_p7)
}
  0x69   : > { %s8064_s18 = scalar_lea.vmem %s444_s9, 18432  ;;  %p8072_p11 = scmp.lt.s32.totalorder %s444_s9, %s444_s9 }
  0x6a   : > { %p8065_p9 = scmp.ne.s32.totalorder %s444_s9, %s8064_s18  ;;  %p8073_p12 = scmp.lt.s32.totalorder %s8064_s18, %s8064_s18 }
  0x6c   : > { %p8067_p4 = pnand %p8065_p9, %p8398_p8  ;;  %p8074_p1 = por %p8073_p12, %p8072_p11 }
  0x6e   : > { %p8068_p10 = pneg %p8067_p4 }
  0x70   : > { %p8075_p3 = pnand %p8074_p1, %p8068_p10 }
  0x72   : > { %8078 = shalt.err (!%p8075_p3)
}
  0x73   : > { %7588 = dma.hbm_to_vmem [thread:$0]  (!%p8382_p6), %s11519_s5, 18432, %s444_s9, [#allocation7], %s11535_s16, %s11535_s16, %s11536_s13  }
  0x74   : > { %s8079_s20 = scalar_lea.hbm %s11525_s11, 2048 }
  0x75   : > { %p8080_p1 = scmp.ne.s32.totalorder %s11525_s11, %s8079_s20  ;;  %p8086_p0 = scmp.lt.u32.totalorder %s8079_s20, %s11525_s11 }
  0x77   : > { %p8082_p3 = pnand %p8080_p1, %p8398_p8 }
  0x79   : > { %p8083_p13 = pneg %p8082_p3 }
  0x7b   : > { %p8088_p2 = pnand %p8086_p0, %p8083_p13 }
  0x7d   : > { %8091 = shalt.err (!%p8088_p2)
}
  0x7e   : > { %s8092_s26 = scalar_lea.vmem %s482_s19, 2048  ;;  %p8100_p4 = scmp.lt.s32.totalorder %s482_s19, %s482_s19 }
  0x7f   : > { %p8093_p5 = scmp.ne.s32.totalorder %s482_s19, %s8092_s26  ;;  %p8101_p10 = scmp.lt.s32.totalorder %s8092_s26, %s8092_s26 }
  0x81   : > { %p8095_p7 = pnand %p8093_p5, %p8398_p8  ;;  %p8102_p11 = por %p8101_p10, %p8100_p4 }
  0x83   : > { %p8096_p9 = pneg %p8095_p7 }
  0x85   : > { %p8103_p12 = pnand %p8102_p11, %p8096_p9 }
  0x87   : > { %8106 = shalt.err (!%p8103_p12)
}
  0x88   : > { %7594 = dma.hbm_to_vmem [thread:$0]  (!%p8382_p6), %s11525_s11, 2048, %s482_s19, [#allocation10], %s11535_s16, %s11535_s16, %s11536_s13  }
  0x89   : > { %s8252_s4 = smov [#allocation14]   ;;  %s8107_s20 = scalar_lea.hbm %s11528_s14, 2048 }
  0x8a   : > { %s510_s6 = sshll.u32 %s8252_s4, 4  ;;  %p8108_p1 = scmp.ne.s32.totalorder %s11528_s14, %s8107_s20  ;;  %s511_s6 = int_to_ptr.vmem [resolvable:$true] %s510_s6 }
  0x8b   : > { %p8114_p0 = scmp.lt.u32.totalorder %s8107_s20, %s11528_s14 }
  0x8c   : > { %p8110_p3 = pnand %p8108_p1, %p8398_p8 }
  0x8e   : > { %p8111_p13 = pneg %p8110_p3 }
  0x90   : > { %p8116_p2 = pnand %p8114_p0, %p8111_p13 }
  0x92   : > { %8119 = shalt.err (!%p8116_p2)
}
  0x93   : > { %s8120_s19 = scalar_lea.vmem %s511_s6, 2048  ;;  %p8128_p4 = scmp.lt.s32.totalorder %s511_s6, %s511_s6 }
  0x94   : > { %p8121_p5 = scmp.ne.s32.totalorder %s511_s6, %s8120_s19  ;;  %p8129_p10 = scmp.lt.s32.totalorder %s8120_s19, %s8120_s19 }
  0x96   : > { %p8123_p7 = pnand %p8121_p5, %p8398_p8  ;;  %p8130_p11 = por %p8129_p10, %p8128_p4 }
  0x98   : > { %p8124_p9 = pneg %p8123_p7 }
  0x9a   : > { %p8131_p12 = pnand %p8130_p11, %p8124_p9 }
  0x9c   : > { %8134 = shalt.err (!%p8131_p12)
}
  0x9d   : > { %7600 = dma.hbm_to_vmem [thread:$0]  (!%p8382_p6), %s11528_s14, 2048, %s511_s6, [#allocation13], %s11535_s16, %s11535_s16, %s11536_s13  }
  0x9e   : > { %s5815_s0 = sadd.s32 4294967294, %s8243_s24   ;;  %s8539_s29 = sadd.s32 1, %s8243_s24  }
  0x9f   : > { %s39_s18 = ssub.s32 %s8243_s24, %s8539_s29  ;;  %s42_s4 = sadd.s32 1, %s8239_s23 }
  0xa0   : > { %p40_p8 = scmp.eq.s32.totalorder %s39_s18, 0  ;;  %p49_p1 = scmp.ne.s32.totalorder %s8239_s23, %s8235_s22 }
  0xa1   : > { %p50_p3 = scmp.eq.s32.totalorder %s8243_s24, 0  ;;  %p55_p13 = scmp.ne.s32.totalorder %s8235_s22, %s8231_s21 }
  0xa2   : > { %s8550_s8 = scalar_select %p40_p8, %s8239_s23, %s42_s4  }
  0xa3   : > { %p8552_p0 = por %p50_p3, %p49_p1  ;;  %p11575_p2 = scmp.eq.s32.totalorder %s8366_s27, 0 }
  0xa4   : > { %p399_p5 = scmp.eq.s32.totalorder %s8366_s27, 1  ;;  %p405_p7 = scmp.eq.s32.totalorder %s5815_s0, 1 }
  0xa5   : > { %p8558_p6 = por %p11575_p2, %p55_p13  ;;  %p7615_p9 = scmp.lt.s32.totalorder %s8243_s24, 2 }
  0xa6   : > { %s527_s20 = sand.u32 1, %s8239_s23   ;;  %p8565_p4 = por %p399_p5, %p49_p1 }
  0xa7   : > { %p8569_p10 = por %p405_p7, %p55_p13  ;;  %s5824_s15 = sshll.u32 %s527_s20, 8 }
  0xa8   : > { %s11577_s25 = scalar_select %p8565_p4, 1, 0 }
  0xa9   : > { %s11578_s17 = scalar_select %p8569_p10, 1, 0 }
  0xaa   : > { %s5914_s30 = sshll.u32 %s8243_s24, 12  ;;  %s11579_s9 = sld [smem:[#allocation33_spill]] }
  0xab   : > { %s531_s0 = scalar_lea.vmem [#allocation3], %s5824_s15  ;;  %p8583_p11 = pnand %p7615_p9, %p8552_p0 }
  0xac   : > { %s538_s4 = sshll.u32 %s531_s0, 4  ;;  %s8587_s13 = scalar_lea.sflag [#allocation4], %s527_s20  ;;  %s8579_s4 = int_to_ptr.vmem [resolvable:$true] %s538_s4 }
  0xad   : > { %p8137_p8 = pneg %p8583_p11 }
  0xb0   : > { %s8577_s18 = scalar_lea.hbm %s11579_s9, %s5914_s30  ;;  %s8140_s10 = scalar_lea.hbm %s11579_s9, 8192 }
  0xb1   : > { %s8135_s19 = scalar_lea.hbm %s8577_s18, 4096  ;;  %p8141_p13 = scmp.lt.u32.totalorder %s8577_s18, %s11579_s9 }
  0xb2   : > { %p8136_p12 = scmp.ne.s32.totalorder %s8577_s18, %s8135_s19  ;;  %p8142_p0 = scmp.lt.u32.totalorder %s8140_s10, %s8135_s19 }
  0xb3   : > { %p8144_p5 = scmp.lt.u32.totalorder %s8135_s19, %s8577_s18 }
  0xb4   : > { %p8138_p1 = pnand %p8137_p8, %p8136_p12  ;;  %p8143_p2 = por %p8142_p0, %p8141_p13 }
  0xb6   : > { %p8139_p3 = pneg %p8138_p1  ;;  %p8145_p7 = por %p8144_p5, %p8143_p2 }
  0xb8   : > { %p8146_p9 = pnand %p8145_p7, %p8139_p3 }
  0xba   : > { %8149 = shalt.err (!%p8146_p9)
}
  0xbb   : > { %s8150_s20 = scalar_lea.vmem %s8579_s4, 4096  ;;  %s8253_s15 = smov [#allocation3]  }
  0xbc   : > { %p8151_p12 = scmp.ne.s32.totalorder %s8579_s4, %s8150_s20  ;;  %s8155_s30 = sshll.u32 %s8253_s15, 4  ;;  %s8156_s30 = int_to_ptr.vmem [resolvable:$false] %s8155_s30 }
  0xbd   : > { %s8157_s26 = scalar_lea.vmem %s8156_s30, 8192  ;;  %p8158_p4 = scmp.lt.s32.totalorder %s8579_s4, %s8156_s30 }
  0xbe   : > { %p8153_p1 = pnand %p8151_p12, %p8137_p8  ;;  %p8159_p13 = scmp.lt.s32.totalorder %s8157_s26, %s8150_s20 }
  0xc0   : > { %p8154_p10 = pneg %p8153_p1  ;;  %p8160_p0 = por %p8159_p13, %p8158_p4 }
  0xc2   : > { %p8161_p2 = pnand %p8160_p0, %p8154_p10 }
  0xc4   : > { %8164 = shalt.err (!%p8161_p2)
}
  0xc5   : > { %s11581_s19 = smov 8   ;;  %s11582_s10 = smov 128  }
  0xc6   : > { %7604 = dma.hbm_to_vmem [thread:$0]  (!%p8583_p11), %s8577_s18, 4096, %s8579_s4, %s8587_s13, %s11582_s10, %s11582_s10, %s11581_s19  }
  0xc7   : > { %p11583_p8 = scmp.ne.s32.totalorder %s11570_s28, 0 }
  0xc9   : > { %556 = sbr.rel (%p11583_p8) target bundleno = 2390 (0x956), region = 84 }
  0xd0   : > { %s8621_s0 = sand.u32 1, %s8235_s22  }
  0xd1   : > { %s5828_s20 = sshll.u32 %s8621_s0, 8  ;;  %s559_s15 = scalar_lea.sflag [#allocation4], %s8621_s0 }
  0xd2   : > { %s8627_s16 = scalar_lea.vmem [#allocation3], %s5828_s20 }
  0xd3   : > { %8210 = dma.done.wait (%p8558_p6), %s559_s15, 4096  }
  0xd4   : > { %8212 = vsyncadd (%p8558_p6), %s559_s15, 4294963200  ;;  %p11584_p4 = scmp.eq.s32.totalorder %s8366_s27, 0 }
  0xd6   : > { %8214 = dma.done.wait (%p11584_p4), [#allocation7], 20480   ;;  %p11585_p10 = pmov %p11584_p4 }
  0xd7   : > { %p11586_p11 = pmov %p11584_p4 }
  0xd8   : > { %8216 = vsyncadd (%p11585_p10), [#allocation7], 4294946816 }
  0xd9   : > { %8218 = dma.done.wait (%p11586_p11), [#allocation10], 2560   ;;  %p11587_p3 = pmov %p11584_p4 }
  0xdb   : > { %8220 = vsyncadd (%p11587_p3), [#allocation10], 4294964736  ;;  %p11588_p5 = pmov %p11587_p3 }
  0xdc   : > { %p11589_p7 = pmov %p11587_p3 }
  0xdd   : > { %8222 = dma.done.wait (%p11588_p5), [#allocation13], 20480  }
  0xde   : > { %8224 = vsyncadd (%p11589_p7), [#allocation13], 4294946816  ;;  %v11538_v0 = vmov 0.0|0.0   ;;  %v8255_v1 = vmov 0.0   ;;  %vm8256_vm0 = vmmov 0   ;;  %v748_v2 = vld [vmem:[#allocation6] sm:$0xff] }
  0xdf   : > { %6524 = vmatprep.subr.bf16.mxu0 %v11538_v0  ;;  %6548 = vmatprep.subr.bf16.mxu1 %v11538_v0  ;;  %641 = vst [vmem:[#allocation2] sm:$0xff] %v8255_v1  ;;  %642 = vst [vmem:[#allocation2 + $0x8] sm:$0xff] %v8255_v1  ;;  %v749_v3 = vld [vmem:[#allocation6 + $0x8] sm:$0xff]  ;;  %v750_v4 = vld [vmem:[#allocation6 + $0x10] sm:$0xff]  ;;  %p638_p6 = scmp.lt.s32.totalorder %s8366_s27, 1  ;;  %vm3180_vm1 = vcmask 261120  }
  0xe0   : > { %643 = vst [vmem:[#allocation2 + $0x10] sm:$0xff] %v8255_v1  ;;  %644 = vst [vmem:[#allocation2 + $0x18] sm:$0xff] %v8255_v1  ;;  %6165 = vmatprep.mubr.msk.f32.mxu0 %vm8256_vm0, %v8255_v1  ;;  %6200 = vmatprep.mubr.msk.f32.mxu1 %vm8256_vm0, %v8255_v1  ;;  %v6525_v5 = vpack.c.bf16 %v749_v3, %v748_v2  ;;  %v751_v6 = vld [vmem:[#allocation6 + $0x18] sm:$0xff]  ;;  %v752_v8 = vld [vmem:[#allocation6 + $0x20] sm:$0xff]  ;;  %s11618_s28 = sld [smem:[#allocation36_spill]]  ;;  %s11619_s18 = sld [smem:[#allocation35_spill]] }
  0xe1   : > { %645 = vst [vmem:[#allocation2 + $0x20] sm:$0xff] %v8255_v1  ;;  %648 = vst [vmem:[#allocation2 + $0x38] sm:$0xff] %v8255_v1  ;;  %v6528_v7 = vpack.c.bf16 %v751_v6, %v750_v4  ;;  %v753_v9 = vld [vmem:[#allocation6 + $0x28] sm:$0xff]  ;;  %v8694_v10 = vld [vmem:[%s8627_s16] sm:$0xff]  ;;  %s639_s4 = scalar_select %p638_p6, %s8366_s27, 1 }
  0xe2   : > { %649 = vst [vmem:[#allocation2 + $0x40] sm:$0xff] %v8255_v1  ;;  %652 = vst [vmem:[#allocation2 + $0x58] sm:$0xff] %v8255_v1  ;;  %6526 = vmatpush3.bf16.msra.mxu0 %v6525_v5  ;;  %6550 = vmatpush3.bf16.msra.mxu1 %v6525_v5  ;;  %v8697_v11 = vld [vmem:[%s8627_s16 + $0x8] sm:$0xff]  ;;  %v8700_v12 = vld [vmem:[%s8627_s16 + $0x10] sm:$0xff]  ;;  %v6531_v14 = vpack.c.bf16 %v753_v9, %v752_v8  ;;  %v1131_v27 = vmul.f32 %v8694_v10, %v8694_v10  ;;  %s11625_s26 = sld [smem:[#allocation37_spill]]  ;;  %s11626_s15 = sld [smem:[#allocation38_spill]] }
  0xe3   : > { %653 = vst [vmem:[#allocation2 + $0x60] sm:$0xff] %v8255_v1  ;;  %656 = vst [vmem:[#allocation2 + $0x78] sm:$0xff] %v8255_v1  ;;  %6527 = vmatprep.subr.bf16.mxu0 %v11538_v0  ;;  %6551 = vmatprep.subr.bf16.mxu1 %v11538_v0  ;;  %v1094_v13 = vadd.f32 %v8697_v11, %v8694_v10  ;;  %v8705_v15 = vld [vmem:[%s8627_s16 + $0x18] sm:$0xff]  ;;  %v754_v16 = vld [vmem:[#allocation6 + $0x30] sm:$0xff]  ;;  %v1132_v28 = vmul.f32 %v8697_v11, %v8697_v11  ;;  %s640_s19 = scalar_lea.vmem %s11515_s1, %s639_s4  ;;  %s11655_s13 = sld [smem:[#allocation39_spill]] }
  0xe4   : > { %657 = vst [vmem:[#allocation2 + $0x80] sm:$0xff] %v8255_v1  ;;  %660 = vst [vmem:[#allocation2 + $0x98] sm:$0xff] %v8255_v1  ;;  %v755_v17 = vld [vmem:[#allocation6 + $0x38] sm:$0xff]  ;;  %v8711_v19 = vld [vmem:[%s8627_s16 + $0x20] sm:$0xff]  ;;  %v1133_v32 = vmul.f32 %v8700_v12, %v8700_v12  ;;  %v1134_v37 = vmul.f32 %v8705_v15, %v8705_v15  ;;  %s11656_s4 = sld [smem:[#allocation40_spill]]  ;;  %s11308_s30 = scalar_lea.vmem [#allocation15], %s5828_s20 }
  0xe5   : > { %661 = vst [vmem:[#allocation2 + $0xa0] sm:$0xff] %v8255_v1  ;;  %664 = vst [vmem:[#allocation2 + $0xb8] sm:$0xff] %v8255_v1  ;;  %v1095_v18 = vadd.f32 %v1094_v13, %v8700_v12  ;;  %v6534_v21 = vpack.c.bf16 %v755_v17, %v754_v16  ;;  %v8715_v22 = vld [vmem:[%s8627_s16 + $0x28] sm:$0xff]  ;;  %v756_v23 = vld [vmem:[#allocation6 + $0x40] sm:$0xff]  ;;  %v1163_v38 = vadd.f32 %v1132_v28, %v1131_v27  ;;  %s5915_s20 = sshll.u32 %s8366_s27, 12  ;;  %p11670_p12 = scmp.ne.s32.totalorder %s11577_s25, 0 }
  0xe6   : > { %665 = vst [vmem:[#allocation2 + $0xc0] sm:$0xff] %v8255_v1  ;;  %668 = vst [vmem:[#allocation2 + $0xd8] sm:$0xff] %v8255_v1  ;;  %6529 = vmatpush3.bf16.msra.mxu0 %v6528_v7  ;;  %6553 = vmatpush3.bf16.msra.mxu1 %v6528_v7  ;;  %v757_v24 = vld [vmem:[#allocation6 + $0x48] sm:$0xff]  ;;  %v8721_v26 = vld [vmem:[%s8627_s16 + $0x30] sm:$0xff]  ;;  %v1135_v42 = vmul.f32 %v8711_v19, %v8711_v19  ;;  %v1136_v48 = vmul.f32 %v8715_v22, %v8715_v22  ;;  %s8257_s27 = smov [#allocation15]  }
  0xe7   : > { %669 = vst [vmem:[#allocation2 + $0xe0] sm:$0xff] %v8255_v1  ;;  %672 = vst [vmem:[#allocation2 + $0xf8] sm:$0xff] %v8255_v1  ;;  %6530 = vmatprep.subr.bf16.mxu0 %v11538_v0  ;;  %6554 = vmatprep.subr.bf16.mxu1 %v11538_v0  ;;  %v1096_v20 = vadd.f32 %v1095_v18, %v8705_v15  ;;  %v6537_v30 = vpack.c.bf16 %v757_v24, %v756_v23  ;;  %v8729_v31 = vld [vmem:[%s8627_s16 + $0x38] sm:$0xff]  ;;  %v758_v33 = vld [vmem:[#allocation6 + $0x50] sm:$0xff]  ;;  %s8169_s6 = sshll.u32 %s8257_s27, 4  ;;  %s8170_s6 = int_to_ptr.vmem [resolvable:$false] %s8169_s6 }
  0xe8   : > { %673 = vst [vmem:[#allocation2 + $0x100] sm:$0xff] %v8255_v1  ;;  %676 = vst [vmem:[#allocation2 + $0x118] sm:$0xff] %v8255_v1  ;;  %v759_v34 = vld [vmem:[#allocation6 + $0x58] sm:$0xff]  ;;  %v8737_v36 = vld [vmem:[%s8627_s16 + $0x40] sm:$0xff]  ;;  %v1164_v43 = vadd.f32 %v1163_v38, %v1133_v32  ;;  %v1137_v53 = vmul.f32 %v8721_v26, %v8721_v26  ;;  %v1138_v59 = vmul.f32 %v8729_v31, %v8729_v31 }
  0xe9   : > { %677 = vst [vmem:[#allocation2 + $0x120] sm:$0xff] %v8255_v1  ;;  %680 = vst [vmem:[#allocation2 + $0x138] sm:$0xff] %v8255_v1  ;;  %v1097_v25 = vadd.f32 %v1096_v20, %v8711_v19  ;;  %v6540_v40 = vpack.c.bf16 %v759_v34, %v758_v33  ;;  %v8743_v41 = vld [vmem:[%s8627_s16 + $0x48] sm:$0xff]  ;;  %v760_v44 = vld [vmem:[#allocation6 + $0x60] sm:$0xff]  ;;  %v1139_v2 = vmul.f32 %v8737_v36, %v8737_v36 }
  0xea   : > { %681 = vst [vmem:[#allocation2 + $0x140] sm:$0xff] %v8255_v1  ;;  %684 = vst [vmem:[#allocation2 + $0x158] sm:$0xff] %v8255_v1  ;;  %6532 = vmatpush3.bf16.msra.mxu0 %v6531_v14  ;;  %6556 = vmatpush3.bf16.msra.mxu1 %v6531_v14  ;;  %v761_v45 = vld [vmem:[#allocation6 + $0x68] sm:$0xff]  ;;  %v8751_v47 = vld [vmem:[%s8627_s16 + $0x50] sm:$0xff]  ;;  %v1165_v49 = vadd.f32 %v1164_v43, %v1134_v37  ;;  %v1140_v6 = vmul.f32 %v8743_v41, %v8743_v41 }
  0xeb   : > { %685 = vst [vmem:[#allocation2 + $0x160] sm:$0xff] %v8255_v1  ;;  %688 = vst [vmem:[#allocation2 + $0x178] sm:$0xff] %v8255_v1  ;;  %6533 = vmatprep.subr.bf16.mxu0 %v11538_v0  ;;  %6557 = vmatprep.subr.bf16.mxu1 %v11538_v0  ;;  %v1098_v29 = vadd.f32 %v1097_v25, %v8715_v22  ;;  %v6543_v51 = vpack.c.bf16 %v761_v45, %v760_v44  ;;  %v8757_v52 = vld [vmem:[%s8627_s16 + $0x58] sm:$0xff]  ;;  %v762_v55 = vld [vmem:[#allocation6 + $0x70] sm:$0xff] }
  0xec   : > { %689 = vst [vmem:[#allocation2 + $0x180] sm:$0xff] %v8255_v1  ;;  %692 = vst [vmem:[#allocation2 + $0x198] sm:$0xff] %v8255_v1  ;;  %v1166_v54 = vadd.f32 %v1165_v49, %v1135_v42  ;;  %v763_v56 = vld [vmem:[#allocation6 + $0x78] sm:$0xff]  ;;  %v8765_v58 = vld [vmem:[%s8627_s16 + $0x60] sm:$0xff]  ;;  %v1141_v13 = vmul.f32 %v8751_v47, %v8751_v47  ;;  %v1142_v18 = vmul.f32 %v8757_v52, %v8757_v52 }
  0xed   : > { %693 = vst [vmem:[#allocation2 + $0x1a0] sm:$0xff] %v8255_v1  ;;  %696 = vst [vmem:[#allocation2 + $0x1b8] sm:$0xff] %v8255_v1  ;;  %v1099_v35 = vadd.f32 %v1098_v29, %v8721_v26  ;;  %v6546_v62 = vpack.c.bf16 %v763_v56, %v762_v55  ;;  %v8771_v63 = vld [vmem:[%s8627_s16 + $0x68] sm:$0xff]  ;;  %v8779_v5 = vld [vmem:[%s8627_s16 + $0x70] sm:$0xff]  ;;  %v1143_v24 = vmul.f32 %v8765_v58, %v8765_v58 }
  0xee   : > { %697 = vst [vmem:[#allocation2 + $0x1c0] sm:$0xff] %v8255_v1  ;;  %700 = vst [vmem:[#allocation2 + $0x1d8] sm:$0xff] %v8255_v1  ;;  %6535 = vmatpush3.bf16.msra.mxu0 %v6534_v21  ;;  %6559 = vmatpush3.bf16.msra.mxu1 %v6534_v21  ;;  %v1167_v60 = vadd.f32 %v1166_v54, %v1136_v48  ;;  %v8785_v9 = vld [vmem:[%s8627_s16 + $0x78] sm:$0xff]  ;;  %v8792_v17 = vld [vmem:[%s8627_s16 + $0x80] sm:$0xff]  ;;  %v1144_v29 = vmul.f32 %v8771_v63, %v8771_v63 }
  0xef   : > { %701 = vst [vmem:[#allocation2 + $0x1e0] sm:$0xff] %v8255_v1  ;;  %704 = vst [vmem:[#allocation2 + $0x1f8] sm:$0xff] %v8255_v1  ;;  %6536 = vmatprep.subr.bf16.mxu0 %v11538_v0  ;;  %6560 = vmatprep.subr.bf16.mxu1 %v11538_v0  ;;  %v1100_v39 = vadd.f32 %v1099_v35, %v8729_v31  ;;  %v8798_v23 = vld [vmem:[%s8627_s16 + $0x88] sm:$0xff]  ;;  %v8804_v28 = vld [vmem:[%s8627_s16 + $0x90] sm:$0xff]  ;;  %v1145_v34 = vmul.f32 %v8779_v5, %v8779_v5 }
  0xf0   : > { %705 = vst [vmem:[#allocation2 + $0x200] sm:$0xff] %v8255_v1  ;;  %708 = vst [vmem:[#allocation2 + $0x218] sm:$0xff] %v8255_v1  ;;  %v1168_v3 = vadd.f32 %v1167_v60, %v1137_v53  ;;  %v8810_v33 = vld [vmem:[%s8627_s16 + $0x98] sm:$0xff]  ;;  %v8816_v38 = vld [vmem:[%s8627_s16 + $0xa0] sm:$0xff]  ;;  %v1147_v44 = vmul.f32 %v8792_v17, %v8792_v17  ;;  %v1148_v49 = vmul.f32 %v8798_v23, %v8798_v23 }
  0xf1   : > { %709 = vst [vmem:[#allocation2 + $0x220] sm:$0xff] %v8255_v1  ;;  %710 = vst [vmem:[#allocation2 + $0x228] sm:$0xff] %v8255_v1  ;;  %v1101_v46 = vadd.f32 %v1100_v39, %v8737_v36  ;;  %v1146_v39 = vmul.f32 %v8785_v9, %v8785_v9  ;;  %v8822_v43 = vld [vmem:[%s8627_s16 + $0xa8] sm:$0xff]  ;;  %v8828_v48 = vld [vmem:[%s8627_s16 + $0xb0] sm:$0xff]  ;;  %v1149_v54 = vmul.f32 %v8804_v28, %v8804_v28 }
  0xf2   : > { %711 = vst [vmem:[#allocation2 + $0x230] sm:$0xff] %v8255_v1  ;;  %712 = vst [vmem:[#allocation2 + $0x238] sm:$0xff] %v8255_v1  ;;  %6538 = vmatpush3.bf16.msra.mxu0 %v6537_v30  ;;  %6562 = vmatpush3.bf16.msra.mxu1 %v6537_v30  ;;  %v1169_v7 = vadd.f32 %v1168_v3, %v1138_v59  ;;  %v8834_v53 = vld [vmem:[%s8627_s16 + $0xb8] sm:$0xff]  ;;  %v1150_v59 = vmul.f32 %v8810_v33, %v8810_v33 }
  0xf3   : > { %6539 = vmatprep.subr.bf16.mxu0 %v11538_v0  ;;  %6563 = vmatprep.subr.bf16.mxu1 %v11538_v0  ;;  %v1102_v50 = vadd.f32 %v1101_v46, %v8743_v41 }
  0xf4   : > { %v1170_v14 = vadd.f32 %v1169_v7, %v1139_v2  ;;  %v1151_v2 = vmul.f32 %v8816_v38, %v8816_v38  ;;  %v1152_v7 = vmul.f32 %v8822_v43, %v8822_v43 }
  0xf5   : > { %v1103_v57 = vadd.f32 %v1102_v50, %v8751_v47 }
  0xf6   : > { %6541 = vmatpush3.bf16.msra.mxu0 %v6540_v40  ;;  %6565 = vmatpush3.bf16.msra.mxu1 %v6540_v40  ;;  %v1171_v20 = vadd.f32 %v1170_v14, %v1140_v6  ;;  %v8852_v6 = vld [vmem:[%s8627_s16 + $0xd0] sm:$0xff]  ;;  %v8858_v14 = vld [vmem:[%s8627_s16 + $0xd8] sm:$0xff] }
  0xf7   : > { %6542 = vmatprep.subr.bf16.mxu0 %v11538_v0  ;;  %6566 = vmatprep.subr.bf16.mxu1 %v11538_v0  ;;  %v1104_v61 = vadd.f32 %v1103_v57, %v8757_v52  ;;  %v8840_v57 = vld [vmem:[%s8627_s16 + $0xc0] sm:$0xff] }
  0xf8   : > { %v1172_v25 = vadd.f32 %v1171_v20, %v1141_v13 }
  0xf9   : > { %v1105_v4 = vadd.f32 %v1104_v61, %v8765_v58 }
  0xfa   : > { %6544 = vmatpush3.bf16.msra.mxu0 %v6543_v51  ;;  %6568 = vmatpush3.bf16.msra.mxu1 %v6543_v51  ;;  %v1173_v30 = vadd.f32 %v1172_v25, %v1142_v18 }
  0xfb   : > { %6545 = vmatprep.subr.bf16.mxu0 %v11538_v0  ;;  %6569 = vmatprep.subr.bf16.mxu1 %v11538_v0  ;;  %v1106_v8 = vadd.f32 %v1105_v4, %v8771_v63 }
  0xfc   : > { %v1174_v35 = vadd.f32 %v1173_v30, %v1143_v24  ;;  %v1154_v24 = vmul.f32 %v8834_v53, %v8834_v53  ;;  %v1155_v30 = vmul.f32 %v8840_v57, %v8840_v57 }
  0xfd   : > { %v1107_v16 = vadd.f32 %v1106_v8, %v8779_v5 }
  0xfe   : > { %6547 = vmatpush3.bf16.msra.mxu0 %v6546_v62  ;;  %6571 = vmatpush3.bf16.msra.mxu1 %v6546_v62  ;;  %v1175_v40 = vadd.f32 %v1174_v35, %v1144_v29  ;;  %v8846_v62 = vld [vmem:[%s8627_s16 + $0xc8] sm:$0xff]  ;;  %v8876_v35 = vld [vmem:[%s8627_s16 + $0xf0] sm:$0xff] }
  0xff   : > { %6572 = vmatprep.subr.bf16.mxu0 %v11538_v0  ;;  %v1108_v21 = vadd.f32 %v1107_v16, %v8785_v9  ;;  %v1153_v16 = vmul.f32 %v8828_v48, %v8828_v48  ;;  %v8870_v29 = vld [vmem:[%s8627_s16 + $0xe8] sm:$0xff] }
 0x100   : > { %v1176_v45 = vadd.f32 %v1175_v40, %v1145_v34 }
 0x101   : > { %v1109_v27 = vadd.f32 %v1108_v21, %v8792_v17  ;;  %v8864_v21 = vld [vmem:[%s8627_s16 + $0xe0] sm:$0xff] }
 0x102   : > { %v1177_v50 = vadd.f32 %v1176_v45, %v1146_v39 }
 0x103   : > { %v1110_v32 = vadd.f32 %v1109_v27, %v8798_v23 }
 0x104   : > { %v1178_v55 = vadd.f32 %v1177_v50, %v1147_v44  ;;  %v1157_v44 = vmul.f32 %v8852_v6, %v8852_v6 }
 0x105   : > { %v1111_v37 = vadd.f32 %v1110_v32, %v8804_v28 }
 0x106   : > { %v1179_v60 = vadd.f32 %v1178_v55, %v1148_v49  ;;  %v1158_v49 = vmul.f32 %v8858_v14, %v8858_v14 }
 0x107   : > { %v1112_v42 = vadd.f32 %v1111_v37, %v8810_v33  ;;  %v1156_v37 = vmul.f32 %v8846_v62, %v8846_v62 }
 0x108   : > { %v1180_v3 = vadd.f32 %v1179_v60, %v1149_v54  ;;  %v1159_v54 = vmul.f32 %v8864_v21, %v8864_v21 }
 0x109   : > { %v1113_v46 = vadd.f32 %v1112_v42, %v8816_v38  ;;  %v8882_v42 = vld [vmem:[%s8627_s16 + $0xf8] sm:$0xff] }
 0x10a   : > { %v1181_v8 = vadd.f32 %v1180_v3, %v1150_v59  ;;  %v1160_v59 = vmul.f32 %v8870_v29, %v8870_v29 }
 0x10b   : > { %v1114_v51 = vadd.f32 %v1113_v46, %v8822_v43 }
 0x10c   : > { %v1182_v18 = vadd.f32 %v1181_v8, %v1151_v2  ;;  %v1161_v2 = vmul.f32 %v8876_v35, %v8876_v35 }
 0x10d   : > { %v1115_v56 = vadd.f32 %v1114_v51, %v8828_v48 }
 0x10e   : > { %v1183_v25 = vadd.f32 %v1182_v18, %v1152_v7  ;;  %v1162_v7 = vmul.f32 %v8882_v42, %v8882_v42  ;;  %v765_v18 = vld [vmem:[#allocation8 + $0x8] sm:$0xff] }
 0x10f   : > { %v1116_v61 = vadd.f32 %v1115_v56, %v8834_v53 }
 0x110   : > { %v1184_v32 = vadd.f32 %v1183_v25, %v1153_v16  ;;  %v764_v16 = vld [vmem:[#allocation8] sm:$0xff] }
 0x111   : > { %v1117_v4 = vadd.f32 %v1116_v61, %v8840_v57 }
 0x112   : > { %v1185_v39 = vadd.f32 %v1184_v32, %v1154_v24  ;;  %v766_v32 = vld [vmem:[#allocation8 + $0x10] sm:$0xff] }
 0x113   : > { %v1118_v13 = vadd.f32 %v1117_v4, %v8846_v62 }
 0x114   : > { %v1186_v45 = vadd.f32 %v1185_v39, %v1155_v30 }
 0x115   : > { %v1119_v20 = vadd.f32 %v1118_v13, %v8852_v6 }
 0x116   : > { %v1187_v50 = vadd.f32 %v1186_v45, %v1156_v37 }
 0x117   : > { %v1120_v27 = vadd.f32 %v1119_v20, %v8858_v14 }
 0x118   : > { %v1188_v55 = vadd.f32 %v1187_v50, %v1157_v44  ;;  %v768_v50 = vld [vmem:[#allocation8 + $0x20] sm:$0xff] }
 0x119   : > { %v1121_v34 = vadd.f32 %v1120_v27, %v8864_v21  ;;  %v6573_v27 = vpack.c.bf16 %v765_v18, %v764_v16  ;;  %v778_v18 = vld [vmem:[#allocation8 + $0x70] sm:$0xff] }
 0x11a   : > { %v1189_v60 = vadd.f32 %v1188_v55, %v1158_v49  ;;  %v770_v55 = vld [vmem:[#allocation8 + $0x30] sm:$0xff] }
 0x11b   : > { %v1122_v40 = vadd.f32 %v1121_v34, %v8870_v29  ;;  %v767_v34 = vld [vmem:[#allocation8 + $0x18] sm:$0xff] }
 0x11c   : > { %v1190_v3 = vadd.f32 %v1189_v60, %v1159_v54  ;;  %v772_v60 = vld [vmem:[#allocation8 + $0x40] sm:$0xff] }
 0x11d   : > { %v1123_v46 = vadd.f32 %v1122_v40, %v8876_v35  ;;  %v6576_v40 = vpack.c.bf16 %v767_v34, %v766_v32  ;;  %v782_v32 = vld [vmem:[#allocation8 + $0x90] sm:$0xff]  ;;  %v783_v34 = vld [vmem:[#allocation8 + $0x98] sm:$0xff] }
 0x11e   : > { %v1191_v8 = vadd.f32 %v1190_v3, %v1160_v59  ;;  %v774_v3 = vld [vmem:[#allocation8 + $0x50] sm:$0xff] }
 0x11f   : > { %v1124_v51 = vadd.f32 %v1123_v46, %v8882_v42 }
 0x120   : > { %v1192_v20 = vadd.f32 %v1191_v8, %v1161_v2  ;;  %v776_v8 = vld [vmem:[#allocation8 + $0x60] sm:$0xff] }
 0x121   : > { %v1125_v56 = vrot.slane %v1124_v51, 4 }
 0x122   : > { %v1193_v25 = vadd.f32 %v1192_v20, %v1162_v7  ;;  %v779_v20 = vld [vmem:[#allocation8 + $0x78] sm:$0xff] }
 0x123   : > { %v1126_v61 = vadd.f32 %v1125_v56, %v1124_v51  ;;  %v769_v51 = vld [vmem:[#allocation8 + $0x28] sm:$0xff]  ;;  %v771_v56 = vld [vmem:[#allocation8 + $0x38] sm:$0xff] }
 0x124   : > { %v1194_v37 = vrot.slane %v1193_v25, 4  ;;  %v6579_v54 = vpack.c.bf16 %v769_v51, %v768_v50  ;;  %v6582_v59 = vpack.c.bf16 %v771_v56, %v770_v55  ;;  %v893_v50 = vld [vmem:[#allocation8 + $0x408] sm:$0xff]  ;;  %v788_v55 = vld [vmem:[#allocation8 + $0xc0] sm:$0xff] }
 0x125   : > { %v1127_v4 = vrot.slane %v1126_v61, 2  ;;  %v789_v56 = vld [vmem:[#allocation8 + $0xc8] sm:$0xff] }
 0x126   : > { %v1195_v39 = vadd.f32 %v1194_v37, %v1193_v25  ;;  %v780_v25 = vld [vmem:[#allocation8 + $0x80] sm:$0xff]  ;;  %v6600_v37 = vpack.c.bf16 %v783_v34, %v782_v32  ;;  %v794_v32 = vld [vmem:[#allocation8 + $0xf0] sm:$0xff]  ;;  %v795_v34 = vld [vmem:[#allocation8 + $0xf8] sm:$0xff] }
 0x127   : > { %v1128_v13 = vadd.f32 %v1127_v4, %v1126_v61  ;;  %v773_v61 = vld [vmem:[#allocation8 + $0x48] sm:$0xff]  ;;  %v775_v4 = vld [vmem:[#allocation8 + $0x58] sm:$0xff] }
 0x128   : > { %v1196_v44 = vrot.slane %v1195_v39, 2  ;;  %v6585_v2 = vpack.c.bf16 %v773_v61, %v772_v60  ;;  %v6588_v7 = vpack.c.bf16 %v775_v4, %v774_v3  ;;  %v895_v60 = vld [vmem:[#allocation8 + $0x418] sm:$0xff]  ;;  %v6609_v61 = vpack.c.bf16 %v789_v56, %v788_v55  ;;  %v790_v3 = vld [vmem:[#allocation8 + $0xd0] sm:$0xff] }
 0x129   : > { %v1129_v24 = vrot.slane %v1128_v13, 1  ;;  %v791_v4 = vld [vmem:[#allocation8 + $0xd8] sm:$0xff]  ;;  %v1754_v55 = vld [vmem:[#allocation2 + $0xf] sm:$0xff] }
 0x12a   : > { %v1197_v45 = vadd.f32 %v1196_v44, %v1195_v39  ;;  %v784_v39 = vld [vmem:[#allocation8 + $0xa0] sm:$0xff] }
 0x12b   : > { %v1130_v30 = vadd.f32 %v1129_v24, %v1128_v13  ;;  %v777_v13 = vld [vmem:[#allocation8 + $0x68] sm:$0xff]  ;;  %v6594_v24 = vpack.c.bf16 %v779_v20, %v778_v18  ;;  %v792_v18 = vld [vmem:[#allocation8 + $0xe0] sm:$0xff] }
 0x12c   : > { %v1198_v46 = vrot.slane %v1197_v45, 1  ;;  %v6591_v16 = vpack.c.bf16 %v777_v13, %v776_v8  ;;  %v897_v8 = vld [vmem:[#allocation8 + $0x428] sm:$0xff]  ;;  %v6612_v13 = vpack.c.bf16 %v791_v4, %v790_v3  ;;  %v907_v3 = vld [vmem:[#allocation8 + $0x478] sm:$0xff] }
 0x12d   : > { %6166 = vmatmul.mubr.f32.vlgmr.msra.gmra.mrb[0].mxu0 %v1130_v30  ;;  %v793_v20 = vld [vmem:[#allocation8 + $0xe8] sm:$0xff] }
 0x12e   : > { %6574 = vmatpush1.bf16.msra.mxu0 %v6573_v27  ;;  %2112 = vmatprep.mubr.f32.mxu0 %v8255_v1  ;;  %v1199_v49 = vadd.f32 %v1198_v46, %v1197_v45  ;;  %v781_v27 = vld [vmem:[#allocation8 + $0x88] sm:$0xff]  ;;  %v786_v45 = vld [vmem:[#allocation8 + $0xb0] sm:$0xff]  ;;  %v787_v46 = vld [vmem:[#allocation8 + $0xb8] sm:$0xff] }
 0x12f   : > { %6575 = vmatprep.subr.bf16.mxu0 %v11538_v0  ;;  %v6597_v30 = vpack.c.bf16 %v781_v27, %v780_v25  ;;  %v6606_v51 = vpack.c.bf16 %v787_v46, %v786_v45  ;;  %v899_v25 = vld [vmem:[#allocation8 + $0x438] sm:$0xff]  ;;  %v6615_v27 = vpack.c.bf16 %v793_v20, %v792_v18  ;;  %v902_v45 = vld [vmem:[#allocation8 + $0x450] sm:$0xff] }
 0x130   : > { %6201 = vmatmul.mubr.f32.vlgmr.msra.gmra.mrb[0].mxu1 %v1199_v49  ;;  %v892_v49 = vld [vmem:[#allocation8 + $0x400] sm:$0xff]  ;;  %v903_v46 = vld [vmem:[#allocation8 + $0x458] sm:$0xff]  ;;  %v802_v20 = vld [vmem:[#allocation8 + $0x130] sm:$0xff] }
 0x132   : > { %6577 = vmatpush1.bf16.msra.mxu0 %v6576_v40  ;;  %v785_v40 = vld [vmem:[#allocation8 + $0xa8] sm:$0xff] }
 0x133   : > { %6578 = vmatprep.subr.bf16.mxu0 %v11538_v0  ;;  %v6603_v44 = vpack.c.bf16 %v785_v40, %v784_v39  ;;  %v901_v39 = vld [vmem:[#allocation8 + $0x448] sm:$0xff]  ;;  %v6618_v40 = vpack.c.bf16 %v795_v34, %v794_v32 }
 0x136   : > { %6580 = vmatpush1.bf16.msra.mxu0 %v6579_v54  ;;  %v6764_v54 = vpack.c.bf16 %v893_v50, %v892_v49  ;;  %v1753_v49 = vld [vmem:[#allocation2 + $0x7] sm:$0xff]  ;;  %v6784_v50 = vpack.c.bf16 %v903_v46, %v902_v45 }
 0x137   : > { %6581 = vmatprep.subr.bf16.mxu0 %v11538_v0 }
 0x138   : > { %6765 = vmatprep.subr.bf16.mxu1 %v6764_v54 }
 0x139   : > { %6767 = vmatpush3.bf16.msra.mxu1 %v6764_v54  ;;  %v905_v54 = vld [vmem:[#allocation8 + $0x468] sm:$0xff] }
 0x13a   : > { %6583 = vmatpush1.bf16.msra.mxu0 %v6582_v59  ;;  %v894_v59 = vld [vmem:[#allocation8 + $0x410] sm:$0xff] }
 0x13b   : > { %6584 = vmatprep.subr.bf16.mxu0 %v11538_v0 }
 0x13e   : > { %6586 = vmatpush1.bf16.msra.mxu0 %v6585_v2  ;;  %v6768_v2 = vpack.c.bf16 %v895_v60, %v894_v59  ;;  %v796_v59 = vld [vmem:[#allocation8 + $0x100] sm:$0xff]  ;;  %v797_v60 = vld [vmem:[#allocation8 + $0x108] sm:$0xff] }
 0x13f   : > { %6587 = vmatprep.subr.bf16.mxu0 %v11538_v0 }
 0x140   : > { %6769 = vmatprep.subr.bf16.mxu1 %v6768_v2 }
 0x141   : > { %6771 = vmatpush3.bf16.msra.mxu1 %v6768_v2  ;;  %v6621_v2 = vpack.c.bf16 %v797_v60, %v796_v59 }
 0x142   : > { %6589 = vmatpush1.bf16.msra.mxu0 %v6588_v7  ;;  %v896_v7 = vld [vmem:[#allocation8 + $0x420] sm:$0xff] }
 0x143   : > { %6590 = vmatprep.subr.bf16.mxu0 %v11538_v0 }
 0x146   : > { %6592 = vmatpush1.bf16.msra.mxu0 %v6591_v16  ;;  %v6772_v16 = vpack.c.bf16 %v897_v8, %v896_v7  ;;  %v799_v7 = vld [vmem:[#allocation8 + $0x118] sm:$0xff] }
 0x147   : > { %6593 = vmatprep.subr.bf16.mxu0 %v11538_v0 }
 0x148   : > { %6773 = vmatprep.subr.bf16.mxu1 %v6772_v16 }
 0x149   : > { %6775 = vmatpush3.bf16.msra.mxu1 %v6772_v16  ;;  %v801_v16 = vld [vmem:[#allocation8 + $0x128] sm:$0xff] }
 0x14a   : > { %6595 = vmatpush1.bf16.msra.mxu0 %v6594_v24  ;;  %v898_v24 = vld [vmem:[#allocation8 + $0x430] sm:$0xff] }
 0x14b   : > { %6596 = vmatprep.subr.bf16.mxu0 %v11538_v0 }
 0x14e   : > { %6598 = vmatpush1.bf16.msra.mxu0 %v6597_v30  ;;  %v6776_v30 = vpack.c.bf16 %v899_v25, %v898_v24  ;;  %v803_v24 = vld [vmem:[#allocation8 + $0x138] sm:$0xff] }
 0x14f   : > { %6599 = vmatprep.subr.bf16.mxu0 %v11538_v0  ;;  %v6630_v25 = vpack.c.bf16 %v803_v24, %v802_v20  ;;  %v812_v24 = vld [vmem:[#allocation8 + $0x180] sm:$0xff] }
 0x150   : > { %6777 = vmatprep.subr.bf16.mxu1 %v6776_v30 }
 0x151   : > { %6779 = vmatpush3.bf16.msra.mxu1 %v6776_v30  ;;  %v805_v30 = vld [vmem:[#allocation8 + $0x148] sm:$0xff] }
 0x152   : > { %6601 = vmatpush1.bf16.msra.mxu0 %v6600_v37  ;;  %v900_v37 = vld [vmem:[#allocation8 + $0x440] sm:$0xff] }
 0x153   : > { %6602 = vmatprep.subr.bf16.mxu0 %v11538_v0 }
 0x156   : > { %6604 = vmatpush1.bf16.msra.mxu0 %v6603_v44  ;;  %v6780_v44 = vpack.c.bf16 %v901_v39, %v900_v37  ;;  %v806_v39 = vld [vmem:[#allocation8 + $0x150] sm:$0xff] }
 0x157   : > { %6605 = vmatprep.subr.bf16.mxu0 %v11538_v0 }
 0x158   : > { %6781 = vmatprep.subr.bf16.mxu1 %v6780_v44 }
 0x159   : > { %6783 = vmatpush3.bf16.msra.mxu1 %v6780_v44 }
 0x15a   : > { %6607 = vmatpush1.bf16.msra.mxu0 %v6606_v51  ;;  %6785 = vmatprep.subr.bf16.mxu1 %v6784_v50  ;;  %v904_v51 = vld [vmem:[#allocation8 + $0x460] sm:$0xff] }
 0x15b   : > { %6608 = vmatprep.subr.bf16.mxu0 %v11538_v0  ;;  %v6788_v56 = vpack.c.bf16 %v905_v54, %v904_v51  ;;  %v809_v51 = vld [vmem:[#allocation8 + $0x168] sm:$0xff] }
 0x15d   : > { %6787 = vmatpush3.bf16.msra.mxu1 %v6784_v50  ;;  %v808_v50 = vld [vmem:[#allocation8 + $0x160] sm:$0xff] }
 0x15e   : > { %6610 = vmatpush1.bf16.msra.mxu0 %v6609_v61  ;;  %v906_v61 = vld [vmem:[#allocation8 + $0x470] sm:$0xff]  ;;  %6789 = vmatprep.subr.bf16.mxu1 %v6788_v56  ;;  %v6639_v59 = vpack.c.bf16 %v809_v51, %v808_v50 }
 0x15f   : > { %6611 = vmatprep.subr.bf16.mxu0 %v11538_v0  ;;  %v6792_v4 = vpack.c.bf16 %v907_v3, %v906_v61 }
 0x161   : > { %6791 = vmatpush3.bf16.msra.mxu1 %v6788_v56 }
 0x162   : > { %6613 = vmatpush1.bf16.msra.mxu0 %v6612_v13  ;;  %6793 = vmatprep.subr.bf16.mxu1 %v6792_v4  ;;  %v800_v13 = vld [vmem:[#allocation8 + $0x120] sm:$0xff] }
 0x163   : > { %6614 = vmatprep.subr.bf16.mxu0 %v11538_v0  ;;  %v6627_v18 = vpack.c.bf16 %v801_v16, %v800_v13 }
 0x165   : > { %6795 = vmatpush3.bf16.msra.mxu1 %v6792_v4 }
 0x166   : > { %6616 = vmatpush1.bf16.msra.mxu0 %v6615_v27  ;;  %6796 = vmatprep.subr.bf16.mxu1 %v11538_v0  ;;  %v804_v27 = vld [vmem:[#allocation8 + $0x140] sm:$0xff] }
 0x167   : > { %6617 = vmatprep.subr.bf16.mxu0 %v11538_v0  ;;  %v6633_v32 = vpack.c.bf16 %v805_v30, %v804_v27 }
 0x16a   : > { %6619 = vmatpush1.bf16.msra.mxu0 %v6618_v40  ;;  %v807_v40 = vld [vmem:[#allocation8 + $0x158] sm:$0xff] }
 0x16b   : > { %6620 = vmatprep.subr.bf16.mxu0 %v11538_v0  ;;  %v6636_v44 = vpack.c.bf16 %v807_v40, %v806_v39 }
 0x16d   : > { %2113 = vmatmul.mubr.f32.vlgmr.msra.gmra.mrb[2].mxu0 %v1753_v49  ;;  %v1348_v49 = vlaneseq }
 0x16e   : > { %2117 = vmatprep.mubr.f32.mxu0 %v8255_v1  ;;  %6622 = vmatpush1.bf16.msra.mxu0 %v6621_v2  ;;  %v798_v1 = vld [vmem:[#allocation8 + $0x110] sm:$0xff] }
 0x16f   : > { %6623 = vmatprep.subr.bf16.mxu0 %v11538_v0  ;;  %v6624_v8 = vpack.c.bf16 %v799_v7, %v798_v1  ;;  %v1349_v60 = vshrl.u32 %v1348_v49, 7  ;;  %v810_v1 = vld [vmem:[#allocation8 + $0x170] sm:$0xff]  ;;  %v811_v7 = vld [vmem:[#allocation8 + $0x178] sm:$0xff]  ;;  %v816_v49 = vld [vmem:[#allocation8 + $0x1a0] sm:$0xff] }
 0x171   : > { %2118 = vmatmul.mubr.f32.gmra.mrb[4].mxu0 %v1754_v55  ;;  %v8924_v3 = vsub.s32 0, %v1349_v60 }
 0x172   : > { %6625 = vmatpush1.bf16.msra.mxu0 %v6624_v8  ;;  %v6642_v8 = vpack.c.bf16 %v811_v7, %v810_v1 }
 0x173   : > { %6626 = vmatprep.subr.bf16.mxu0 %v11538_v0  ;;  %11590 = vst [vmem:[#allocation21_spill] sm:$0xff] %v8924_v3 }
 0x176   : > { %6628 = vmatpush1.bf16.msra.mxu0 %v6627_v18 }
 0x177   : > { %6629 = vmatprep.subr.bf16.mxu0 %v11538_v0 }
 0x17a   : > { %6631 = vmatpush1.bf16.msra.mxu0 %v6630_v25  ;;  %v813_v25 = vld [vmem:[#allocation8 + $0x188] sm:$0xff] }
 0x17b   : > { %6632 = vmatprep.subr.bf16.mxu0 %v11538_v0 }
 0x17e   : > { %6634 = vmatpush1.bf16.msra.mxu0 %v6633_v32 }
 0x17f   : > { %6635 = vmatprep.subr.bf16.mxu0 %v11538_v0 }
 0x182   : > { %6637 = vmatpush1.bf16.msra.mxu0 %v6636_v44  ;;  %v815_v44 = vld [vmem:[#allocation8 + $0x198] sm:$0xff] }
 0x183   : > { %6638 = vmatprep.subr.bf16.mxu0 %v11538_v0 }
 0x186   : > { %6640 = vmatpush1.bf16.msra.mxu0 %v6639_v59 }
 0x187   : > { %6641 = vmatprep.subr.bf16.mxu0 %v11538_v0 }
 0x18a   : > { %6643 = vmatpush1.bf16.msra.mxu0 %v6642_v8 }
 0x18b   : > { %6644 = vmatprep.subr.bf16.mxu0 %v11538_v0 }
 0x200   : > { %v1266_v34 = vpop.f32.mrb[0].mxu0 }
 0x201   : > { %v6167_v37 = vpop.f32.mrb[1].mxu0  ;;  %v1341_v45 = vmul.f32 0.001953125, %v1266_v34  ;;  %v6645_v34 = vpack.c.bf16 %v813_v25, %v812_v24  ;;  %v9009_v25 = vld [vmem:[%s11517_s3] ss:$0 sm:$0xff] }
 0x203   : > { %v1343_v46 = vmul.f32 %v1341_v45, %v1341_v45  ;;  %v1336_v54 = vpop.f32.mrb[0].mxu1  ;;  %v8927_v13 = vrot.slane %v1341_v45, %v8924_v3  ;;  %6646 = vmatpush1.bf16.msra.mxu0 %v6645_v34 }
 0x204   : > { %v1342_v55 = vmul.f32 0.001953125, %v1336_v54  ;;  %v6202_v56 = vpop.f32.mrb[1].mxu1  ;;  %6647 = vmatprep.subr.bf16.mxu0 %v11538_v0 }
 0x205   : > { %v1369_v16 = vsub.f32 %v8798_v23, %v8927_v13  ;;  %v1370_v18 = vsub.f32 %v8804_v28, %v8927_v13  ;;  %v1371_v20 = vsub.f32 %v8810_v33, %v8927_v13  ;;  %v1372_v27 = vsub.f32 %v8816_v38, %v8927_v13 }
 0x206   : > { %v1344_v61 = vsub.f32 %v1342_v55, %v1343_v46  ;;  %v1373_v30 = vsub.f32 %v8822_v43, %v8927_v13  ;;  %v1374_v32 = vsub.f32 %v8828_v48, %v8927_v13  ;;  %v1375_v37 = vsub.f32 %v8834_v53, %v8927_v13 }
 0x207   : > { %v1376_v39 = vsub.f32 %v8840_v57, %v8927_v13  ;;  %v1377_v33 = vsub.f32 %v8846_v62, %v8927_v13  ;;  %v1378_v40 = vsub.f32 %v8852_v6, %v8927_v13  ;;  %v1379_v38 = vsub.f32 %v8858_v14, %v8927_v13  ;;  %v814_v57 = vld [vmem:[#allocation8 + $0x190] sm:$0xff] }
 0x208   : > { %v1345_v2 = vmax.f32 %v1344_v61, 0.0  ;;  %v1380_v43 = vsub.f32 %v8864_v21, %v8927_v13  ;;  %v1381_v48 = vsub.f32 %v8870_v29, %v8927_v13  ;;  %v1382_v53 = vsub.f32 %v8876_v35, %v8927_v13 }
 0x209   : > { %v1383_v62 = vsub.f32 %v8882_v42, %v8927_v13  ;;  %v1352_v6 = vsub.f32 %v8694_v10, %v8927_v13  ;;  %v1354_v14 = vsub.f32 %v8700_v12, %v8927_v13  ;;  %v6648_v21 = vpack.c.bf16 %v815_v44, %v814_v57  ;;  %v817_v10 = vld [vmem:[#allocation8 + $0x1a8] sm:$0xff] }
 0x20a   : > { %v1346_v4 = vadd.f32 1e-06, %v1345_v2  ;;  %v1355_v35 = vsub.f32 %v8705_v15, %v8927_v13  ;;  %v1353_v46 = vsub.f32 %v8697_v11, %v8927_v13  ;;  %v1356_v42 = vsub.f32 %v8711_v19, %v8927_v13  ;;  %v8983_v15 = vld [vmem:[%s11516_s2] ss:$0 sm:$0xff] }
 0x20b   : > { %v1357_v50 = vsub.f32 %v8715_v22, %v8927_v13  ;;  %v1358_v51 = vsub.f32 %v8721_v26, %v8927_v13  ;;  %v1359_v54 = vsub.f32 %v8729_v31, %v8927_v13  ;;  %v6651_v55 = vpack.c.bf16 %v817_v10, %v816_v49  ;;  %6649 = vmatpush1.bf16.msra.mxu0 %v6648_v21 }
 0x20c   : > { %7668 = vrsqrt.f32 %v1346_v4  ;;  %6650 = vmatprep.subr.bf16.mxu0 %v11538_v0  ;;  %v1361_v34 = vsub.f32 %v8743_v41, %v8927_v13 }
 0x20f   : > { %6652 = vmatpush1.bf16.msra.mxu0 %v6651_v55 }
 0x210   : > { %6653 = vmatprep.subr.bf16.mxu0 %v11538_v0 }
 0x216   : > { %v7669_v45 = vpop.eup %7668 }
 0x217   : > { %v8966_v29 = vrot.slane %v7669_v45, %v8924_v3  ;;  %v829_v3 = vld [vmem:[#allocation8 + $0x208] sm:$0xff] }
 0x219   : > { %v8986_v56 = vmul.f32 %v8966_v29, %v1371_v20  ;;  %v8989_v59 = vmul.f32 %v8966_v29, %v1372_v27  ;;  %v8992_v22 = vmul.f32 %v8966_v29, %v1373_v30  ;;  %v8995_v60 = vmul.f32 %v8966_v29, %v1374_v32 }
 0x21a   : > { %v1411_v61 = vmul.f32 %v8966_v29, %v1375_v37  ;;  %v1412_v2 = vmul.f32 %v8966_v29, %v1376_v39  ;;  %v1413_v4 = vmul.f32 %v8966_v29, %v1377_v33  ;;  %v1414_v1 = vmul.f32 %v8966_v29, %v1378_v40 }
 0x21b   : > { %v1415_v7 = vmul.f32 %v8966_v29, %v1379_v38  ;;  %v1416_v8 = vmul.f32 %v8966_v29, %v1380_v43  ;;  %v1417_v20 = vmul.f32 %v8966_v29, %v1381_v48  ;;  %v1418_v24 = vmul.f32 %v8966_v29, %v1382_v53 }
 0x21c   : > { %v1419_v27 = vmul.f32 %v8966_v29, %v1383_v62  ;;  %v1449_v30 = vmul.f32 %v8983_v15, %v1411_v61  ;;  %v1360_v32 = vsub.f32 %v8737_v36, %v8927_v13  ;;  %v1450_v37 = vmul.f32 %v8983_v15, %v1412_v2 }
 0x21d   : > { %v1451_v39 = vmul.f32 %v8983_v15, %v1413_v4  ;;  %v1452_v33 = vmul.f32 %v8983_v15, %v1414_v1  ;;  %v1453_v40 = vmul.f32 %v8983_v15, %v1415_v7  ;;  %v1454_v38 = vmul.f32 %v8983_v15, %v1416_v8 }
 0x21e   : > { %v1455_v43 = vmul.f32 %v8983_v15, %v1417_v20  ;;  %v1456_v48 = vmul.f32 %v8983_v15, %v1418_v24  ;;  %v1457_v53 = vmul.f32 %v8983_v15, %v1419_v27  ;;  %v9027_v57 = vadd.f32 %v9009_v25, %v1449_v30 }
 0x21f   : > { %v9030_v44 = vadd.f32 %v9009_v25, %v1450_v37  ;;  %v9033_v45 = vadd.f32 %v9009_v25, %v1451_v39  ;;  %v9036_v62 = vadd.f32 %v9009_v25, %v1452_v33  ;;  %v9039_v21 = vadd.f32 %v9009_v25, %v1453_v40 }
 0x220   : > { %v9042_v49 = vadd.f32 %v9009_v25, %v1454_v38  ;;  %v9045_v10 = vadd.f32 %v9009_v25, %v1455_v43  ;;  %v9048_v55 = vadd.f32 %v9009_v25, %v1456_v48  ;;  %v5861_v61 = vmul.f32 -1.442695, %v9027_v57 }
 0x221   : > { %v5862_v2 = vmul.f32 -1.442695, %v9030_v44  ;;  %v5863_v4 = vmul.f32 -1.442695, %v9033_v45  ;;  %v1362_v1 = vsub.f32 %v8751_v47, %v8927_v13  ;;  %v9056_v7 = vadd.f32 %v9009_v25, %v1457_v53 }
 0x222   : > { %v5864_v8 = vmul.f32 -1.442695, %v9036_v62  ;;  %v5865_v20 = vmul.f32 -1.442695, %v9039_v21  ;;  %v1388_v24 = vmul.f32 %v8966_v29, %v1352_v6  ;;  %7670 = vpow2.f32 %v5861_v61 }
 0x223   : > { %v5866_v27 = vmul.f32 -1.442695, %v9042_v49  ;;  %v5867_v30 = vmul.f32 -1.442695, %v9045_v10  ;;  %v5868_v37 = vmul.f32 -1.442695, %v9048_v55  ;;  %7672 = vpow2.f32 %v5862_v2 }
 0x224   : > { %v1426_v39 = vmul.f32 %v8983_v15, %v1388_v24  ;;  %v1390_v47 = vmul.f32 %v8966_v29, %v1354_v14  ;;  %v1391_v33 = vmul.f32 %v8966_v29, %v1355_v35  ;;  %7674 = vpow2.f32 %v5863_v4 }
 0x225   : > { %v1389_v6 = vmul.f32 %v8966_v29, %v1353_v46  ;;  %v1392_v40 = vmul.f32 %v8966_v29, %v1356_v42  ;;  %v1393_v38 = vmul.f32 %v8966_v29, %v1357_v50  ;;  %7676 = vpow2.f32 %v5864_v8 }
 0x226   : > { %v9080_v12 = vadd.f32 %v9009_v25, %v1426_v39  ;;  %v1428_v14 = vmul.f32 %v8983_v15, %v1390_v47  ;;  %v1429_v35 = vmul.f32 %v8983_v15, %v1391_v33  ;;  %7678 = vpow2.f32 %v5865_v20 }
 0x227   : > { %v5869_v11 = vmul.f32 -1.442695, %v9056_v7  ;;  %v1427_v46 = vmul.f32 %v8983_v15, %v1389_v6  ;;  %v1430_v43 = vmul.f32 %v8983_v15, %v1392_v40  ;;  %7680 = vpow2.f32 %v5866_v27 }
 0x228   : > { %v5838_v19 = vmul.f32 -1.442695, %v9080_v12  ;;  %v9089_v42 = vadd.f32 %v9009_v25, %v1428_v14  ;;  %v9092_v50 = vadd.f32 %v9009_v25, %v1429_v35  ;;  %7682 = vpow2.f32 %v5867_v30 }
 0x229   : > { %v9095_v48 = vadd.f32 %v9009_v25, %v1427_v46  ;;  %v1363_v53 = vsub.f32 %v8757_v52, %v8927_v13  ;;  %v1364_v61 = vsub.f32 %v8765_v58, %v8927_v13  ;;  %7684 = vpow2.f32 %v5868_v37 }
 0x22a   : > { %v5840_v2 = vmul.f32 -1.442695, %v9089_v42  ;;  %v5841_v4 = vmul.f32 -1.442695, %v9092_v50  ;;  %v1394_v8 = vmul.f32 %v8966_v29, %v1358_v51  ;;  %7686 = vpow2.f32 %v5869_v11 }
 0x22b   : > { %v5839_v20 = vmul.f32 -1.442695, %v9095_v48  ;;  %v1431_v24 = vmul.f32 %v8983_v15, %v1393_v38  ;;  %v1365_v52 = vsub.f32 %v8771_v63, %v8927_v13  ;;  %7688 = vpow2.f32 %v5838_v19 }
 0x22c   : > { %v9112_v58 = vadd.f32 %v9009_v25, %v1430_v43  ;;  %v1395_v27 = vmul.f32 %v8966_v29, %v1359_v54  ;;  %v1396_v26 = vmul.f32 %v8966_v29, %v1360_v32  ;;  %v7671_v51 = vpop.eup %7670  ;;  %7690 = vpow2.f32 %v5840_v2 }
 0x22d   : > { %v1397_v63 = vmul.f32 %v8966_v29, %v1361_v34  ;;  %v1398_v30 = vmul.f32 %v8966_v29, %v1362_v1  ;;  %v1399_v37 = vmul.f32 %v8966_v29, %v1363_v53  ;;  %v7673_v39 = vpop.eup %7672  ;;  %v1615_v31 = vadd.f32 1.0, %v7671_v51 }
 0x22e   : > { %7692 = vpow2.f32 %v5841_v4  ;;  %v1432_v54 = vmul.f32 %v8983_v15, %v1394_v8  ;;  %v1366_v36 = vsub.f32 %v8779_v5, %v8927_v13  ;;  %v7675_v32 = vpop.eup %7674  ;;  %v1616_v47 = vadd.f32 1.0, %v7673_v39 }
 0x22f   : > { %7694 = vpow2.f32 %v5839_v20  ;;  %v9132_v33 = vadd.f32 %v9009_v25, %v1431_v24  ;;  %v1433_v41 = vmul.f32 %v8983_v15, %v1395_v27  ;;  %v7677_v34 = vpop.eup %7676  ;;  %v1617_v1 = vadd.f32 1.0, %v7675_v32 }
 0x230   : > { %7696 = vrcp.f32 %v1615_v31  ;;  %v1434_v6 = vmul.f32 %v8983_v15, %v1396_v26  ;;  %v1367_v40 = vsub.f32 %v8785_v9, %v8927_v13  ;;  %v7679_v38 = vpop.eup %7678  ;;  %v1618_v14 = vadd.f32 1.0, %v7677_v34 }
 0x231   : > { %7698 = vrcp.f32 %v1616_v47  ;;  %v5842_v5 = vmul.f32 -1.442695, %v9112_v58  ;;  %v1368_v35 = vsub.f32 %v8792_v17, %v8927_v13  ;;  %v7681_v11 = vpop.eup %7680  ;;  %v1619_v46 = vadd.f32 1.0, %v7679_v38 }
 0x232   : > { %7700 = vrcp.f32 %v1617_v1  ;;  %v9142_v43 = vadd.f32 %v9009_v25, %v1432_v54  ;;  %v1435_v19 = vmul.f32 %v8983_v15, %v1397_v63  ;;  %v7683_v53 = vpop.eup %7682  ;;  %v1620_v2 = vadd.f32 1.0, %v7681_v11 }
 0x233   : > { %7702 = vrcp.f32 %v1618_v14  ;;  %v5843_v9 = vmul.f32 -1.442695, %v9132_v33  ;;  %v9147_v4 = vadd.f32 %v9009_v25, %v1433_v41  ;;  %v7685_v8 = vpop.eup %7684  ;;  %v1621_v20 = vadd.f32 1.0, %v7683_v53 }
 0x234   : > { %7704 = vrcp.f32 %v1619_v46  ;;  %v9150_v17 = vadd.f32 %v9009_v25, %v1434_v6  ;;  %v1436_v24 = vmul.f32 %v8983_v15, %v1398_v30  ;;  %v7687_v27 = vpop.eup %7686  ;;  %v1622_v26 = vadd.f32 1.0, %v7685_v8 }
 0x235   : > { %7706 = vrcp.f32 %v1620_v2  ;;  %v1400_v51 = vmul.f32 %v8966_v29, %v1364_v61  ;;  %v1401_v63 = vmul.f32 %v8966_v29, %v1365_v52  ;;  %v7689_v39 = vpop.eup %7688  ;;  %v1623_v31 = vadd.f32 1.0, %v7687_v27 }
 0x236   : > { %7708 = vrcp.f32 %v1621_v20  ;;  %v5844_v54 = vmul.f32 -1.442695, %v9142_v43  ;;  %v9157_v32 = vadd.f32 %v9009_v25, %v1435_v19  ;;  %v7691_v47 = vpop.eup %7690  ;;  %v1592_v41 = vadd.f32 1.0, %v7689_v39 }
 0x237   : > { %7710 = vrcp.f32 %v1622_v26  ;;  %v5845_v30 = vmul.f32 -1.442695, %v9147_v4  ;;  %v1437_v34 = vmul.f32 %v8983_v15, %v1399_v37  ;;  %v1594_v61 = vadd.f32 1.0, %v7691_v47 }
 0x238   : > { %v7693_v1 = vpop.eup %7692  ;;  %7712 = vrcp.f32 %v1623_v31  ;;  %v1438_v52 = vmul.f32 %v8983_v15, %v1400_v51  ;;  %v1402_v6 = vmul.f32 %v8966_v29, %v1366_v36  ;;  %v5846_v11 = vmul.f32 -1.442695, %v9150_v17 }
 0x239   : > { %v7695_v38 = vpop.eup %7694  ;;  %7714 = vrcp.f32 %v1592_v41  ;;  %v1595_v14 = vadd.f32 1.0, %v7693_v1  ;;  %v9165_v46 = vadd.f32 %v9009_v25, %v1436_v24  ;;  %v1439_v37 = vmul.f32 %v8983_v15, %v1401_v63 }
 0x23a   : > { %v9167_v19 = vpop.eup %7696  ;;  %7716 = vrcp.f32 %v1594_v61  ;;  %v1593_v53 = vadd.f32 1.0, %v7695_v38  ;;  %v1403_v2 = vmul.f32 %v8966_v29, %v1367_v40  ;;  %v9174_v36 = vadd.f32 %v9009_v25, %v1437_v34 }
 0x23b   : > { %v9171_v8 = vpop.eup %7698  ;;  %7718 = vrcp.f32 %v1595_v14  ;;  %v1440_v20 = vmul.f32 %v8983_v15, %v1402_v6  ;;  %v1404_v27 = vmul.f32 %v8966_v29, %v1368_v35  ;;  %v9179_v26 = vadd.f32 %v9009_v25, %v1438_v52 }
 0x23c   : > { %v7701_v24 = vpop.eup %7700  ;;  %7720 = vrcp.f32 %v1593_v53  ;;  %v1441_v51 = vmul.f32 %v8983_v15, %v1403_v2  ;;  %v9186_v40 = vmul.f32 %v8966_v29, %v1369_v16  ;;  %v9194_v35 = vmul.f32 %v8966_v29, %v1370_v18 }
 0x23d   : > { %v7703_v63 = vpop.eup %7702  ;;  %v1713_v39 = vmul.f32 %v7701_v24, %v9033_v45  ;;  %7722 = vpow2.f32 %v5842_v5  ;;  %v1442_v31 = vmul.f32 %v8983_v15, %v1404_v27  ;;  %v5847_v23 = vmul.f32 -1.442695, %v9157_v32 }
 0x23e   : > { %v7705_v47 = vpop.eup %7704  ;;  %v1714_v41 = vmul.f32 %v7703_v63, %v9036_v62  ;;  %7724 = vpow2.f32 %v5843_v9  ;;  %v9199_v16 = vadd.f32 %v9009_v25, %v1439_v37  ;;  %v5848_v5 = vmul.f32 -1.442695, %v9165_v46 }
 0x23f   : > { %v7707_v34 = vpop.eup %7706  ;;  %v1715_v45 = vmul.f32 %v7705_v47, %v9039_v21  ;;  %1746 = vst [vmem:[#allocation2 + $0x1b0] sm:$0xff] %v1713_v39  ;;  %7726 = vpow2.f32 %v5844_v54  ;;  %v9204_v28 = vadd.f32 %v9009_v25, %v1440_v20  ;;  %v5849_v29 = vmul.f32 -1.442695, %v9174_v36  ;;  %v818_v20 = vld [vmem:[#allocation8 + $0x1b0] sm:$0xff]  ;;  %v821_v39 = vld [vmem:[#allocation8 + $0x1c8] sm:$0xff] }
 0x240   : > { %v7709_v13 = vpop.eup %7708  ;;  %v1716_v18 = vmul.f32 %v7707_v34, %v9042_v49  ;;  %1747 = vst [vmem:[#allocation2 + $0x1c8] sm:$0xff] %v1714_v41  ;;  %7728 = vpow2.f32 %v5845_v30  ;;  %v9209_v62 = vadd.f32 %v9009_v25, %v1441_v51  ;;  %v5850_v54 = vmul.f32 -1.442695, %v9179_v26 }
 0x241   : > { %v7711_v9 = vpop.eup %7710  ;;  %v1717_v21 = vmul.f32 %v7709_v13, %v9045_v10  ;;  %1748 = vst [vmem:[#allocation2 + $0x1d0] sm:$0xff] %v1715_v45  ;;  %7730 = vpow2.f32 %v5846_v11  ;;  %v9214_v1 = vadd.f32 %v9009_v25, %v1442_v31  ;;  %v5851_v30 = vmul.f32 -1.442695, %v9199_v16 }
 0x242   : > { %v7713_v61 = vpop.eup %7712  ;;  %v1718_v49 = vmul.f32 %v7711_v9, %v9048_v55  ;;  %1749 = vst [vmem:[#allocation2 + $0x1e8] sm:$0xff] %v1716_v18  ;;  %7732 = vpow2.f32 %v5847_v23  ;;  %v5852_v10 = vmul.f32 -1.442695, %v9204_v28  ;;  %v5853_v11 = vmul.f32 -1.442695, %v9209_v62  ;;  %v822_v18 = vld [vmem:[#allocation8 + $0x1d0] sm:$0xff] }
 0x243   : > { %v7715_v52 = vpop.eup %7714  ;;  %v1719_v6 = vmul.f32 %v7713_v61, %v9056_v7  ;;  %1750 = vst [vmem:[#allocation2 + $0x1f0] sm:$0xff] %v1717_v21  ;;  %7734 = vpow2.f32 %v5848_v5  ;;  %v5854_v37 = vmul.f32 -1.442695, %v9214_v1  ;;  %v9234_v63 = vmul.f32 %v9167_v19, %v9027_v57 }
 0x244   : > { %v7717_v38 = vpop.eup %7716  ;;  %1751 = vst [vmem:[#allocation2 + $0x208] sm:$0xff] %v1718_v49  ;;  %v1688_v14 = vmul.f32 %v7715_v52, %v9080_v12  ;;  %7736 = vpow2.f32 %v5849_v29  ;;  %v819_v12 = vld [vmem:[#allocation8 + $0x1b8] sm:$0xff]  ;;  %v9238_v41 = vmul.f32 %v9171_v8, %v9030_v44  ;;  %v1443_v45 = vmul.f32 %v8983_v15, %v9186_v40 }
 0x245   : > { %v7719_v53 = vpop.eup %7718  ;;  %1752 = vst [vmem:[#allocation2 + $0x210] sm:$0xff] %v1719_v6  ;;  %v9223_v55 = vmul.f32 %v7717_v38, %v9089_v42  ;;  %7738 = vpow2.f32 %v5850_v54  ;;  %1744 = vst [vmem:[#allocation2 + $0x190] sm:$0xff] %v9234_v63  ;;  %v1444_v8 = vmul.f32 %v8983_v15, %v9194_v35  ;;  %v823_v29 = vld [vmem:[#allocation8 + $0x1d8] sm:$0xff]  ;;  %v1445_v54 = vmul.f32 %v8983_v15, %v8986_v56 }
 0x246   : > { %v7721_v7 = vpop.eup %7720  ;;  %1721 = vst [vmem:[#allocation2 + $0x28] sm:$0xff] %v1688_v14  ;;  %2122 = vmatprep.mubr.f32.mxu0 %v1688_v14  ;;  %v9227_v2 = vmul.f32 %v7719_v53, %v9092_v50  ;;  %7740 = vpow2.f32 %v5851_v30  ;;  %v820_v50 = vld [vmem:[#allocation8 + $0x1c0] sm:$0xff]  ;;  %1745 = vst [vmem:[#allocation2 + $0x1a8] sm:$0xff] %v9238_v41  ;;  %v9253_v30 = vadd.f32 %v9009_v25, %v1443_v45 }
 0x247   : > { %v7723_v27 = vpop.eup %7722  ;;  %1723 = vst [vmem:[#allocation2 + $0x48] sm:$0xff] %v9223_v55  ;;  %v1689_v24 = vmul.f32 %v7721_v7, %v9095_v48  ;;  %7742 = vpow2.f32 %v5852_v10  ;;  %v6654_v48 = vpack.c.bf16 %v819_v12, %v818_v20  ;;  %v6657_v5 = vpack.c.bf16 %v821_v39, %v820_v50  ;;  %v825_v7 = vld [vmem:[#allocation8 + $0x1e8] sm:$0xff] }
 0x248   : > { %v7725_v42 = vpop.eup %7724  ;;  %1724 = vst [vmem:[#allocation2 + $0x50] sm:$0xff] %v9227_v2  ;;  %v1596_v51 = vadd.f32 1.0, %v7723_v27  ;;  %7744 = vpow2.f32 %v5853_v11  ;;  %v1446_v35 = vmul.f32 %v8983_v15, %v8989_v59  ;;  %v1447_v6 = vmul.f32 %v8983_v15, %v8992_v22  ;;  %v824_v22 = vld [vmem:[#allocation8 + $0x1e0] sm:$0xff] }
 0x249   : > { %v7727_v31 = vpop.eup %7726  ;;  %1722 = vst [vmem:[#allocation2 + $0x30] sm:$0xff] %v1689_v24  ;;  %v1597_v47 = vadd.f32 1.0, %v7725_v42  ;;  %7746 = vpow2.f32 %v5854_v37  ;;  %6655 = vmatpush1.bf16.msra.mxu0 %v6654_v48  ;;  %v6660_v14 = vpack.c.bf16 %v823_v29, %v822_v18  ;;  %v1448_v53 = vmul.f32 %v8983_v15, %v8995_v60 }
 0x24a   : > { %v7729_v23 = vpop.eup %7728  ;;  %7748 = vrcp.f32 %v1596_v51  ;;  %v1598_v34 = vadd.f32 1.0, %v7727_v31  ;;  %6656 = vmatprep.subr.bf16.mxu0 %v11538_v0  ;;  %v9267_v37 = vadd.f32 %v9009_v25, %v1444_v8  ;;  %v9274_v15 = vadd.f32 %v9009_v25, %v1445_v54 }
 0x24b   : > { %v7731_v57 = vpop.eup %7730  ;;  %7750 = vrcp.f32 %v1597_v47  ;;  %v1599_v19 = vadd.f32 1.0, %v7729_v23  ;;  %v5855_v42 = vmul.f32 -1.442695, %v9253_v30  ;;  %v9279_v51 = vadd.f32 %v9009_v25, %v1446_v35 }
 0x24c   : > { %v7733_v13 = vpop.eup %7732  ;;  %7752 = vrcp.f32 %v1598_v34  ;;  %v1600_v44 = vadd.f32 1.0, %v7731_v57  ;;  %v9283_v31 = vadd.f32 %v9009_v25, %v1447_v6  ;;  %v6663_v47 = vpack.c.bf16 %v825_v7, %v824_v22  ;;  %v826_v57 = vld [vmem:[#allocation8 + $0x1f0] sm:$0xff] }
 0x24d   : > { %v7735_v40 = vpop.eup %7734  ;;  %v9247_v9 = vld [vmem:[#allocation2 + $0x27] sm:$0xff]  ;;  %7754 = vrcp.f32 %v1599_v19  ;;  %v1601_v21 = vadd.f32 1.0, %v7733_v13  ;;  %6658 = vmatpush1.bf16.msra.mxu0 %v6657_v5  ;;  %v5856_v34 = vmul.f32 -1.442695, %v9267_v37  ;;  %v9287_v45 = vadd.f32 %v9009_v25, %v1448_v53  ;;  %v827_v19 = vld [vmem:[#allocation8 + $0x1f8] sm:$0xff] }
 0x24e   : > { %v7737_v61 = vpop.eup %7736  ;;  %2123 = vmatmul.mubr.f32.gmra.mrb[6].mxu0 %v9247_v9  ;;  %7756 = vrcp.f32 %v1600_v44  ;;  %v1602_v49 = vadd.f32 1.0, %v7735_v40  ;;  %6659 = vmatprep.subr.bf16.mxu0 %v11538_v0  ;;  %v9291_v13 = vld [vmem:[#allocation2 + $0x47] sm:$0xff]  ;;  %v5857_v44 = vmul.f32 -1.442695, %v9274_v15  ;;  %v5858_v25 = vmul.f32 -1.442695, %v9279_v51 }
 0x24f   : > { %v7739_v52 = vpop.eup %7738  ;;  %v9259_v10 = vld [vmem:[#allocation2 + $0x49] sm:$0xff]  ;;  %v9261_v38 = vld [vmem:[#allocation2 + $0x51] sm:$0xff]  ;;  %2127 = vmatprep.mubr.f32.mxu0 %v1689_v24  ;;  %7758 = vrcp.f32 %v1601_v21  ;;  %v1603_v56 = vadd.f32 1.0, %v7737_v61  ;;  %v6666_v21 = vpack.c.bf16 %v827_v19, %v826_v57  ;;  %v5860_v61 = vmul.f32 -1.442695, %v9287_v45 }
 0x250   : > { %v7741_v11 = vpop.eup %7740  ;;  %6235 = vmatprep.mubr.f32.mxu1 %v9259_v10  ;;  %7760 = vrcp.f32 %v1602_v49  ;;  %v1604_v59 = vadd.f32 1.0, %v7739_v52  ;;  %v9271_v12 = vld [vmem:[#allocation2 + $0x2f] sm:$0xff] }
 0x251   : > { %v7743_v20 = vpop.eup %7742  ;;  %6236 = vmatmul.mubr.f32.vlgmr.msra.gmra.mrb[2].mxu1 %v9261_v38  ;;  %7762 = vrcp.f32 %v1603_v56  ;;  %v1605_v27 = vadd.f32 1.0, %v7741_v11  ;;  %6661 = vmatpush1.bf16.msra.mxu0 %v6660_v14 }
 0x252   : > { %v7745_v60 = vpop.eup %7744  ;;  %2128 = vmatmul.mubr.f32.gmra.mrb[8].mxu0 %v9271_v12  ;;  %7764 = vrcp.f32 %v1604_v59  ;;  %v1606_v24 = vadd.f32 1.0, %v7743_v20  ;;  %6662 = vmatprep.subr.bf16.mxu0 %v11538_v0 }
 0x253   : > { %v7747_v50 = vpop.eup %7746  ;;  %2132 = vmatprep.mubr.f32.mxu0 %v9223_v55  ;;  %7766 = vrcp.f32 %v1605_v27  ;;  %v1607_v39 = vadd.f32 1.0, %v7745_v60 }
 0x254   : > { %v7749_v48 = vpop.eup %7748  ;;  %7768 = vrcp.f32 %v1606_v24  ;;  %v1608_v23 = vadd.f32 1.0, %v7747_v50 }
 0x255   : > { %v7751_v55 = vpop.eup %7750  ;;  %v1692_v5 = vmul.f32 %v7749_v48, %v9112_v58  ;;  %7770 = vrcp.f32 %v1607_v39  ;;  %v5859_v58 = vmul.f32 -1.442695, %v9283_v31  ;;  %6664 = vmatpush1.bf16.msra.mxu0 %v6663_v47 }
 0x256   : > { %v7753_v8 = vpop.eup %7752  ;;  %v1693_v18 = vmul.f32 %v7751_v55, %v9132_v33  ;;  %2133 = vmatmul.mubr.f32.gmra.mrb[10].mxu0 %v9291_v13  ;;  %7772 = vpow2.f32 %v5855_v42  ;;  %6665 = vmatprep.subr.bf16.mxu0 %v11538_v0 }
 0x257   : > { %v7755_v29 = vpop.eup %7754  ;;  %1725 = vst [vmem:[#allocation2 + $0x68] sm:$0xff] %v1692_v5  ;;  %v9298_v40 = vmul.f32 %v7753_v8, %v9142_v43  ;;  %2137 = vmatprep.mubr.f32.mxu0 %v9227_v2  ;;  %7774 = vrcp.f32 %v1608_v23  ;;  %v9311_v2 = vld [vmem:[#allocation2 + $0x4f] sm:$0xff] }
 0x258   : > { %v7757_v54 = vpop.eup %7756  ;;  %1726 = vst [vmem:[#allocation2 + $0x70] sm:$0xff] %v1693_v18  ;;  %v9303_v33 = vmul.f32 %v7755_v29, %v9147_v4  ;;  %7776 = vpow2.f32 %v5856_v34 }
 0x259   : > { %v7759_v49 = vpop.eup %7758  ;;  %1727 = vst [vmem:[#allocation2 + $0x88] sm:$0xff] %v9298_v40  ;;  %v9309_v43 = vmul.f32 %v7757_v54, %v9150_v17  ;;  %7778 = vpow2.f32 %v5857_v44  ;;  %6667 = vmatpush1.bf16.msra.mxu0 %v6666_v21 }
 0x25a   : > { %v7761_v35 = vpop.eup %7760  ;;  %1728 = vst [vmem:[#allocation2 + $0x90] sm:$0xff] %v9303_v33  ;;  %v9315_v4 = vmul.f32 %v7759_v49, %v9157_v32  ;;  %2138 = vmatmul.mubr.f32.gmra.mrb[12].mxu0 %v9311_v2  ;;  %7780 = vpow2.f32 %v5858_v25  ;;  %6668 = vmatprep.subr.bf16.mxu0 %v11538_v0  ;;  %v828_v0 = vld [vmem:[#allocation8 + $0x200] sm:$0xff] }
 0x25b   : > { %v7763_v52 = vpop.eup %7762  ;;  %1729 = vst [vmem:[#allocation2 + $0xa8] sm:$0xff] %v9309_v43  ;;  %2142 = vmatprep.mubr.f32.mxu0 %v1692_v5  ;;  %v9320_v6 = vmul.f32 %v7761_v35, %v9165_v46  ;;  %7782 = vpow2.f32 %v5859_v58 }
 0x25c   : > { %v7765_v17 = vpop.eup %7764  ;;  %1730 = vst [vmem:[#allocation2 + $0xb0] sm:$0xff] %v9315_v4  ;;  %v9324_v56 = vmul.f32 %v7763_v52, %v9174_v36  ;;  %7784 = vpow2.f32 %v5860_v61 }
 0x25d   : > { %v7767_v32 = vpop.eup %7766  ;;  %1731 = vst [vmem:[#allocation2 + $0xc8] sm:$0xff] %v9320_v6  ;;  %v9329_v14 = vmul.f32 %v7765_v17, %v9179_v26 }
 0x25e   : > { %v7769_v11 = vpop.eup %7768  ;;  %1732 = vst [vmem:[#allocation2 + $0xd0] sm:$0xff] %v9324_v56  ;;  %v9332_v46 = vld [vmem:[#allocation2 + $0x67] sm:$0xff]  ;;  %v9335_v53 = vmul.f32 %v7767_v32, %v9199_v16 }
 0x25f   : > { %v7771_v59 = vpop.eup %7770  ;;  %v9337_v36 = vld [vmem:[#allocation2 + $0x69] sm:$0xff]  ;;  %2143 = vmatmul.mubr.f32.gmra.mrb[14].mxu0 %v9332_v46  ;;  %1733 = vst [vmem:[#allocation2 + $0xe8] sm:$0xff] %v9329_v14  ;;  %v9342_v22 = vmul.f32 %v7769_v11, %v9204_v28  ;;  %v9345_v7 = vld [vmem:[#allocation2 + $0x71] sm:$0xff] }
 0x260   : > { %v7773_v26 = vpop.eup %7772  ;;  %6238 = vmatprep.mubr.f32.mxu1 %v9337_v36  ;;  %2147 = vmatprep.mubr.f32.mxu0 %v1693_v18  ;;  %1734 = vst [vmem:[#allocation2 + $0xf0] sm:$0xff] %v9335_v53  ;;  %v9349_v16 = vmul.f32 %v7771_v59, %v9209_v62  ;;  %v9356_v24 = vld [vmem:[#allocation2 + $0x6f] sm:$0xff]  ;;  %v9371_v19 = vld [vmem:[#allocation2 + $0x87] sm:$0xff] }
 0x261   : > { %v7775_v20 = vpop.eup %7774  ;;  %6239 = vmatmul.mubr.f32.gmra.mrb[4].mxu1 %v9345_v7  ;;  %v9352_v27 = vld [vmem:[#allocation2 + $0x89] sm:$0xff]  ;;  %1735 = vst [vmem:[#allocation2 + $0x108] sm:$0xff] %v9342_v22  ;;  %v1609_v28 = vadd.f32 1.0, %v7773_v26  ;;  %v9363_v47 = vld [vmem:[#allocation2 + $0x91] sm:$0xff] }
 0x262   : > { %v7777_v60 = vpop.eup %7776  ;;  %6241 = vmatprep.mubr.f32.mxu1 %v9352_v27  ;;  %1736 = vst [vmem:[#allocation2 + $0x110] sm:$0xff] %v9349_v16  ;;  %v9360_v42 = vmul.f32 %v7775_v20, %v9214_v1  ;;  %v9381_v18 = vld [vmem:[#allocation2 + $0x8f] sm:$0xff]  ;;  %v9394_v21 = vld [vmem:[#allocation2 + $0xa7] sm:$0xff] }
 0x263   : > { %v7779_v62 = vpop.eup %7778  ;;  %2148 = vmatmul.mubr.f32.gmra.mrb[16].mxu0 %v9356_v24  ;;  %7786 = vrcp.f32 %v1609_v28  ;;  %v1610_v50 = vadd.f32 1.0, %v7777_v60  ;;  %v9368_v34 = vld [vmem:[#allocation2 + $0xa9] sm:$0xff]  ;;  %v9374_v44 = vld [vmem:[#allocation2 + $0xb1] sm:$0xff] }
 0x264   : > { %v7781_v39 = vpop.eup %7780  ;;  %2152 = vmatprep.mubr.f32.mxu0 %v9298_v40  ;;  %1737 = vst [vmem:[#allocation2 + $0x128] sm:$0xff] %v9360_v42  ;;  %v1611_v48 = vadd.f32 1.0, %v7779_v62  ;;  %v9468_v62 = vld [vmem:[#allocation2 + $0x191] sm:$0xff] }
 0x265   : > { %v7783_v23 = vpop.eup %7782  ;;  %6242 = vmatmul.mubr.f32.gmra.mrb[6].mxu1 %v9363_v47  ;;  %7788 = vrcp.f32 %v1610_v50  ;;  %v1612_v1 = vadd.f32 1.0, %v7781_v39  ;;  %v9378_v8 = vld [vmem:[#allocation2 + $0xc9] sm:$0xff]  ;;  %v9384_v25 = vld [vmem:[#allocation2 + $0xd1] sm:$0xff] }
 0x266   : > { %v7785_v57 = vpop.eup %7784  ;;  %6244 = vmatprep.mubr.f32.mxu1 %v9368_v34  ;;  %7790 = vrcp.f32 %v1611_v48  ;;  %v1613_v55 = vadd.f32 1.0, %v7783_v23  ;;  %v9472_v50 = vld [vmem:[#allocation2 + $0x1a9] sm:$0xff]  ;;  %v9478_v39 = vld [vmem:[#allocation2 + $0x1b1] sm:$0xff] }
 0x267   : > { %2153 = vmatmul.mubr.f32.gmra.mrb[18].mxu0 %v9371_v19  ;;  %7792 = vrcp.f32 %v1612_v1  ;;  %v1614_v5 = vadd.f32 1.0, %v7785_v57  ;;  %v9388_v40 = vld [vmem:[#allocation2 + $0xe9] sm:$0xff]  ;;  %v9397_v61 = vld [vmem:[#allocation2 + $0xf1] sm:$0xff] }
 0x268   : > { %2157 = vmatprep.mubr.f32.mxu0 %v9303_v33  ;;  %7794 = vrcp.f32 %v1613_v55  ;;  %v9482_v48 = vld [vmem:[#allocation2 + $0x1c9] sm:$0xff]  ;;  %v9488_v23 = vld [vmem:[#allocation2 + $0x1d1] sm:$0xff] }
 0x269   : > { %6245 = vmatmul.mubr.f32.gmra.mrb[8].mxu1 %v9374_v44  ;;  %7796 = vrcp.f32 %v1614_v5  ;;  %11591 = vst [vmem:[#allocation22_spill] sm:$0xff] %v9482_v48  ;;  %11592 = vst [vmem:[#allocation23_spill] sm:$0xff] %v9488_v23  ;;  %v9492_v1 = vld [vmem:[#allocation2 + $0x1e9] sm:$0xff]  ;;  %v9498_v57 = vld [vmem:[#allocation2 + $0x1f1] sm:$0xff] }
 0x26a   : > { %6247 = vmatprep.mubr.f32.mxu1 %v9378_v8  ;;  %11593 = vst [vmem:[#allocation24_spill] sm:$0xff] %v9492_v1  ;;  %11594 = vst [vmem:[#allocation25_spill] sm:$0xff] %v9498_v57  ;;  %v2038_v55 = vld [vmem:[#allocation2 + $0x209] sm:$0xff] }
 0x26b   : > { %2158 = vmatmul.mubr.f32.gmra.mrb[20].mxu0 %v9381_v18 }
 0x26c   : > { %2162 = vmatprep.mubr.f32.mxu0 %v9309_v43 }
 0x26d   : > { %v7787_v29 = vpop.eup %7786  ;;  %6248 = vmatmul.mubr.f32.gmra.mrb[10].mxu1 %v9384_v25 }
 0x26e   : > { %6250 = vmatprep.mubr.f32.mxu1 %v9388_v40  ;;  %v9392_v58 = vmul.f32 %v7787_v29, %v9253_v30  ;;  %v9405_v30 = vld [vmem:[#allocation2 + $0x109] sm:$0xff] }
 0x26f   : > { %v7789_v54 = vpop.eup %7788  ;;  %2163 = vmatmul.mubr.f32.gmra.mrb[22].mxu0 %v9394_v21 }
 0x270   : > { %v7791_v33 = vpop.eup %7790  ;;  %1738 = vst [vmem:[#allocation2 + $0x130] sm:$0xff] %v9392_v58  ;;  %v9401_v49 = vmul.f32 %v7789_v54, %v9267_v37  ;;  %2167 = vmatprep.mubr.f32.mxu0 %v9315_v4  ;;  %v9415_v37 = vld [vmem:[#allocation2 + $0xaf] sm:$0xff] }
 0x271   : > { %v7793_v43 = vpop.eup %7792  ;;  %6251 = vmatmul.mubr.f32.gmra.mrb[12].mxu1 %v9397_v61  ;;  %v9408_v35 = vmul.f32 %v7791_v33, %v9274_v15  ;;  %v9422_v15 = vld [vmem:[#allocation2 + $0x111] sm:$0xff] }
 0x272   : > { %v7795_v52 = vpop.eup %7794  ;;  %6253 = vmatprep.mubr.f32.mxu1 %v9405_v30  ;;  %1739 = vst [vmem:[#allocation2 + $0x148] sm:$0xff] %v9401_v49  ;;  %v9413_v17 = vmul.f32 %v7793_v43, %v9279_v51  ;;  %v9432_v51 = vld [vmem:[#allocation2 + $0xc7] sm:$0xff] }
 0x273   : > { %v7797_v32 = vpop.eup %7796  ;;  %1740 = vst [vmem:[#allocation2 + $0x150] sm:$0xff] %v9408_v35  ;;  %v9419_v4 = vmul.f32 %v7795_v52, %v9283_v31  ;;  %2168 = vmatmul.mubr.f32.gmra.mrb[24].mxu0 %v9415_v37  ;;  %v9533_v52 = vld [vmem:[#allocation2 + $0x1b0] sm:$0xff] }
 0x274   : > { %1741 = vst [vmem:[#allocation2 + $0x168] sm:$0xff] %v9413_v17  ;;  %2172 = vmatprep.mubr.f32.mxu0 %v9320_v6  ;;  %v9427_v11 = vmul.f32 %v7797_v32, %v9287_v45  ;;  %v9444_v6 = vld [vmem:[#allocation2 + $0xcf] sm:$0xff]  ;;  %11595 = vst [vmem:[#allocation26_spill] sm:$0xff] %v9533_v52 }
 0x275   : > { %6254 = vmatmul.mubr.f32.gmra.mrb[14].mxu1 %v9422_v15  ;;  %1742 = vst [vmem:[#allocation2 + $0x170] sm:$0xff] %v9419_v4  ;;  %v9539_v32 = vld [vmem:[#allocation2 + $0x1c8] sm:$0xff] }
 0x276   : > { %1743 = vst [vmem:[#allocation2 + $0x188] sm:$0xff] %v9427_v11  ;;  %11596 = vst [vmem:[#allocation27_spill] sm:$0xff] %v9539_v32 }
 0x277   : > { %v9434_v31 = vld [vmem:[#allocation2 + $0x129] sm:$0xff]  ;;  %2173 = vmatmul.mubr.f32.gmra.mrb[26].mxu0 %v9432_v51  ;;  %v9438_v59 = vld [vmem:[#allocation2 + $0x131] sm:$0xff] }
 0x278   : > { %6256 = vmatprep.mubr.f32.mxu1 %v9434_v31  ;;  %2177 = vmatprep.mubr.f32.mxu0 %v9324_v56  ;;  %v9455_v56 = vld [vmem:[#allocation2 + $0xe7] sm:$0xff]  ;;  %v9502_v5 = vld [vmem:[#allocation2 + $0x12f] sm:$0xff] }
 0x279   : > { %6257 = vmatmul.mubr.f32.gmra.mrb[16].mxu1 %v9438_v59  ;;  %v9506_v29 = vld [vmem:[#allocation2 + $0x147] sm:$0xff] }
 0x27a   : > { %v9442_v45 = vld [vmem:[#allocation2 + $0x149] sm:$0xff]  ;;  %v9448_v26 = vld [vmem:[#allocation2 + $0x151] sm:$0xff] }
 0x27b   : > { %6259 = vmatprep.mubr.f32.mxu1 %v9442_v45  ;;  %2178 = vmatmul.mubr.f32.gmra.mrb[28].mxu0 %v9444_v6  ;;  %v9510_v54 = vld [vmem:[#allocation2 + $0x14f] sm:$0xff] }
 0x27c   : > { %2182 = vmatprep.mubr.f32.mxu0 %v9329_v14  ;;  %v9452_v20 = vld [vmem:[#allocation2 + $0x169] sm:$0xff]  ;;  %v9458_v28 = vld [vmem:[#allocation2 + $0x171] sm:$0xff] }
 0x27d   : > { %6260 = vmatmul.mubr.f32.gmra.mrb[18].mxu1 %v9448_v26  ;;  %v9462_v60 = vld [vmem:[#allocation2 + $0x189] sm:$0xff] }
 0x27e   : > { %6262 = vmatprep.mubr.f32.mxu1 %v9452_v20  ;;  %v9465_v14 = vld [vmem:[#allocation2 + $0xef] sm:$0xff] }
 0x27f   : > { %2183 = vmatmul.mubr.f32.gmra.mrb[30].mxu0 %v9455_v56  ;;  %v9518_v33 = vld [vmem:[#allocation2 + $0x16f] sm:$0xff] }
 0x280   : > { %2187 = vmatprep.mubr.f32.mxu0 %v9335_v53  ;;  %v9475_v53 = vld [vmem:[#allocation2 + $0x107] sm:$0xff]  ;;  %v9526_v43 = vld [vmem:[#allocation2 + $0x18f] sm:$0xff] }
 0x281   : > { %6263 = vmatmul.mubr.f32.gmra.mrb[20].mxu1 %v9458_v28 }
 0x282   : > { %6265 = vmatprep.mubr.f32.mxu1 %v9462_v60 }
 0x283   : > { %2188 = vmatmul.mubr.f32.gmra.mrb[32].mxu0 %v9465_v14 }
 0x284   : > { %2192 = vmatprep.mubr.f32.mxu0 %v9342_v22  ;;  %v9485_v22 = vld [vmem:[#allocation2 + $0x10f] sm:$0xff] }
 0x285   : > { %6266 = vmatmul.mubr.f32.gmra.mrb[22].mxu1 %v9468_v62 }
 0x286   : > { %6268 = vmatprep.mubr.f32.mxu1 %v9472_v50 }
 0x287   : > { %2193 = vmatmul.mubr.f32.gmra.mrb[34].mxu0 %v9475_v53 }
 0x288   : > { %2197 = vmatprep.mubr.f32.mxu0 %v9349_v16  ;;  %v9495_v16 = vld [vmem:[#allocation2 + $0x127] sm:$0xff] }
 0x289   : > { %6269 = vmatmul.mubr.f32.gmra.mrb[24].mxu1 %v9478_v39 }
 0x28a   : > { %6271 = vmatprep.mubr.f32.mxu1 %v9482_v48  ;;  %v11602_v48 = vmov 0.0|0.0  }
 0x28b   : > { %2198 = vmatmul.mubr.f32.gmra.mrb[36].mxu0 %v9485_v22 }
 0x28c   : > { %2202 = vmatprep.mubr.f32.mxu0 %v9360_v42  ;;  %v2039_v42 = vld [vmem:[#allocation2 + $0x211] sm:$0xff] }
 0x28d   : > { %6272 = vmatmul.mubr.f32.gmra.mrb[26].mxu1 %v9488_v23 }
 0x28e   : > { %6274 = vmatprep.mubr.f32.mxu1 %v9492_v1  ;;  %v1818_v1 = vld [vmem:[#allocation2 + $0x11] sm:$0xff] }
 0x28f   : > { %2203 = vmatmul.mubr.f32.gmra.mrb[38].mxu0 %v9495_v16 }
 0x290   : > { %2207 = vmatprep.mubr.f32.mxu0 %v9392_v58  ;;  %v9514_v58 = vld [vmem:[#allocation2 + $0x167] sm:$0xff] }
 0x291   : > { %6275 = vmatmul.mubr.f32.gmra.mrb[28].mxu1 %v9498_v57  ;;  %v830_v57 = vld [vmem:[#allocation8 + $0x210] sm:$0xff] }
 0x292   : > { %6277 = vmatprep.mubr.f32.mxu1 %v2038_v55  ;;  %v9554_v55 = vld [vmem:[#allocation2 + $0x1e7] sm:$0xff] }
 0x293   : > { %2208 = vmatmul.mubr.f32.gmra.mrb[40].mxu0 %v9502_v5  ;;  %11599 = vst [vmem:[#allocation30_spill] sm:$0xff] %v9554_v55 }
 0x294   : > { %2212 = vmatprep.mubr.f32.mxu0 %v9401_v49  ;;  %v9522_v49 = vld [vmem:[#allocation2 + $0x187] sm:$0xff] }
 0x295   : > { %6278 = vmatmul.mubr.f32.gmra.mrb[30].mxu1 %v2039_v42  ;;  %v9557_v42 = vld [vmem:[#allocation2 + $0x1f0] sm:$0xff] }
 0x296   : > { %11600 = vst [vmem:[#allocation31_spill] sm:$0xff] %v9557_v42 }
 0x297   : > { %2213 = vmatmul.mubr.f32.gmra.mrb[42].mxu0 %v9506_v29 }
 0x298   : > { %2217 = vmatprep.mubr.f32.mxu0 %v9408_v35  ;;  %v9530_v35 = vld [vmem:[#allocation2 + $0x1a7] sm:$0xff] }
 0x29b   : > { %2218 = vmatmul.mubr.f32.gmra.mrb[44].mxu0 %v9510_v54 }
 0x29c   : > { %2222 = vmatprep.mubr.f32.mxu0 %v9413_v17  ;;  %v9536_v17 = vld [vmem:[#allocation2 + $0x1af] sm:$0xff] }
 0x29f   : > { %2223 = vmatmul.mubr.f32.gmra.mrb[46].mxu0 %v9514_v58 }
 0x2a0   : > { %2227 = vmatprep.mubr.f32.mxu0 %v9419_v4  ;;  %v9548_v4 = vld [vmem:[#allocation2 + $0x1cf] sm:$0xff] }
 0x2a3   : > { %2228 = vmatmul.mubr.f32.gmra.mrb[48].mxu0 %v9518_v33 }
 0x2a4   : > { %2232 = vmatprep.mubr.f32.mxu0 %v9427_v11  ;;  %v9551_v11 = vld [vmem:[#allocation2 + $0x1e8] sm:$0xff] }
 0x2a5   : > { %11598 = vst [vmem:[#allocation29_spill] sm:$0xff] %v9551_v11 }
 0x2a7   : > { %2233 = vmatmul.mubr.f32.gmra.mrb[50].mxu0 %v9522_v49 }
 0x2a8   : > { %2237 = vmatprep.mubr.f32.mxu0 %v9234_v63  ;;  %v9542_v63 = vld [vmem:[#allocation2 + $0x1c7] sm:$0xff] }
 0x2ab   : > { %2238 = vmatmul.mubr.f32.gmra.mrb[52].mxu0 %v9526_v43 }
 0x2ac   : > { %2242 = vmatprep.mubr.f32.mxu0 %v9238_v41  ;;  %v9545_v41 = vld [vmem:[#allocation2 + $0x1d0] sm:$0xff] }
 0x2ad   : > { %11597 = vst [vmem:[#allocation28_spill] sm:$0xff] %v9545_v41 }
 0x2af   : > { %2243 = vmatmul.mubr.f32.gmra.mrb[54].mxu0 %v9530_v35 }
 0x2b0   : > { %2247 = vmatprep.mubr.f32.mxu0 %v9533_v52  ;;  %v6669_v52 = vpack.c.bf16 %v829_v3, %v828_v0  ;;  %v834_v0 = vld [vmem:[#allocation8 + $0x230] sm:$0xff]  ;;  %v835_v3 = vld [vmem:[#allocation8 + $0x238] sm:$0xff] }
 0x2b3   : > { %2248 = vmatmul.mubr.f32.gmra.mrb[56].mxu0 %v9536_v17 }
 0x2b4   : > { %2252 = vmatprep.mubr.f32.mxu0 %v9539_v32  ;;  %v9560_v32 = vld [vmem:[#allocation2 + $0x1ef] sm:$0xff] }
 0x2b5   : > { %11601 = vst [vmem:[#allocation32_spill] sm:$0xff] %v9560_v32 }
 0x2b7   : > { %2253 = vmatmul.mubr.f32.gmra.mrb[58].mxu0 %v9542_v63 }
 0x2b8   : > { %2257 = vmatprep.mubr.f32.mxu0 %v9545_v41  ;;  %v1817_v41 = vld [vmem:[#allocation2 + $0x9] sm:$0xff] }
 0x2bb   : > { %2258 = vmatmul.mubr.f32.gmra.mrb[60].mxu0 %v9548_v4 }
 0x2bc   : > { %2262 = vmatprep.mubr.f32.mxu0 %v9551_v11  ;;  %v831_v11 = vld [vmem:[#allocation8 + $0x218] sm:$0xff] }
 0x2bd   : > { %v6672_v23 = vpack.c.bf16 %v831_v11, %v830_v57  ;;  %v836_v57 = vld [vmem:[#allocation8 + $0x240] sm:$0xff]  ;;  %v841_v11 = vld [vmem:[#allocation8 + $0x268] sm:$0xff] }
 0x2bf   : > { %2263 = vmatmul.mubr.f32.gmra.mrb[62].mxu0 %v9554_v55  ;;  %v833_v55 = vld [vmem:[#allocation8 + $0x228] sm:$0xff] }
 0x2c0   : > { %2267 = vmatprep.mubr.f32.mxu0 %v9557_v42  ;;  %v832_v42 = vld [vmem:[#allocation8 + $0x220] sm:$0xff] }
 0x2c3   : > { %2268 = vmatmul.mubr.f32.gmra.mrb[64].mxu0 %v9560_v32  ;;  %v6675_v32 = vpack.c.bf16 %v833_v55, %v832_v42  ;;  %v842_v55 = vld [vmem:[#allocation8 + $0x270] sm:$0xff]  ;;  %v843_v42 = vld [vmem:[#allocation8 + $0x278] sm:$0xff] }
 0x2c4   : > { %2337 = vmatprep.mubr.f32.mxu0 %v9247_v9  ;;  %v9568_v9 = vld [vmem:[#allocation2 + $0x29] sm:$0xff] }
 0x2c7   : > { %2338 = vmatmul.mubr.f32.vlgmr.msra.gmra.mrb[2].mxu0 %v1817_v41  ;;  %v839_v41 = vld [vmem:[#allocation8 + $0x258] sm:$0xff] }
 0x2c8   : > { %6670 = vmatpush1.bf16.msra.mxu0 %v6669_v52  ;;  %2342 = vmatprep.mubr.f32.mxu0 %v9271_v12  ;;  %v6678_v12 = vpack.c.bf16 %v835_v3, %v834_v0  ;;  %v9573_v52 = vld [vmem:[#allocation2 + $0x31] sm:$0xff]  ;;  %v845_v0 = vld [vmem:[#allocation8 + $0x288] sm:$0xff] }
 0x2c9   : > { %6671 = vmatprep.subr.bf16.mxu0 %v11602_v48  ;;  %v847_v3 = vld [vmem:[#allocation8 + $0x298] sm:$0xff] }
 0x2cb   : > { %2343 = vmatmul.mubr.f32.gmra.mrb[4].mxu0 %v1818_v1  ;;  %v837_v1 = vld [vmem:[#allocation8 + $0x248] sm:$0xff] }
 0x2cc   : > { %2347 = vmatprep.mubr.f32.mxu0 %v9291_v13  ;;  %6673 = vmatpush1.bf16.msra.mxu0 %v6672_v23  ;;  %v6681_v13 = vpack.c.bf16 %v837_v1, %v836_v57  ;;  %v838_v23 = vld [vmem:[#allocation8 + $0x250] sm:$0xff]  ;;  %v851_v57 = vld [vmem:[#allocation8 + $0x2b8] sm:$0xff]  ;;  %v853_v1 = vld [vmem:[#allocation8 + $0x2c8] sm:$0xff] }
 0x2cd   : > { %6674 = vmatprep.subr.bf16.mxu0 %v11602_v48 }
 0x2cf   : > { %2348 = vmatmul.mubr.f32.gmra.mrb[6].mxu0 %v9568_v9 }
 0x2d0   : > { %2352 = vmatprep.mubr.f32.mxu0 %v9311_v2  ;;  %6676 = vmatpush1.bf16.msra.mxu0 %v6675_v32  ;;  %v6684_v2 = vpack.c.bf16 %v839_v41, %v838_v23  ;;  %v840_v32 = vld [vmem:[#allocation8 + $0x260] sm:$0xff]  ;;  %v857_v23 = vld [vmem:[#allocation8 + $0x2e8] sm:$0xff]  ;;  %v859_v41 = vld [vmem:[#allocation8 + $0x2f8] sm:$0xff] }
 0x2d1   : > { %6677 = vmatprep.subr.bf16.mxu0 %v11602_v48 }
 0x2d3   : > { %2353 = vmatmul.mubr.f32.gmra.mrb[8].mxu0 %v9573_v52 }
 0x2d4   : > { %2357 = vmatprep.mubr.f32.mxu0 %v9332_v46  ;;  %6679 = vmatpush1.bf16.msra.mxu0 %v6678_v12  ;;  %v6687_v46 = vpack.c.bf16 %v841_v11, %v840_v32  ;;  %v849_v12 = vld [vmem:[#allocation8 + $0x2a8] sm:$0xff]  ;;  %v863_v32 = vld [vmem:[#allocation8 + $0x318] sm:$0xff] }
 0x2d5   : > { %6680 = vmatprep.subr.bf16.mxu0 %v11602_v48 }
 0x2d7   : > { %2358 = vmatmul.mubr.f32.gmra.mrb[10].mxu0 %v9259_v10  ;;  %v6690_v10 = vpack.c.bf16 %v843_v42, %v842_v55  ;;  %v1881_v55 = vld [vmem:[#allocation2 + $0x28] sm:$0xff] }
 0x2d8   : > { %2362 = vmatprep.mubr.f32.mxu0 %v9356_v24  ;;  %6682 = vmatpush1.bf16.msra.mxu0 %v6681_v13  ;;  %v844_v24 = vld [vmem:[#allocation8 + $0x280] sm:$0xff]  ;;  %v855_v13 = vld [vmem:[#allocation8 + $0x2d8] sm:$0xff] }
 0x2d9   : > { %6683 = vmatprep.subr.bf16.mxu0 %v11602_v48 }
 0x2db   : > { %2363 = vmatmul.mubr.f32.gmra.mrb[12].mxu0 %v9261_v38  ;;  %v6693_v38 = vpack.c.bf16 %v845_v0, %v844_v24  ;;  %v864_v24 = vld [vmem:[#allocation8 + $0x320] sm:$0xff]  ;;  %v865_v0 = vld [vmem:[#allocation8 + $0x328] sm:$0xff] }
 0x2dc   : > { %2367 = vmatprep.mubr.f32.mxu0 %v9371_v19  ;;  %6685 = vmatpush1.bf16.msra.mxu0 %v6684_v2  ;;  %v846_v19 = vld [vmem:[#allocation8 + $0x290] sm:$0xff] }
 0x2dd   : > { %6686 = vmatprep.subr.bf16.mxu0 %v11602_v48  ;;  %v862_v2 = vld [vmem:[#allocation8 + $0x310] sm:$0xff] }
 0x2de   : > { %v6720_v42 = vpack.c.bf16 %v863_v32, %v862_v2  ;;  %v9731_v2 = vld [vmem:[#allocation2 + $0x88] sm:$0xff]  ;;  %v1920_v32 = vld [vmem:[#allocation2 + $0x91] sm:$0xff] }
 0x2df   : > { %2368 = vmatmul.mubr.f32.gmra.mrb[14].mxu0 %v9337_v36  ;;  %v6696_v36 = vpack.c.bf16 %v847_v3, %v846_v19  ;;  %v1915_v19 = vld [vmem:[#allocation2 + $0x49] sm:$0xff] }
 0x2e0   : > { %2372 = vmatprep.mubr.f32.mxu0 %v9381_v18  ;;  %6688 = vmatpush1.bf16.msra.mxu0 %v6687_v46  ;;  %v848_v18 = vld [vmem:[#allocation8 + $0x2a0] sm:$0xff] }
 0x2e1   : > { %6689 = vmatprep.subr.bf16.mxu0 %v11602_v48  ;;  %v9675_v46 = vld [vmem:[#allocation2] sm:$0xff] }
 0x2e3   : > { %2373 = vmatmul.mubr.f32.gmra.mrb[16].mxu0 %v9345_v7  ;;  %v6699_v7 = vpack.c.bf16 %v849_v12, %v848_v18  ;;  %v866_v12 = vld [vmem:[#allocation8 + $0x330] sm:$0xff] }
 0x2e4   : > { %2377 = vmatprep.mubr.f32.mxu0 %v9394_v21  ;;  %6691 = vmatpush1.bf16.msra.mxu0 %v6690_v10  ;;  %v850_v21 = vld [vmem:[#allocation8 + $0x2b0] sm:$0xff] }
 0x2e5   : > { %6692 = vmatprep.subr.bf16.mxu0 %v11602_v48 }
 0x2e7   : > { %2378 = vmatmul.mubr.f32.gmra.mrb[18].mxu0 %v9352_v27  ;;  %v6702_v27 = vpack.c.bf16 %v851_v57, %v850_v21  ;;  %v9699_v57 = vld [vmem:[#allocation2 + $0x48] sm:$0xff] }
 0x2e8   : > { %2382 = vmatprep.mubr.f32.mxu0 %v9415_v37  ;;  %6694 = vmatpush1.bf16.msra.mxu0 %v6693_v38  ;;  %v852_v37 = vld [vmem:[#allocation8 + $0x2c0] sm:$0xff]  ;;  %v1882_v38 = vld [vmem:[#allocation2 + $0x30] sm:$0xff] }
 0x2e9   : > { %6695 = vmatprep.subr.bf16.mxu0 %v11602_v48 }
 0x2eb   : > { %2383 = vmatmul.mubr.f32.gmra.mrb[20].mxu0 %v9363_v47  ;;  %v6705_v47 = vpack.c.bf16 %v853_v1, %v852_v37 }
 0x2ec   : > { %2387 = vmatprep.mubr.f32.mxu0 %v9432_v51  ;;  %6697 = vmatpush1.bf16.msra.mxu0 %v6696_v36  ;;  %v854_v51 = vld [vmem:[#allocation8 + $0x2d0] sm:$0xff]  ;;  %v9693_v36 = vld [vmem:[%s640_s19] sm:$0x1] }
 0x2ed   : > { %6698 = vmatprep.subr.bf16.mxu0 %v11602_v48  ;;  %v5871_v21 = vmul.f32 -1.442695, %v9693_v36 }
 0x2ef   : > { %2388 = vmatmul.mubr.f32.gmra.mrb[22].mxu0 %v9368_v34  ;;  %v6708_v34 = vpack.c.bf16 %v855_v13, %v854_v51  ;;  %7798 = vpow2.f32 %v5871_v21  ;;  %v868_v51 = vld [vmem:[#allocation8 + $0x340] sm:$0xff]  ;;  %v869_v13 = vld [vmem:[#allocation8 + $0x348] sm:$0xff]  ;;  %v878_v21 = vld [vmem:[#allocation8 + $0x390] sm:$0xff] }
 0x2f0   : > { %2392 = vmatprep.mubr.f32.mxu0 %v9444_v6  ;;  %6700 = vmatpush1.bf16.msra.mxu0 %v6699_v7  ;;  %v856_v6 = vld [vmem:[#allocation8 + $0x2e0] sm:$0xff]  ;;  %v867_v7 = vld [vmem:[#allocation8 + $0x338] sm:$0xff] }
 0x2f1   : > { %6701 = vmatprep.subr.bf16.mxu0 %v11602_v48  ;;  %v6726_v1 = vpack.c.bf16 %v867_v7, %v866_v12 }
 0x2f3   : > { %2393 = vmatmul.mubr.f32.gmra.mrb[24].mxu0 %v9374_v44  ;;  %v6711_v44 = vpack.c.bf16 %v857_v23, %v856_v6  ;;  %v1917_v6 = vld [vmem:[#allocation2 + $0x69] sm:$0xff] }
 0x2f4   : > { %2397 = vmatprep.mubr.f32.mxu0 %v9455_v56  ;;  %6703 = vmatpush1.bf16.msra.mxu0 %v6702_v27  ;;  %v858_v56 = vld [vmem:[#allocation8 + $0x2f0] sm:$0xff] }
 0x2f5   : > { %6704 = vmatprep.subr.bf16.mxu0 %v11602_v48  ;;  %v1916_v27 = vld [vmem:[#allocation2 + $0x51] sm:$0xff] }
 0x2f7   : > { %2398 = vmatmul.mubr.f32.gmra.mrb[26].mxu0 %v9378_v8  ;;  %v6714_v8 = vpack.c.bf16 %v859_v41, %v858_v56  ;;  %v870_v41 = vld [vmem:[#allocation8 + $0x350] sm:$0xff] }
 0x2f8   : > { %2402 = vmatprep.mubr.f32.mxu0 %v9465_v14  ;;  %6706 = vmatpush1.bf16.msra.mxu0 %v6705_v47 }
 0x2f9   : > { %6707 = vmatprep.subr.bf16.mxu0 %v11602_v48 }
 0x2fb   : > { %2403 = vmatmul.mubr.f32.gmra.mrb[28].mxu0 %v9384_v25 }
 0x2fc   : > { %2407 = vmatprep.mubr.f32.mxu0 %v9475_v53  ;;  %6709 = vmatpush1.bf16.msra.mxu0 %v6708_v34  ;;  %v9707_v34 = vld [vmem:[#allocation2 + $0x50] sm:$0xff] }
 0x2fd   : > { %6710 = vmatprep.subr.bf16.mxu0 %v11602_v48 }
 0x2ff   : > { %2408 = vmatmul.mubr.f32.gmra.mrb[30].mxu0 %v9388_v40 }
 0x300   : > { %2412 = vmatprep.mubr.f32.mxu0 %v9485_v22  ;;  %6712 = vmatpush1.bf16.msra.mxu0 %v6711_v44  ;;  %v910_v22 = vld [vmem:[#allocation9 + $0x8] sm:$0xff]  ;;  %v6729_v44 = vpack.c.bf16 %v869_v13, %v868_v51  ;;  %v1922_v13 = vld [vmem:[#allocation2 + $0xb1] sm:$0xff] }
 0x301   : > { %6713 = vmatprep.subr.bf16.mxu0 %v11602_v48  ;;  %v9747_v51 = vld [vmem:[#allocation2 + $0xa8] sm:$0xff] }
 0x303   : > { %2413 = vmatmul.mubr.f32.gmra.mrb[32].mxu0 %v9397_v61 }
 0x304   : > { %2417 = vmatprep.mubr.f32.mxu0 %v9495_v16  ;;  %6715 = vmatpush1.bf16.msra.mxu0 %v6714_v8  ;;  %v2040_v16 = vld [vmem:[#allocation2 + $0x229] sm:$0xff]  ;;  %v871_v8 = vld [vmem:[#allocation8 + $0x358] sm:$0xff] }
 0x305   : > { %6716 = vmatprep.subr.bf16.mxu0 %v11602_v48  ;;  %6280 = vmatprep.mubr.f32.mxu1 %v2040_v16  ;;  %v873_v16 = vld [vmem:[#allocation8 + $0x368] sm:$0xff] }
 0x307   : > { %2418 = vmatmul.mubr.f32.gmra.mrb[34].mxu0 %v9405_v30  ;;  %v11603_v30 = vld [vmem:[#allocation30_spill] sm:$0xff] }
 0x308   : > { %2422 = vmatprep.mubr.f32.mxu0 %v9502_v5 }
 0x30b   : > { %2423 = vmatmul.mubr.f32.gmra.mrb[36].mxu0 %v9422_v15 }
 0x30c   : > { %2427 = vmatprep.mubr.f32.mxu0 %v9506_v29  ;;  %v860_v29 = vld [vmem:[#allocation8 + $0x300] sm:$0xff] }
 0x30f   : > { %2428 = vmatmul.mubr.f32.gmra.mrb[38].mxu0 %v9434_v31  ;;  %v11604_v31 = vld [vmem:[#allocation22_spill] sm:$0xff] }
 0x310   : > { %2432 = vmatprep.mubr.f32.mxu0 %v9510_v54  ;;  %v861_v54 = vld [vmem:[#allocation8 + $0x308] sm:$0xff] }
 0x313   : > { %2433 = vmatmul.mubr.f32.gmra.mrb[40].mxu0 %v9438_v59 }
 0x314   : > { %2437 = vmatprep.mubr.f32.mxu0 %v9514_v58 }
 0x317   : > { %2438 = vmatmul.mubr.f32.gmra.mrb[42].mxu0 %v9442_v45  ;;  %v11605_v45 = vld [vmem:[#allocation32_spill] sm:$0xff] }
 0x318   : > { %2442 = vmatprep.mubr.f32.mxu0 %v9518_v33  ;;  %v11608_v33 = vld [vmem:[#allocation25_spill] sm:$0xff] }
 0x31b   : > { %2443 = vmatmul.mubr.f32.gmra.mrb[44].mxu0 %v9448_v26 }
 0x31c   : > { %2447 = vmatprep.mubr.f32.mxu0 %v9522_v49  ;;  %v2041_v49 = vld [vmem:[#allocation2 + $0x231] sm:$0xff] }
 0x31d   : > { %6281 = vmatmul.mubr.f32.gmra.mrb[32].mxu1 %v2041_v49 }
 0x31e   : > { %6291 = vmatprep.mubr.msk.f32.mxu1 %vm8256_vm0, %v9675_v46 }
 0x31f   : > { %2448 = vmatmul.mubr.f32.gmra.mrb[46].mxu0 %v9452_v20  ;;  %v11606_v20 = vld [vmem:[#allocation23_spill] sm:$0xff] }
 0x320   : > { %2452 = vmatprep.mubr.f32.mxu0 %v9526_v43 }
 0x323   : > { %2453 = vmatmul.mubr.f32.gmra.mrb[48].mxu0 %v9458_v28  ;;  %v9653_v28 = vld [vmem:[#allocation2 + $0x207] sm:$0xff] }
 0x324   : > { %v9629_v25 = vpop.f32.mrb[2].mxu1  ;;  %2457 = vmatprep.mubr.f32.mxu0 %v9530_v35  ;;  %v6717_v35 = vpack.c.bf16 %v861_v54, %v860_v29  ;;  %v9723_v29 = vld [vmem:[#allocation2 + $0x70] sm:$0xff] }
 0x325   : > { %v9632_v40 = vpop.f32.mrb[3].mxu1 }
 0x327   : > { %2458 = vmatmul.mubr.f32.gmra.mrb[50].mxu0 %v9462_v60 }
 0x328   : > { %2462 = vmatprep.mubr.f32.mxu0 %v9536_v17  ;;  %v911_v17 = vld [vmem:[#allocation9 + $0x10] sm:$0xff] }
 0x32b   : > { %2463 = vmatmul.mubr.f32.gmra.mrb[52].mxu0 %v9468_v62  ;;  %v11607_v62 = vld [vmem:[#allocation24_spill] sm:$0xff] }
 0x32c   : > { %2467 = vmatprep.mubr.f32.mxu0 %v9542_v63  ;;  %v912_v63 = vld [vmem:[#allocation9 + $0x18] sm:$0xff] }
 0x32d   : > { %v6800_v11 = vpack.c.bf16 %v912_v63, %v911_v17  ;;  %v874_v17 = vld [vmem:[#allocation8 + $0x370] sm:$0xff]  ;;  %v875_v63 = vld [vmem:[#allocation8 + $0x378] sm:$0xff] }
 0x32f   : > { %2468 = vmatmul.mubr.f32.gmra.mrb[54].mxu0 %v9472_v50  ;;  %v9661_v50 = vld [vmem:[#allocation2 + $0x20f] sm:$0xff] }
 0x330   : > { %2472 = vmatprep.mubr.f32.mxu0 %v9548_v4 }
 0x333   : > { %2473 = vmatmul.mubr.f32.gmra.mrb[56].mxu0 %v9478_v39  ;;  %v909_v39 = vld [vmem:[#allocation9] sm:$0xff] }
 0x334   : > { %v9641_v61 = vpop.f32.mrb[4].mxu1  ;;  %2477 = vmatprep.mubr.f32.mxu0 %v11603_v30  ;;  %v6797_v58 = vpack.c.bf16 %v910_v22, %v909_v39  ;;  %v9715_v30 = vld [vmem:[#allocation2 + $0x68] sm:$0xff]  ;;  %v872_v22 = vld [vmem:[#allocation8 + $0x360] sm:$0xff] }
 0x335   : > { %v9644_v15 = vpop.f32.mrb[5].mxu1  ;;  %v6735_v49 = vpack.c.bf16 %v873_v16, %v872_v22  ;;  %v882_v16 = vld [vmem:[#allocation8 + $0x3b0] sm:$0xff] }
 0x336   : > { %6798 = vmatpush3.bf16.msra.mxu1 %v6797_v58  ;;  %v1919_v58 = vld [vmem:[#allocation2 + $0x89] sm:$0xff] }
 0x337   : > { %2478 = vmatmul.mubr.f32.gmra.mrb[58].mxu0 %v11604_v31  ;;  %6799 = vmatprep.subr.bf16.mxu1 %v11602_v48  ;;  %v1918_v31 = vld [vmem:[#allocation2 + $0x71] sm:$0xff] }
 0x338   : > { %v9647_v59 = vpop.f32.mrb[6].mxu1  ;;  %2482 = vmatprep.mubr.f32.mxu0 %v11605_v45 }
 0x339   : > { %v9650_v26 = vpop.f32.mrb[7].mxu1 }
 0x33a   : > { %6801 = vmatpush3.bf16.msra.mxu1 %v6800_v11 }
 0x33b   : > { %2483 = vmatmul.mubr.f32.gmra.mrb[60].mxu0 %v11606_v20  ;;  %6802 = vmatprep.subr.bf16.mxu1 %v11602_v48  ;;  %v6732_v20 = vpack.c.bf16 %v871_v8, %v870_v41 }
 0x33c   : > { %v9655_v60 = vpop.f32.mrb[8].mxu1  ;;  %2487 = vmatprep.mubr.f32.mxu0 %v9653_v28 }
 0x33d   : > { %v9658_v14 = vpop.f32.mrb[9].mxu1 }
 0x33f   : > { %2488 = vmatmul.mubr.f32.gmra.mrb[62].mxu0 %v11607_v62  ;;  %v7799_v62 = vpop.eup %7798 }
 0x340   : > { %v9663_v53 = vpop.f32.mrb[10].mxu1  ;;  %2492 = vmatprep.mubr.f32.mxu0 %v9661_v50  ;;  %v3176_v54 = vadd.f32 1.0, %v7799_v62  ;;  %v9756_v62 = vld [vmem:[#allocation2 + $0xb0] sm:$0xff] }
 0x341   : > { %v9666_v5 = vpop.f32.mrb[11].mxu1 }
 0x342   : > { %7800 = vrcp.f32 %v3176_v54  ;;  %v883_v54 = vld [vmem:[#allocation8 + $0x3b8] sm:$0xff] }
 0x343   : > { %2493 = vmatmul.mubr.f32.gmra.mrb[64].mxu0 %v11608_v33 }
 0x344   : > { %v9669_v43 = vpop.f32.mrb[12].mxu1  ;;  %2562 = vmatprep.mubr.f32.mxu0 %v9568_v9 }
 0x345   : > { %v9672_v4 = vpop.f32.mrb[13].mxu1 }
 0x347   : > { %2563 = vmatmul.mubr.f32.vlgmr.msra.gmra.mrb[2].mxu0 %v1881_v55  ;;  %v6738_v55 = vpack.c.bf16 %v875_v63, %v874_v17  ;;  %v6750_v17 = vpack.c.bf16 %v883_v54, %v882_v16  ;;  %v884_v63 = vld [vmem:[#allocation8 + $0x3c0] sm:$0xff]  ;;  %v9778_v16 = vld [vmem:[#allocation2 + $0x108] sm:$0xff]  ;;  %v1928_v54 = vld [vmem:[#allocation2 + $0x111] sm:$0xff] }
 0x348   : > { %v9680_v9 = vpop.f32.mrb[14].mxu1  ;;  %6718 = vmatpush1.bf16.msra.mxu0 %v6717_v35  ;;  %2567 = vmatprep.mubr.f32.mxu0 %v9573_v52  ;;  %v6723_v52 = vpack.c.bf16 %v865_v0, %v864_v24  ;;  %v876_v24 = vld [vmem:[#allocation8 + $0x380] sm:$0xff]  ;;  %v877_v0 = vld [vmem:[#allocation8 + $0x388] sm:$0xff] }
 0x349   : > { %v9683_v10 = vpop.f32.mrb[15].mxu1  ;;  %6719 = vmatprep.subr.bf16.mxu0 %v11602_v48  ;;  %v6741_v12 = vpack.c.bf16 %v877_v0, %v876_v24  ;;  %v1925_v24 = vld [vmem:[#allocation2 + $0xe9] sm:$0xff] }
 0x34b   : > { %2568 = vmatmul.mubr.f32.gmra.mrb[4].mxu0 %v1882_v38  ;;  %v9739_v38 = vld [vmem:[#allocation2 + $0x90] sm:$0xff] }
 0x34c   : > { %v9691_v3 = vpop.f32.mrb[16].mxu1  ;;  %2572 = vmatprep.mubr.f32.mxu0 %v1915_v19  ;;  %6721 = vmatpush1.bf16.msra.mxu0 %v6720_v42  ;;  %v1921_v19 = vld [vmem:[#allocation2 + $0xa9] sm:$0xff] }
 0x34d   : > { %v9695_v18 = vpop.f32.mrb[17].mxu1  ;;  %6722 = vmatprep.subr.bf16.mxu0 %v11602_v48 }
 0x34f   : > { %2573 = vmatmul.mubr.f32.gmra.mrb[6].mxu0 %v9699_v57 }
 0x350   : > { %v9702_v37 = vpop.f32.mrb[18].mxu1  ;;  %2577 = vmatprep.mubr.f32.mxu0 %v1916_v27  ;;  %6724 = vmatpush1.bf16.msra.mxu0 %v6723_v52  ;;  %v879_v27 = vld [vmem:[#allocation8 + $0x398] sm:$0xff] }
 0x351   : > { %v9704_v47 = vpop.f32.mrb[19].mxu1  ;;  %6725 = vmatprep.subr.bf16.mxu0 %v11602_v48  ;;  %v6744_v41 = vpack.c.bf16 %v879_v27, %v878_v21  ;;  %v9770_v21 = vld [vmem:[#allocation2 + $0xe8] sm:$0xff]  ;;  %v1926_v27 = vld [vmem:[#allocation2 + $0xf1] sm:$0xff] }
 0x353   : > { %2578 = vmatmul.mubr.f32.gmra.mrb[8].mxu0 %v9707_v34 }
 0x354   : > { %v9710_v23 = vpop.f32.mrb[20].mxu1  ;;  %2582 = vmatprep.mubr.f32.mxu0 %v1917_v6  ;;  %6727 = vmatpush1.bf16.msra.mxu0 %v6726_v1  ;;  %v7801_v1 = vpop.eup %7800 }
 0x355   : > { %v9712_v56 = vpop.f32.mrb[21].mxu1  ;;  %6728 = vmatprep.subr.bf16.mxu0 %v11602_v48  ;;  %v3179_v6 = vmul.f32 %v7801_v1, %v9693_v36  ;;  %v1923_v36 = vld [vmem:[#allocation2 + $0xc9] sm:$0xff] }
 0x357   : > { %2583 = vmatmul.mubr.f32.gmra.mrb[10].mxu0 %v9715_v30  ;;  %6292 = vmatmul.mubr.msk.f32.vlgmr.msra.gmra.mrb[34].mxu1 %vm3180_vm1, %v3179_v6  ;;  %v889_v6 = vld [vmem:[#allocation8 + $0x3e8] sm:$0xff] }
 0x358   : > { %v9718_v45 = vpop.f32.mrb[22].mxu1  ;;  %2587 = vmatprep.mubr.f32.mxu0 %v1918_v31  ;;  %6730 = vmatpush1.bf16.msra.mxu0 %v6729_v44  ;;  %v880_v31 = vld [vmem:[#allocation8 + $0x3a0] sm:$0xff] }
 0x359   : > { %v9720_v39 = vpop.f32.mrb[23].mxu1  ;;  %6731 = vmatprep.subr.bf16.mxu0 %v11602_v48  ;;  %6326 = vmatprep.mubr.msk.f32.mxu1 %vm8256_vm0, %v9675_v46 }
 0x35b   : > { %2588 = vmatmul.mubr.f32.gmra.mrb[12].mxu0 %v9723_v29 }
 0x35c   : > { %v9726_v33 = vpop.f32.mrb[24].mxu1  ;;  %2592 = vmatprep.mubr.f32.mxu0 %v1919_v58  ;;  %6733 = vmatpush1.bf16.msra.mxu0 %v6732_v20  ;;  %v881_v20 = vld [vmem:[#allocation8 + $0x3a8] sm:$0xff] }
 0x35d   : > { %v9728_v35 = vpop.f32.mrb[25].mxu1  ;;  %6734 = vmatprep.subr.bf16.mxu0 %v11602_v48  ;;  %v6747_v22 = vpack.c.bf16 %v881_v20, %v880_v31  ;;  %v9762_v58 = vld [vmem:[#allocation2 + $0xc8] sm:$0xff] }
 0x35e   : > { %v1927_v31 = vld [vmem:[#allocation2 + $0x109] sm:$0xff] }
 0x35f   : > { %2593 = vmatmul.mubr.f32.gmra.mrb[14].mxu0 %v9731_v2 }
 0x360   : > { %v9734_v11 = vpop.f32.mrb[26].mxu1  ;;  %2597 = vmatprep.mubr.f32.mxu0 %v1920_v32  ;;  %6736 = vmatpush1.bf16.msra.mxu0 %v6735_v49  ;;  %v1924_v49 = vld [vmem:[#allocation2 + $0xd1] sm:$0xff]  ;;  %v885_v32 = vld [vmem:[#allocation8 + $0x3c8] sm:$0xff] }
 0x361   : > { %v9736_v42 = vpop.f32.mrb[27].mxu1  ;;  %6737 = vmatprep.subr.bf16.mxu0 %v11602_v48  ;;  %v6753_v0 = vpack.c.bf16 %v885_v32, %v884_v63  ;;  %v1929_v63 = vld [vmem:[#allocation2 + $0x129] sm:$0xff] }
 0x362   : > { %v9785_v32 = vld [vmem:[#allocation2 + $0x128] sm:$0xff] }
 0x363   : > { %2598 = vmatmul.mubr.f32.gmra.mrb[16].mxu0 %v9739_v38 }
 0x364   : > { %v9742_v52 = vpop.f32.mrb[28].mxu1  ;;  %2602 = vmatprep.mubr.f32.mxu0 %v1921_v19  ;;  %6739 = vmatpush1.bf16.msra.mxu0 %v6738_v55  ;;  %v9766_v55 = vld [vmem:[#allocation2 + $0xd0] sm:$0xff] }
 0x365   : > { %11609 = vst [vmem:[#allocation30_spill] sm:$0xff] %v9742_v52  ;;  %v9744_v7 = vpop.f32.mrb[29].mxu1  ;;  %6740 = vmatprep.subr.bf16.mxu0 %v11602_v48  ;;  %v886_v19 = vld [vmem:[#allocation8 + $0x3d0] sm:$0xff] }
 0x366   : > { %11610 = vst [vmem:[#allocation22_spill] sm:$0xff] %v9744_v7  ;;  %v11617_v52 = vld [vmem:[#allocation31_spill] sm:$0xff] }
 0x367   : > { %2603 = vmatmul.mubr.f32.gmra.mrb[18].mxu0 %v9747_v51  ;;  %v1943_v7 = vld [vmem:[#allocation2 + $0x209] sm:$0xff] }
 0x368   : > { %v9751_v44 = vpop.f32.mrb[30].mxu1  ;;  %2607 = vmatprep.mubr.f32.mxu0 %v1922_v13  ;;  %6742 = vmatpush1.bf16.msra.mxu0 %v6741_v12  ;;  %v887_v12 = vld [vmem:[#allocation8 + $0x3d8] sm:$0xff]  ;;  %v888_v13 = vld [vmem:[#allocation8 + $0x3e0] sm:$0xff] }
 0x369   : > { %11611 = vst [vmem:[#allocation32_spill] sm:$0xff] %v9751_v44  ;;  %v9753_v8 = vpop.f32.mrb[31].mxu1  ;;  %6743 = vmatprep.subr.bf16.mxu0 %v11602_v48  ;;  %v6756_v1 = vpack.c.bf16 %v887_v12, %v886_v19  ;;  %v6759_v20 = vpack.c.bf16 %v889_v6, %v888_v13  ;;  %v1931_v19 = vld [vmem:[#allocation2 + $0x149] sm:$0xff] }
 0x36a   : > { %11612 = vst [vmem:[#allocation23_spill] sm:$0xff] %v9753_v8  ;;  %v9791_v12 = vld [vmem:[#allocation2 + $0x148] sm:$0xff]  ;;  %v11616_v8 = vld [vmem:[#allocation29_spill] sm:$0xff] }
 0x36b   : > { %2608 = vmatmul.mubr.f32.gmra.mrb[20].mxu0 %v9756_v62  ;;  %v1933_v13 = vld [vmem:[#allocation2 + $0x169] sm:$0xff] }
 0x36c   : > { %2612 = vmatprep.mubr.f32.mxu0 %v1923_v36  ;;  %6745 = vmatpush1.bf16.msra.mxu0 %v6744_v41  ;;  %v9774_v41 = vld [vmem:[#allocation2 + $0xf0] sm:$0xff]  ;;  %v9797_v6 = vld [vmem:[#allocation2 + $0x168] sm:$0xff] }
 0x36d   : > { %6746 = vmatprep.subr.bf16.mxu0 %v11602_v48  ;;  %v890_v36 = vld [vmem:[#allocation8 + $0x3f0] sm:$0xff] }
 0x36e   : > { %v1941_v44 = vld [vmem:[#allocation2 + $0x1e9] sm:$0xff] }
 0x36f   : > { %2613 = vmatmul.mubr.f32.gmra.mrb[22].mxu0 %v9762_v58 }
 0x370   : > { %2617 = vmatprep.mubr.f32.mxu0 %v1924_v49  ;;  %6748 = vmatpush1.bf16.msra.mxu0 %v6747_v22  ;;  %v891_v22 = vld [vmem:[#allocation8 + $0x3f8] sm:$0xff] }
 0x371   : > { %6749 = vmatprep.subr.bf16.mxu0 %v11602_v48  ;;  %v6762_v49 = vpack.c.bf16 %v891_v22, %v890_v36  ;;  %v1935_v36 = vld [vmem:[#allocation2 + $0x189] sm:$0xff] }
 0x372   : > { %v9803_v22 = vld [vmem:[#allocation2 + $0x188] sm:$0xff] }
 0x373   : > { %2618 = vmatmul.mubr.f32.gmra.mrb[24].mxu0 %v9766_v55 }
 0x374   : > { %2622 = vmatprep.mubr.f32.mxu0 %v1925_v24  ;;  %6751 = vmatpush1.bf16.msra.mxu0 %v6750_v17  ;;  %v9782_v17 = vld [vmem:[#allocation2 + $0x110] sm:$0xff] }
 0x375   : > { %6752 = vmatprep.subr.bf16.mxu0 %v11602_v48  ;;  %v1930_v24 = vld [vmem:[#allocation2 + $0x131] sm:$0xff] }
 0x377   : > { %2623 = vmatmul.mubr.f32.gmra.mrb[26].mxu0 %v9770_v21 }
 0x378   : > { %2627 = vmatprep.mubr.f32.mxu0 %v1926_v27  ;;  %6754 = vmatpush1.bf16.msra.mxu0 %v6753_v0  ;;  %v9788_v0 = vld [vmem:[#allocation2 + $0x130] sm:$0xff] }
 0x379   : > { %6755 = vmatprep.subr.bf16.mxu0 %v11602_v48  ;;  %v1932_v27 = vld [vmem:[#allocation2 + $0x151] sm:$0xff] }
 0x37b   : > { %2628 = vmatmul.mubr.f32.gmra.mrb[28].mxu0 %v9774_v41 }
 0x37c   : > { %2632 = vmatprep.mubr.f32.mxu0 %v1927_v31  ;;  %6757 = vmatpush1.bf16.msra.mxu0 %v6756_v1  ;;  %v9794_v1 = vld [vmem:[#allocation2 + $0x150] sm:$0xff] }
 0x37d   : > { %6758 = vmatprep.subr.bf16.mxu0 %v11602_v48  ;;  %v1934_v31 = vld [vmem:[#allocation2 + $0x171] sm:$0xff] }
 0x37f   : > { %2633 = vmatmul.mubr.f32.gmra.mrb[30].mxu0 %v9778_v16 }
 0x380   : > { %2637 = vmatprep.mubr.f32.mxu0 %v1928_v54  ;;  %6760 = vmatpush1.bf16.msra.mxu0 %v6759_v20  ;;  %v9800_v20 = vld [vmem:[#allocation2 + $0x170] sm:$0xff] }
 0x381   : > { %6761 = vmatprep.subr.bf16.mxu0 %v11602_v48  ;;  %v1936_v54 = vld [vmem:[#allocation2 + $0x191] sm:$0xff] }
 0x383   : > { %2638 = vmatmul.mubr.f32.gmra.mrb[32].mxu0 %v9782_v17 }
 0x384   : > { %2642 = vmatprep.mubr.f32.mxu0 %v1929_v63  ;;  %6763 = vmatpush1.bf16.msra.mxu0 %v6762_v49  ;;  %v9806_v49 = vld [vmem:[#allocation2 + $0x190] sm:$0xff] }
 0x385   : > { %v1937_v63 = vld [vmem:[#allocation2 + $0x1a9] sm:$0xff] }
 0x387   : > { %2643 = vmatmul.mubr.f32.gmra.mrb[34].mxu0 %v9785_v32 }
 0x388   : > { %2647 = vmatprep.mubr.f32.mxu0 %v1930_v24  ;;  %v9809_v24 = vld [vmem:[#allocation2 + $0x1a8] sm:$0xff] }
 0x38b   : > { %2648 = vmatmul.mubr.f32.gmra.mrb[36].mxu0 %v9788_v0 }
 0x38c   : > { %2652 = vmatprep.mubr.f32.mxu0 %v1931_v19  ;;  %v1938_v19 = vld [vmem:[#allocation2 + $0x1b1] sm:$0xff] }
 0x38f   : > { %2653 = vmatmul.mubr.f32.gmra.mrb[38].mxu0 %v9791_v12 }
 0x390   : > { %2657 = vmatprep.mubr.f32.mxu0 %v1932_v27  ;;  %v11613_v27 = vld [vmem:[#allocation26_spill] sm:$0xff] }
 0x393   : > { %2658 = vmatmul.mubr.f32.gmra.mrb[40].mxu0 %v9794_v1 }
 0x394   : > { %2662 = vmatprep.mubr.f32.mxu0 %v1933_v13  ;;  %v1939_v13 = vld [vmem:[#allocation2 + $0x1c9] sm:$0xff] }
 0x397   : > { %2663 = vmatmul.mubr.f32.gmra.mrb[42].mxu0 %v9797_v6 }
 0x398   : > { %2667 = vmatprep.mubr.f32.mxu0 %v1934_v31  ;;  %v11614_v31 = vld [vmem:[#allocation27_spill] sm:$0xff] }
 0x39b   : > { %2668 = vmatmul.mubr.f32.gmra.mrb[44].mxu0 %v9800_v20 }
 0x39c   : > { %2672 = vmatprep.mubr.f32.mxu0 %v1935_v36  ;;  %v1940_v36 = vld [vmem:[#allocation2 + $0x1d1] sm:$0xff] }
 0x39f   : > { %2673 = vmatmul.mubr.f32.gmra.mrb[46].mxu0 %v9803_v22 }
 0x3a0   : > { %2677 = vmatprep.mubr.f32.mxu0 %v1936_v54  ;;  %v11615_v54 = vld [vmem:[#allocation28_spill] sm:$0xff] }
 0x3a3   : > { %2678 = vmatmul.mubr.f32.gmra.mrb[48].mxu0 %v9806_v49 }
 0x3a4   : > { %2682 = vmatprep.mubr.f32.mxu0 %v1937_v63  ;;  %v1942_v63 = vld [vmem:[#allocation2 + $0x1f1] sm:$0xff] }
 0x3a7   : > { %2683 = vmatmul.mubr.f32.gmra.mrb[50].mxu0 %v9809_v24 }
 0x3a8   : > { %2687 = vmatprep.mubr.f32.mxu0 %v1938_v19  ;;  %v9817_v19 = vld [vmem:[#allocation2 + $0x208] sm:$0xff] }
 0x3ab   : > { %2688 = vmatmul.mubr.f32.gmra.mrb[52].mxu0 %v11613_v27  ;;  %v1944_v27 = vld [vmem:[#allocation2 + $0x211] sm:$0xff] }
 0x3ac   : > { %2692 = vmatprep.mubr.f32.mxu0 %v1939_v13  ;;  %v9820_v13 = vld [vmem:[#allocation2 + $0x210] sm:$0xff] }
 0x3af   : > { %2693 = vmatmul.mubr.f32.gmra.mrb[54].mxu0 %v11614_v31  ;;  %v1950_v31 = vld [vmem:[#allocation2 + $0x87] sm:$0xff] }
 0x3b0   : > { %2697 = vmatprep.mubr.f32.mxu0 %v1940_v36 }
 0x3b3   : > { %2698 = vmatmul.mubr.f32.gmra.mrb[56].mxu0 %v11615_v54  ;;  %v2001_v54 = vld [vmem:[#allocation2 + $0x1b0] sm:$0xff] }
 0x3b4   : > { %2702 = vmatprep.mubr.f32.mxu0 %v1941_v44  ;;  %v1946_v44 = vld [vmem:[#allocation2 + $0x47] sm:$0xff] }
 0x3b7   : > { %2703 = vmatmul.mubr.f32.gmra.mrb[58].mxu0 %v11616_v8  ;;  %v1947_v8 = vld [vmem:[#allocation2 + $0x4f] sm:$0xff] }
 0x3b8   : > { %2707 = vmatprep.mubr.f32.mxu0 %v1942_v63  ;;  %v2002_v63 = vld [vmem:[#allocation2 + $0x1c8] sm:$0xff] }
 0x3bb   : > { %2708 = vmatmul.mubr.f32.gmra.mrb[60].mxu0 %v11617_v52  ;;  %v1948_v52 = vld [vmem:[#allocation2 + $0x67] sm:$0xff] }
 0x3bc   : > { %2712 = vmatprep.mubr.f32.mxu0 %v1943_v7  ;;  %v1949_v7 = vld [vmem:[#allocation2 + $0x6f] sm:$0xff] }
 0x3bf   : > { %2713 = vmatmul.mubr.f32.gmra.mrb[62].mxu0 %v9817_v19 }
 0x3c0   : > { %2717 = vmatprep.mubr.f32.mxu0 %v1944_v27  ;;  %v2003_v27 = vld [vmem:[#allocation2 + $0x1d0] sm:$0xff] }
 0x3c3   : > { %2718 = vmatmul.mubr.f32.gmra.mrb[64].mxu0 %v9820_v13 }
 0x3c4   : > { %2787 = vmatprep.mubr.f32.mxu0 %v9699_v57  ;;  %v1951_v57 = vld [vmem:[#allocation2 + $0x8f] sm:$0xff] }
 0x3c7   : > { %2788 = vmatmul.mubr.f32.vlgmr.msra.gmra.mrb[2].mxu0 %v1946_v44  ;;  %v1971_v44 = vld [vmem:[#allocation2 + $0x1cf] sm:$0xff] }
 0x3c8   : > { %2792 = vmatprep.mubr.f32.mxu0 %v9707_v34  ;;  %v1952_v34 = vld [vmem:[#allocation2 + $0xa7] sm:$0xff] }
 0x3cb   : > { %2793 = vmatmul.mubr.f32.gmra.mrb[4].mxu0 %v1947_v8  ;;  %v1972_v8 = vld [vmem:[#allocation2 + $0x1e7] sm:$0xff] }
 0x3cc   : > { %2797 = vmatprep.mubr.f32.mxu0 %v9715_v30  ;;  %v1953_v30 = vld [vmem:[#allocation2 + $0xaf] sm:$0xff] }
 0x3cf   : > { %2798 = vmatmul.mubr.f32.gmra.mrb[6].mxu0 %v1948_v52  ;;  %v2005_v52 = vld [vmem:[#allocation2 + $0x1f0] sm:$0xff] }
 0x3d0   : > { %2802 = vmatprep.mubr.f32.mxu0 %v9723_v29  ;;  %v1954_v29 = vld [vmem:[#allocation2 + $0xc7] sm:$0xff] }
 0x3d3   : > { %2803 = vmatmul.mubr.f32.gmra.mrb[8].mxu0 %v1949_v7  ;;  %v1976_v7 = vld [vmem:[#allocation2 + $0x227] sm:$0xff] }
 0x3d4   : > { %2807 = vmatprep.mubr.f32.mxu0 %v9731_v2  ;;  %v1955_v2 = vld [vmem:[#allocation2 + $0xcf] sm:$0xff] }
 0x3d7   : > { %2808 = vmatmul.mubr.f32.gmra.mrb[10].mxu0 %v1950_v31 }
 0x3d8   : > { %2812 = vmatprep.mubr.f32.mxu0 %v9739_v38  ;;  %v1956_v38 = vld [vmem:[#allocation2 + $0xe7] sm:$0xff] }
 0x3db   : > { %2813 = vmatmul.mubr.f32.gmra.mrb[12].mxu0 %v1951_v57 }
 0x3dc   : > { %2817 = vmatprep.mubr.f32.mxu0 %v9747_v51  ;;  %v1957_v51 = vld [vmem:[#allocation2 + $0xef] sm:$0xff] }
 0x3df   : > { %2818 = vmatmul.mubr.f32.gmra.mrb[14].mxu0 %v1952_v34  ;;  %v1977_v34 = vld [vmem:[#allocation2 + $0x22f] sm:$0xff] }
 0x3e0   : > { %2822 = vmatprep.mubr.f32.mxu0 %v9756_v62  ;;  %v1958_v62 = vld [vmem:[#allocation2 + $0x107] sm:$0xff] }
 0x3e3   : > { %2823 = vmatmul.mubr.f32.gmra.mrb[16].mxu0 %v1953_v30  ;;  %v916_v30 = vld [vmem:[#allocation11] sm:$0xff] }
 0x3e4   : > { %2827 = vmatprep.mubr.f32.mxu0 %v9762_v58  ;;  %v1959_v58 = vld [vmem:[#allocation2 + $0x10f] sm:$0xff] }
 0x3e7   : > { %2828 = vmatmul.mubr.f32.gmra.mrb[18].mxu0 %v1954_v29  ;;  %v917_v29 = vld [vmem:[#allocation11 + $0x8] sm:$0xff] }
 0x3e8   : > { %2832 = vmatprep.mubr.f32.mxu0 %v9766_v55  ;;  %v1960_v55 = vld [vmem:[#allocation2 + $0x127] sm:$0xff] }
 0x3eb   : > { %2833 = vmatmul.mubr.f32.gmra.mrb[20].mxu0 %v1955_v2  ;;  %v919_v2 = vld [vmem:[#allocation11 + $0x18] sm:$0xff] }
 0x3ec   : > { %2837 = vmatprep.mubr.f32.mxu0 %v9770_v21  ;;  %v1961_v21 = vld [vmem:[#allocation2 + $0x12f] sm:$0xff] }
 0x3ef   : > { %2838 = vmatmul.mubr.f32.gmra.mrb[22].mxu0 %v1956_v38 }
 0x3f0   : > { %2842 = vmatprep.mubr.f32.mxu0 %v9774_v41  ;;  %v1962_v41 = vld [vmem:[#allocation2 + $0x147] sm:$0xff]  ;;  %v9844_v36 = vpop.f32.mrb[32].mxu1 }
 0x3f3   : > { %2843 = vmatmul.mubr.f32.gmra.mrb[24].mxu0 %v1957_v51 }
 0x3f4   : > { %2847 = vmatprep.mubr.f32.mxu0 %v9778_v16  ;;  %v1963_v16 = vld [vmem:[#allocation2 + $0x14f] sm:$0xff] }
 0x3f7   : > { %2848 = vmatmul.mubr.f32.gmra.mrb[26].mxu0 %v1958_v62 }
 0x3f8   : > { %2852 = vmatprep.mubr.f32.mxu0 %v9782_v17  ;;  %v1964_v17 = vld [vmem:[#allocation2 + $0x167] sm:$0xff] }
 0x3fb   : > { %2853 = vmatmul.mubr.f32.gmra.mrb[28].mxu0 %v1959_v58  ;;  %v11620_v58 = vld [vmem:[#allocation21_spill] sm:$0xff] }
 0x3fc   : > { %2857 = vmatprep.mubr.f32.mxu0 %v9785_v32  ;;  %v1965_v32 = vld [vmem:[#allocation2 + $0x16f] sm:$0xff] }
 0x3ff   : > { %2858 = vmatmul.mubr.f32.gmra.mrb[30].mxu0 %v1960_v55 }
 0x400   : > { %2862 = vmatprep.mubr.f32.mxu0 %v9788_v0  ;;  %v1966_v0 = vld [vmem:[#allocation2 + $0x187] sm:$0xff] }
 0x403   : > { %2863 = vmatmul.mubr.f32.gmra.mrb[32].mxu0 %v1961_v21 }
 0x404   : > { %2867 = vmatprep.mubr.f32.mxu0 %v9791_v12  ;;  %v9847_v12 = vpop.f32.mrb[33].mxu1 }
 0x407   : > { %2868 = vmatmul.mubr.f32.gmra.mrb[34].mxu0 %v1962_v41  ;;  %v920_v41 = vld [vmem:[#allocation11 + $0x20] sm:$0xff] }
 0x408   : > { %2872 = vmatprep.mubr.f32.mxu0 %v9794_v1  ;;  %v1967_v1 = vld [vmem:[#allocation2 + $0x18f] sm:$0xff] }
 0x40b   : > { %2873 = vmatmul.mubr.f32.gmra.mrb[36].mxu0 %v1963_v16  ;;  %v921_v16 = vld [vmem:[#allocation11 + $0x28] sm:$0xff] }
 0x40c   : > { %2877 = vmatprep.mubr.f32.mxu0 %v9797_v6  ;;  %v1968_v6 = vld [vmem:[#allocation2 + $0x1a7] sm:$0xff] }
 0x40f   : > { %2878 = vmatmul.mubr.f32.gmra.mrb[38].mxu0 %v1964_v17  ;;  %v9876_v17 = vpack.c.bf16 %v921_v16, %v920_v41 }
 0x410   : > { %2882 = vmatprep.mubr.f32.mxu0 %v9800_v20  ;;  %v1969_v20 = vld [vmem:[#allocation2 + $0x1af] sm:$0xff] }
 0x413   : > { %2883 = vmatmul.mubr.f32.gmra.mrb[40].mxu0 %v1965_v32 }
 0x414   : > { %2887 = vmatprep.mubr.f32.mxu0 %v9803_v22  ;;  %v1970_v22 = vld [vmem:[#allocation2 + $0x1c7] sm:$0xff] }
 0x417   : > { %2888 = vmatmul.mubr.f32.gmra.mrb[42].mxu0 %v1966_v0 }
 0x418   : > { %2892 = vmatprep.mubr.f32.mxu0 %v9806_v49  ;;  %v2004_v49 = vld [vmem:[#allocation2 + $0x1e8] sm:$0xff] }
 0x41b   : > { %2893 = vmatmul.mubr.f32.gmra.mrb[44].mxu0 %v1967_v1 }
 0x41c   : > { %2897 = vmatprep.mubr.f32.mxu0 %v9809_v24  ;;  %v1973_v24 = vld [vmem:[#allocation2 + $0x1ef] sm:$0xff] }
 0x41f   : > { %2898 = vmatmul.mubr.f32.gmra.mrb[46].mxu0 %v1968_v6 }
 0x420   : > { %2902 = vmatprep.mubr.f32.mxu0 %v2001_v54 }
 0x423   : > { %2903 = vmatmul.mubr.f32.gmra.mrb[48].mxu0 %v1969_v20 }
 0x424   : > { %2907 = vmatprep.mubr.f32.mxu0 %v2002_v63  ;;  %v922_v63 = vld [vmem:[#allocation11 + $0x30] sm:$0xff] }
 0x427   : > { %2908 = vmatmul.mubr.f32.gmra.mrb[50].mxu0 %v1970_v22  ;;  %v923_v22 = vld [vmem:[#allocation11 + $0x38] sm:$0xff] }
 0x428   : > { %2912 = vmatprep.mubr.f32.mxu0 %v2003_v27  ;;  %v924_v27 = vld [vmem:[#allocation11 + $0x40] sm:$0xff] }
 0x42a   : > { %v3250_v31 = vpop.f32.mrb[34].mxu1 }
 0x42b   : > { %2913 = vmatmul.mubr.f32.gmra.mrb[52].mxu0 %v1971_v44  ;;  %v6293_v57 = vpop.f32.mrb[35].mxu1 }
 0x42c   : > { %2917 = vmatprep.mubr.f32.mxu0 %v2004_v49  ;;  %v9886_v49 = vpack.c.bf16 %v923_v22, %v922_v63  ;;  %v927_v57 = vld [vmem:[#allocation11 + $0x58] sm:$0xff] }
 0x42f   : > { %2918 = vmatmul.mubr.f32.gmra.mrb[54].mxu0 %v1972_v8 }
 0x430   : > { %2922 = vmatprep.mubr.f32.mxu0 %v2005_v52 }
 0x433   : > { %2923 = vmatmul.mubr.f32.gmra.mrb[56].mxu0 %v1973_v24 }
 0x434   : > { %2927 = vmatprep.mubr.f32.mxu0 %v9817_v19  ;;  %v9859_v19 = vpack.c.bf16 %v917_v29, %v916_v30 }
 0x436   : > { %6804 = vmatpush3.bf16.msra.mxu1 %v9859_v19 }
 0x437   : > { %2928 = vmatmul.mubr.f32.gmra.mrb[58].mxu0 %v9653_v28  ;;  %v913_v28 = vld [vmem:[%s11618_s28] sm:$0x1]  ;;  %6805 = vmatprep.subr.bf16.mxu1 %v11602_v48  ;;  %s5663_s28 = scalar_lea.sflag [#allocation5], %s8621_s0 }
 0x438   : > { %2932 = vmatprep.mubr.f32.mxu0 %v9820_v13  ;;  %v918_v13 = vld [vmem:[#allocation11 + $0x10] sm:$0xff] }
 0x439   : > { %v9868_v38 = vpack.c.bf16 %v919_v2, %v918_v13  ;;  %v929_v2 = vld [vmem:[#allocation11 + $0x68] sm:$0xff] }
 0x43b   : > { %2933 = vmatmul.mubr.f32.gmra.mrb[60].mxu0 %v9661_v50  ;;  %v3251_v50 = vadd.f32 %v3250_v31, %v913_v28  ;;  %6807 = vmatpush3.bf16.msra.mxu1 %v9868_v38 }
 0x43c   : > { %2937 = vmatprep.mubr.f32.mxu0 %v9675_v46  ;;  %6808 = vmatprep.subr.bf16.mxu1 %v11602_v48 }
 0x43d   : > { %v9873_v55 = vrot.slane %v3251_v50, %v11620_v58 }
 0x43f   : > { %2938 = vmatmul.mubr.f32.gmra.mrb[62].mxu0 %v1976_v7  ;;  %6810 = vmatpush3.bf16.msra.mxu1 %v9876_v17 }
 0x440   : > { %2942 = vmatprep.mubr.f32.mxu0 %v9675_v46  ;;  %v9866_v46 = vld [vmem:[%s11619_s18] ss:$0 sm:$0xff]  ;;  %6811 = vmatprep.subr.bf16.mxu1 %v11602_v48  ;;  %s8171_s18 = scalar_lea.vmem %s8170_s6, 8192 }
 0x443   : > { %2943 = vmatmul.mubr.f32.gmra.mrb[64].mxu0 %v1977_v34  ;;  %6813 = vmatpush3.bf16.msra.mxu1 %v9886_v49 }
 0x444   : > { %6814 = vmatprep.subr.bf16.mxu1 %v11602_v48 }
 0x49a   : > { %v2789_v51 = vpop.f32.mrb[2].mxu0 }
 0x49b   : > { %v7106_v62 = vadd.f32 %v9866_v46, %v2789_v51  ;;  %v2791_v21 = vpop.f32.mrb[3].mxu0 }
 0x49d   : > { %v3015_v32 = vadd.f32 %v7106_v62, %v9632_v40  ;;  %v925_v40 = vld [vmem:[#allocation11 + $0x48] sm:$0xff] }
 0x49e   : > { %v2794_v0 = vpop.f32.mrb[4].mxu0  ;;  %v9893_v7 = vpack.c.bf16 %v925_v40, %v924_v27 }
 0x49f   : > { %v9881_v1 = vadd.f32 %v9873_v55, %v3015_v32  ;;  %v7107_v6 = vadd.f32 %v9866_v46, %v2794_v0  ;;  %v2796_v54 = vpop.f32.mrb[5].mxu0  ;;  %v931_v0 = vld [vmem:[#allocation11 + $0x78] sm:$0xff] }
 0x4a0   : > { %6816 = vmatpush3.bf16.msra.mxu1 %v9893_v7 }
 0x4a1   : > { %v3020_v20 = vadd.f32 %v7107_v6, %v9629_v25  ;;  %v926_v25 = vld [vmem:[#allocation11 + $0x50] sm:$0xff]  ;;  %6817 = vmatprep.subr.bf16.mxu1 %v11602_v48 }
 0x4a2   : > { %v2799_v44 = vpop.f32.mrb[6].mxu0  ;;  %v9902_v50 = vpack.c.bf16 %v927_v57, %v926_v25 }
 0x4a3   : > { %v9889_v8 = vadd.f32 %v9873_v55, %v3020_v20  ;;  %v7108_v52 = vadd.f32 %v9866_v46, %v2799_v44  ;;  %v2801_v24 = vpop.f32.mrb[7].mxu0 }
 0x4a4   : > { %6819 = vmatpush3.bf16.msra.mxu1 %v9902_v50 }
 0x4a5   : > { %v3025_v31 = vadd.f32 %v7108_v52, %v9644_v15  ;;  %v928_v15 = vld [vmem:[#allocation11 + $0x60] sm:$0xff]  ;;  %6820 = vmatprep.subr.bf16.mxu1 %v11602_v48 }
 0x4a6   : > { %v2804_v34 = vpop.f32.mrb[8].mxu0  ;;  %v9911_v16 = vpack.c.bf16 %v929_v2, %v928_v15 }
 0x4a7   : > { %v9898_v30 = vadd.f32 %v9873_v55, %v3025_v31  ;;  %v7109_v29 = vadd.f32 %v9866_v46, %v2804_v34  ;;  %v2806_v28 = vpop.f32.mrb[9].mxu0 }
 0x4a8   : > { %6822 = vmatpush3.bf16.msra.mxu1 %v9911_v16 }
 0x4a9   : > { %v3030_v13 = vadd.f32 %v7109_v29, %v9641_v61  ;;  %v930_v61 = vld [vmem:[#allocation11 + $0x70] sm:$0xff]  ;;  %6823 = vmatprep.subr.bf16.mxu1 %v11602_v48 }
 0x4aa   : > { %v2809_v51 = vpop.f32.mrb[10].mxu0  ;;  %v9920_v22 = vpack.c.bf16 %v931_v0, %v930_v61 }
 0x4ab   : > { %v9907_v62 = vadd.f32 %v9873_v55, %v3030_v13  ;;  %v7110_v21 = vadd.f32 %v9866_v46, %v2809_v51  ;;  %v2811_v41 = vpop.f32.mrb[11].mxu0 }
 0x4ac   : > { %6825 = vmatpush3.bf16.msra.mxu1 %v9920_v22 }
 0x4ad   : > { %v3035_v32 = vadd.f32 %v7110_v21, %v9650_v26  ;;  %6826 = vmatprep.subr.bf16.mxu1 %v11602_v48 }
 0x4ae   : > { %v2814_v6 = vpop.f32.mrb[12].mxu0 }
 0x4af   : > { %v9916_v54 = vadd.f32 %v9873_v55, %v3035_v32  ;;  %v7111_v20 = vadd.f32 %v9866_v46, %v2814_v6  ;;  %v2816_v63 = vpop.f32.mrb[13].mxu0 }
 0x4b1   : > { %v3040_v27 = vadd.f32 %v7111_v20, %v9647_v59 }
 0x4b2   : > { %v2819_v26 = vpop.f32.mrb[14].mxu0 }
 0x4b3   : > { %v9925_v44 = vadd.f32 %v9873_v55, %v3040_v27  ;;  %v7112_v40 = vadd.f32 %v9866_v46, %v2819_v26  ;;  %v2821_v52 = vpop.f32.mrb[15].mxu0 }
 0x4b5   : > { %v3045_v24 = vadd.f32 %v7112_v40, %v9658_v14 }
 0x4b6   : > { %v2824_v31 = vpop.f32.mrb[16].mxu0 }
 0x4b7   : > { %v9932_v25 = vadd.f32 %v9873_v55, %v3045_v24  ;;  %v7113_v59 = vadd.f32 %v9866_v46, %v2824_v31  ;;  %v2826_v57 = vpop.f32.mrb[17].mxu0 }
 0x4b9   : > { %v3050_v34 = vadd.f32 %v7113_v59, %v9655_v60 }
 0x4ba   : > { %v2829_v29 = vpop.f32.mrb[18].mxu0 }
 0x4bb   : > { %v9937_v28 = vadd.f32 %v9873_v55, %v3050_v34  ;;  %v7114_v13 = vadd.f32 %v9866_v46, %v2829_v29  ;;  %v2831_v15 = vpop.f32.mrb[19].mxu0 }
 0x4bd   : > { %v3055_v14 = vadd.f32 %v7114_v13, %v9666_v5 }
 0x4be   : > { %v2834_v2 = vpop.f32.mrb[20].mxu0 }
 0x4bf   : > { %v9942_v51 = vadd.f32 %v9873_v55, %v3055_v14  ;;  %v7115_v21 = vadd.f32 %v9866_v46, %v2834_v2  ;;  %v2836_v41 = vpop.f32.mrb[21].mxu0 }
 0x4c1   : > { %v3060_v32 = vadd.f32 %v7115_v21, %v9663_v53 }
 0x4c2   : > { %v2839_v61 = vpop.f32.mrb[22].mxu0 }
 0x4c3   : > { %v9947_v60 = vadd.f32 %v9873_v55, %v3060_v32  ;;  %v7116_v0 = vadd.f32 %v9866_v46, %v2839_v61  ;;  %v2841_v6 = vpop.f32.mrb[23].mxu0 }
 0x4c5   : > { %v3065_v20 = vadd.f32 %v7116_v0, %v9672_v4 }
 0x4c6   : > { %v2844_v63 = vpop.f32.mrb[24].mxu0 }
 0x4c7   : > { %v9952_v5 = vadd.f32 %v9873_v55, %v3065_v20  ;;  %v7117_v27 = vadd.f32 %v9866_v46, %v2844_v63  ;;  %v2846_v26 = vpop.f32.mrb[25].mxu0 }
 0x4c9   : > { %v3070_v40 = vadd.f32 %v7117_v27, %v9669_v43 }
 0x4ca   : > { %v2849_v52 = vpop.f32.mrb[26].mxu0 }
 0x4cb   : > { %v9957_v53 = vadd.f32 %v9873_v55, %v3070_v40  ;;  %v7118_v24 = vadd.f32 %v9866_v46, %v2849_v52  ;;  %v2851_v31 = vpop.f32.mrb[27].mxu0 }
 0x4cd   : > { %v3075_v59 = vadd.f32 %v7118_v24, %v9683_v10  ;;  %v3290_v24 = vadd.f32 %v9889_v8, %v9881_v1 }
 0x4ce   : > { %v2854_v57 = vpop.f32.mrb[28].mxu0 }
 0x4cf   : > { %v9962_v4 = vadd.f32 %v9873_v55, %v3075_v59  ;;  %v7119_v34 = vadd.f32 %v9866_v46, %v2854_v57  ;;  %v2856_v29 = vpop.f32.mrb[29].mxu0  ;;  %v3291_v59 = vadd.f32 %v3290_v24, %v9898_v30 }
 0x4d1   : > { %v3080_v13 = vadd.f32 %v7119_v34, %v9680_v9  ;;  %v3292_v29 = vadd.f32 %v3291_v59, %v9907_v62 }
 0x4d2   : > { %v2859_v15 = vpop.f32.mrb[30].mxu0 }
 0x4d3   : > { %v9967_v43 = vadd.f32 %v9873_v55, %v3080_v13  ;;  %v7120_v14 = vadd.f32 %v9866_v46, %v2859_v15  ;;  %v2861_v2 = vpop.f32.mrb[31].mxu0 }
 0x4d5   : > { %v3085_v21 = vadd.f32 %v7120_v14, %v9695_v18  ;;  %v3293_v14 = vadd.f32 %v3292_v29, %v9916_v54 }
 0x4d6   : > { %v2864_v41 = vpop.f32.mrb[32].mxu0 }
 0x4d7   : > { %v9972_v10 = vadd.f32 %v9873_v55, %v3085_v21  ;;  %v7121_v32 = vadd.f32 %v9866_v46, %v2864_v41  ;;  %v2866_v61 = vpop.f32.mrb[33].mxu0  ;;  %v3294_v41 = vadd.f32 %v3293_v14, %v9925_v44 }
 0x4d9   : > { %v3090_v0 = vadd.f32 %v7121_v32, %v9691_v3 }
 0x4da   : > { %v2869_v6 = vpop.f32.mrb[34].mxu0 }
 0x4db   : > { %v9977_v9 = vadd.f32 %v9873_v55, %v3090_v0  ;;  %v7122_v20 = vadd.f32 %v9866_v46, %v2869_v6  ;;  %v2871_v63 = vpop.f32.mrb[35].mxu0  ;;  %v3295_v0 = vadd.f32 %v3294_v41, %v9932_v25 }
 0x4dd   : > { %v3095_v27 = vadd.f32 %v7122_v20, %v9704_v47  ;;  %v3296_v63 = vadd.f32 %v3295_v0, %v9937_v28 }
 0x4de   : > { %v2874_v26 = vpop.f32.mrb[36].mxu0 }
 0x4df   : > { %v9982_v18 = vadd.f32 %v9873_v55, %v3095_v27  ;;  %v7123_v40 = vadd.f32 %v9866_v46, %v2874_v26  ;;  %v2876_v52 = vpop.f32.mrb[37].mxu0 }
 0x4e1   : > { %v3100_v3 = vadd.f32 %v7123_v40, %v9702_v37  ;;  %v3297_v40 = vadd.f32 %v3296_v63, %v9942_v51 }
 0x4e2   : > { %v2879_v31 = vpop.f32.mrb[38].mxu0 }
 0x4e3   : > { %v9990_v57 = vadd.f32 %v9873_v55, %v3100_v3  ;;  %v7124_v47 = vadd.f32 %v9866_v46, %v2879_v31  ;;  %v2881_v34 = vpop.f32.mrb[39].mxu0  ;;  %v3328_v3 = vmul.f32 %v9889_v8, %v9889_v8  ;;  %v3298_v31 = vadd.f32 %v3297_v40, %v9947_v60 }
 0x4e4   : > { %v3332_v40 = vmul.f32 %v9925_v44, %v9925_v44 }
 0x4e5   : > { %v3105_v13 = vadd.f32 %v7124_v47, %v9712_v56  ;;  %v3327_v47 = vmul.f32 %v9881_v1, %v9881_v1  ;;  %v3299_v29 = vadd.f32 %v3298_v31, %v9952_v5 }
 0x4e6   : > { %v2884_v15 = vpop.f32.mrb[40].mxu0 }
 0x4e7   : > { %v9997_v2 = vadd.f32 %v9873_v55, %v3105_v13  ;;  %v7125_v37 = vadd.f32 %v9866_v46, %v2884_v15  ;;  %v2886_v21 = vpop.f32.mrb[41].mxu0 }
 0x4e8   : > { %v3330_v21 = vmul.f32 %v9907_v62, %v9907_v62 }
 0x4e9   : > { %v3110_v32 = vadd.f32 %v7125_v37, %v9710_v23  ;;  %v3359_v37 = vadd.f32 %v3328_v3, %v3327_v47  ;;  %v3333_v3 = vmul.f32 %v9932_v25, %v9932_v25 }
 0x4ea   : > { %v2889_v61 = vpop.f32.mrb[42].mxu0 }
 0x4eb   : > { %v10004_v6 = vadd.f32 %v9873_v55, %v3110_v32  ;;  %v7126_v56 = vadd.f32 %v9866_v46, %v2889_v61  ;;  %v2891_v20 = vpop.f32.mrb[43].mxu0  ;;  %v3331_v61 = vmul.f32 %v9916_v54, %v9916_v54 }
 0x4ed   : > { %v3115_v27 = vadd.f32 %v7126_v56, %v9720_v39  ;;  %v3329_v39 = vmul.f32 %v9898_v30, %v9898_v30 }
 0x4ee   : > { %v2894_v26 = vpop.f32.mrb[44].mxu0 }
 0x4ef   : > { %v10011_v52 = vadd.f32 %v9873_v55, %v3115_v27  ;;  %v7127_v23 = vadd.f32 %v9866_v46, %v2894_v26  ;;  %v2896_v24 = vpop.f32.mrb[45].mxu0  ;;  %v3360_v32 = vadd.f32 %v3359_v37, %v3329_v39 }
 0x4f1   : > { %v3120_v59 = vadd.f32 %v7127_v23, %v9718_v45  ;;  %v3300_v45 = vadd.f32 %v3299_v29, %v9957_v53  ;;  %v3361_v26 = vadd.f32 %v3360_v32, %v3330_v21  ;;  %v3335_v21 = vmul.f32 %v9942_v51, %v9942_v51 }
 0x4f2   : > { %v2899_v34 = vpop.f32.mrb[46].mxu0 }
 0x4f3   : > { %v10024_v13 = vadd.f32 %v9873_v55, %v3120_v59  ;;  %v7128_v15 = vadd.f32 %v9866_v46, %v2899_v34  ;;  %v2901_v14 = vpop.f32.mrb[47].mxu0  ;;  %v3301_v56 = vadd.f32 %v3300_v45, %v9962_v4  ;;  %v3362_v24 = vadd.f32 %v3361_v26, %v3331_v61 }
 0x4f5   : > { %v3125_v41 = vadd.f32 %v7128_v15, %v9728_v35  ;;  %v3302_v23 = vadd.f32 %v3301_v56, %v9967_v43  ;;  %v3363_v29 = vadd.f32 %v3362_v24, %v3332_v40  ;;  %v3334_v15 = vmul.f32 %v9937_v28, %v9937_v28 }
 0x4f6   : > { %v2904_v0 = vpop.f32.mrb[48].mxu0  ;;  %v3337_v40 = vmul.f32 %v9952_v5, %v9952_v5 }
 0x4f7   : > { %v10035_v20 = vadd.f32 %v9873_v55, %v3125_v41  ;;  %v7129_v63 = vadd.f32 %v9866_v46, %v2904_v0  ;;  %v2906_v27 = vpop.f32.mrb[49].mxu0  ;;  %v3303_v59 = vadd.f32 %v3302_v23, %v9972_v10  ;;  %v3364_v37 = vadd.f32 %v3363_v29, %v3333_v3 }
 0x4f9   : > { %v3130_v35 = vadd.f32 %v7129_v63, %v9726_v33  ;;  %v3304_v14 = vadd.f32 %v3303_v59, %v9977_v9  ;;  %v3365_v56 = vadd.f32 %v3364_v37, %v3334_v15  ;;  %v3336_v63 = vmul.f32 %v9947_v60, %v9947_v60 }
 0x4fa   : > { %v2909_v31 = vpop.f32.mrb[50].mxu0 }
 0x4fb   : > { %v10046_v47 = vadd.f32 %v9873_v55, %v3130_v35  ;;  %v7130_v39 = vadd.f32 %v9866_v46, %v2909_v31  ;;  %v2911_v34 = vpop.f32.mrb[51].mxu0  ;;  %v3305_v41 = vadd.f32 %v3304_v14, %v9982_v18  ;;  %v3366_v26 = vadd.f32 %v3365_v56, %v3335_v21 }
 0x4fc   : > { %v3339_v14 = vmul.f32 %v9962_v4, %v9962_v4 }
 0x4fd   : > { %v3135_v33 = vadd.f32 %v7130_v39, %v9736_v42  ;;  %v3306_v27 = vadd.f32 %v3305_v41, %v9990_v57  ;;  %v3367_v59 = vadd.f32 %v3366_v26, %v3336_v63  ;;  %v3338_v39 = vmul.f32 %v9957_v53, %v9957_v53  ;;  %v11622_v63 = vld [vmem:[#allocation30_spill] sm:$0xff] }
 0x4fe   : > { %v2914_v45 = vpop.f32.mrb[52].mxu0  ;;  %v3341_v26 = vmul.f32 %v9972_v10, %v9972_v10 }
 0x4ff   : > { %v10057_v32 = vadd.f32 %v9873_v55, %v3135_v33  ;;  %v7131_v61 = vadd.f32 %v9866_v46, %v2914_v45  ;;  %v2916_v0 = vpop.f32.mrb[53].mxu0  ;;  %v3307_v35 = vadd.f32 %v3306_v27, %v9997_v2  ;;  %v3368_v15 = vadd.f32 %v3367_v59, %v3337_v40 }
 0x500   : > { %v3340_v0 = vmul.f32 %v9967_v43, %v9967_v43 }
 0x501   : > { %v3140_v42 = vadd.f32 %v7131_v61, %v9734_v11  ;;  %v3308_v34 = vadd.f32 %v3307_v35, %v10004_v6  ;;  %v11621_v11 = vld [vmem:[#allocation22_spill] sm:$0xff]  ;;  %v3369_v61 = vadd.f32 %v3368_v15, %v3338_v39  ;;  %v3342_v39 = vmul.f32 %v9977_v9, %v9977_v9 }
 0x502   : > { %v2919_v23 = vpop.f32.mrb[54].mxu0 }
 0x503   : > { %v10068_v24 = vadd.f32 %v9873_v55, %v3140_v42  ;;  %v7132_v3 = vadd.f32 %v9866_v46, %v2919_v23  ;;  %v2921_v31 = vpop.f32.mrb[55].mxu0  ;;  %v3309_v37 = vadd.f32 %v3308_v34, %v10011_v52  ;;  %v3370_v42 = vadd.f32 %v3369_v61, %v3339_v14 }
 0x504   : > { %v3343_v14 = vmul.f32 %v9982_v18, %v9982_v18 }
 0x505   : > { %v3145_v29 = vadd.f32 %v7132_v3, %v11621_v11  ;;  %v3310_v56 = vadd.f32 %v3309_v37, %v10024_v13  ;;  %v3371_v59 = vadd.f32 %v3370_v42, %v3340_v0  ;;  %v11623_v11 = vld [vmem:[#allocation23_spill] sm:$0xff] }
 0x506   : > { %v2924_v33 = vpop.f32.mrb[56].mxu0 }
 0x507   : > { %v10079_v21 = vadd.f32 %v9873_v55, %v3145_v29  ;;  %v7133_v45 = vadd.f32 %v9866_v46, %v2924_v33  ;;  %v2926_v41 = vpop.f32.mrb[57].mxu0  ;;  %v3311_v23 = vadd.f32 %v3310_v56, %v10035_v20  ;;  %v3372_v15 = vadd.f32 %v3371_v59, %v3341_v26 }
 0x508   : > { %v3344_v56 = vmul.f32 %v9990_v57, %v9990_v57 }
 0x509   : > { %v3150_v27 = vadd.f32 %v7133_v45, %v11622_v63  ;;  %v3312_v34 = vadd.f32 %v3311_v23, %v10046_v47  ;;  %v3373_v0 = vadd.f32 %v3372_v15, %v3342_v39 }
 0x50a   : > { %v2929_v40 = vpop.f32.mrb[58].mxu0 }
 0x50b   : > { %v10090_v35 = vadd.f32 %v9873_v55, %v3150_v27  ;;  %v7134_v3 = vadd.f32 %v9866_v46, %v2929_v40  ;;  %v2931_v31 = vpop.f32.mrb[59].mxu0  ;;  %v3313_v37 = vadd.f32 %v3312_v34, %v10057_v32  ;;  %v11624_v27 = vld [vmem:[#allocation32_spill] sm:$0xff]  ;;  %v3374_v26 = vadd.f32 %v3373_v0, %v3343_v14 }
 0x50c   : > { %v3345_v40 = vmul.f32 %v9997_v2, %v9997_v2 }
 0x50d   : > { %v3155_v29 = vadd.f32 %v7134_v3, %v11623_v11  ;;  %v3314_v63 = vadd.f32 %v3313_v37, %v10068_v24  ;;  %v3375_v34 = vadd.f32 %v3374_v26, %v3344_v56  ;;  %v3346_v11 = vmul.f32 %v10004_v6, %v10004_v6 }
 0x50e   : > { %v2934_v33 = vpop.f32.mrb[60].mxu0  ;;  %v3347_v37 = vmul.f32 %v10011_v52, %v10011_v52 }
 0x50f   : > { %v10101_v45 = vadd.f32 %v9873_v55, %v3155_v29  ;;  %v7135_v41 = vadd.f32 %v9866_v46, %v2934_v33  ;;  %v2936_v61 = vpop.f32.mrb[61].mxu0  ;;  %v3315_v3 = vadd.f32 %v3314_v63, %v10079_v21  ;;  %v3376_v14 = vadd.f32 %v3375_v34, %v3345_v40 }
 0x510   : > { %v3349_v40 = vmul.f32 %v10035_v20, %v10035_v20 }
 0x511   : > { %v3160_v42 = vadd.f32 %v7135_v41, %v11624_v27  ;;  %v3316_v29 = vadd.f32 %v3315_v3, %v10090_v35  ;;  %v3377_v63 = vadd.f32 %v3376_v14, %v3346_v11  ;;  %v3348_v27 = vmul.f32 %v10024_v13, %v10024_v13 }
 0x512   : > { %v2939_v23 = vpop.f32.mrb[62].mxu0  ;;  %v3351_v11 = vmul.f32 %v10057_v32, %v10057_v32 }
 0x513   : > { %v10112_v31 = vadd.f32 %v9873_v55, %v3160_v42  ;;  %v7136_v59 = vadd.f32 %v9866_v46, %v2939_v23  ;;  %v2941_v39 = vpop.f32.mrb[63].mxu0  ;;  %v3317_v41 = vadd.f32 %v3316_v29, %v10101_v45  ;;  %v3378_v26 = vadd.f32 %v3377_v63, %v3347_v37 }
 0x515   : > { %v3165_v15 = vadd.f32 %v7136_v59, %v9847_v12  ;;  %v3318_v42 = vadd.f32 %v3317_v41, %v10112_v31  ;;  %v3379_v59 = vadd.f32 %v3378_v26, %v3348_v27  ;;  %v3355_v27 = vmul.f32 %v10101_v45, %v10101_v45 }
 0x516   : > { %v2944_v33 = vpop.f32.mrb[64].mxu0  ;;  %v3356_v26 = vmul.f32 %v10112_v31, %v10112_v31 }
 0x517   : > { %v10123_v61 = vadd.f32 %v9873_v55, %v3165_v15  ;;  %v7137_v0 = vadd.f32 %v9866_v46, %v2944_v33  ;;  %v2946_v56 = vpop.f32.mrb[65].mxu0  ;;  %v3350_v46 = vmul.f32 %v10046_v47, %v10046_v47  ;;  %v3380_v34 = vadd.f32 %v3379_v59, %v3349_v40 }
 0x518   : > { %v3352_v15 = vmul.f32 %v10068_v24, %v10068_v24 }
 0x519   : > { %v3170_v12 = vadd.f32 %v7137_v0, %v9844_v36  ;;  %v3319_v23 = vadd.f32 %v3318_v42, %v10123_v61  ;;  %v3381_v29 = vadd.f32 %v3380_v34, %v3350_v46  ;;  %v3354_v0 = vmul.f32 %v10090_v35, %v10090_v35  ;;  %v10154_v46 = vld [vmem:[#allocation2] sm:$0xff] }
 0x51a   : > { %v3357_v59 = vmul.f32 %v10123_v61, %v10123_v61 }
 0x51b   : > { %v10134_v3 = vadd.f32 %v9873_v55, %v3170_v12  ;;  %v3382_v33 = vadd.f32 %v3381_v29, %v3351_v11  ;;  %v3353_v55 = vmul.f32 %v10079_v21, %v10079_v21 }
 0x51d   : > { %v3320_v39 = vadd.f32 %v3319_v23, %v10134_v3  ;;  %v3383_v41 = vadd.f32 %v3382_v33, %v3352_v15  ;;  %v3358_v34 = vmul.f32 %v10134_v3, %v10134_v3  ;;  %v934_v33 = vld [vmem:[#allocation12 + $0x10] sm:$0xff] }
 0x51f   : > { %v3321_v36 = vrot.slane %v3320_v39, 4  ;;  %v3384_v63 = vadd.f32 %v3383_v41, %v3353_v55  ;;  %v935_v55 = vld [vmem:[#allocation12 + $0x18] sm:$0xff] }
 0x521   : > { %v3322_v14 = vadd.f32 %v3321_v36, %v3320_v39  ;;  %v3385_v12 = vadd.f32 %v3384_v63, %v3354_v0  ;;  %v938_v0 = vld [vmem:[#allocation12 + $0x30] sm:$0xff] }
 0x523   : > { %v3323_v37 = vrot.slane %v3322_v14, 2  ;;  %v3386_v23 = vadd.f32 %v3385_v12, %v3355_v27  ;;  %v940_v27 = vld [vmem:[#allocation12 + $0x40] sm:$0xff] }
 0x525   : > { %v3324_v56 = vadd.f32 %v3323_v37, %v3322_v14  ;;  %v3387_v39 = vadd.f32 %v3386_v23, %v3356_v26  ;;  %v933_v14 = vld [vmem:[#allocation12 + $0x8] sm:$0xff]  ;;  %v6854_v37 = vpack.c.bf16 %v935_v55, %v934_v33  ;;  %v942_v26 = vld [vmem:[#allocation12 + $0x50] sm:$0xff] }
 0x526   : > { %v953_v33 = vld [vmem:[#allocation12 + $0xa8] sm:$0xff] }
 0x527   : > { %v3325_v42 = vrot.slane %v3324_v56, 1  ;;  %v3388_v11 = vadd.f32 %v3387_v39, %v3357_v59  ;;  %v944_v59 = vld [vmem:[#allocation12 + $0x60] sm:$0xff]  ;;  %v945_v39 = vld [vmem:[#allocation12 + $0x68] sm:$0xff] }
 0x529   : > { %v3326_v40 = vadd.f32 %v3325_v42, %v3324_v56  ;;  %v3389_v36 = vadd.f32 %v3388_v11, %v3358_v34  ;;  %v939_v56 = vld [vmem:[#allocation12 + $0x38] sm:$0xff]  ;;  %v941_v42 = vld [vmem:[#allocation12 + $0x48] sm:$0xff]  ;;  %v6869_v34 = vpack.c.bf16 %v945_v39, %v944_v59  ;;  %v946_v11 = vld [vmem:[#allocation12 + $0x70] sm:$0xff] }
 0x52a   : > { %v6860_v63 = vpack.c.bf16 %v939_v56, %v938_v0  ;;  %v6863_v12 = vpack.c.bf16 %v941_v42, %v940_v27  ;;  %v1061_v0 = vld [vmem:[#allocation12 + $0x408] sm:$0xff]  ;;  %v1062_v27 = vld [vmem:[#allocation12 + $0x410] sm:$0xff]  ;;  %v956_v42 = vld [vmem:[#allocation12 + $0xc0] sm:$0xff] }
 0x52b   : > { %6327 = vmatmul.mubr.f32.vlgmr.msra.gmra.mrb[36].mxu1 %v3326_v40  ;;  %v943_v40 = vld [vmem:[#allocation12 + $0x58] sm:$0xff]  ;;  %v958_v59 = vld [vmem:[#allocation12 + $0xd0] sm:$0xff] }
 0x52c   : > { %6828 = vmatpush3.bf16.msra.mxu1 %v9859_v19  ;;  %6361 = vmatprep.mubr.msk.f32.mxu1 %vm8256_vm0, %v10154_v46  ;;  %v3390_v19 = vrot.slane %v3389_v36, 4  ;;  %v6866_v23 = vpack.c.bf16 %v943_v40, %v942_v26  ;;  %v1063_v26 = vld [vmem:[#allocation12 + $0x418] sm:$0xff]  ;;  %v1064_v40 = vld [vmem:[#allocation12 + $0x420] sm:$0xff] }
 0x52d   : > { %6829 = vmatprep.subr.bf16.mxu1 %v11602_v48  ;;  %v959_v39 = vld [vmem:[#allocation12 + $0xd8] sm:$0xff] }
 0x52e   : > { %v3391_v29 = vadd.f32 %v3390_v19, %v3389_v36  ;;  %v947_v36 = vld [vmem:[#allocation12 + $0x78] sm:$0xff] }
 0x52f   : > { %v6872_v19 = vpack.c.bf16 %v947_v36, %v946_v11 }
 0x530   : > { %6831 = vmatpush3.bf16.msra.mxu1 %v9868_v38  ;;  %v3392_v15 = vrot.slane %v3391_v29, 2 }
 0x531   : > { %6832 = vmatprep.subr.bf16.mxu1 %v11602_v48 }
 0x532   : > { %v3393_v38 = vadd.f32 %v3392_v15, %v3391_v29  ;;  %v948_v29 = vld [vmem:[#allocation12 + $0x80] sm:$0xff]  ;;  %v949_v15 = vld [vmem:[#allocation12 + $0x88] sm:$0xff] }
 0x534   : > { %6834 = vmatpush3.bf16.msra.mxu1 %v9876_v17  ;;  %v3394_v17 = vrot.slane %v3393_v38, 1 }
 0x535   : > { %6835 = vmatprep.subr.bf16.mxu1 %v11602_v48 }
 0x538   : > { %6837 = vmatpush3.bf16.msra.mxu1 %v9886_v49  ;;  %v3395_v49 = vadd.f32 %v3394_v17, %v3393_v38  ;;  %v6875_v38 = vpack.c.bf16 %v949_v15, %v948_v29  ;;  %v950_v17 = vld [vmem:[#allocation12 + $0x90] sm:$0xff]  ;;  %v1067_v29 = vld [vmem:[#allocation12 + $0x438] sm:$0xff]  ;;  %v6890_v15 = vpack.c.bf16 %v959_v39, %v958_v59 }
 0x539   : > { %6838 = vmatprep.subr.bf16.mxu1 %v11602_v48  ;;  %v966_v39 = vld [vmem:[#allocation12 + $0x110] sm:$0xff] }
 0x53c   : > { %6840 = vmatpush3.bf16.msra.mxu1 %v9893_v7  ;;  %v932_v7 = vld [vmem:[#allocation12] sm:$0xff] }
 0x53d   : > { %6841 = vmatprep.subr.bf16.mxu1 %v11602_v48 }
 0x540   : > { %6843 = vmatpush3.bf16.msra.mxu1 %v9902_v50  ;;  %v6851_v50 = vpack.c.bf16 %v933_v14, %v932_v7  ;;  %v952_v14 = vld [vmem:[#allocation12 + $0xa0] sm:$0xff] }
 0x541   : > { %6844 = vmatprep.subr.bf16.mxu1 %v11602_v48 }
 0x544   : > { %6846 = vmatpush3.bf16.msra.mxu1 %v9911_v16  ;;  %v936_v16 = vld [vmem:[#allocation12 + $0x20] sm:$0xff] }
 0x545   : > { %6847 = vmatprep.subr.bf16.mxu1 %v11602_v48 }
 0x548   : > { %6849 = vmatpush3.bf16.msra.mxu1 %v9920_v22  ;;  %v937_v22 = vld [vmem:[#allocation12 + $0x28] sm:$0xff] }
 0x549   : > { %6850 = vmatprep.subr.bf16.mxu1 %v11602_v48  ;;  %v6857_v41 = vpack.c.bf16 %v937_v22, %v936_v16  ;;  %v954_v16 = vld [vmem:[#allocation12 + $0xb0] sm:$0xff]  ;;  %v955_v22 = vld [vmem:[#allocation12 + $0xb8] sm:$0xff] }
 0x54a   : > { %v6884_v56 = vpack.c.bf16 %v955_v22, %v954_v16  ;;  %v1070_v22 = vld [vmem:[#allocation12 + $0x450] sm:$0xff] }
 0x54b   : > { %6362 = vmatmul.mubr.f32.vlgmr.msra.gmra.mrb[38].mxu1 %v3395_v49  ;;  %v951_v49 = vld [vmem:[#allocation12 + $0x98] sm:$0xff] }
 0x54c   : > { %4306 = vmatprep.mubr.f32.mxu1 %v10154_v46  ;;  %6852 = vmatpush1.bf16.msra.mxu1 %v6851_v50  ;;  %v6878_v7 = vpack.c.bf16 %v951_v49, %v950_v17  ;;  %v6881_v50 = vpack.c.bf16 %v953_v33, %v952_v14  ;;  %v961_v17 = vld [vmem:[#allocation12 + $0xe8] sm:$0xff] }
 0x54d   : > { %6853 = vmatprep.subr.bf16.mxu1 %v11602_v48  ;;  %v1069_v14 = vld [vmem:[#allocation12 + $0x448] sm:$0xff] }
 0x550   : > { %6855 = vmatpush1.bf16.msra.mxu1 %v6854_v37 }
 0x551   : > { %6856 = vmatprep.subr.bf16.mxu1 %v11602_v48 }
 0x554   : > { %6858 = vmatpush1.bf16.msra.mxu1 %v6857_v41  ;;  %v1060_v41 = vld [vmem:[#allocation12 + $0x400] sm:$0xff] }
 0x555   : > { %6859 = vmatprep.subr.bf16.mxu1 %v11602_v48 }
 0x558   : > { %6861 = vmatpush1.bf16.msra.mxu1 %v6860_v63  ;;  %v7042_v63 = vpack.c.bf16 %v1061_v0, %v1060_v41  ;;  %v1071_v41 = vld [vmem:[#allocation12 + $0x458] sm:$0xff] }
 0x559   : > { %6862 = vmatprep.subr.bf16.mxu1 %v11602_v48 }
 0x55a   : > { %7043 = vmatprep.subr.bf16.mxu0 %v7042_v63 }
 0x55b   : > { %7045 = vmatpush3.bf16.msra.mxu0 %v7042_v63  ;;  %v1072_v63 = vld [vmem:[#allocation12 + $0x460] sm:$0xff] }
 0x55c   : > { %6864 = vmatpush1.bf16.msra.mxu1 %v6863_v12  ;;  %v957_v12 = vld [vmem:[#allocation12 + $0xc8] sm:$0xff] }
 0x55d   : > { %6865 = vmatprep.subr.bf16.mxu1 %v11602_v48  ;;  %v6887_v11 = vpack.c.bf16 %v957_v12, %v956_v42  ;;  %v3948_v42 = vld [vmem:[#allocation2 + $0x7] sm:$0xff] }
 0x55e   : > { %v964_v12 = vld [vmem:[#allocation12 + $0x100] sm:$0xff] }
 0x560   : > { %6867 = vmatpush1.bf16.msra.mxu1 %v6866_v23  ;;  %v1065_v23 = vld [vmem:[#allocation12 + $0x428] sm:$0xff] }
 0x561   : > { %6868 = vmatprep.subr.bf16.mxu1 %v11602_v48  ;;  %v7050_v36 = vpack.c.bf16 %v1065_v23, %v1064_v40 }
 0x564   : > { %6870 = vmatpush1.bf16.msra.mxu1 %v6869_v34  ;;  %v7046_v34 = vpack.c.bf16 %v1063_v26, %v1062_v27  ;;  %v1073_v27 = vld [vmem:[#allocation12 + $0x468] sm:$0xff] }
 0x565   : > { %6871 = vmatprep.subr.bf16.mxu1 %v11602_v48  ;;  %v965_v26 = vld [vmem:[#allocation12 + $0x108] sm:$0xff]  ;;  %v7066_v59 = vpack.c.bf16 %v1073_v27, %v1072_v63 }
 0x566   : > { %7047 = vmatprep.subr.bf16.mxu0 %v7046_v34  ;;  %v6899_v23 = vpack.c.bf16 %v965_v26, %v964_v12  ;;  %v975_v12 = vld [vmem:[#allocation12 + $0x158] sm:$0xff] }
 0x567   : > { %7049 = vmatpush3.bf16.msra.mxu0 %v7046_v34  ;;  %v967_v34 = vld [vmem:[#allocation12 + $0x118] sm:$0xff] }
 0x568   : > { %6873 = vmatpush1.bf16.msra.mxu1 %v6872_v19  ;;  %v1066_v19 = vld [vmem:[#allocation12 + $0x430] sm:$0xff]  ;;  %7051 = vmatprep.subr.bf16.mxu0 %v7050_v36 }
 0x569   : > { %6874 = vmatprep.subr.bf16.mxu1 %v11602_v48  ;;  %v7054_v49 = vpack.c.bf16 %v1067_v29, %v1066_v19  ;;  %v3949_v19 = vld [vmem:[#allocation2 + $0xf] sm:$0xff]  ;;  %v6902_v29 = vpack.c.bf16 %v967_v34, %v966_v39 }
 0x56b   : > { %7053 = vmatpush3.bf16.msra.mxu0 %v7050_v36  ;;  %v1075_v36 = vld [vmem:[#allocation12 + $0x478] sm:$0xff] }
 0x56c   : > { %6876 = vmatpush1.bf16.msra.mxu1 %v6875_v38  ;;  %v960_v38 = vld [vmem:[#allocation12 + $0xe0] sm:$0xff]  ;;  %7055 = vmatprep.subr.bf16.mxu0 %v7054_v49 }
 0x56d   : > { %6877 = vmatprep.subr.bf16.mxu1 %v11602_v48  ;;  %v6893_v33 = vpack.c.bf16 %v961_v17, %v960_v38  ;;  %v968_v38 = vld [vmem:[#allocation12 + $0x120] sm:$0xff]  ;;  %v969_v17 = vld [vmem:[#allocation12 + $0x128] sm:$0xff] }
 0x56f   : > { %7057 = vmatpush3.bf16.msra.mxu0 %v7054_v49 }
 0x570   : > { %6879 = vmatpush1.bf16.msra.mxu1 %v6878_v7  ;;  %v1068_v7 = vld [vmem:[#allocation12 + $0x440] sm:$0xff] }
 0x571   : > { %6880 = vmatprep.subr.bf16.mxu1 %v11602_v48  ;;  %v7058_v16 = vpack.c.bf16 %v1069_v14, %v1068_v7 }
 0x573   : > { %7059 = vmatprep.subr.bf16.mxu0 %v7058_v16 }
 0x574   : > { %6882 = vmatpush1.bf16.msra.mxu1 %v6881_v50  ;;  %v962_v50 = vld [vmem:[#allocation12 + $0xf0] sm:$0xff]  ;;  %7061 = vmatpush3.bf16.msra.mxu0 %v7058_v16 }
 0x575   : > { %6883 = vmatprep.subr.bf16.mxu1 %v11602_v48 }
 0x578   : > { %6885 = vmatpush1.bf16.msra.mxu1 %v6884_v56  ;;  %v7062_v56 = vpack.c.bf16 %v1071_v41, %v1070_v22 }
 0x579   : > { %6886 = vmatprep.subr.bf16.mxu1 %v11602_v48 }
 0x57a   : > { %7063 = vmatprep.subr.bf16.mxu0 %v7062_v56 }
 0x57b   : > { %7065 = vmatpush3.bf16.msra.mxu0 %v7062_v56  ;;  %v973_v56 = vld [vmem:[#allocation12 + $0x148] sm:$0xff] }
 0x57c   : > { %6888 = vmatpush1.bf16.msra.mxu1 %v6887_v11  ;;  %v1074_v11 = vld [vmem:[#allocation12 + $0x470] sm:$0xff]  ;;  %7067 = vmatprep.subr.bf16.mxu0 %v7066_v59 }
 0x57d   : > { %6889 = vmatprep.subr.bf16.mxu1 %v11602_v48  ;;  %v7070_v14 = vpack.c.bf16 %v1075_v36, %v1074_v11  ;;  %v977_v36 = vld [vmem:[#allocation12 + $0x168] sm:$0xff] }
 0x57f   : > { %7069 = vmatpush3.bf16.msra.mxu0 %v7066_v59 }
 0x580   : > { %6891 = vmatpush1.bf16.msra.mxu1 %v6890_v15  ;;  %7071 = vmatprep.subr.bf16.mxu0 %v7070_v14 }
 0x581   : > { %6892 = vmatprep.subr.bf16.mxu1 %v11602_v48 }
 0x583   : > { %7073 = vmatpush3.bf16.msra.mxu0 %v7070_v14 }
 0x584   : > { %6894 = vmatpush1.bf16.msra.mxu1 %v6893_v33 }
 0x585   : > { %6895 = vmatprep.subr.bf16.mxu1 %v11602_v48 }
 0x5fe   : > { %v3462_v55 = vpop.f32.mrb[36].mxu1 }
 0x5ff   : > { %v6328_v37 = vpop.f32.mrb[37].mxu1  ;;  %v3537_v40 = vmul.f32 0.0009765625, %v3462_v55 }
 0x600   : > { %v963_v37 = vld [vmem:[#allocation12 + $0xf8] sm:$0xff] }
 0x601   : > { %v6896_v0 = vpack.c.bf16 %v963_v37, %v962_v50  ;;  %v3539_v55 = vmul.f32 %v3537_v40, %v3537_v40  ;;  %v6905_v50 = vpack.c.bf16 %v969_v17, %v968_v38  ;;  %v971_v37 = vld [vmem:[#allocation12 + $0x138] sm:$0xff]  ;;  %v10197_v63 = vrot.slane %v3537_v40, %v11620_v58 }
 0x603   : > { %6897 = vmatpush1.bf16.msra.mxu1 %v6896_v0  ;;  %v972_v0 = vld [vmem:[#allocation12 + $0x140] sm:$0xff]  ;;  %v3548_v26 = vsub.f32 %v9881_v1, %v10197_v63  ;;  %v3550_v59 = vsub.f32 %v9898_v30, %v10197_v63  ;;  %v3551_v40 = vsub.f32 %v9907_v62, %v10197_v63  ;;  %v3552_v39 = vsub.f32 %v9916_v54, %v10197_v63 }
 0x604   : > { %6898 = vmatprep.subr.bf16.mxu1 %v11602_v48  ;;  %v6911_v27 = vpack.c.bf16 %v973_v56, %v972_v0  ;;  %v3553_v34 = vsub.f32 %v9925_v44, %v10197_v63  ;;  %v3554_v11 = vsub.f32 %v9932_v25, %v10197_v63  ;;  %v3555_v1 = vsub.f32 %v9937_v28, %v10197_v63 }
 0x605   : > { %v3557_v30 = vsub.f32 %v9947_v60, %v10197_v63  ;;  %v3558_v54 = vsub.f32 %v9952_v5, %v10197_v63  ;;  %v3559_v44 = vsub.f32 %v9957_v53, %v10197_v63  ;;  %v3560_v25 = vsub.f32 %v9962_v4, %v10197_v63 }
 0x606   : > { %4307 = vmatmul.mubr.f32.vlgmr.msra.gmra.mrb[40].mxu1 %v3948_v42  ;;  %v974_v42 = vld [vmem:[#allocation12 + $0x150] sm:$0xff]  ;;  %v3561_v28 = vsub.f32 %v9967_v43, %v10197_v63  ;;  %v3562_v60 = vsub.f32 %v9972_v10, %v10197_v63  ;;  %v3564_v5 = vsub.f32 %v9982_v18, %v10197_v63  ;;  %v3565_v53 = vsub.f32 %v9990_v57, %v10197_v63 }
 0x607   : > { %6900 = vmatpush1.bf16.msra.mxu1 %v6899_v23  ;;  %4311 = vmatprep.mubr.f32.mxu1 %v10154_v46  ;;  %v970_v46 = vld [vmem:[#allocation12 + $0x130] sm:$0xff]  ;;  %v3549_v23 = vsub.f32 %v9889_v8, %v10197_v63  ;;  %v3556_v8 = vsub.f32 %v9942_v51, %v10197_v63  ;;  %v6914_v62 = vpack.c.bf16 %v975_v12, %v974_v42  ;;  %v976_v51 = vld [vmem:[#allocation12 + $0x160] sm:$0xff] }
 0x608   : > { %6901 = vmatprep.subr.bf16.mxu1 %v11602_v48  ;;  %v6908_v41 = vpack.c.bf16 %v971_v37, %v970_v46  ;;  %v3566_v4 = vsub.f32 %v9997_v2, %v10197_v63  ;;  %v3567_v43 = vsub.f32 %v10004_v6, %v10197_v63  ;;  %v3569_v10 = vsub.f32 %v10024_v13, %v10197_v63 }
 0x609   : > { %v3571_v18 = vsub.f32 %v10046_v47, %v10197_v63  ;;  %v3572_v57 = vsub.f32 %v10057_v32, %v10197_v63  ;;  %v6917_v2 = vpack.c.bf16 %v977_v36, %v976_v51  ;;  %v3573_v6 = vsub.f32 %v10068_v24, %v10197_v63 }
 0x60a   : > { %4312 = vmatmul.mubr.f32.gmra.mrb[42].mxu1 %v3949_v19  ;;  %v3563_v19 = vsub.f32 %v9977_v9, %v10197_v63  ;;  %v3570_v9 = vsub.f32 %v10035_v20, %v10197_v63  ;;  %v3575_v13 = vsub.f32 %v10090_v35, %v10197_v63  ;;  %v3576_v20 = vsub.f32 %v10101_v45, %v10197_v63 }
 0x60b   : > { %6903 = vmatpush1.bf16.msra.mxu1 %v6902_v29  ;;  %v3568_v29 = vsub.f32 %v10011_v52, %v10197_v63  ;;  %v3574_v52 = vsub.f32 %v10079_v21, %v10197_v63  ;;  %v3577_v47 = vsub.f32 %v10112_v31, %v10197_v63  ;;  %v3578_v32 = vsub.f32 %v10123_v61, %v10197_v63 }
 0x60c   : > { %6904 = vmatprep.subr.bf16.mxu1 %v11602_v48  ;;  %v3579_v24 = vsub.f32 %v10134_v3, %v10197_v63 }
 0x60f   : > { %6906 = vmatpush1.bf16.msra.mxu1 %v6905_v50 }
 0x610   : > { %6907 = vmatprep.subr.bf16.mxu1 %v11602_v48 }
 0x613   : > { %6909 = vmatpush1.bf16.msra.mxu1 %v6908_v41 }
 0x614   : > { %6910 = vmatprep.subr.bf16.mxu1 %v11602_v48 }
 0x617   : > { %6912 = vmatpush1.bf16.msra.mxu1 %v6911_v27 }
 0x618   : > { %6913 = vmatprep.subr.bf16.mxu1 %v11602_v48 }
 0x61b   : > { %6915 = vmatpush1.bf16.msra.mxu1 %v6914_v62 }
 0x61c   : > { %6916 = vmatprep.subr.bf16.mxu1 %v11602_v48 }
 0x61e   : > { %v3532_v15 = vpop.f32.mrb[38].mxu1 }
 0x61f   : > { %v3538_v49 = vmul.f32 0.0009765625, %v3532_v15  ;;  %v6363_v7 = vpop.f32.mrb[39].mxu1  ;;  %6918 = vmatpush1.bf16.msra.mxu1 %v6917_v2 }
 0x620   : > { %6919 = vmatprep.subr.bf16.mxu1 %v11602_v48 }
 0x621   : > { %v3540_v33 = vsub.f32 %v3538_v49, %v3539_v55 }
 0x623   : > { %v3541_v16 = vmax.f32 %v3540_v33, 0.0 }
 0x625   : > { %v3542_v22 = vadd.f32 1e-06, %v3541_v16 }
 0x627   : > { %7802 = vrsqrt.f32 %v3542_v22 }
 0x631   : > { %v7803_v15 = vpop.eup %7802 }
 0x632   : > { %v3583_v38 = vrot.slane %v7803_v15, %v11620_v58 }
 0x634   : > { %v3584_v21 = vmul.f32 %v3583_v38, %v3548_v26  ;;  %v3585_v17 = vmul.f32 %v3583_v38, %v3549_v23  ;;  %v3586_v55 = vmul.f32 %v3583_v38, %v3550_v59  ;;  %v3587_v35 = vmul.f32 %v3583_v38, %v3551_v40 }
 0x635   : > { %v3588_v49 = vmul.f32 %v3583_v38, %v3552_v39  ;;  %v3589_v58 = vmul.f32 %v3583_v38, %v3553_v34  ;;  %v3590_v7 = vmul.f32 %v3583_v38, %v3554_v11  ;;  %v3591_v14 = vmul.f32 %v3583_v38, %v3555_v1  ;;  %v10297_v1 = vld [vmem:[%s11625_s26] ss:$0 sm:$0xff]  ;;  %s5676_s26 = sshll.u32 %s11308_s30, 4  ;;  %s11469_s26 = int_to_ptr.vmem [resolvable:$true] %s5676_s26 }
 0x636   : > { %v3592_v33 = vmul.f32 %v3583_v38, %v3556_v8  ;;  %v3593_v45 = vmul.f32 %v3583_v38, %v3557_v30  ;;  %v3594_v50 = vmul.f32 %v3583_v38, %v3558_v54  ;;  %v3595_v46 = vmul.f32 %v3583_v38, %v3559_v44  ;;  %v10305_v54 = vld [vmem:[%s11626_s15] ss:$0 sm:$0xff]  ;;  %s11669_s15 = sld [smem:[#allocation41_spill]]  ;;  %p8172_p0 = scmp.lt.s32.totalorder %s11469_s26, %s8170_s6 }
 0x637   : > { %v3596_v31 = vmul.f32 %v3583_v38, %v3560_v25  ;;  %v3597_v61 = vmul.f32 %v3583_v38, %v3561_v28  ;;  %v3598_v37 = vmul.f32 %v3583_v38, %v3562_v60  ;;  %v3599_v16 = vmul.f32 %v3583_v38, %v3563_v19 }
 0x638   : > { %v3600_v3 = vmul.f32 %v3583_v38, %v3564_v5  ;;  %v3601_v22 = vmul.f32 %v3583_v38, %v3565_v53  ;;  %v3602_v41 = vmul.f32 %v3583_v38, %v3566_v4  ;;  %v10268_v0 = vmul.f32 %v3583_v38, %v3567_v43 }
 0x639   : > { %v10270_v56 = vmul.f32 %v3583_v38, %v3568_v29  ;;  %v10272_v63 = vmul.f32 %v3583_v38, %v3569_v10  ;;  %v10274_v27 = vmul.f32 %v3583_v38, %v3570_v9  ;;  %v10276_v42 = vmul.f32 %v3583_v38, %v3571_v18  ;;  %v978_v29 = vld [vmem:[#allocation12 + $0x170] sm:$0xff]  ;;  %v979_v10 = vld [vmem:[#allocation12 + $0x178] sm:$0xff] }
 0x63a   : > { %v10278_v12 = vmul.f32 %v3583_v38, %v3572_v57  ;;  %v10280_v26 = vmul.f32 %v3583_v38, %v3573_v6  ;;  %v10282_v23 = vmul.f32 %v3583_v38, %v3574_v52  ;;  %v10284_v59 = vmul.f32 %v3583_v38, %v3575_v13 }
 0x63b   : > { %v10286_v40 = vmul.f32 %v3583_v38, %v3576_v20  ;;  %v10288_v39 = vmul.f32 %v3583_v38, %v3577_v47  ;;  %v10290_v34 = vmul.f32 %v3583_v38, %v3578_v32  ;;  %v10292_v11 = vmul.f32 %v3583_v38, %v3579_v24  ;;  %v980_v38 = vld [vmem:[#allocation12 + $0x180] sm:$0xff]  ;;  %v981_v20 = vld [vmem:[#allocation12 + $0x188] sm:$0xff] }
 0x63c   : > { %v3622_v8 = vmul.f32 %v10297_v1, %v3584_v21  ;;  %v3623_v30 = vmul.f32 %v10297_v1, %v3585_v17  ;;  %v3624_v62 = vmul.f32 %v10297_v1, %v3586_v55  ;;  %v3625_v44 = vmul.f32 %v10297_v1, %v3587_v35 }
 0x63d   : > { %v3626_v25 = vmul.f32 %v10297_v1, %v3588_v49  ;;  %v3627_v28 = vmul.f32 %v10297_v1, %v3589_v58  ;;  %v3628_v51 = vmul.f32 %v10297_v1, %v3590_v7  ;;  %v3629_v5 = vmul.f32 %v10297_v1, %v3591_v14 }
 0x63e   : > { %v10312_v36 = vadd.f32 %v10305_v54, %v3622_v8  ;;  %v10315_v60 = vadd.f32 %v10305_v54, %v3623_v30  ;;  %v10318_v19 = vadd.f32 %v10305_v54, %v3624_v62  ;;  %v3630_v53 = vmul.f32 %v10297_v1, %v3592_v33 }
 0x63f   : > { %v3631_v4 = vmul.f32 %v10297_v1, %v3593_v45  ;;  %v10324_v43 = vadd.f32 %v10305_v54, %v3625_v44  ;;  %v3632_v15 = vmul.f32 %v10297_v1, %v3594_v50  ;;  %v3633_v9 = vmul.f32 %v10297_v1, %v3595_v46  ;;  %v982_v44 = vld [vmem:[#allocation12 + $0x190] sm:$0xff] }
 0x640   : > { %v3634_v18 = vmul.f32 %v10297_v1, %v3596_v31  ;;  %v10330_v57 = vadd.f32 %v10305_v54, %v3626_v25  ;;  %v3635_v2 = vmul.f32 %v10297_v1, %v3597_v61  ;;  %v3636_v6 = vmul.f32 %v10297_v1, %v3598_v37 }
 0x641   : > { %v10335_v52 = vadd.f32 %v10305_v54, %v3627_v28  ;;  %v10338_v13 = vadd.f32 %v10305_v54, %v3628_v51  ;;  %v5875_v47 = vmul.f32 -1.442695, %v10312_v36  ;;  %v5876_v32 = vmul.f32 -1.442695, %v10315_v60 }
 0x642   : > { %v5877_v24 = vmul.f32 -1.442695, %v10318_v19  ;;  %v6920_v21 = vpack.c.bf16 %v979_v10, %v978_v29  ;;  %v3637_v17 = vmul.f32 %v10297_v1, %v3599_v16  ;;  %v3638_v55 = vmul.f32 %v10297_v1, %v3600_v3  ;;  %v985_v29 = vld [vmem:[#allocation12 + $0x1a8] sm:$0xff] }
 0x643   : > { %v10346_v35 = vadd.f32 %v10305_v54, %v3629_v5  ;;  %v5878_v49 = vmul.f32 -1.442695, %v10324_v43  ;;  %v10350_v58 = vadd.f32 %v10305_v54, %v3630_v53  ;;  %7804 = vpow2.f32 %v5875_v47 }
 0x644   : > { %v5879_v7 = vmul.f32 -1.442695, %v10330_v57  ;;  %6921 = vmatpush1.bf16.msra.mxu1 %v6920_v21  ;;  %v6923_v14 = vpack.c.bf16 %v981_v20, %v980_v38  ;;  %v3639_v33 = vmul.f32 %v10297_v1, %v3601_v22  ;;  %v10355_v45 = vadd.f32 %v10305_v54, %v3631_v4  ;;  %v984_v4 = vld [vmem:[#allocation12 + $0x1a0] sm:$0xff]  ;;  %v986_v21 = vld [vmem:[#allocation12 + $0x1b0] sm:$0xff] }
 0x645   : > { %7806 = vpow2.f32 %v5876_v32  ;;  %v5880_v50 = vmul.f32 -1.442695, %v10335_v52  ;;  %6922 = vmatprep.subr.bf16.mxu1 %v11602_v48  ;;  %v3640_v46 = vmul.f32 %v10297_v1, %v3602_v41  ;;  %v10361_v31 = vadd.f32 %v10305_v54, %v3632_v15 }
 0x646   : > { %7808 = vpow2.f32 %v5877_v24  ;;  %v5881_v61 = vmul.f32 -1.442695, %v10338_v13  ;;  %v3641_v37 = vmul.f32 %v10297_v1, %v10268_v0  ;;  %v10367_v16 = vadd.f32 %v10305_v54, %v3633_v9 }
 0x647   : > { %7810 = vpow2.f32 %v5878_v49  ;;  %v5882_v3 = vmul.f32 -1.442695, %v10346_v35  ;;  %v3642_v22 = vmul.f32 %v10297_v1, %v10270_v56  ;;  %v10373_v41 = vadd.f32 %v10305_v54, %v3634_v18  ;;  %v983_v56 = vld [vmem:[#allocation12 + $0x198] sm:$0xff] }
 0x648   : > { %7812 = vpow2.f32 %v5879_v7  ;;  %v5883_v8 = vmul.f32 -1.442695, %v10350_v58  ;;  %6924 = vmatpush1.bf16.msra.mxu1 %v6923_v14  ;;  %v3643_v30 = vmul.f32 %v10297_v1, %v10272_v63  ;;  %v10379_v0 = vadd.f32 %v10305_v54, %v3635_v2 }
 0x649   : > { %7814 = vpow2.f32 %v5880_v50  ;;  %v5884_v62 = vmul.f32 -1.442695, %v10355_v45  ;;  %6925 = vmatprep.subr.bf16.mxu1 %v11602_v48  ;;  %v3644_v25 = vmul.f32 %v10297_v1, %v10274_v27  ;;  %v10386_v28 = vadd.f32 %v10305_v54, %v3636_v6 }
 0x64a   : > { %7816 = vpow2.f32 %v5881_v61  ;;  %v5885_v51 = vmul.f32 -1.442695, %v10361_v31  ;;  %v3645_v63 = vmul.f32 %v10297_v1, %v10276_v42  ;;  %v10392_v5 = vadd.f32 %v10305_v54, %v3637_v17  ;;  %v987_v17 = vld [vmem:[#allocation12 + $0x1b8] sm:$0xff] }
 0x64b   : > { %7818 = vpow2.f32 %v5882_v3  ;;  %v5886_v53 = vmul.f32 -1.442695, %v10367_v16  ;;  %v10396_v10 = vadd.f32 %v10305_v54, %v3638_v55  ;;  %v5887_v27 = vmul.f32 -1.442695, %v10373_v41 }
 0x64c   : > { %7820 = vpow2.f32 %v5883_v8  ;;  %v6926_v15 = vpack.c.bf16 %v983_v56, %v982_v44  ;;  %v3646_v9 = vmul.f32 %v10297_v1, %v10278_v12  ;;  %v10402_v42 = vadd.f32 %v10305_v54, %v3639_v33  ;;  %v989_v44 = vld [vmem:[#allocation12 + $0x1c8] sm:$0xff] }
 0x64d   : > { %7822 = vpow2.f32 %v5884_v62  ;;  %v5888_v18 = vmul.f32 -1.442695, %v10379_v0  ;;  %v10405_v2 = vpop.eup %7804  ;;  %v10408_v6 = vadd.f32 %v10305_v54, %v3640_v46  ;;  %v5889_v38 = vmul.f32 -1.442695, %v10386_v28  ;;  %v988_v62 = vld [vmem:[#allocation12 + $0x1c0] sm:$0xff] }
 0x64e   : > { %7824 = vpow2.f32 %v5885_v51  ;;  %6927 = vmatpush1.bf16.msra.mxu1 %v6926_v15  ;;  %v6929_v20 = vpack.c.bf16 %v985_v29, %v984_v4  ;;  %v3647_v12 = vmul.f32 %v10297_v1, %v10280_v26  ;;  %v10416_v32 = vadd.f32 %v10305_v54, %v3641_v37 }
 0x64f   : > { %v10411_v47 = vpop.eup %7806  ;;  %7826 = vpow2.f32 %v5886_v53  ;;  %v5890_v24 = vmul.f32 -1.442695, %v10392_v5  ;;  %6928 = vmatprep.subr.bf16.mxu1 %v11602_v48  ;;  %v3648_v49 = vmul.f32 %v10297_v1, %v10282_v23  ;;  %v10425_v7 = vadd.f32 %v10305_v54, %v3642_v22 }
 0x650   : > { %v10420_v55 = vpop.eup %7808  ;;  %7828 = vpow2.f32 %v5887_v27  ;;  %v5891_v26 = vmul.f32 -1.442695, %v10396_v10  ;;  %v3649_v33 = vmul.f32 %v10297_v1, %v10284_v59  ;;  %v10433_v50 = vadd.f32 %v10305_v54, %v3643_v30 }
 0x651   : > { %v10428_v14 = vpop.eup %7810  ;;  %7830 = vpow2.f32 %v5888_v18  ;;  %v5892_v46 = vmul.f32 -1.442695, %v10402_v42  ;;  %v10439_v23 = vadd.f32 %v10305_v54, %v3644_v25  ;;  %v5893_v37 = vmul.f32 -1.442695, %v10408_v6 }
 0x652   : > { %v10436_v61 = vpop.eup %7812  ;;  %7832 = vpow2.f32 %v5889_v38  ;;  %6930 = vmatpush1.bf16.msra.mxu1 %v6929_v20  ;;  %v6932_v3 = vpack.c.bf16 %v987_v17, %v986_v21  ;;  %v3650_v59 = vmul.f32 %v10297_v1, %v10286_v40  ;;  %v10447_v8 = vadd.f32 %v10305_v54, %v3645_v63 }
 0x653   : > { %v10442_v22 = vpop.eup %7814  ;;  %7834 = vpow2.f32 %v5890_v24  ;;  %v5894_v30 = vmul.f32 -1.442695, %v10416_v32  ;;  %6931 = vmatprep.subr.bf16.mxu1 %v11602_v48  ;;  %v3651_v25 = vmul.f32 %v10297_v1, %v10288_v39  ;;  %v10456_v51 = vadd.f32 %v10305_v54, %v3646_v9 }
 0x654   : > { %v10451_v56 = vpop.eup %7816  ;;  %7836 = vpow2.f32 %v5891_v26  ;;  %v5895_v40 = vmul.f32 -1.442695, %v10425_v7  ;;  %v3652_v53 = vmul.f32 %v10297_v1, %v10290_v34  ;;  %v10464_v4 = vadd.f32 %v10305_v54, %v3647_v12  ;;  %v991_v26 = vld [vmem:[#allocation12 + $0x1d8] sm:$0xff] }
 0x655   : > { %v10459_v63 = vpop.eup %7818  ;;  %7838 = vpow2.f32 %v5892_v46  ;;  %v5896_v29 = vmul.f32 -1.442695, %v10433_v50  ;;  %v10470_v39 = vadd.f32 %v10305_v54, %v3648_v49  ;;  %v5897_v15 = vmul.f32 -1.442695, %v10439_v23  ;;  %v990_v49 = vld [vmem:[#allocation12 + $0x1d0] sm:$0xff] }
 0x656   : > { %v10467_v27 = vpop.eup %7820  ;;  %7840 = vpow2.f32 %v5893_v37  ;;  %6933 = vmatpush1.bf16.msra.mxu1 %v6932_v3  ;;  %v6935_v9 = vpack.c.bf16 %v989_v44, %v988_v62  ;;  %v3653_v34 = vmul.f32 %v10297_v1, %v10292_v11  ;;  %v10478_v38 = vadd.f32 %v10305_v54, %v3649_v33 }
 0x657   : > { %v10473_v18 = vpop.eup %7822  ;;  %7842 = vpow2.f32 %v5894_v30  ;;  %v5898_v20 = vmul.f32 -1.442695, %v10447_v8  ;;  %6934 = vmatprep.subr.bf16.mxu1 %v11602_v48  ;;  %v10485_v24 = vadd.f32 %v10305_v54, %v3650_v59  ;;  %v5899_v21 = vmul.f32 -1.442695, %v10456_v51 }
 0x658   : > { %v10482_v12 = vpop.eup %7824  ;;  %7844 = vpow2.f32 %v5895_v40  ;;  %v10491_v11 = vadd.f32 %v10305_v54, %v3651_v25  ;;  %v5900_v1 = vmul.f32 -1.442695, %v10464_v4  ;;  %v10497_v46 = vadd.f32 %v10305_v54, %v3652_v53 }
 0x659   : > { %v10488_v17 = vpop.eup %7826  ;;  %7846 = vpow2.f32 %v5896_v29  ;;  %v5901_v37 = vmul.f32 -1.442695, %v10470_v39  ;;  %v6938_v3 = vpack.c.bf16 %v991_v26, %v990_v49  ;;  %v10503_v30 = vadd.f32 %v10305_v54, %v3653_v34  ;;  %v992_v49 = vld [vmem:[#allocation12 + $0x1e0] sm:$0xff]  ;;  %v993_v26 = vld [vmem:[#allocation12 + $0x1e8] sm:$0xff] }
 0x65a   : > { %v10494_v33 = vpop.eup %7828  ;;  %11627 = vst [vmem:[#allocation24_spill] sm:$0xff] %v10497_v46  ;;  %7848 = vpow2.f32 %v5897_v15  ;;  %6936 = vmatpush1.bf16.msra.mxu1 %v6935_v9  ;;  %v5902_v62 = vmul.f32 -1.442695, %v10478_v38  ;;  %v5903_v25 = vmul.f32 -1.442695, %v10485_v24 }
 0x65b   : > { %v10500_v59 = vpop.eup %7830  ;;  %11628 = vst [vmem:[#allocation25_spill] sm:$0xff] %v10503_v30  ;;  %7850 = vpow2.f32 %v5898_v20  ;;  %6937 = vmatprep.subr.bf16.mxu1 %v11602_v48  ;;  %v5904_v53 = vmul.f32 -1.442695, %v10491_v11  ;;  %v5905_v54 = vmul.f32 -1.442695, %v10497_v46  ;;  %v3788_v20 = vadd.f32 1.0, %v10405_v2 }
 0x65c   : > { %v10507_v44 = vpop.eup %7832  ;;  %7852 = vpow2.f32 %v5899_v21  ;;  %v5906_v9 = vmul.f32 -1.442695, %v10503_v30  ;;  %v3792_v2 = vadd.f32 1.0, %v10436_v61 }
 0x65d   : > { %v10510_v40 = vpop.eup %7834  ;;  %7854 = vpow2.f32 %v5900_v1  ;;  %v3789_v1 = vadd.f32 1.0, %v10411_v47 }
 0x65e   : > { %v10513_v29 = vpop.eup %7836  ;;  %7856 = vpow2.f32 %v5901_v37  ;;  %6939 = vmatpush1.bf16.msra.mxu1 %v6938_v3  ;;  %v3790_v3 = vadd.f32 1.0, %v10420_v55 }
 0x65f   : > { %v10516_v15 = vpop.eup %7838  ;;  %7858 = vpow2.f32 %v5902_v62  ;;  %6940 = vmatprep.subr.bf16.mxu1 %v11602_v48  ;;  %v6941_v62 = vpack.c.bf16 %v993_v26, %v992_v49  ;;  %v995_v26 = vld [vmem:[#allocation12 + $0x1f8] sm:$0xff] }
 0x660   : > { %v10520_v34 = vpop.eup %7840  ;;  %7860 = vpow2.f32 %v5903_v25  ;;  %v3791_v25 = vadd.f32 1.0, %v10428_v14  ;;  %v3795_v14 = vadd.f32 1.0, %v10459_v63 }
 0x661   : > { %v10523_v21 = vpop.eup %7842  ;;  %7862 = vpow2.f32 %v5904_v53  ;;  %v3793_v53 = vadd.f32 1.0, %v10442_v22  ;;  %v3797_v22 = vadd.f32 1.0, %v10473_v18 }
 0x662   : > { %v10526_v37 = vpop.eup %7844  ;;  %7864 = vpow2.f32 %v5905_v54  ;;  %6942 = vmatpush1.bf16.msra.mxu1 %v6941_v62  ;;  %v3794_v54 = vadd.f32 1.0, %v10451_v56  ;;  %v3798_v56 = vadd.f32 1.0, %v10482_v12 }
 0x663   : > { %v10529_v30 = vpop.eup %7846  ;;  %7866 = vpow2.f32 %v5906_v9  ;;  %6943 = vmatprep.subr.bf16.mxu1 %v11602_v48 }
 0x664   : > { %v10532_v46 = vpop.eup %7848  ;;  %7868 = vrcp.f32 %v3788_v20  ;;  %v3796_v20 = vadd.f32 1.0, %v10467_v27 }
 0x665   : > { %v10535_v47 = vpop.eup %7850  ;;  %7870 = vrcp.f32 %v3789_v1  ;;  %v994_v1 = vld [vmem:[#allocation12 + $0x1f0] sm:$0xff] }
 0x666   : > { %v10539_v55 = vpop.eup %7852  ;;  %7872 = vrcp.f32 %v3790_v3  ;;  %v6944_v3 = vpack.c.bf16 %v995_v26, %v994_v1 }
 0x667   : > { %v10542_v9 = vpop.eup %7854  ;;  %7874 = vrcp.f32 %v3791_v25  ;;  %v3799_v25 = vadd.f32 1.0, %v10488_v17  ;;  %v3803_v17 = vadd.f32 1.0, %v10510_v40  ;;  %v3806_v40 = vadd.f32 1.0, %v10520_v34 }
 0x668   : > { %v10545_v61 = vpop.eup %7856  ;;  %7876 = vrcp.f32 %v3792_v2  ;;  %v3800_v2 = vadd.f32 1.0, %v10494_v33  ;;  %6945 = vmatpush1.bf16.msra.mxu1 %v6944_v3 }
 0x669   : > { %v10548_v49 = vpop.eup %7858  ;;  %7878 = vrcp.f32 %v3793_v53  ;;  %v3801_v53 = vadd.f32 1.0, %v10500_v59  ;;  %6946 = vmatprep.subr.bf16.mxu1 %v11602_v48 }
 0x66a   : > { %v10551_v62 = vpop.eup %7860  ;;  %7880 = vrcp.f32 %v3794_v54  ;;  %v3802_v54 = vadd.f32 1.0, %v10507_v44 }
 0x66b   : > { %v10554_v63 = vpop.eup %7862  ;;  %7882 = vrcp.f32 %v3795_v14 }
 0x66c   : > { %v10557_v27 = vpop.eup %7864  ;;  %7884 = vrcp.f32 %v3796_v20  ;;  %v3804_v20 = vadd.f32 1.0, %v10513_v29 }
 0x66d   : > { %v10560_v18 = vpop.eup %7866  ;;  %7886 = vrcp.f32 %v3797_v22  ;;  %v3805_v22 = vadd.f32 1.0, %v10516_v15 }
 0x66e   : > { %v7869_v12 = vpop.eup %7868  ;;  %7888 = vrcp.f32 %v3798_v56  ;;  %v3808_v56 = vadd.f32 1.0, %v10526_v37 }
 0x66f   : > { %v7871_v1 = vpop.eup %7870  ;;  %7890 = vrcp.f32 %v3799_v25  ;;  %v3884_v14 = vmul.f32 %v7869_v12, %v10312_v36  ;;  %v3809_v25 = vadd.f32 1.0, %v10529_v30  ;;  %v3812_v12 = vadd.f32 1.0, %v10539_v55 }
 0x670   : > { %v7873_v33 = vpop.eup %7872  ;;  %7892 = vrcp.f32 %v3800_v2  ;;  %v3885_v26 = vmul.f32 %v7871_v1, %v10315_v60  ;;  %v3807_v60 = vadd.f32 1.0, %v10523_v21  ;;  %v3810_v2 = vadd.f32 1.0, %v10532_v46 }
 0x671   : > { %v7875_v59 = vpop.eup %7874  ;;  %7894 = vrcp.f32 %v3801_v53  ;;  %v10571_v3 = vmul.f32 %v7873_v33, %v10318_v19  ;;  %3916 = vst [vmem:[#allocation2 + $0x28] sm:$0xff] %v3884_v14  ;;  %4316 = vmatprep.mubr.f32.mxu1 %v3884_v14  ;;  %v3811_v53 = vadd.f32 1.0, %v10535_v47  ;;  %v3813_v47 = vadd.f32 1.0, %v10542_v9 }
 0x672   : > { %v7877_v44 = vpop.eup %7876  ;;  %7896 = vrcp.f32 %v3802_v54  ;;  %v10575_v36 = vmul.f32 %v7875_v59, %v10324_v43  ;;  %3917 = vst [vmem:[#allocation2 + $0x30] sm:$0xff] %v3885_v26  ;;  %v3814_v1 = vadd.f32 1.0, %v10545_v61  ;;  %v3815_v9 = vadd.f32 1.0, %v10548_v49 }
 0x673   : > { %v7879_v29 = vpop.eup %7878  ;;  %7898 = vrcp.f32 %v3803_v17  ;;  %v10579_v15 = vmul.f32 %v7877_v44, %v10330_v57  ;;  %3918 = vst [vmem:[#allocation2 + $0x48] sm:$0xff] %v10571_v3 }
 0x674   : > { %v7881_v19 = vpop.eup %7880  ;;  %7900 = vrcp.f32 %v3804_v20  ;;  %v10584_v34 = vmul.f32 %v7879_v29, %v10335_v52  ;;  %3919 = vst [vmem:[#allocation2 + $0x50] sm:$0xff] %v10575_v36 }
 0x675   : > { %v7883_v43 = vpop.eup %7882  ;;  %7902 = vrcp.f32 %v3805_v22  ;;  %v10589_v21 = vmul.f32 %v7881_v19, %v10338_v13  ;;  %3920 = vst [vmem:[#allocation2 + $0x68] sm:$0xff] %v10579_v15  ;;  %v3818_v22 = vadd.f32 1.0, %v10557_v27 }
 0x676   : > { %v7885_v57 = vpop.eup %7884  ;;  %7904 = vrcp.f32 %v3806_v40  ;;  %v10594_v37 = vmul.f32 %v7883_v43, %v10346_v35  ;;  %3921 = vst [vmem:[#allocation2 + $0x70] sm:$0xff] %v10584_v34 }
 0x677   : > { %v7887_v52 = vpop.eup %7886  ;;  %7906 = vrcp.f32 %v3807_v60  ;;  %v10599_v30 = vmul.f32 %v7885_v57, %v10350_v58  ;;  %3922 = vst [vmem:[#allocation2 + $0x88] sm:$0xff] %v10589_v21 }
 0x678   : > { %v7889_v13 = vpop.eup %7888  ;;  %7908 = vrcp.f32 %v3808_v56  ;;  %v10604_v46 = vmul.f32 %v7887_v52, %v10355_v45  ;;  %3923 = vst [vmem:[#allocation2 + $0x90] sm:$0xff] %v10594_v37  ;;  %v10607_v35 = vld [vmem:[#allocation2 + $0x27] sm:$0xff] }
 0x679   : > { %v7891_v54 = vpop.eup %7890  ;;  %7910 = vrcp.f32 %v3809_v25  ;;  %v10611_v58 = vmul.f32 %v7889_v13, %v10361_v31  ;;  %3924 = vst [vmem:[#allocation2 + $0xa8] sm:$0xff] %v10599_v30  ;;  %4317 = vmatmul.mubr.f32.gmra.mrb[44].mxu1 %v10607_v35  ;;  %v10635_v49 = vld [vmem:[#allocation2 + $0x2f] sm:$0xff] }
 0x67a   : > { %v7893_v55 = vpop.eup %7892  ;;  %7912 = vrcp.f32 %v3810_v2  ;;  %v10617_v45 = vmul.f32 %v7891_v54, %v10367_v16  ;;  %3925 = vst [vmem:[#allocation2 + $0xb0] sm:$0xff] %v10604_v46  ;;  %4321 = vmatprep.mubr.f32.mxu1 %v3885_v26  ;;  %v3816_v16 = vadd.f32 1.0, %v10551_v62  ;;  %v3817_v26 = vadd.f32 1.0, %v10554_v63  ;;  %v10664_v60 = vld [vmem:[#allocation2 + $0x47] sm:$0xff] }
 0x67b   : > { %v7895_v17 = vpop.eup %7894  ;;  %7914 = vrcp.f32 %v3811_v53  ;;  %v10622_v31 = vmul.f32 %v7893_v55, %v10373_v41  ;;  %3926 = vst [vmem:[#allocation2 + $0xc8] sm:$0xff] %v10611_v58  ;;  %v10625_v14 = vld [vmem:[#allocation2 + $0x49] sm:$0xff]  ;;  %v10627_v33 = vld [vmem:[#allocation2 + $0x51] sm:$0xff]  ;;  %v3819_v63 = vadd.f32 1.0, %v10560_v18 }
 0x67c   : > { %v7897_v61 = vpop.eup %7896  ;;  %7916 = vrcp.f32 %v3812_v12  ;;  %v10631_v20 = vmul.f32 %v7895_v17, %v10379_v0  ;;  %3927 = vst [vmem:[#allocation2 + $0xd0] sm:$0xff] %v10617_v45  ;;  %6396 = vmatprep.mubr.f32.mxu0 %v10625_v14  ;;  %v10690_v57 = vld [vmem:[#allocation2 + $0x4f] sm:$0xff]  ;;  %v10716_v54 = vld [vmem:[#allocation2 + $0x67] sm:$0xff] }
 0x67d   : > { %v7899_v41 = vpop.eup %7898  ;;  %7918 = vrcp.f32 %v3813_v47  ;;  %v10639_v59 = vmul.f32 %v7897_v61, %v10386_v28  ;;  %3928 = vst [vmem:[#allocation2 + $0xe8] sm:$0xff] %v10622_v31  ;;  %6397 = vmatmul.mubr.f32.vlgmr.msra.gmra.mrb[66].mxu0 %v10627_v33  ;;  %v10643_v62 = vld [vmem:[#allocation2 + $0x69] sm:$0xff]  ;;  %4322 = vmatmul.mubr.f32.gmra.mrb[46].mxu1 %v10635_v49  ;;  %v10662_v29 = vld [vmem:[#allocation2 + $0x71] sm:$0xff] }
 0x67e   : > { %v7901_v0 = vpop.eup %7900  ;;  %7920 = vrcp.f32 %v3814_v1  ;;  %v10648_v44 = vmul.f32 %v7899_v41, %v10392_v5  ;;  %3929 = vst [vmem:[#allocation2 + $0xf0] sm:$0xff] %v10631_v20  ;;  %6399 = vmatprep.mubr.f32.mxu0 %v10643_v62  ;;  %4326 = vmatprep.mubr.f32.mxu1 %v10571_v3  ;;  %v10742_v61 = vld [vmem:[#allocation2 + $0x6f] sm:$0xff]  ;;  %v11629_v41 = vld [vmem:[#allocation24_spill] sm:$0xff] }
 0x67f   : > { %v7903_v28 = vpop.eup %7902  ;;  %7922 = vrcp.f32 %v3815_v9  ;;  %v10655_v40 = vmul.f32 %v7901_v0, %v10396_v10  ;;  %3930 = vst [vmem:[#allocation2 + $0x108] sm:$0xff] %v10639_v59  ;;  %v10671_v10 = vld [vmem:[#allocation2 + $0x89] sm:$0xff] }
 0x680   : > { %v7905_v27 = vpop.eup %7904  ;;  %7924 = vrcp.f32 %v3816_v16  ;;  %v10659_v5 = vmul.f32 %v7903_v28, %v10402_v42  ;;  %3931 = vst [vmem:[#allocation2 + $0x110] sm:$0xff] %v10648_v44 }
 0x681   : > { %v7907_v3 = vpop.eup %7906  ;;  %7926 = vrcp.f32 %v3817_v26  ;;  %v10667_v18 = vmul.f32 %v7905_v27, %v10408_v6  ;;  %3932 = vst [vmem:[#allocation2 + $0x128] sm:$0xff] %v10655_v40  ;;  %6400 = vmatmul.mubr.f32.gmra.mrb[68].mxu0 %v10662_v29  ;;  %4327 = vmatmul.mubr.f32.gmra.mrb[48].mxu1 %v10664_v60  ;;  %v10766_v27 = vld [vmem:[#allocation2 + $0x8f] sm:$0xff] }
 0x682   : > { %v7909_v42 = vpop.eup %7908  ;;  %7928 = vrcp.f32 %v3818_v22  ;;  %v10675_v19 = vmul.f32 %v7907_v3, %v10416_v32  ;;  %3933 = vst [vmem:[#allocation2 + $0x130] sm:$0xff] %v10659_v5  ;;  %6402 = vmatprep.mubr.f32.mxu0 %v10671_v10  ;;  %4331 = vmatprep.mubr.f32.mxu1 %v10575_v36  ;;  %v10688_v32 = vld [vmem:[#allocation2 + $0x91] sm:$0xff]  ;;  %v10756_v22 = vld [vmem:[#allocation2 + $0x87] sm:$0xff] }
 0x683   : > { %v7911_v6 = vpop.eup %7910  ;;  %7930 = vrcp.f32 %v3819_v63  ;;  %v10681_v56 = vmul.f32 %v7909_v42, %v10425_v7  ;;  %3934 = vst [vmem:[#allocation2 + $0x148] sm:$0xff] %v10667_v18  ;;  %v10697_v7 = vld [vmem:[#allocation2 + $0xa9] sm:$0xff] }
 0x684   : > { %v7913_v43 = vpop.eup %7912  ;;  %v10685_v25 = vmul.f32 %v7911_v6, %v10433_v50  ;;  %3935 = vst [vmem:[#allocation2 + $0x150] sm:$0xff] %v10675_v19  ;;  %v10776_v42 = vld [vmem:[#allocation2 + $0xa7] sm:$0xff] }
 0x685   : > { %v7915_v2 = vpop.eup %7914  ;;  %v10693_v36 = vmul.f32 %v7913_v43, %v10439_v23  ;;  %3936 = vst [vmem:[#allocation2 + $0x168] sm:$0xff] %v10681_v56  ;;  %6403 = vmatmul.mubr.f32.gmra.mrb[70].mxu0 %v10688_v32  ;;  %4332 = vmatmul.mubr.f32.gmra.mrb[50].mxu1 %v10690_v57  ;;  %v10754_v0 = vld [vmem:[#allocation2 + $0xf1] sm:$0xff] }
 0x686   : > { %v7917_v50 = vpop.eup %7916  ;;  %v10701_v52 = vmul.f32 %v7915_v2, %v10447_v8  ;;  %3937 = vst [vmem:[#allocation2 + $0x170] sm:$0xff] %v10685_v25  ;;  %6405 = vmatprep.mubr.f32.mxu0 %v10697_v7  ;;  %4336 = vmatprep.mubr.f32.mxu1 %v10579_v15  ;;  %v10714_v8 = vld [vmem:[#allocation2 + $0xb1] sm:$0xff] }
 0x687   : > { %v7919_v23 = vpop.eup %7918  ;;  %v10707_v53 = vmul.f32 %v7917_v50, %v10456_v51  ;;  %3938 = vst [vmem:[#allocation2 + $0x188] sm:$0xff] %v10693_v36  ;;  %v10723_v51 = vld [vmem:[#allocation2 + $0xc9] sm:$0xff]  ;;  %v10764_v63 = vld [vmem:[#allocation2 + $0x111] sm:$0xff] }
 0x688   : > { %v7921_v13 = vpop.eup %7920  ;;  %v10711_v12 = vmul.f32 %v7919_v23, %v10464_v4  ;;  %3939 = vst [vmem:[#allocation2 + $0x190] sm:$0xff] %v10701_v52  ;;  %v10759_v28 = vld [vmem:[#allocation2 + $0x109] sm:$0xff] }
 0x689   : > { %v7923_v47 = vpop.eup %7922  ;;  %v10719_v55 = vmul.f32 %v7921_v13, %v10470_v39  ;;  %3940 = vst [vmem:[#allocation2 + $0x1a8] sm:$0xff] %v10707_v53  ;;  %6406 = vmatmul.mubr.f32.gmra.mrb[72].mxu0 %v10714_v8  ;;  %4337 = vmatmul.mubr.f32.gmra.mrb[52].mxu1 %v10716_v54  ;;  %v10774_v3 = vld [vmem:[#allocation2 + $0x131] sm:$0xff]  ;;  %v10796_v50 = vld [vmem:[#allocation2 + $0xc7] sm:$0xff] }
 0x68a   : > { %v7925_v4 = vpop.eup %7924  ;;  %v10727_v15 = vmul.f32 %v7923_v47, %v10478_v38  ;;  %3941 = vst [vmem:[#allocation2 + $0x1b0] sm:$0xff] %v10711_v12  ;;  %6408 = vmatprep.mubr.f32.mxu0 %v10723_v51  ;;  %4341 = vmatprep.mubr.f32.mxu1 %v10584_v34  ;;  %v10740_v38 = vld [vmem:[#allocation2 + $0xd1] sm:$0xff]  ;;  %v11630_v34 = vld [vmem:[#allocation25_spill] sm:$0xff] }
 0x68b   : > { %v7927_v39 = vpop.eup %7926  ;;  %v10733_v1 = vmul.f32 %v7925_v4, %v10485_v24  ;;  %3942 = vst [vmem:[#allocation2 + $0x1c8] sm:$0xff] %v10719_v55  ;;  %v10747_v24 = vld [vmem:[#allocation2 + $0xe9] sm:$0xff]  ;;  %v10784_v6 = vld [vmem:[#allocation2 + $0x151] sm:$0xff] }
 0x68c   : > { %v7929_v17 = vpop.eup %7928  ;;  %v10737_v9 = vmul.f32 %v7927_v39, %v10491_v11  ;;  %3943 = vst [vmem:[#allocation2 + $0x1d0] sm:$0xff] %v10727_v15  ;;  %v10786_v43 = vld [vmem:[#allocation2 + $0xaf] sm:$0xff]  ;;  %v10816_v4 = vld [vmem:[#allocation2 + $0xe7] sm:$0xff] }
 0x68d   : > { %v7931_v16 = vpop.eup %7930  ;;  %v3914_v26 = vmul.f32 %v7929_v17, %v11629_v41  ;;  %3944 = vst [vmem:[#allocation2 + $0x1e8] sm:$0xff] %v10733_v1  ;;  %6409 = vmatmul.mubr.f32.gmra.mrb[74].mxu0 %v10740_v38  ;;  %4342 = vmatmul.mubr.f32.gmra.mrb[54].mxu1 %v10742_v61  ;;  %v10794_v2 = vld [vmem:[#allocation2 + $0x171] sm:$0xff]  ;;  %v10836_v41 = vld [vmem:[#allocation2 + $0x107] sm:$0xff] }
 0x68e   : > { %v3915_v11 = vmul.f32 %v7931_v16, %v11630_v34  ;;  %3945 = vst [vmem:[#allocation2 + $0x1f0] sm:$0xff] %v10737_v9  ;;  %6411 = vmatprep.mubr.f32.mxu0 %v10747_v24  ;;  %4346 = vmatprep.mubr.f32.mxu1 %v10589_v21  ;;  %v10769_v21 = vld [vmem:[#allocation2 + $0x129] sm:$0xff] }
 0x68f   : > { %3946 = vst [vmem:[#allocation2 + $0x208] sm:$0xff] %v3914_v26  ;;  %v10804_v23 = vld [vmem:[#allocation2 + $0x191] sm:$0xff] }
 0x690   : > { %3947 = vst [vmem:[#allocation2 + $0x210] sm:$0xff] %v3915_v11  ;;  %v10806_v13 = vld [vmem:[#allocation2 + $0xcf] sm:$0xff] }
 0x691   : > { %6412 = vmatmul.mubr.f32.gmra.mrb[76].mxu0 %v10754_v0  ;;  %4347 = vmatmul.mubr.f32.gmra.mrb[56].mxu1 %v10756_v22  ;;  %v10814_v47 = vld [vmem:[#allocation2 + $0x1b1] sm:$0xff] }
 0x692   : > { %6414 = vmatprep.mubr.f32.mxu0 %v10759_v28  ;;  %4351 = vmatprep.mubr.f32.mxu1 %v10594_v37  ;;  %v10779_v37 = vld [vmem:[#allocation2 + $0x149] sm:$0xff] }
 0x693   : > { %v10824_v39 = vld [vmem:[#allocation2 + $0x1d1] sm:$0xff] }
 0x694   : > { %11632 = vst [vmem:[#allocation27_spill] sm:$0xff] %v10824_v39  ;;  %v10826_v17 = vld [vmem:[#allocation2 + $0xef] sm:$0xff] }
 0x695   : > { %6415 = vmatmul.mubr.f32.gmra.mrb[78].mxu0 %v10764_v63  ;;  %4352 = vmatmul.mubr.f32.gmra.mrb[58].mxu1 %v10766_v27  ;;  %v10834_v16 = vld [vmem:[#allocation2 + $0x1f1] sm:$0xff] }
 0x696   : > { %6417 = vmatprep.mubr.f32.mxu0 %v10769_v21  ;;  %4356 = vmatprep.mubr.f32.mxu1 %v10599_v30  ;;  %v10789_v30 = vld [vmem:[#allocation2 + $0x169] sm:$0xff]  ;;  %11634 = vst [vmem:[#allocation29_spill] sm:$0xff] %v10834_v16 }
 0x697   : > { %v4233_v26 = vld [vmem:[#allocation2 + $0x211] sm:$0xff] }
 0x698   : > { %v10841_v34 = vld [vmem:[#allocation2 + $0x10f] sm:$0xff] }
 0x699   : > { %6418 = vmatmul.mubr.f32.gmra.mrb[80].mxu0 %v10774_v3  ;;  %4357 = vmatmul.mubr.f32.gmra.mrb[60].mxu1 %v10776_v42  ;;  %v10849_v11 = vld [vmem:[#allocation2 + $0x12f] sm:$0xff] }
 0x69a   : > { %6420 = vmatprep.mubr.f32.mxu0 %v10779_v37  ;;  %4361 = vmatprep.mubr.f32.mxu1 %v10604_v46  ;;  %v10799_v46 = vld [vmem:[#allocation2 + $0x189] sm:$0xff] }
 0x69d   : > { %6421 = vmatmul.mubr.f32.gmra.mrb[82].mxu0 %v10784_v6  ;;  %4362 = vmatmul.mubr.f32.gmra.mrb[62].mxu1 %v10786_v43 }
 0x69e   : > { %6423 = vmatprep.mubr.f32.mxu0 %v10789_v30  ;;  %4366 = vmatprep.mubr.f32.mxu1 %v10611_v58  ;;  %v10809_v58 = vld [vmem:[#allocation2 + $0x1a9] sm:$0xff] }
 0x6a1   : > { %6424 = vmatmul.mubr.f32.gmra.mrb[84].mxu0 %v10794_v2  ;;  %4367 = vmatmul.mubr.f32.gmra.mrb[64].mxu1 %v10796_v50 }
 0x6a2   : > { %6426 = vmatprep.mubr.f32.mxu0 %v10799_v46  ;;  %4371 = vmatprep.mubr.f32.mxu1 %v10617_v45  ;;  %v10819_v45 = vld [vmem:[#allocation2 + $0x1c9] sm:$0xff] }
 0x6a3   : > { %11631 = vst [vmem:[#allocation26_spill] sm:$0xff] %v10819_v45 }
 0x6a5   : > { %6427 = vmatmul.mubr.f32.gmra.mrb[86].mxu0 %v10804_v23  ;;  %4372 = vmatmul.mubr.f32.gmra.mrb[66].mxu1 %v10806_v13 }
 0x6a6   : > { %6429 = vmatprep.mubr.f32.mxu0 %v10809_v58  ;;  %4376 = vmatprep.mubr.f32.mxu1 %v10622_v31  ;;  %v10829_v31 = vld [vmem:[#allocation2 + $0x1e9] sm:$0xff] }
 0x6a7   : > { %11633 = vst [vmem:[#allocation28_spill] sm:$0xff] %v10829_v31 }
 0x6a9   : > { %6430 = vmatmul.mubr.f32.gmra.mrb[88].mxu0 %v10814_v47  ;;  %4377 = vmatmul.mubr.f32.gmra.mrb[68].mxu1 %v10816_v4 }
 0x6aa   : > { %6432 = vmatprep.mubr.f32.mxu0 %v10819_v45  ;;  %4381 = vmatprep.mubr.f32.mxu1 %v10631_v20  ;;  %v4232_v20 = vld [vmem:[#allocation2 + $0x209] sm:$0xff] }
 0x6ad   : > { %6433 = vmatmul.mubr.f32.gmra.mrb[90].mxu0 %v10824_v39  ;;  %4382 = vmatmul.mubr.f32.gmra.mrb[70].mxu1 %v10826_v17  ;;  %v999_v39 = vld [vmem:[#allocation12 + $0x218] sm:$0xff] }
 0x6ae   : > { %6435 = vmatprep.mubr.f32.mxu0 %v10829_v31  ;;  %4386 = vmatprep.mubr.f32.mxu1 %v10639_v59  ;;  %v10845_v59 = vld [vmem:[#allocation2 + $0x127] sm:$0xff]  ;;  %v998_v31 = vld [vmem:[#allocation12 + $0x210] sm:$0xff] }
 0x6af   : > { %v6950_v45 = vpack.c.bf16 %v999_v39, %v998_v31  ;;  %v1004_v39 = vld [vmem:[#allocation12 + $0x240] sm:$0xff]  ;;  %v1005_v31 = vld [vmem:[#allocation12 + $0x248] sm:$0xff] }
 0x6b1   : > { %6436 = vmatmul.mubr.f32.gmra.mrb[92].mxu0 %v10834_v16  ;;  %4387 = vmatmul.mubr.f32.gmra.mrb[72].mxu1 %v10836_v41 }
 0x6b2   : > { %6438 = vmatprep.mubr.f32.mxu0 %v4232_v20  ;;  %4391 = vmatprep.mubr.f32.mxu1 %v10648_v44  ;;  %v10853_v44 = vld [vmem:[#allocation2 + $0x147] sm:$0xff]  ;;  %v10857_v20 = vld [vmem:[#allocation2 + $0x14f] sm:$0xff] }
 0x6b5   : > { %6439 = vmatmul.mubr.f32.gmra.mrb[94].mxu0 %v4233_v26  ;;  %4392 = vmatmul.mubr.f32.gmra.mrb[74].mxu1 %v10841_v34  ;;  %v10897_v26 = vld [vmem:[#allocation2 + $0x1ef] sm:$0xff] }
 0x6b6   : > { %4396 = vmatprep.mubr.f32.mxu1 %v10655_v40  ;;  %v10861_v40 = vld [vmem:[#allocation2 + $0x167] sm:$0xff]  ;;  %11636 = vst [vmem:[#allocation21_spill] sm:$0xff] %v10897_v26 }
 0x6b9   : > { %4397 = vmatmul.mubr.f32.gmra.mrb[76].mxu1 %v10845_v59 }
 0x6ba   : > { %4401 = vmatprep.mubr.f32.mxu1 %v10659_v5  ;;  %v10865_v5 = vld [vmem:[#allocation2 + $0x16f] sm:$0xff] }
 0x6bd   : > { %4402 = vmatmul.mubr.f32.gmra.mrb[78].mxu1 %v10849_v11 }
 0x6be   : > { %4406 = vmatprep.mubr.f32.mxu1 %v10667_v18  ;;  %v10869_v18 = vld [vmem:[#allocation2 + $0x187] sm:$0xff] }
 0x6c1   : > { %4407 = vmatmul.mubr.f32.gmra.mrb[80].mxu1 %v10853_v44 }
 0x6c2   : > { %4411 = vmatprep.mubr.f32.mxu1 %v10675_v19  ;;  %v10873_v19 = vld [vmem:[#allocation2 + $0x18f] sm:$0xff] }
 0x6c5   : > { %4412 = vmatmul.mubr.f32.gmra.mrb[82].mxu1 %v10857_v20 }
 0x6c6   : > { %4416 = vmatprep.mubr.f32.mxu1 %v10681_v56  ;;  %v10877_v56 = vld [vmem:[#allocation2 + $0x1a7] sm:$0xff] }
 0x6c9   : > { %4417 = vmatmul.mubr.f32.gmra.mrb[84].mxu1 %v10861_v40 }
 0x6ca   : > { %4421 = vmatprep.mubr.f32.mxu1 %v10685_v25  ;;  %v10881_v25 = vld [vmem:[#allocation2 + $0x1af] sm:$0xff] }
 0x6cd   : > { %4422 = vmatmul.mubr.f32.gmra.mrb[86].mxu1 %v10865_v5 }
 0x6ce   : > { %4426 = vmatprep.mubr.f32.mxu1 %v10693_v36  ;;  %v10885_v36 = vld [vmem:[#allocation2 + $0x1c7] sm:$0xff] }
 0x6d1   : > { %4427 = vmatmul.mubr.f32.gmra.mrb[88].mxu1 %v10869_v18 }
 0x6d2   : > { %4431 = vmatprep.mubr.f32.mxu1 %v10701_v52  ;;  %v10889_v52 = vld [vmem:[#allocation2 + $0x1cf] sm:$0xff] }
 0x6d5   : > { %4432 = vmatmul.mubr.f32.gmra.mrb[90].mxu1 %v10873_v19 }
 0x6d6   : > { %4436 = vmatprep.mubr.f32.mxu1 %v10707_v53  ;;  %v10893_v53 = vld [vmem:[#allocation2 + $0x1e7] sm:$0xff] }
 0x6d7   : > { %11635 = vst [vmem:[#allocation31_spill] sm:$0xff] %v10893_v53 }
 0x6d9   : > { %4437 = vmatmul.mubr.f32.gmra.mrb[92].mxu1 %v10877_v56 }
 0x6da   : > { %4441 = vmatprep.mubr.f32.mxu1 %v10711_v12  ;;  %v996_v12 = vld [vmem:[#allocation12 + $0x200] sm:$0xff] }
 0x6dd   : > { %4442 = vmatmul.mubr.f32.gmra.mrb[94].mxu1 %v10881_v25 }
 0x6de   : > { %4446 = vmatprep.mubr.f32.mxu1 %v10719_v55  ;;  %v997_v55 = vld [vmem:[#allocation12 + $0x208] sm:$0xff] }
 0x6df   : > { %v6947_v16 = vpack.c.bf16 %v997_v55, %v996_v12  ;;  %v1003_v12 = vld [vmem:[#allocation12 + $0x238] sm:$0xff]  ;;  %v10905_v55 = vld [vmem:[#allocation2 + $0x29] sm:$0xff] }
 0x6e1   : > { %4447 = vmatmul.mubr.f32.gmra.mrb[96].mxu1 %v10885_v36 }
 0x6e2   : > { %4451 = vmatprep.mubr.f32.mxu1 %v10727_v15  ;;  %v4012_v15 = vld [vmem:[#allocation2 + $0x9] sm:$0xff] }
 0x6e5   : > { %4452 = vmatmul.mubr.f32.gmra.mrb[98].mxu1 %v10889_v52 }
 0x6e6   : > { %4456 = vmatprep.mubr.f32.mxu1 %v10733_v1  ;;  %v4013_v1 = vld [vmem:[#allocation2 + $0x11] sm:$0xff] }
 0x6e9   : > { %4457 = vmatmul.mubr.f32.gmra.mrb[100].mxu1 %v10893_v53  ;;  %v1001_v53 = vld [vmem:[#allocation12 + $0x228] sm:$0xff] }
 0x6ea   : > { %4461 = vmatprep.mubr.f32.mxu1 %v10737_v9  ;;  %v1000_v9 = vld [vmem:[#allocation12 + $0x220] sm:$0xff] }
 0x6ed   : > { %4462 = vmatmul.mubr.f32.gmra.mrb[102].mxu1 %v10897_v26  ;;  %v6953_v26 = vpack.c.bf16 %v1001_v53, %v1000_v9  ;;  %v1007_v53 = vld [vmem:[#allocation12 + $0x258] sm:$0xff] }
 0x6ee   : > { %4531 = vmatprep.mubr.f32.mxu1 %v10607_v35  ;;  %v1002_v35 = vld [vmem:[#allocation12 + $0x230] sm:$0xff]  ;;  %v1011_v9 = vld [vmem:[#allocation12 + $0x278] sm:$0xff] }
 0x6f1   : > { %4532 = vmatmul.mubr.f32.vlgmr.msra.gmra.mrb[40].mxu1 %v4012_v15  ;;  %v1009_v15 = vld [vmem:[#allocation12 + $0x268] sm:$0xff] }
 0x6f2   : > { %6948 = vmatpush1.bf16.msra.mxu1 %v6947_v16  ;;  %4536 = vmatprep.mubr.f32.mxu1 %v10635_v49  ;;  %v6956_v49 = vpack.c.bf16 %v1003_v12, %v1002_v35  ;;  %v10910_v16 = vld [vmem:[#allocation2 + $0x31] sm:$0xff]  ;;  %v1012_v35 = vld [vmem:[#allocation12 + $0x280] sm:$0xff]  ;;  %v1013_v12 = vld [vmem:[#allocation12 + $0x288] sm:$0xff] }
 0x6f3   : > { %6949 = vmatprep.subr.bf16.mxu1 %v11602_v48 }
 0x6f5   : > { %4537 = vmatmul.mubr.f32.gmra.mrb[42].mxu1 %v4013_v1  ;;  %v1010_v1 = vld [vmem:[#allocation12 + $0x270] sm:$0xff] }
 0x6f6   : > { %4541 = vmatprep.mubr.f32.mxu1 %v10664_v60  ;;  %6951 = vmatpush1.bf16.msra.mxu1 %v6950_v45  ;;  %v6959_v60 = vpack.c.bf16 %v1005_v31, %v1004_v39  ;;  %v1006_v45 = vld [vmem:[#allocation12 + $0x250] sm:$0xff]  ;;  %v1015_v39 = vld [vmem:[#allocation12 + $0x298] sm:$0xff]  ;;  %v1016_v31 = vld [vmem:[#allocation12 + $0x2a0] sm:$0xff] }
 0x6f7   : > { %6952 = vmatprep.subr.bf16.mxu1 %v11602_v48 }
 0x6f9   : > { %4542 = vmatmul.mubr.f32.gmra.mrb[44].mxu1 %v10905_v55 }
 0x6fa   : > { %4546 = vmatprep.mubr.f32.mxu1 %v10690_v57  ;;  %6954 = vmatpush1.bf16.msra.mxu1 %v6953_v26  ;;  %v6962_v57 = vpack.c.bf16 %v1007_v53, %v1006_v45  ;;  %v1008_v26 = vld [vmem:[#allocation12 + $0x260] sm:$0xff]  ;;  %v1018_v45 = vld [vmem:[#allocation12 + $0x2b0] sm:$0xff]  ;;  %v1019_v53 = vld [vmem:[#allocation12 + $0x2b8] sm:$0xff] }
 0x6fb   : > { %6955 = vmatprep.subr.bf16.mxu1 %v11602_v48 }
 0x6fd   : > { %4547 = vmatmul.mubr.f32.gmra.mrb[46].mxu1 %v10910_v16 }
 0x6fe   : > { %4551 = vmatprep.mubr.f32.mxu1 %v10716_v54  ;;  %6957 = vmatpush1.bf16.msra.mxu1 %v6956_v49  ;;  %v6965_v54 = vpack.c.bf16 %v1009_v15, %v1008_v26  ;;  %v1014_v49 = vld [vmem:[#allocation12 + $0x290] sm:$0xff]  ;;  %v1021_v26 = vld [vmem:[#allocation12 + $0x2c8] sm:$0xff] }
 0x6ff   : > { %6958 = vmatprep.subr.bf16.mxu1 %v11602_v48  ;;  %v1022_v15 = vld [vmem:[#allocation12 + $0x2d0] sm:$0xff] }
 0x701   : > { %4552 = vmatmul.mubr.f32.gmra.mrb[48].mxu1 %v10625_v14 }
 0x702   : > { %4556 = vmatprep.mubr.f32.mxu1 %v10742_v61  ;;  %6960 = vmatpush1.bf16.msra.mxu1 %v6959_v60  ;;  %v6968_v61 = vpack.c.bf16 %v1011_v9, %v1010_v1  ;;  %v1017_v60 = vld [vmem:[#allocation12 + $0x2a8] sm:$0xff]  ;;  %v1024_v1 = vld [vmem:[#allocation12 + $0x2e0] sm:$0xff] }
 0x703   : > { %6961 = vmatprep.subr.bf16.mxu1 %v11602_v48  ;;  %v1025_v9 = vld [vmem:[#allocation12 + $0x2e8] sm:$0xff] }
 0x705   : > { %4557 = vmatmul.mubr.f32.gmra.mrb[50].mxu1 %v10627_v33 }
 0x706   : > { %4561 = vmatprep.mubr.f32.mxu1 %v10756_v22  ;;  %6963 = vmatpush1.bf16.msra.mxu1 %v6962_v57  ;;  %v6971_v22 = vpack.c.bf16 %v1013_v12, %v1012_v35  ;;  %v1020_v57 = vld [vmem:[#allocation12 + $0x2c0] sm:$0xff]  ;;  %v11640_v35 = vld [vmem:[#allocation27_spill] sm:$0xff] }
 0x707   : > { %6964 = vmatprep.subr.bf16.mxu1 %v11602_v48  ;;  %v11002_v12 = vld [vmem:[#allocation2 + $0x207] sm:$0xff] }
 0x709   : > { %4562 = vmatmul.mubr.f32.gmra.mrb[52].mxu1 %v10643_v62 }
 0x70a   : > { %4566 = vmatprep.mubr.f32.mxu1 %v10766_v27  ;;  %6966 = vmatpush1.bf16.msra.mxu1 %v6965_v54  ;;  %v6974_v27 = vpack.c.bf16 %v1015_v39, %v1014_v49  ;;  %v1023_v54 = vld [vmem:[#allocation12 + $0x2d8] sm:$0xff] }
 0x70b   : > { %6967 = vmatprep.subr.bf16.mxu1 %v11602_v48  ;;  %v1088_v49 = vld [vmem:[#allocation14 + $0x58] sm:$0xff] }
 0x70d   : > { %4567 = vmatmul.mubr.f32.gmra.mrb[54].mxu1 %v10662_v29 }
 0x70e   : > { %4571 = vmatprep.mubr.f32.mxu1 %v10776_v42  ;;  %6969 = vmatpush1.bf16.msra.mxu1 %v6968_v61  ;;  %v6977_v42 = vpack.c.bf16 %v1017_v60, %v1016_v31  ;;  %v1027_v61 = vld [vmem:[#allocation12 + $0x2f8] sm:$0xff] }
 0x70f   : > { %6970 = vmatprep.subr.bf16.mxu1 %v11602_v48  ;;  %v11641_v60 = vld [vmem:[#allocation28_spill] sm:$0xff] }
 0x711   : > { %4572 = vmatmul.mubr.f32.gmra.mrb[56].mxu1 %v10671_v10 }
 0x712   : > { %4576 = vmatprep.mubr.f32.mxu1 %v10786_v43  ;;  %6972 = vmatpush1.bf16.msra.mxu1 %v6971_v22  ;;  %v6980_v43 = vpack.c.bf16 %v1019_v53, %v1018_v45  ;;  %v1087_v22 = vld [vmem:[#allocation14 + $0x50] sm:$0xff]  ;;  %v1089_v45 = vld [vmem:[#allocation14 + $0x60] sm:$0xff]  ;;  %v1090_v53 = vld [vmem:[#allocation14 + $0x68] sm:$0xff] }
 0x713   : > { %6973 = vmatprep.subr.bf16.mxu1 %v11602_v48  ;;  %v7094_v39 = vpack.c.bf16 %v1088_v49, %v1087_v22  ;;  %v7937_v22 = vld [vmem:[%s8627_s16 + $0x18] sm:$0xff] }
 0x715   : > { %4577 = vmatmul.mubr.f32.gmra.mrb[58].mxu1 %v10688_v32 }
 0x716   : > { %4581 = vmatprep.mubr.f32.mxu1 %v10796_v50  ;;  %6975 = vmatpush1.bf16.msra.mxu1 %v6974_v27  ;;  %v6983_v50 = vpack.c.bf16 %v1021_v26, %v1020_v57  ;;  %v1029_v57 = vld [vmem:[#allocation12 + $0x308] sm:$0xff]  ;;  %v7098_v26 = vpack.c.bf16 %v1090_v53, %v1089_v45  ;;  %v1038_v53 = vld [vmem:[#allocation12 + $0x350] sm:$0xff] }
 0x717   : > { %6976 = vmatprep.subr.bf16.mxu1 %v11602_v48 }
 0x719   : > { %4582 = vmatmul.mubr.f32.gmra.mrb[60].mxu1 %v10697_v7 }
 0x71a   : > { %4586 = vmatprep.mubr.f32.mxu1 %v10806_v13  ;;  %6978 = vmatpush1.bf16.msra.mxu1 %v6977_v42  ;;  %v6986_v13 = vpack.c.bf16 %v1023_v54, %v1022_v15  ;;  %v11010_v42 = vld [vmem:[#allocation2 + $0x20f] sm:$0xff]  ;;  %v11642_v54 = vld [vmem:[#allocation29_spill] sm:$0xff] }
 0x71b   : > { %6979 = vmatprep.subr.bf16.mxu1 %v11602_v48 }
 0x71d   : > { %4587 = vmatmul.mubr.f32.gmra.mrb[62].mxu1 %v10714_v8  ;;  %v6989_v8 = vpack.c.bf16 %v1025_v9, %v1024_v1  ;;  %v4235_v9 = vld [vmem:[#allocation2 + $0x231] sm:$0xff] }
 0x71e   : > { %4591 = vmatprep.mubr.f32.mxu1 %v10816_v4  ;;  %6981 = vmatpush1.bf16.msra.mxu1 %v6980_v43  ;;  %v1026_v4 = vld [vmem:[#allocation12 + $0x2f0] sm:$0xff]  ;;  %v1028_v43 = vld [vmem:[#allocation12 + $0x300] sm:$0xff] }
 0x71f   : > { %6982 = vmatprep.subr.bf16.mxu1 %v11602_v48  ;;  %v6995_v1 = vpack.c.bf16 %v1029_v57, %v1028_v43  ;;  %v1039_v43 = vld [vmem:[#allocation12 + $0x358] sm:$0xff]  ;;  %v7939_v57 = vld [vmem:[%s8627_s16 + $0x28] sm:$0xff] }
 0x721   : > { %4592 = vmatmul.mubr.f32.gmra.mrb[64].mxu1 %v10723_v51  ;;  %v6992_v51 = vpack.c.bf16 %v1027_v61, %v1026_v4  ;;  %v1092_v4 = vld [vmem:[#allocation14 + $0x78] sm:$0xff]  ;;  %v1030_v61 = vld [vmem:[#allocation12 + $0x310] sm:$0xff] }
 0x722   : > { %4596 = vmatprep.mubr.f32.mxu1 %v10826_v17  ;;  %6984 = vmatpush1.bf16.msra.mxu1 %v6983_v50  ;;  %v1081_v17 = vld [vmem:[#allocation14 + $0x20] sm:$0xff] }
 0x723   : > { %6985 = vmatprep.subr.bf16.mxu1 %v11602_v48 }
 0x725   : > { %4597 = vmatmul.mubr.f32.gmra.mrb[66].mxu1 %v10740_v38 }
 0x726   : > { %4601 = vmatprep.mubr.f32.mxu1 %v10836_v41  ;;  %6987 = vmatpush1.bf16.msra.mxu1 %v6986_v13  ;;  %v1082_v41 = vld [vmem:[#allocation14 + $0x28] sm:$0xff] }
 0x727   : > { %6988 = vmatprep.subr.bf16.mxu1 %v11602_v48  ;;  %v4234_v13 = vld [vmem:[#allocation2 + $0x229] sm:$0xff] }
 0x728   : > { %6441 = vmatprep.mubr.f32.mxu0 %v4234_v13  ;;  %v7940_v13 = vld [vmem:[%s8627_s16 + $0x30] sm:$0xff] }
 0x729   : > { %4602 = vmatmul.mubr.f32.gmra.mrb[68].mxu1 %v10747_v24  ;;  %6442 = vmatmul.mubr.f32.gmra.mrb[96].mxu0 %v4235_v9  ;;  %v1040_v9 = vld [vmem:[#allocation12 + $0x360] sm:$0xff] }
 0x72a   : > { %4606 = vmatprep.mubr.f32.mxu1 %v10841_v34  ;;  %6990 = vmatpush1.bf16.msra.mxu1 %v6989_v8  ;;  %v1091_v8 = vld [vmem:[#allocation14 + $0x70] sm:$0xff] }
 0x72b   : > { %6991 = vmatprep.subr.bf16.mxu1 %v11602_v48 }
 0x72d   : > { %4607 = vmatmul.mubr.f32.gmra.mrb[70].mxu1 %v10754_v0  ;;  %v1077_v0 = vld [vmem:[#allocation14] sm:$0xff] }
 0x72e   : > { %4611 = vmatprep.mubr.f32.mxu1 %v10845_v59  ;;  %6993 = vmatpush1.bf16.msra.mxu1 %v6992_v51  ;;  %v1031_v51 = vld [vmem:[#allocation12 + $0x318] sm:$0xff] }
 0x72f   : > { %6994 = vmatprep.subr.bf16.mxu1 %v11602_v48 }
 0x731   : > { %4612 = vmatmul.mubr.f32.gmra.mrb[72].mxu1 %v10759_v28  ;;  %v1078_v28 = vld [vmem:[#allocation14 + $0x8] sm:$0xff] }
 0x732   : > { %4616 = vmatprep.mubr.f32.mxu1 %v10849_v11  ;;  %v11637_v11 = vld [vmem:[#allocation31_spill] sm:$0xff] }
 0x735   : > { %4617 = vmatmul.mubr.f32.gmra.mrb[74].mxu1 %v10764_v63  ;;  %v7074_v63 = vpack.c.bf16 %v1078_v28, %v1077_v0  ;;  %v7102_v0 = vpack.c.bf16 %v1092_v4, %v1091_v8  ;;  %v1041_v8 = vld [vmem:[#allocation12 + $0x368] sm:$0xff]  ;;  %v7941_v4 = vld [vmem:[%s8627_s16 + $0x38] sm:$0xff] }
 0x736   : > { %4621 = vmatprep.mubr.f32.mxu1 %v10853_v44  ;;  %v1083_v44 = vld [vmem:[#allocation14 + $0x30] sm:$0xff] }
 0x737   : > { %7075 = vmatprep.subr.bf16.mxu0 %v7074_v63 }
 0x738   : > { %7077 = vmatpush3.bf16.msra.mxu0 %v7074_v63  ;;  %v4076_v63 = vld [vmem:[#allocation2 + $0x28] sm:$0xff] }
 0x739   : > { %4622 = vmatmul.mubr.f32.gmra.mrb[76].mxu1 %v10769_v21 }
 0x73a   : > { %4626 = vmatprep.mubr.f32.mxu1 %v10857_v20  ;;  %v1084_v20 = vld [vmem:[#allocation14 + $0x38] sm:$0xff] }
 0x73d   : > { %4627 = vmatmul.mubr.f32.gmra.mrb[78].mxu1 %v10774_v3 }
 0x73e   : > { %4631 = vmatprep.mubr.f32.mxu1 %v10861_v40 }
 0x741   : > { %4632 = vmatmul.mubr.f32.gmra.mrb[80].mxu1 %v10779_v37  ;;  %v1079_v37 = vld [vmem:[#allocation14 + $0x10] sm:$0xff] }
 0x742   : > { %4636 = vmatprep.mubr.f32.mxu1 %v10865_v5 }
 0x745   : > { %4637 = vmatmul.mubr.f32.gmra.mrb[82].mxu1 %v10784_v6  ;;  %v1080_v6 = vld [vmem:[#allocation14 + $0x18] sm:$0xff] }
 0x746   : > { %4641 = vmatprep.mubr.f32.mxu1 %v10869_v18  ;;  %v11638_v18 = vld [vmem:[#allocation26_spill] sm:$0xff] }
 0x749   : > { %4642 = vmatmul.mubr.f32.gmra.mrb[84].mxu1 %v10789_v30  ;;  %v7078_v30 = vpack.c.bf16 %v1080_v6, %v1079_v37  ;;  %v1032_v6 = vld [vmem:[#allocation12 + $0x320] sm:$0xff] }
 0x74a   : > { %4646 = vmatprep.mubr.f32.mxu1 %v10873_v19  ;;  %v11639_v19 = vld [vmem:[#allocation21_spill] sm:$0xff] }
 0x74b   : > { %7079 = vmatprep.subr.bf16.mxu0 %v7078_v30 }
 0x74c   : > { %7081 = vmatpush3.bf16.msra.mxu0 %v7078_v30  ;;  %v1033_v30 = vld [vmem:[#allocation12 + $0x328] sm:$0xff] }
 0x74d   : > { %4647 = vmatmul.mubr.f32.gmra.mrb[86].mxu1 %v10794_v2 }
 0x74e   : > { %4651 = vmatprep.mubr.f32.mxu1 %v10877_v56  ;;  %v1085_v56 = vld [vmem:[#allocation14 + $0x40] sm:$0xff] }
 0x750   : > { %v10967_v38 = vpop.f32.mrb[66].mxu0 }
 0x751   : > { %v10969_v24 = vpop.f32.mrb[67].mxu0  ;;  %4652 = vmatmul.mubr.f32.gmra.mrb[88].mxu1 %v10799_v46 }
 0x752   : > { %4656 = vmatprep.mubr.f32.mxu1 %v10881_v25  ;;  %v1086_v25 = vld [vmem:[#allocation14 + $0x48] sm:$0xff] }
 0x754   : > { %v10973_v21 = vpop.f32.mrb[68].mxu0 }
 0x755   : > { %v10975_v3 = vpop.f32.mrb[69].mxu0  ;;  %4657 = vmatmul.mubr.f32.gmra.mrb[90].mxu1 %v10804_v23  ;;  %v7082_v23 = vpack.c.bf16 %v1082_v41, %v1081_v17  ;;  %v4077_v41 = vld [vmem:[#allocation2 + $0x30] sm:$0xff] }
 0x756   : > { %4661 = vmatprep.mubr.f32.mxu1 %v10885_v36 }
 0x757   : > { %7083 = vmatprep.subr.bf16.mxu0 %v7082_v23 }
 0x758   : > { %v10979_v2 = vpop.f32.mrb[70].mxu0  ;;  %7085 = vmatpush3.bf16.msra.mxu0 %v7082_v23  ;;  %v7934_v23 = vld [vmem:[%s8627_s16] sm:$0xff] }
 0x759   : > { %v10981_v46 = vpop.f32.mrb[71].mxu0  ;;  %4662 = vmatmul.mubr.f32.gmra.mrb[92].mxu1 %v10809_v58  ;;  %v7086_v58 = vpack.c.bf16 %v1084_v20, %v1083_v44  ;;  %6476 = vmatprep.mubr.f32.mxu0 %v7934_v23  ;;  %v1034_v44 = vld [vmem:[#allocation12 + $0x330] sm:$0xff]  ;;  %v1035_v20 = vld [vmem:[#allocation12 + $0x338] sm:$0xff]  ;;  %v11079_v23 = vld [vmem:[#allocation2 + $0x88] sm:$0xff] }
 0x75a   : > { %4666 = vmatprep.mubr.f32.mxu1 %v10889_v52 }
 0x75b   : > { %7087 = vmatprep.subr.bf16.mxu0 %v7086_v58 }
 0x75c   : > { %v10985_v34 = vpop.f32.mrb[72].mxu0  ;;  %7089 = vmatpush3.bf16.msra.mxu0 %v7086_v58  ;;  %v7935_v58 = vld [vmem:[%s8627_s16 + $0x8] sm:$0xff] }
 0x75d   : > { %v10987_v59 = vpop.f32.mrb[73].mxu0  ;;  %4667 = vmatmul.mubr.f32.gmra.mrb[94].mxu1 %v10814_v47  ;;  %v7090_v47 = vpack.c.bf16 %v1086_v25, %v1085_v56  ;;  %v7936_v56 = vld [vmem:[%s8627_s16 + $0x10] sm:$0xff] }
 0x75e   : > { %4671 = vmatprep.mubr.f32.mxu1 %v11637_v11 }
 0x75f   : > { %7091 = vmatprep.subr.bf16.mxu0 %v7090_v47 }
 0x760   : > { %v10991_v40 = vpop.f32.mrb[74].mxu0  ;;  %7093 = vmatpush3.bf16.msra.mxu0 %v7090_v47  ;;  %v1036_v47 = vld [vmem:[#allocation12 + $0x340] sm:$0xff] }
 0x761   : > { %v10993_v5 = vpop.f32.mrb[75].mxu0  ;;  %4672 = vmatmul.mubr.f32.gmra.mrb[96].mxu1 %v11638_v18  ;;  %7095 = vmatprep.subr.bf16.mxu0 %v7094_v39 }
 0x762   : > { %4676 = vmatprep.mubr.f32.mxu1 %v11639_v19  ;;  %v11035_v19 = vld [vmem:[#allocation2 + $0x48] sm:$0xff] }
 0x764   : > { %v10997_v36 = vpop.f32.mrb[76].mxu0  ;;  %7097 = vmatpush3.bf16.msra.mxu0 %v7094_v39  ;;  %v11046_v39 = vld [vmem:[#allocation2 + $0x50] sm:$0xff] }
 0x765   : > { %v10999_v52 = vpop.f32.mrb[77].mxu0  ;;  %4677 = vmatmul.mubr.f32.gmra.mrb[98].mxu1 %v11640_v35  ;;  %7099 = vmatprep.subr.bf16.mxu0 %v7098_v26  ;;  %v1037_v35 = vld [vmem:[#allocation12 + $0x348] sm:$0xff] }
 0x766   : > { %4681 = vmatprep.mubr.f32.mxu1 %v11002_v12 }
 0x768   : > { %v11005_v27 = vpop.f32.mrb[78].mxu0  ;;  %7101 = vmatpush3.bf16.msra.mxu0 %v7098_v26 }
 0x769   : > { %v11007_v31 = vpop.f32.mrb[79].mxu0  ;;  %4682 = vmatmul.mubr.f32.gmra.mrb[100].mxu1 %v11641_v60  ;;  %7103 = vmatprep.subr.bf16.mxu0 %v7102_v0  ;;  %v7938_v60 = vld [vmem:[%s8627_s16 + $0x20] sm:$0xff] }
 0x76a   : > { %4686 = vmatprep.mubr.f32.mxu1 %v11010_v42 }
 0x76c   : > { %v11013_v50 = vpop.f32.mrb[80].mxu0  ;;  %7105 = vmatpush3.bf16.msra.mxu0 %v7102_v0  ;;  %v7942_v0 = vld [vmem:[%s8627_s16 + $0x40] sm:$0xff] }
 0x76d   : > { %v11015_v15 = vpop.f32.mrb[81].mxu0  ;;  %4687 = vmatmul.mubr.f32.gmra.mrb[102].mxu1 %v11642_v54  ;;  %v11057_v54 = vld [vmem:[#allocation2 + $0x68] sm:$0xff] }
 0x76e   : > { %4756 = vmatprep.mubr.f32.mxu1 %v10905_v55  ;;  %v6998_v55 = vpack.c.bf16 %v1031_v51, %v1030_v61  ;;  %v11068_v51 = vld [vmem:[#allocation2 + $0x70] sm:$0xff] }
 0x76f   : > { %6477 = vmatmul.mubr.f32.vlgmr.msra.gmra.mrb[98].mxu0 %v7935_v58  ;;  %v1045_v58 = vld [vmem:[#allocation12 + $0x388] sm:$0xff] }
 0x770   : > { %v11019_v28 = vpop.f32.mrb[82].mxu0  ;;  %6479 = vmatprep.mubr.f32.mxu0 %v7936_v56  ;;  %v7945_v56 = vld [vmem:[%s8627_s16 + $0x58] sm:$0xff] }
 0x771   : > { %v11021_v37 = vpop.f32.mrb[83].mxu0  ;;  %4757 = vmatmul.mubr.f32.vlgmr.msra.gmra.mrb[40].mxu1 %v4076_v63 }
 0x772   : > { %6996 = vmatpush1.bf16.msra.mxu1 %v6995_v1  ;;  %4761 = vmatprep.mubr.f32.mxu1 %v10910_v16  ;;  %v7001_v16 = vpack.c.bf16 %v1033_v30, %v1032_v6  ;;  %v1043_v6 = vld [vmem:[#allocation12 + $0x378] sm:$0xff]  ;;  %v7943_v30 = vld [vmem:[%s8627_s16 + $0x48] sm:$0xff] }
 0x773   : > { %6997 = vmatprep.subr.bf16.mxu1 %v11602_v48  ;;  %6480 = vmatmul.mubr.f32.gmra.mrb[100].mxu0 %v7937_v22  ;;  %v1047_v22 = vld [vmem:[#allocation12 + $0x398] sm:$0xff] }
 0x774   : > { %v11025_v17 = vpop.f32.mrb[84].mxu0  ;;  %6482 = vmatprep.mubr.f32.mxu0 %v7938_v60  ;;  %v7947_v60 = vld [vmem:[%s8627_s16 + $0x68] sm:$0xff] }
 0x775   : > { %v11028_v11 = vpop.f32.mrb[85].mxu0  ;;  %4762 = vmatmul.mubr.f32.gmra.mrb[42].mxu1 %v4077_v41 }
 0x776   : > { %4766 = vmatprep.mubr.f32.mxu1 %v10625_v14  ;;  %6999 = vmatpush1.bf16.msra.mxu1 %v6998_v55  ;;  %v7004_v14 = vpack.c.bf16 %v1035_v20, %v1034_v44  ;;  %v1042_v55 = vld [vmem:[#allocation12 + $0x370] sm:$0xff]  ;;  %v1044_v20 = vld [vmem:[#allocation12 + $0x380] sm:$0xff] }
 0x777   : > { %7000 = vmatprep.subr.bf16.mxu1 %v11602_v48  ;;  %6483 = vmatmul.mubr.f32.gmra.mrb[102].mxu0 %v7939_v57  ;;  %v1048_v57 = vld [vmem:[#allocation12 + $0x3a0] sm:$0xff] }
 0x778   : > { %v11033_v18 = vpop.f32.mrb[86].mxu0  ;;  %6485 = vmatprep.mubr.f32.mxu0 %v7940_v13  ;;  %v1049_v13 = vld [vmem:[#allocation12 + $0x3a8] sm:$0xff] }
 0x779   : > { %v11038_v25 = vpop.f32.mrb[87].mxu0  ;;  %4767 = vmatmul.mubr.f32.gmra.mrb[44].mxu1 %v11035_v19 }
 0x77a   : > { %4771 = vmatprep.mubr.f32.mxu1 %v10627_v33  ;;  %7002 = vmatpush1.bf16.msra.mxu1 %v7001_v16  ;;  %v7007_v33 = vpack.c.bf16 %v1037_v35, %v1036_v47  ;;  %v7944_v16 = vld [vmem:[%s8627_s16 + $0x50] sm:$0xff]  ;;  %v7946_v47 = vld [vmem:[%s8627_s16 + $0x60] sm:$0xff] }
 0x77b   : > { %7003 = vmatprep.subr.bf16.mxu1 %v11602_v48  ;;  %6486 = vmatmul.mubr.f32.gmra.mrb[104].mxu0 %v7941_v4  ;;  %v1046_v35 = vld [vmem:[#allocation12 + $0x390] sm:$0xff] }
 0x77c   : > { %v11044_v49 = vpop.f32.mrb[88].mxu0  ;;  %6488 = vmatprep.mubr.f32.mxu0 %v7942_v0  ;;  %v4118_v4 = vld [vmem:[#allocation2 + $0xc9] sm:$0xff]  ;;  %v7025_v0 = vpack.c.bf16 %v1049_v13, %v1048_v57 }
 0x77d   : > { %v11049_v45 = vpop.f32.mrb[89].mxu0  ;;  %4772 = vmatmul.mubr.f32.gmra.mrb[46].mxu1 %v11046_v39  ;;  %v11119_v57 = vld [vmem:[#allocation2 + $0xe8] sm:$0xff]  ;;  %v7956_v13 = vld [vmem:[%s8627_s16 + $0xb0] sm:$0xff] }
 0x77e   : > { %4776 = vmatprep.mubr.f32.mxu1 %v10643_v62  ;;  %7005 = vmatpush1.bf16.msra.mxu1 %v7004_v14  ;;  %v7010_v62 = vpack.c.bf16 %v1039_v43, %v1038_v53  ;;  %v11088_v14 = vld [vmem:[#allocation2 + $0x90] sm:$0xff] }
 0x77f   : > { %7006 = vmatprep.subr.bf16.mxu1 %v11602_v48  ;;  %6489 = vmatmul.mubr.f32.gmra.mrb[106].mxu0 %v7943_v30  ;;  %v7948_v53 = vld [vmem:[%s8627_s16 + $0x70] sm:$0xff]  ;;  %v11107_v30 = vld [vmem:[#allocation2 + $0xc8] sm:$0xff] }
 0x780   : > { %v11055_v26 = vpop.f32.mrb[90].mxu0  ;;  %6491 = vmatprep.mubr.f32.mxu0 %v7944_v16  ;;  %v4117_v43 = vld [vmem:[#allocation2 + $0xb1] sm:$0xff] }
 0x781   : > { %v11060_v1 = vpop.f32.mrb[91].mxu0  ;;  %4777 = vmatmul.mubr.f32.gmra.mrb[48].mxu1 %v11057_v54  ;;  %v7952_v16 = vld [vmem:[%s8627_s16 + $0x90] sm:$0xff] }
 0x782   : > { %4781 = vmatprep.mubr.f32.mxu1 %v10662_v29  ;;  %7008 = vmatpush1.bf16.msra.mxu1 %v7007_v33  ;;  %v7013_v29 = vpack.c.bf16 %v1041_v8, %v1040_v9  ;;  %v11095_v33 = vld [vmem:[#allocation2 + $0xa8] sm:$0xff]  ;;  %v11101_v9 = vld [vmem:[#allocation2 + $0xb0] sm:$0xff]  ;;  %v7950_v8 = vld [vmem:[%s8627_s16 + $0x80] sm:$0xff] }
 0x783   : > { %7009 = vmatprep.subr.bf16.mxu1 %v11602_v48  ;;  %6492 = vmatmul.mubr.f32.gmra.mrb[108].mxu0 %v7945_v56  ;;  %v1053_v56 = vld [vmem:[#allocation12 + $0x3c8] sm:$0xff] }
 0x784   : > { %v11066_v61 = vpop.f32.mrb[92].mxu0  ;;  %6494 = vmatprep.mubr.f32.mxu0 %v7946_v47  ;;  %v7953_v47 = vld [vmem:[%s8627_s16 + $0x98] sm:$0xff] }
 0x785   : > { %11643 = vst [vmem:[#allocation22_spill] sm:$0xff] %v11066_v61  ;;  %v11071_v63 = vpop.f32.mrb[93].mxu0  ;;  %4782 = vmatmul.mubr.f32.gmra.mrb[50].mxu1 %v11068_v51  ;;  %v4143_v61 = vld [vmem:[#allocation2 + $0x6f] sm:$0xff] }
 0x786   : > { %11644 = vst [vmem:[#allocation30_spill] sm:$0xff] %v11071_v63  ;;  %4786 = vmatprep.mubr.f32.mxu1 %v10671_v10  ;;  %7011 = vmatpush1.bf16.msra.mxu1 %v7010_v62  ;;  %v7016_v10 = vpack.c.bf16 %v1043_v6, %v1042_v55  ;;  %v7949_v62 = vld [vmem:[%s8627_s16 + $0x78] sm:$0xff]  ;;  %v7951_v6 = vld [vmem:[%s8627_s16 + $0x88] sm:$0xff] }
 0x787   : > { %7012 = vmatprep.subr.bf16.mxu1 %v11602_v48  ;;  %6495 = vmatmul.mubr.f32.gmra.mrb[110].mxu0 %v7947_v60  ;;  %v1051_v55 = vld [vmem:[#allocation12 + $0x3b8] sm:$0xff] }
 0x788   : > { %v11077_v41 = vpop.f32.mrb[94].mxu0  ;;  %6497 = vmatprep.mubr.f32.mxu0 %v7948_v53  ;;  %v1054_v53 = vld [vmem:[#allocation12 + $0x3d0] sm:$0xff] }
 0x789   : > { %11645 = vst [vmem:[#allocation23_spill] sm:$0xff] %v11077_v41  ;;  %v11082_v44 = vpop.f32.mrb[95].mxu0  ;;  %4787 = vmatmul.mubr.f32.gmra.mrb[52].mxu1 %v11079_v23  ;;  %v11186_v41 = vld [vmem:[#allocation2 + $0x208] sm:$0xff] }
 0x78a   : > { %11646 = vst [vmem:[#allocation32_spill] sm:$0xff] %v11082_v44  ;;  %4791 = vmatprep.mubr.f32.mxu1 %v10688_v32  ;;  %7014 = vmatpush1.bf16.msra.mxu1 %v7013_v29  ;;  %v7019_v32 = vpack.c.bf16 %v1045_v58, %v1044_v20  ;;  %v1050_v29 = vld [vmem:[#allocation12 + $0x3b0] sm:$0xff]  ;;  %v1052_v58 = vld [vmem:[#allocation12 + $0x3c0] sm:$0xff] }
 0x78b   : > { %7015 = vmatprep.subr.bf16.mxu1 %v11602_v48  ;;  %6498 = vmatmul.mubr.f32.gmra.mrb[112].mxu0 %v7949_v62  ;;  %v7028_v20 = vpack.c.bf16 %v1051_v55, %v1050_v29  ;;  %v7031_v60 = vpack.c.bf16 %v1053_v56, %v1052_v58  ;;  %v4121_v62 = vld [vmem:[#allocation2 + $0xf1] sm:$0xff]  ;;  %v7959_v56 = vld [vmem:[%s8627_s16 + $0xc8] sm:$0xff] }
 0x78c   : > { %6500 = vmatprep.mubr.f32.mxu0 %v7950_v8  ;;  %v7957_v29 = vld [vmem:[%s8627_s16 + $0xb8] sm:$0xff]  ;;  %v11125_v55 = vld [vmem:[#allocation2 + $0xf0] sm:$0xff] }
 0x78d   : > { %4792 = vmatmul.mubr.f32.gmra.mrb[54].mxu1 %v11088_v14  ;;  %v1059_v58 = vld [vmem:[#allocation12 + $0x3f8] sm:$0xff]  ;;  %v11189_v44 = vld [vmem:[#allocation2 + $0x210] sm:$0xff] }
 0x78e   : > { %4796 = vmatprep.mubr.f32.mxu1 %v10697_v7  ;;  %7017 = vmatpush1.bf16.msra.mxu1 %v7016_v10  ;;  %v7022_v7 = vpack.c.bf16 %v1047_v22, %v1046_v35  ;;  %v4119_v10 = vld [vmem:[#allocation2 + $0xd1] sm:$0xff]  ;;  %v7954_v35 = vld [vmem:[%s8627_s16 + $0xa0] sm:$0xff]  ;;  %v4120_v22 = vld [vmem:[#allocation2 + $0xe9] sm:$0xff] }
 0x78f   : > { %7018 = vmatprep.subr.bf16.mxu1 %v11602_v48  ;;  %6501 = vmatmul.mubr.f32.gmra.mrb[114].mxu0 %v7951_v6  ;;  %v7958_v6 = vld [vmem:[%s8627_s16 + $0xc0] sm:$0xff] }
 0x790   : > { %6503 = vmatprep.mubr.f32.mxu0 %v7952_v16  ;;  %v4122_v16 = vld [vmem:[#allocation2 + $0x109] sm:$0xff] }
 0x791   : > { %4797 = vmatmul.mubr.f32.gmra.mrb[56].mxu1 %v11095_v33 }
 0x792   : > { %4801 = vmatprep.mubr.f32.mxu1 %v4117_v43  ;;  %7020 = vmatpush1.bf16.msra.mxu1 %v7019_v32  ;;  %v11113_v32 = vld [vmem:[#allocation2 + $0xd0] sm:$0xff]  ;;  %v1055_v43 = vld [vmem:[#allocation12 + $0x3d8] sm:$0xff] }
 0x793   : > { %7021 = vmatprep.subr.bf16.mxu1 %v11602_v48  ;;  %6504 = vmatmul.mubr.f32.gmra.mrb[116].mxu0 %v7953_v47  ;;  %v7034_v8 = vpack.c.bf16 %v1055_v43, %v1054_v53  ;;  %v11131_v47 = vld [vmem:[#allocation2 + $0x108] sm:$0xff]  ;;  %v7961_v53 = vld [vmem:[%s8627_s16 + $0xd8] sm:$0xff]  ;;  %v11137_v43 = vld [vmem:[#allocation2 + $0x110] sm:$0xff] }
 0x794   : > { %6506 = vmatprep.mubr.f32.mxu0 %v7954_v35  ;;  %v7960_v35 = vld [vmem:[%s8627_s16 + $0xd0] sm:$0xff] }
 0x795   : > { %4802 = vmatmul.mubr.f32.gmra.mrb[58].mxu1 %v11101_v9 }
 0x796   : > { %4806 = vmatprep.mubr.f32.mxu1 %v4118_v4  ;;  %7023 = vmatpush1.bf16.msra.mxu1 %v7022_v7  ;;  %v7955_v7 = vld [vmem:[%s8627_s16 + $0xa8] sm:$0xff]  ;;  %v1056_v4 = vld [vmem:[#allocation12 + $0x3e0] sm:$0xff] }
 0x797   : > { %7024 = vmatprep.subr.bf16.mxu1 %v11602_v48  ;;  %6507 = vmatmul.mubr.f32.gmra.mrb[118].mxu0 %v7955_v7  ;;  %v7962_v7 = vld [vmem:[%s8627_s16 + $0xe0] sm:$0xff] }
 0x798   : > { %6509 = vmatprep.mubr.f32.mxu0 %v7956_v13  ;;  %v4124_v13 = vld [vmem:[#allocation2 + $0x129] sm:$0xff] }
 0x799   : > { %4807 = vmatmul.mubr.f32.gmra.mrb[60].mxu1 %v11107_v30 }
 0x79a   : > { %4811 = vmatprep.mubr.f32.mxu1 %v4119_v10  ;;  %7026 = vmatpush1.bf16.msra.mxu1 %v7025_v0  ;;  %v1057_v0 = vld [vmem:[#allocation12 + $0x3e8] sm:$0xff] }
 0x79b   : > { %7027 = vmatprep.subr.bf16.mxu1 %v11602_v48  ;;  %6510 = vmatmul.mubr.f32.gmra.mrb[120].mxu0 %v7957_v29  ;;  %v7037_v10 = vpack.c.bf16 %v1057_v0, %v1056_v4  ;;  %v7964_v4 = vld [vmem:[%s8627_s16 + $0xf0] sm:$0xff]  ;;  %v7965_v0 = vld [vmem:[%s8627_s16 + $0xf8] sm:$0xff] }
 0x79c   : > { %6512 = vmatprep.mubr.f32.mxu0 %v7958_v6  ;;  %v11147_v29 = vld [vmem:[#allocation2 + $0x130] sm:$0xff] }
 0x79d   : > { %4812 = vmatmul.mubr.f32.gmra.mrb[62].mxu1 %v11113_v32  ;;  %v4126_v6 = vld [vmem:[#allocation2 + $0x149] sm:$0xff] }
 0x79e   : > { %4816 = vmatprep.mubr.f32.mxu1 %v4120_v22  ;;  %7029 = vmatpush1.bf16.msra.mxu1 %v7028_v20  ;;  %v1058_v20 = vld [vmem:[#allocation12 + $0x3f0] sm:$0xff] }
 0x79f   : > { %7030 = vmatprep.subr.bf16.mxu1 %v11602_v48  ;;  %6513 = vmatmul.mubr.f32.gmra.mrb[122].mxu0 %v7959_v56  ;;  %v4123_v22 = vld [vmem:[#allocation2 + $0x111] sm:$0xff]  ;;  %v11156_v56 = vld [vmem:[#allocation2 + $0x168] sm:$0xff] }
 0x7a0   : > { %6515 = vmatprep.mubr.f32.mxu0 %v7960_v35  ;;  %v4129_v35 = vld [vmem:[#allocation2 + $0x171] sm:$0xff] }
 0x7a1   : > { %4817 = vmatmul.mubr.f32.gmra.mrb[64].mxu1 %v11119_v57 }
 0x7a2   : > { %4821 = vmatprep.mubr.f32.mxu1 %v4121_v62  ;;  %7032 = vmatpush1.bf16.msra.mxu1 %v7031_v60  ;;  %v7040_v60 = vpack.c.bf16 %v1059_v58, %v1058_v20  ;;  %v7963_v62 = vld [vmem:[%s8627_s16 + $0xe8] sm:$0xff]  ;;  %v11153_v20 = vld [vmem:[#allocation2 + $0x150] sm:$0xff]  ;;  %s11467_s16 = scalar_lea.hbm %s11669_s15, %s5915_s20 }
 0x7a3   : > { %7033 = vmatprep.subr.bf16.mxu1 %v11602_v48  ;;  %6516 = vmatmul.mubr.f32.gmra.mrb[124].mxu0 %v7961_v53  ;;  %v4128_v58 = vld [vmem:[#allocation2 + $0x169] sm:$0xff] }
 0x7a4   : > { %6518 = vmatprep.mubr.f32.mxu0 %v7962_v7  ;;  %v11162_v53 = vld [vmem:[#allocation2 + $0x188] sm:$0xff]  ;;  %v4131_v7 = vld [vmem:[#allocation2 + $0x191] sm:$0xff] }
 0x7a5   : > { %4822 = vmatmul.mubr.f32.gmra.mrb[66].mxu1 %v11125_v55 }
 0x7a6   : > { %4826 = vmatprep.mubr.f32.mxu1 %v4122_v16  ;;  %7035 = vmatpush1.bf16.msra.mxu1 %v7034_v8  ;;  %v11142_v8 = vld [vmem:[#allocation2 + $0x128] sm:$0xff] }
 0x7a7   : > { %7036 = vmatprep.subr.bf16.mxu1 %v11602_v48  ;;  %6519 = vmatmul.mubr.f32.gmra.mrb[126].mxu0 %v7963_v62  ;;  %v11150_v16 = vld [vmem:[#allocation2 + $0x148] sm:$0xff] }
 0x7a8   : > { %6521 = vmatprep.mubr.f32.mxu0 %v7964_v4  ;;  %v4132_v62 = vld [vmem:[#allocation2 + $0x1a9] sm:$0xff] }
 0x7a9   : > { %4827 = vmatmul.mubr.f32.gmra.mrb[68].mxu1 %v11131_v47  ;;  %v11168_v4 = vld [vmem:[#allocation2 + $0x1a8] sm:$0xff] }
 0x7aa   : > { %4831 = vmatprep.mubr.f32.mxu1 %v4123_v22  ;;  %7038 = vmatpush1.bf16.msra.mxu1 %v7037_v10  ;;  %v4127_v10 = vld [vmem:[#allocation2 + $0x151] sm:$0xff] }
 0x7ab   : > { %7039 = vmatprep.subr.bf16.mxu1 %v11602_v48  ;;  %v4125_v48 = vld [vmem:[#allocation2 + $0x131] sm:$0xff]  ;;  %6522 = vmatmul.mubr.f32.gmra.mrb[128].mxu0 %v7965_v0 }
 0x7ac   : > { %v11159_v22 = vld [vmem:[#allocation2 + $0x170] sm:$0xff] }
 0x7ad   : > { %4832 = vmatmul.mubr.f32.gmra.mrb[70].mxu1 %v11137_v43  ;;  %v11171_v0 = vld [vmem:[#allocation2 + $0x1b0] sm:$0xff] }
 0x7ae   : > { %4836 = vmatprep.mubr.f32.mxu1 %v4124_v13  ;;  %7041 = vmatpush1.bf16.msra.mxu1 %v7040_v60  ;;  %v4130_v60 = vld [vmem:[#allocation2 + $0x189] sm:$0xff] }
 0x7af   : > { %v11165_v13 = vld [vmem:[#allocation2 + $0x190] sm:$0xff] }
 0x7b1   : > { %4837 = vmatmul.mubr.f32.gmra.mrb[72].mxu1 %v11142_v8 }
 0x7b2   : > { %4841 = vmatprep.mubr.f32.mxu1 %v4125_v48  ;;  %v4133_v48 = vld [vmem:[#allocation2 + $0x1b1] sm:$0xff] }
 0x7b5   : > { %4842 = vmatmul.mubr.f32.gmra.mrb[74].mxu1 %v11147_v29 }
 0x7b6   : > { %4846 = vmatprep.mubr.f32.mxu1 %v4126_v6  ;;  %v4134_v6 = vld [vmem:[#allocation2 + $0x1c9] sm:$0xff] }
 0x7b9   : > { %4847 = vmatmul.mubr.f32.gmra.mrb[76].mxu1 %v11150_v16 }
 0x7ba   : > { %4851 = vmatprep.mubr.f32.mxu1 %v4127_v10  ;;  %v11174_v10 = vld [vmem:[#allocation2 + $0x1c8] sm:$0xff] }
 0x7bd   : > { %4852 = vmatmul.mubr.f32.gmra.mrb[78].mxu1 %v11153_v20 }
 0x7be   : > { %4856 = vmatprep.mubr.f32.mxu1 %v4128_v58  ;;  %v4135_v58 = vld [vmem:[#allocation2 + $0x1d1] sm:$0xff] }
 0x7c1   : > { %4857 = vmatmul.mubr.f32.gmra.mrb[80].mxu1 %v11156_v56 }
 0x7c2   : > { %4861 = vmatprep.mubr.f32.mxu1 %v4129_v35  ;;  %v11177_v35 = vld [vmem:[#allocation2 + $0x1d0] sm:$0xff] }
 0x7c5   : > { %4862 = vmatmul.mubr.f32.gmra.mrb[82].mxu1 %v11159_v22 }
 0x7c6   : > { %4866 = vmatprep.mubr.f32.mxu1 %v4130_v60  ;;  %v4136_v60 = vld [vmem:[#allocation2 + $0x1e9] sm:$0xff] }
 0x7c9   : > { %4867 = vmatmul.mubr.f32.gmra.mrb[84].mxu1 %v11162_v53 }
 0x7ca   : > { %4871 = vmatprep.mubr.f32.mxu1 %v4131_v7  ;;  %v11180_v7 = vld [vmem:[#allocation2 + $0x1e8] sm:$0xff] }
 0x7cd   : > { %4872 = vmatmul.mubr.f32.gmra.mrb[86].mxu1 %v11165_v13 }
 0x7ce   : > { %4876 = vmatprep.mubr.f32.mxu1 %v4132_v62  ;;  %v4137_v62 = vld [vmem:[#allocation2 + $0x1f1] sm:$0xff] }
 0x7d1   : > { %4877 = vmatmul.mubr.f32.gmra.mrb[88].mxu1 %v11168_v4 }
 0x7d2   : > { %4881 = vmatprep.mubr.f32.mxu1 %v4133_v48  ;;  %v11183_v48 = vld [vmem:[#allocation2 + $0x1f0] sm:$0xff] }
 0x7d5   : > { %4882 = vmatmul.mubr.f32.gmra.mrb[90].mxu1 %v11171_v0 }
 0x7d6   : > { %4886 = vmatprep.mubr.f32.mxu1 %v4134_v6  ;;  %v4138_v6 = vld [vmem:[#allocation2 + $0x209] sm:$0xff] }
 0x7d9   : > { %4887 = vmatmul.mubr.f32.gmra.mrb[92].mxu1 %v11174_v10 }
 0x7da   : > { %4891 = vmatprep.mubr.f32.mxu1 %v4135_v58  ;;  %v4139_v58 = vld [vmem:[#allocation2 + $0x211] sm:$0xff] }
 0x7dd   : > { %4892 = vmatmul.mubr.f32.gmra.mrb[94].mxu1 %v11177_v35 }
 0x7de   : > { %4896 = vmatprep.mubr.f32.mxu1 %v4136_v60  ;;  %v4140_v60 = vld [vmem:[#allocation2 + $0x47] sm:$0xff] }
 0x7e1   : > { %4897 = vmatmul.mubr.f32.gmra.mrb[96].mxu1 %v11180_v7 }
 0x7e2   : > { %4901 = vmatprep.mubr.f32.mxu1 %v4137_v62  ;;  %v4141_v62 = vld [vmem:[#allocation2 + $0x4f] sm:$0xff] }
 0x7e5   : > { %4902 = vmatmul.mubr.f32.gmra.mrb[98].mxu1 %v11183_v48 }
 0x7e6   : > { %4906 = vmatprep.mubr.f32.mxu1 %v4138_v6  ;;  %v4142_v6 = vld [vmem:[#allocation2 + $0x67] sm:$0xff] }
 0x7e9   : > { %4907 = vmatmul.mubr.f32.gmra.mrb[100].mxu1 %v11186_v41 }
 0x7ea   : > { %4911 = vmatprep.mubr.f32.mxu1 %v4139_v58  ;;  %v4144_v58 = vld [vmem:[#allocation2 + $0x87] sm:$0xff] }
 0x7ed   : > { %4912 = vmatmul.mubr.f32.gmra.mrb[102].mxu1 %v11189_v44 }
 0x7ee   : > { %4981 = vmatprep.mubr.f32.mxu1 %v11035_v19  ;;  %v4145_v19 = vld [vmem:[#allocation2 + $0x8f] sm:$0xff] }
 0x7f1   : > { %4982 = vmatmul.mubr.f32.vlgmr.msra.gmra.mrb[40].mxu1 %v4140_v60 }
 0x7f2   : > { %4986 = vmatprep.mubr.f32.mxu1 %v11046_v39  ;;  %v4146_v39 = vld [vmem:[#allocation2 + $0xa7] sm:$0xff] }
 0x7f5   : > { %4987 = vmatmul.mubr.f32.gmra.mrb[42].mxu1 %v4141_v62  ;;  %v4164_v62 = vld [vmem:[#allocation2 + $0x1c7] sm:$0xff] }
 0x7f6   : > { %4991 = vmatprep.mubr.f32.mxu1 %v11057_v54  ;;  %v4147_v54 = vld [vmem:[#allocation2 + $0xaf] sm:$0xff] }
 0x7f9   : > { %4992 = vmatmul.mubr.f32.gmra.mrb[44].mxu1 %v4142_v6 }
 0x7fa   : > { %4996 = vmatprep.mubr.f32.mxu1 %v11068_v51  ;;  %v4148_v51 = vld [vmem:[#allocation2 + $0xc7] sm:$0xff] }
 0x7fd   : > { %4997 = vmatmul.mubr.f32.gmra.mrb[46].mxu1 %v4143_v61  ;;  %v4149_v61 = vld [vmem:[#allocation2 + $0xcf] sm:$0xff] }
 0x7fe   : > { %5001 = vmatprep.mubr.f32.mxu1 %v11079_v23  ;;  %v4150_v23 = vld [vmem:[#allocation2 + $0xe7] sm:$0xff] }
 0x801   : > { %5002 = vmatmul.mubr.f32.gmra.mrb[48].mxu1 %v4144_v58  ;;  %v4166_v58 = vld [vmem:[#allocation2 + $0x1e7] sm:$0xff] }
 0x802   : > { %5006 = vmatprep.mubr.f32.mxu1 %v11088_v14  ;;  %v4151_v14 = vld [vmem:[#allocation2 + $0xef] sm:$0xff] }
 0x805   : > { %5007 = vmatmul.mubr.f32.gmra.mrb[50].mxu1 %v4145_v19 }
 0x806   : > { %5011 = vmatprep.mubr.f32.mxu1 %v11095_v33  ;;  %v4152_v33 = vld [vmem:[#allocation2 + $0x107] sm:$0xff] }
 0x809   : > { %5012 = vmatmul.mubr.f32.gmra.mrb[52].mxu1 %v4146_v39 }
 0x80a   : > { %5016 = vmatprep.mubr.f32.mxu1 %v11101_v9  ;;  %v4153_v9 = vld [vmem:[#allocation2 + $0x10f] sm:$0xff] }
 0x80d   : > { %5017 = vmatmul.mubr.f32.gmra.mrb[54].mxu1 %v4147_v54 }
 0x80e   : > { %5021 = vmatprep.mubr.f32.mxu1 %v11107_v30  ;;  %v4154_v30 = vld [vmem:[#allocation2 + $0x127] sm:$0xff] }
 0x811   : > { %5022 = vmatmul.mubr.f32.gmra.mrb[56].mxu1 %v4148_v51 }
 0x812   : > { %5026 = vmatprep.mubr.f32.mxu1 %v11113_v32  ;;  %v4155_v32 = vld [vmem:[#allocation2 + $0x12f] sm:$0xff] }
 0x815   : > { %5027 = vmatmul.mubr.f32.gmra.mrb[58].mxu1 %v4149_v61 }
 0x816   : > { %5031 = vmatprep.mubr.f32.mxu1 %v11119_v57  ;;  %v4156_v57 = vld [vmem:[#allocation2 + $0x147] sm:$0xff] }
 0x819   : > { %5032 = vmatmul.mubr.f32.gmra.mrb[60].mxu1 %v4150_v23 }
 0x81a   : > { %5036 = vmatprep.mubr.f32.mxu1 %v11125_v55  ;;  %v4157_v55 = vld [vmem:[#allocation2 + $0x14f] sm:$0xff] }
 0x81d   : > { %5037 = vmatmul.mubr.f32.gmra.mrb[62].mxu1 %v4151_v14 }
 0x81e   : > { %5041 = vmatprep.mubr.f32.mxu1 %v11131_v47  ;;  %v4158_v47 = vld [vmem:[#allocation2 + $0x167] sm:$0xff] }
 0x821   : > { %5042 = vmatmul.mubr.f32.gmra.mrb[64].mxu1 %v4152_v33 }
 0x822   : > { %5046 = vmatprep.mubr.f32.mxu1 %v11137_v43  ;;  %v4159_v43 = vld [vmem:[#allocation2 + $0x16f] sm:$0xff] }
 0x825   : > { %5047 = vmatmul.mubr.f32.gmra.mrb[66].mxu1 %v4153_v9 }
 0x826   : > { %5051 = vmatprep.mubr.f32.mxu1 %v11142_v8  ;;  %v4160_v8 = vld [vmem:[#allocation2 + $0x187] sm:$0xff] }
 0x829   : > { %5052 = vmatmul.mubr.f32.gmra.mrb[68].mxu1 %v4154_v30 }
 0x82a   : > { %5056 = vmatprep.mubr.f32.mxu1 %v11147_v29  ;;  %v11214_v29 = vpop.f32.mrb[96].mxu0 }
 0x82b   : > { %11647 = vst [vmem:[#allocation24_spill] sm:$0xff] %v11214_v29 }
 0x82d   : > { %5057 = vmatmul.mubr.f32.gmra.mrb[70].mxu1 %v4155_v32 }
 0x82e   : > { %5061 = vmatprep.mubr.f32.mxu1 %v11150_v16  ;;  %v4161_v16 = vld [vmem:[#allocation2 + $0x18f] sm:$0xff] }
 0x831   : > { %5062 = vmatmul.mubr.f32.gmra.mrb[72].mxu1 %v4156_v57 }
 0x832   : > { %5066 = vmatprep.mubr.f32.mxu1 %v11153_v20  ;;  %v11217_v20 = vpop.f32.mrb[97].mxu0 }
 0x833   : > { %11648 = vst [vmem:[#allocation25_spill] sm:$0xff] %v11217_v20 }
 0x835   : > { %5067 = vmatmul.mubr.f32.gmra.mrb[74].mxu1 %v4157_v55 }
 0x836   : > { %5071 = vmatprep.mubr.f32.mxu1 %v11156_v56  ;;  %v4162_v56 = vld [vmem:[#allocation2 + $0x1a7] sm:$0xff] }
 0x839   : > { %5072 = vmatmul.mubr.f32.gmra.mrb[76].mxu1 %v4158_v47 }
 0x83a   : > { %5076 = vmatprep.mubr.f32.mxu1 %v11159_v22 }
 0x83d   : > { %5077 = vmatmul.mubr.f32.gmra.mrb[78].mxu1 %v4159_v43 }
 0x83e   : > { %5081 = vmatprep.mubr.f32.mxu1 %v11162_v53  ;;  %v4163_v53 = vld [vmem:[#allocation2 + $0x1af] sm:$0xff] }
 0x841   : > { %5082 = vmatmul.mubr.f32.gmra.mrb[80].mxu1 %v4160_v8 }
 0x842   : > { %5086 = vmatprep.mubr.f32.mxu1 %v11165_v13  ;;  %v11220_v22 = vpop.f32.mrb[98].mxu0 }
 0x843   : > { %v5439_v60 = vpop.f32.mrb[99].mxu0 }
 0x845   : > { %5087 = vmatmul.mubr.f32.gmra.mrb[82].mxu1 %v4161_v16 }
 0x846   : > { %5091 = vmatprep.mubr.f32.mxu1 %v11168_v4  ;;  %v11223_v13 = vpop.f32.mrb[100].mxu0  ;;  %v4165_v4 = vld [vmem:[#allocation2 + $0x1cf] sm:$0xff] }
 0x847   : > { %v11225_v6 = vpop.f32.mrb[101].mxu0 }
 0x849   : > { %5092 = vmatmul.mubr.f32.gmra.mrb[84].mxu1 %v4162_v56 }
 0x84a   : > { %5096 = vmatprep.mubr.f32.mxu1 %v11171_v0  ;;  %v11229_v0 = vpop.f32.mrb[102].mxu0 }
 0x84b   : > { %v11231_v19 = vpop.f32.mrb[103].mxu0 }
 0x84d   : > { %5097 = vmatmul.mubr.f32.gmra.mrb[86].mxu1 %v4163_v53 }
 0x84e   : > { %5101 = vmatprep.mubr.f32.mxu1 %v11174_v10  ;;  %v4167_v10 = vld [vmem:[#allocation2 + $0x1ef] sm:$0xff]  ;;  %v11235_v39 = vpop.f32.mrb[104].mxu0 }
 0x84f   : > { %v11237_v54 = vpop.f32.mrb[105].mxu0 }
 0x851   : > { %5102 = vmatmul.mubr.f32.gmra.mrb[88].mxu1 %v4164_v62 }
 0x852   : > { %5106 = vmatprep.mubr.f32.mxu1 %v11177_v35  ;;  %v7966_v35 = vld [vmem:[#allocation2] sm:$0xff]  ;;  %v11242_v51 = vpop.f32.mrb[106].mxu0 }
 0x855   : > { %5107 = vmatmul.mubr.f32.gmra.mrb[90].mxu1 %v4165_v4 }
 0x856   : > { %5111 = vmatprep.mubr.f32.mxu1 %v11180_v7  ;;  %v4170_v7 = vld [vmem:[#allocation2 + $0x227] sm:$0xff] }
 0x859   : > { %5112 = vmatmul.mubr.f32.gmra.mrb[92].mxu1 %v4166_v58 }
 0x85a   : > { %5116 = vmatprep.mubr.f32.mxu1 %v11183_v48  ;;  %v11244_v48 = vpop.f32.mrb[107].mxu0 }
 0x85b   : > { %v11246_v61 = vpop.f32.mrb[108].mxu0 }
 0x85c   : > { %v11248_v23 = vpop.f32.mrb[109].mxu0 }
 0x85d   : > { %5117 = vmatmul.mubr.f32.gmra.mrb[94].mxu1 %v4167_v10 }
 0x85e   : > { %5121 = vmatprep.mubr.f32.mxu1 %v11186_v41  ;;  %v4171_v41 = vld [vmem:[#allocation2 + $0x22f] sm:$0xff] }
 0x861   : > { %5122 = vmatmul.mubr.f32.gmra.mrb[96].mxu1 %v11002_v12  ;;  %v11250_v12 = vpop.f32.mrb[110].mxu0 }
 0x862   : > { %5126 = vmatprep.mubr.f32.mxu1 %v11189_v44  ;;  %v11252_v44 = vpop.f32.mrb[111].mxu0 }
 0x865   : > { %5127 = vmatmul.mubr.f32.gmra.mrb[98].mxu1 %v11010_v42  ;;  %v11254_v42 = vpop.f32.mrb[112].mxu0 }
 0x866   : > { %5131 = vmatprep.mubr.f32.mxu1 %v7966_v35  ;;  %v11256_v14 = vpop.f32.mrb[113].mxu0 }
 0x867   : > { %v11258_v33 = vpop.f32.mrb[114].mxu0 }
 0x868   : > { %v11260_v9 = vpop.f32.mrb[115].mxu0 }
 0x869   : > { %5132 = vmatmul.mubr.f32.gmra.mrb[100].mxu1 %v4170_v7  ;;  %v11262_v30 = vpop.f32.mrb[116].mxu0  ;;  %v11298_v7 = vld [vmem:[%s11656_s4] ss:$0 sm:$0xff] }
 0x86a   : > { %5136 = vmatprep.mubr.f32.mxu1 %v7966_v35  ;;  %v11264_v32 = vpop.f32.mrb[117].mxu0  ;;  %v11293_v35 = vld [vmem:[%s11655_s13] ss:$0 sm:$0xff]  ;;  %s8165_s13 = scalar_lea.vmem %s11469_s26, 4096 }
 0x86b   : > { %v11266_v57 = vpop.f32.mrb[118].mxu0  ;;  %p8166_p9 = scmp.ne.s32.totalorder %s11469_s26, %s8165_s13  ;;  %p8173_p2 = scmp.lt.s32.totalorder %s8171_s18, %s8165_s13 }
 0x86c   : > { %v11268_v55 = vpop.f32.mrb[119].mxu0 }
 0x86d   : > { %5137 = vmatmul.mubr.f32.gmra.mrb[102].mxu1 %v4171_v41  ;;  %p8167_p1 = pnand %p8166_p9, %p11670_p12  ;;  %p8174_p8 = por %p8173_p2, %p8172_p0 }
 0x86e   : > { %v11270_v47 = vpop.f32.mrb[120].mxu0 }
 0x86f   : > { %v11272_v43 = vpop.f32.mrb[121].mxu0  ;;  %p8168_p13 = pneg %p8167_p1 }
 0x871   : > { %p8175_p4 = pnand %p8174_p8, %p8168_p13 }
 0x872   : > { %v11274_v8 = vpop.f32.mrb[122].mxu0 }
 0x873   : > { %v11276_v16 = vpop.f32.mrb[123].mxu0 }
 0x876   : > { %v11278_v56 = vpop.f32.mrb[124].mxu0 }
 0x877   : > { %11649 = vst [vmem:[#allocation31_spill] sm:$0xff] %v11278_v56  ;;  %v11280_v53 = vpop.f32.mrb[125].mxu0 }
 0x878   : > { %11650 = vst [vmem:[#allocation26_spill] sm:$0xff] %v11280_v53 }
 0x87a   : > { %v11282_v62 = vpop.f32.mrb[126].mxu0 }
 0x87b   : > { %11651 = vst [vmem:[#allocation21_spill] sm:$0xff] %v11282_v62  ;;  %v11284_v4 = vpop.f32.mrb[127].mxu0  ;;  %v5440_v62 = vadd.f32 %v11298_v7, %v5439_v60 }
 0x87c   : > { %11652 = vst [vmem:[#allocation27_spill] sm:$0xff] %v11284_v4 }
 0x87e   : > { %v11286_v58 = vpop.f32.mrb[128].mxu0 }
 0x87f   : > { %11653 = vst [vmem:[#allocation28_spill] sm:$0xff] %v11286_v58  ;;  %v11288_v10 = vpop.f32.mrb[129].mxu0 }
 0x880   : > { %11654 = vst [vmem:[#allocation29_spill] sm:$0xff] %v11288_v10  ;;  %v5445_v10 = vadd.f32 %v11220_v22, %v11298_v7  ;;  %v5450_v22 = vadd.f32 %v11298_v7, %v11225_v6 }
 0x8c4   : > { %v4983_v41 = vpop.f32.mrb[40].mxu1 }
 0x8c5   : > { %v7138_v29 = vadd.f32 %v11293_v35, %v4983_v41  ;;  %v4985_v20 = vpop.f32.mrb[41].mxu1 }
 0x8c7   : > { %v5209_v58 = vadd.f32 %v7138_v29, %v10969_v24 }
 0x8c8   : > { %v4988_v4 = vpop.f32.mrb[42].mxu1 }
 0x8c9   : > { %v5598_v56 = vadd.f32 %v5440_v62, %v5209_v58  ;;  %v7139_v63 = vadd.f32 %v11293_v35, %v4988_v4  ;;  %v4990_v53 = vpop.f32.mrb[43].mxu1  ;;  %v5455_v4 = vadd.f32 %v11223_v13, %v11298_v7 }
 0x8cb   : > { %5630 = vst [vmem:[%s11308_s30] sm:$0xff] %v5598_v56  ;;  %v5214_v20 = vadd.f32 %v7139_v63, %v10967_v38 }
 0x8cc   : > { %v4993_v60 = vpop.f32.mrb[44].mxu1 }
 0x8cd   : > { %v5599_v41 = vadd.f32 %v5445_v10, %v5214_v20  ;;  %v7140_v24 = vadd.f32 %v11293_v35, %v4993_v60  ;;  %v4995_v29 = vpop.f32.mrb[45].mxu1 }
 0x8cf   : > { %5631 = vst [vmem:[%s11308_s30 + $0x8] sm:$0xff] %v5599_v41  ;;  %v5219_v53 = vadd.f32 %v7140_v24, %v10975_v3  ;;  %v5460_v3 = vadd.f32 %v11298_v7, %v11231_v19  ;;  %v5465_v24 = vadd.f32 %v11229_v0, %v11298_v7 }
 0x8d0   : > { %v4998_v62 = vpop.f32.mrb[46].mxu1 }
 0x8d1   : > { %v5600_v58 = vadd.f32 %v5450_v22, %v5219_v53  ;;  %v7141_v56 = vadd.f32 %v11293_v35, %v4998_v62  ;;  %v5000_v38 = vpop.f32.mrb[47].mxu1 }
 0x8d2   : > { %v5475_v38 = vadd.f32 %v11235_v39, %v11298_v7 }
 0x8d3   : > { %5632 = vst [vmem:[%s11308_s30 + $0x10] sm:$0xff] %v5600_v58  ;;  %v5224_v63 = vadd.f32 %v7141_v56, %v10973_v21 }
 0x8d4   : > { %v5003_v10 = vpop.f32.mrb[48].mxu1 }
 0x8d5   : > { %v5601_v20 = vadd.f32 %v5455_v4, %v5224_v63  ;;  %v7142_v60 = vadd.f32 %v11293_v35, %v5003_v10  ;;  %v5005_v6 = vpop.f32.mrb[49].mxu1 }
 0x8d7   : > { %5633 = vst [vmem:[%s11308_s30 + $0x18] sm:$0xff] %v5601_v20  ;;  %v5229_v13 = vadd.f32 %v7142_v60, %v10981_v46  ;;  %v5470_v46 = vadd.f32 %v11298_v7, %v11237_v54 }
 0x8d8   : > { %v5008_v41 = vpop.f32.mrb[50].mxu1 }
 0x8d9   : > { %v5602_v29 = vadd.f32 %v5460_v3, %v5229_v13  ;;  %v7143_v22 = vadd.f32 %v11293_v35, %v5008_v41  ;;  %v5010_v21 = vpop.f32.mrb[51].mxu1  ;;  %v5485_v41 = vadd.f32 %v11242_v51, %v11298_v7 }
 0x8db   : > { %5634 = vst [vmem:[%s11308_s30 + $0x20] sm:$0xff] %v5602_v29  ;;  %v5234_v53 = vadd.f32 %v7143_v22, %v10979_v2 }
 0x8dc   : > { %v5013_v62 = vpop.f32.mrb[52].mxu1 }
 0x8dd   : > { %v5603_v4 = vadd.f32 %v5465_v24, %v5234_v53  ;;  %v7144_v58 = vadd.f32 %v11293_v35, %v5013_v62  ;;  %v5015_v19 = vpop.f32.mrb[53].mxu1 }
 0x8df   : > { %5635 = vst [vmem:[%s11308_s30 + $0x28] sm:$0xff] %v5603_v4  ;;  %v5239_v0 = vadd.f32 %v7144_v58, %v10987_v59  ;;  %v5480_v59 = vadd.f32 %v11298_v7, %v11244_v48  ;;  %v5495_v58 = vadd.f32 %v11246_v61, %v11298_v7 }
 0x8e0   : > { %v5018_v56 = vpop.f32.mrb[54].mxu1 }
 0x8e1   : > { %v5604_v63 = vadd.f32 %v5470_v46, %v5239_v0  ;;  %v7145_v10 = vadd.f32 %v11293_v35, %v5018_v56  ;;  %v5020_v2 = vpop.f32.mrb[55].mxu1 }
 0x8e2   : > { %v5505_v2 = vadd.f32 %v11250_v12, %v11298_v7 }
 0x8e3   : > { %5636 = vst [vmem:[%s11308_s30 + $0x30] sm:$0xff] %v5604_v63  ;;  %v5244_v20 = vadd.f32 %v7145_v10, %v10985_v34 }
 0x8e4   : > { %v5023_v60 = vpop.f32.mrb[56].mxu1 }
 0x8e5   : > { %v5605_v6 = vadd.f32 %v5475_v38, %v5244_v20  ;;  %v7146_v3 = vadd.f32 %v11293_v35, %v5023_v60  ;;  %v5025_v54 = vpop.f32.mrb[57].mxu1 }
 0x8e7   : > { %5637 = vst [vmem:[%s11308_s30 + $0x38] sm:$0xff] %v5605_v6  ;;  %v5249_v39 = vadd.f32 %v7146_v3, %v10993_v5  ;;  %v5490_v5 = vadd.f32 %v11298_v7, %v11248_v23 }
 0x8e8   : > { %v5028_v13 = vpop.f32.mrb[58].mxu1 }
 0x8e9   : > { %v5606_v24 = vadd.f32 %v5480_v59, %v5249_v39  ;;  %v7147_v29 = vadd.f32 %v11293_v35, %v5028_v13  ;;  %v5030_v34 = vpop.f32.mrb[59].mxu1  ;;  %v5515_v13 = vadd.f32 %v11254_v42, %v11298_v7 }
 0x8eb   : > { %5638 = vst [vmem:[%s11308_s30 + $0x40] sm:$0xff] %v5606_v24  ;;  %v5254_v22 = vadd.f32 %v7147_v29, %v10991_v40 }
 0x8ec   : > { %v5033_v21 = vpop.f32.mrb[60].mxu1 }
 0x8ed   : > { %v5607_v53 = vadd.f32 %v5485_v41, %v5254_v22  ;;  %v7148_v62 = vadd.f32 %v11293_v35, %v5033_v21  ;;  %v5035_v48 = vpop.f32.mrb[61].mxu1 }
 0x8ef   : > { %5639 = vst [vmem:[%s11308_s30 + $0x48] sm:$0xff] %v5607_v53  ;;  %v5259_v51 = vadd.f32 %v7148_v62, %v10999_v52  ;;  %v5500_v52 = vadd.f32 %v11298_v7, %v11252_v44  ;;  %v5525_v62 = vadd.f32 %v11258_v33, %v11298_v7 }
 0x8f0   : > { %v5038_v4 = vpop.f32.mrb[62].mxu1 }
 0x8f1   : > { %v5608_v19 = vadd.f32 %v5490_v5, %v5259_v51  ;;  %v7149_v46 = vadd.f32 %v11293_v35, %v5038_v4  ;;  %v5040_v40 = vpop.f32.mrb[63].mxu1 }
 0x8f2   : > { %v5535_v40 = vadd.f32 %v11262_v30, %v11298_v7 }
 0x8f3   : > { %5640 = vst [vmem:[%s11308_s30 + $0x50] sm:$0xff] %v5608_v19  ;;  %v5264_v0 = vadd.f32 %v7149_v46, %v10997_v36 }
 0x8f4   : > { %v5043_v56 = vpop.f32.mrb[64].mxu1 }
 0x8f5   : > { %v5609_v38 = vadd.f32 %v5495_v58, %v5264_v0  ;;  %v7150_v63 = vadd.f32 %v11293_v35, %v5043_v56  ;;  %v5045_v23 = vpop.f32.mrb[65].mxu1 }
 0x8f7   : > { %5641 = vst [vmem:[%s11308_s30 + $0x58] sm:$0xff] %v5609_v38  ;;  %v5269_v61 = vadd.f32 %v7150_v63, %v11007_v31  ;;  %v5510_v31 = vadd.f32 %v11298_v7, %v11256_v14 }
 0x8f8   : > { %v5048_v10 = vpop.f32.mrb[66].mxu1 }
 0x8f9   : > { %v5610_v20 = vadd.f32 %v5500_v52, %v5269_v61  ;;  %v7151_v60 = vadd.f32 %v11293_v35, %v5048_v10  ;;  %v5050_v36 = vpop.f32.mrb[67].mxu1  ;;  %v5545_v10 = vadd.f32 %v11266_v57, %v11298_v7 }
 0x8fb   : > { %5642 = vst [vmem:[%s11308_s30 + $0x60] sm:$0xff] %v5610_v20  ;;  %v5274_v6 = vadd.f32 %v7151_v60, %v11005_v27 }
 0x8fc   : > { %v5053_v3 = vpop.f32.mrb[68].mxu1 }
 0x8fd   : > { %v5611_v54 = vadd.f32 %v5505_v2, %v5274_v6  ;;  %v7152_v59 = vadd.f32 %v11293_v35, %v5053_v3  ;;  %v5055_v44 = vpop.f32.mrb[69].mxu1 }
 0x8ff   : > { %5643 = vst [vmem:[%s11308_s30 + $0x68] sm:$0xff] %v5611_v54  ;;  %v5279_v12 = vadd.f32 %v7152_v59, %v11015_v15  ;;  %v5520_v15 = vadd.f32 %v11298_v7, %v11260_v9  ;;  %v5555_v59 = vadd.f32 %v11270_v47, %v11298_v7 }
 0x900   : > { %v5058_v39 = vpop.f32.mrb[70].mxu1 }
 0x901   : > { %v5612_v41 = vadd.f32 %v5510_v31, %v5279_v12  ;;  %v7153_v24 = vadd.f32 %v11293_v35, %v5058_v39  ;;  %v5060_v27 = vpop.f32.mrb[71].mxu1 }
 0x902   : > { %v5565_v27 = vadd.f32 %v11274_v8, %v11298_v7 }
 0x903   : > { %5644 = vst [vmem:[%s11308_s30 + $0x70] sm:$0xff] %v5612_v41  ;;  %v5284_v29 = vadd.f32 %v7153_v24, %v11013_v50 }
 0x904   : > { %v5063_v34 = vpop.f32.mrb[72].mxu1 }
 0x905   : > { %v5613_v22 = vadd.f32 %v5515_v13, %v5284_v29  ;;  %v7154_v21 = vadd.f32 %v11293_v35, %v5063_v34  ;;  %v5065_v14 = vpop.f32.mrb[73].mxu1 }
 0x907   : > { %5645 = vst [vmem:[%s11308_s30 + $0x78] sm:$0xff] %v5613_v22  ;;  %v5289_v42 = vadd.f32 %v7154_v21, %v11021_v37  ;;  %v5530_v37 = vadd.f32 %v11298_v7, %v11264_v32 }
 0x908   : > { %v5068_v53 = vpop.f32.mrb[74].mxu1 }
 0x909   : > { %v5614_v48 = vadd.f32 %v5520_v15, %v5289_v42  ;;  %v7155_v5 = vadd.f32 %v11293_v35, %v5068_v53  ;;  %v5070_v50 = vpop.f32.mrb[75].mxu1  ;;  %v11657_v42 = vld [vmem:[#allocation26_spill] sm:$0xff] }
 0x90a   : > { %v11658_v53 = vld [vmem:[#allocation30_spill] sm:$0xff] }
 0x90b   : > { %5646 = vst [vmem:[%s11308_s30 + $0x80] sm:$0xff] %v5614_v48  ;;  %v5294_v51 = vadd.f32 %v7155_v5, %v11019_v28  ;;  %v11659_v48 = vld [vmem:[#allocation31_spill] sm:$0xff] }
 0x90c   : > { %v5073_v4 = vpop.f32.mrb[76].mxu1  ;;  %v5575_v5 = vadd.f32 %v11659_v48, %v11298_v7 }
 0x90d   : > { %v5615_v58 = vadd.f32 %v5525_v62, %v5294_v51  ;;  %v7156_v19 = vadd.f32 %v11293_v35, %v5073_v4  ;;  %v5075_v9 = vpop.f32.mrb[77].mxu1  ;;  %v11660_v4 = vld [vmem:[#allocation22_spill] sm:$0xff] }
 0x90f   : > { %5647 = vst [vmem:[%s11308_s30 + $0x88] sm:$0xff] %v5615_v58  ;;  %v5299_v33 = vadd.f32 %v7156_v19, %v11028_v11  ;;  %v5540_v11 = vadd.f32 %v11298_v7, %v11268_v55 }
 0x910   : > { %v5078_v46 = vpop.f32.mrb[78].mxu1 }
 0x911   : > { %v5616_v0 = vadd.f32 %v5530_v37, %v5299_v33  ;;  %v7157_v56 = vadd.f32 %v11293_v35, %v5078_v46  ;;  %v5080_v28 = vpop.f32.mrb[79].mxu1  ;;  %v11661_v46 = vld [vmem:[#allocation27_spill] sm:$0xff] }
 0x913   : > { %5648 = vst [vmem:[%s11308_s30 + $0x90] sm:$0xff] %v5616_v0  ;;  %v5304_v38 = vadd.f32 %v7157_v56, %v11025_v17  ;;  %v11662_v0 = vld [vmem:[#allocation32_spill] sm:$0xff] }
 0x914   : > { %v5083_v63 = vpop.f32.mrb[80].mxu1 }
 0x915   : > { %v5617_v23 = vadd.f32 %v5535_v40, %v5304_v38  ;;  %v7158_v52 = vadd.f32 %v11293_v35, %v5083_v63  ;;  %v5085_v32 = vpop.f32.mrb[81].mxu1  ;;  %v5580_v40 = vadd.f32 %v11298_v7, %v11661_v46  ;;  %v11663_v38 = vld [vmem:[#allocation21_spill] sm:$0xff] }
 0x916   : > { %v5585_v63 = vadd.f32 %v11663_v38, %v11298_v7 }
 0x917   : > { %5649 = vst [vmem:[%s11308_s30 + $0x98] sm:$0xff] %v5617_v23  ;;  %v5309_v30 = vadd.f32 %v7158_v52, %v11038_v25  ;;  %v5550_v25 = vadd.f32 %v11298_v7, %v11272_v43 }
 0x918   : > { %v5088_v61 = vpop.f32.mrb[82].mxu1 }
 0x919   : > { %v5618_v2 = vadd.f32 %v5540_v11, %v5309_v30  ;;  %v7159_v20 = vadd.f32 %v11293_v35, %v5088_v61  ;;  %v5090_v17 = vpop.f32.mrb[83].mxu1  ;;  %v11664_v11 = vld [vmem:[#allocation23_spill] sm:$0xff] }
 0x91a   : > { %v11665_v17 = vld [vmem:[#allocation29_spill] sm:$0xff] }
 0x91b   : > { %5650 = vst [vmem:[%s11308_s30 + $0xa0] sm:$0xff] %v5618_v2  ;;  %v5314_v60 = vadd.f32 %v7159_v20, %v11033_v18 }
 0x91c   : > { %v5093_v36 = vpop.f32.mrb[84].mxu1 }
 0x91d   : > { %v5619_v6 = vadd.f32 %v5545_v10, %v5314_v60  ;;  %v7160_v3 = vadd.f32 %v11293_v35, %v5093_v36  ;;  %v5095_v55 = vpop.f32.mrb[85].mxu1  ;;  %v5590_v60 = vadd.f32 %v11298_v7, %v11665_v17  ;;  %v11666_v36 = vld [vmem:[#allocation25_spill] sm:$0xff] }
 0x91e   : > { %v11667_v55 = vld [vmem:[#allocation28_spill] sm:$0xff] }
 0x91f   : > { %5651 = vst [vmem:[%s11308_s30 + $0xa8] sm:$0xff] %v5619_v6  ;;  %v5319_v57 = vadd.f32 %v7160_v3, %v11049_v45  ;;  %v5560_v45 = vadd.f32 %v11298_v7, %v11276_v16 }
 0x920   : > { %v5098_v54 = vpop.f32.mrb[86].mxu1 }
 0x921   : > { %v5620_v44 = vadd.f32 %v5550_v25, %v5319_v57  ;;  %v7161_v31 = vadd.f32 %v11293_v35, %v5098_v54  ;;  %v5100_v18 = vpop.f32.mrb[87].mxu1  ;;  %v5595_v25 = vadd.f32 %v11667_v55, %v11298_v7 }
 0x923   : > { %5652 = vst [vmem:[%s11308_s30 + $0xb0] sm:$0xff] %v5620_v44  ;;  %v5324_v12 = vadd.f32 %v7161_v31, %v11044_v49  ;;  %v11668_v44 = vld [vmem:[#allocation24_spill] sm:$0xff] }
 0x924   : > { %v5103_v39 = vpop.f32.mrb[88].mxu1 }
 0x925   : > { %v5621_v13 = vadd.f32 %v5555_v59, %v5324_v12  ;;  %v7162_v41 = vadd.f32 %v11293_v35, %v5103_v39  ;;  %v5105_v43 = vpop.f32.mrb[89].mxu1 }
 0x927   : > { %5653 = vst [vmem:[%s11308_s30 + $0xb8] sm:$0xff] %v5621_v13  ;;  %v5329_v47 = vadd.f32 %v7162_v41, %v11060_v1  ;;  %v5570_v1 = vadd.f32 %v11298_v7, %v11657_v42 }
 0x928   : > { %v5108_v24 = vpop.f32.mrb[90].mxu1 }
 0x929   : > { %v5622_v29 = vadd.f32 %v5560_v45, %v5329_v47  ;;  %v7163_v34 = vadd.f32 %v11293_v35, %v5108_v24  ;;  %v5110_v49 = vpop.f32.mrb[91].mxu1 }
 0x92b   : > { %5654 = vst [vmem:[%s11308_s30 + $0xc0] sm:$0xff] %v5622_v29  ;;  %v5334_v22 = vadd.f32 %v7163_v34, %v11055_v26 }
 0x92c   : > { %v5113_v21 = vpop.f32.mrb[92].mxu1 }
 0x92d   : > { %v5623_v14 = vadd.f32 %v5565_v27, %v5334_v22  ;;  %v7164_v15 = vadd.f32 %v11293_v35, %v5113_v21  ;;  %v5115_v16 = vpop.f32.mrb[93].mxu1 }
 0x92f   : > { %5655 = vst [vmem:[%s11308_s30 + $0xc8] sm:$0xff] %v5623_v14  ;;  %v5339_v8 = vadd.f32 %v7164_v15, %v11658_v53 }
 0x930   : > { %v5118_v62 = vpop.f32.mrb[94].mxu1 }
 0x931   : > { %v5624_v50 = vadd.f32 %v5570_v1, %v5339_v8  ;;  %v7165_v51 = vadd.f32 %v11293_v35, %v5118_v62  ;;  %v5120_v26 = vpop.f32.mrb[95].mxu1 }
 0x933   : > { %5656 = vst [vmem:[%s11308_s30 + $0xd0] sm:$0xff] %v5624_v50  ;;  %v5344_v58 = vadd.f32 %v7165_v51, %v11660_v4 }
 0x934   : > { %v5123_v19 = vpop.f32.mrb[96].mxu1 }
 0x935   : > { %v5625_v9 = vadd.f32 %v5575_v5, %v5344_v58  ;;  %v7166_v37 = vadd.f32 %v11293_v35, %v5123_v19  ;;  %v5125_v33 = vpop.f32.mrb[97].mxu1 }
 0x937   : > { %5657 = vst [vmem:[%s11308_s30 + $0xd8] sm:$0xff] %v5625_v9  ;;  %v5349_v56 = vadd.f32 %v7166_v37, %v11662_v0 }
 0x938   : > { %v5128_v28 = vpop.f32.mrb[98].mxu1 }
 0x939   : > { %v5626_v23 = vadd.f32 %v5580_v40, %v5349_v56  ;;  %v7167_v52 = vadd.f32 %v11293_v35, %v5128_v28  ;;  %v5130_v32 = vpop.f32.mrb[99].mxu1 }
 0x93b   : > { %5658 = vst [vmem:[%s11308_s30 + $0xe0] sm:$0xff] %v5626_v23  ;;  %v5354_v30 = vadd.f32 %v7167_v52, %v11664_v11 }
 0x93c   : > { %v5133_v61 = vpop.f32.mrb[100].mxu1 }
 0x93d   : > { %v5627_v10 = vadd.f32 %v5585_v63, %v5354_v30  ;;  %v7168_v2 = vadd.f32 %v11293_v35, %v5133_v61  ;;  %v5135_v20 = vpop.f32.mrb[101].mxu1 }
 0x93f   : > { %5659 = vst [vmem:[%s11308_s30 + $0xe8] sm:$0xff] %v5627_v10  ;;  %v5359_v6 = vadd.f32 %v7168_v2, %v11666_v36 }
 0x940   : > { %v5138_v3 = vpop.f32.mrb[102].mxu1 }
 0x941   : > { %v5628_v57 = vadd.f32 %v5590_v60, %v5359_v6  ;;  %v7169_v54 = vadd.f32 %v11293_v35, %v5138_v3  ;;  %v5140_v59 = vpop.f32.mrb[103].mxu1 }
 0x943   : > { %5660 = vst [vmem:[%s11308_s30 + $0xf0] sm:$0xff] %v5628_v57  ;;  %v5364_v31 = vadd.f32 %v7169_v54, %v11668_v44 }
 0x945   : > { %v5629_v7 = vadd.f32 %v5595_v25, %v5364_v31 }
 0x947   : > { %5661 = vst [vmem:[%s11308_s30 + $0xf8] sm:$0xff] %v5629_v7 }
 0x948   : > { %8178 = shalt.err (!%p8175_p4)
}
 0x949   : > { %s8179_s4 = scalar_lea.hbm %s11467_s16, 4096  ;;  %s8183_s19 = scalar_lea.hbm %s11669_s15, 8192 }
 0x94a   : > { %p8180_p10 = scmp.ne.s32.totalorder %s11467_s16, %s8179_s4  ;;  %p8184_p5 = scmp.lt.u32.totalorder %s11467_s16, %s11669_s15 }
 0x94b   : > { %p8185_p7 = scmp.lt.u32.totalorder %s8183_s19, %s8179_s4  ;;  %p8187_p9 = scmp.lt.u32.totalorder %s8179_s4, %s11467_s16 }
 0x94c   : > { %p8181_p11 = pnand %p8180_p10, %p11670_p12 }
 0x94d   : > { %p8186_p6 = por %p8185_p7, %p8184_p5 }
 0x94e   : > { %p8182_p3 = pneg %p8181_p11 }
 0x94f   : > { %p8188_p1 = por %p8187_p9, %p8186_p6 }
 0x951   : > { %p8189_p13 = pnand %p8188_p1, %p8182_p3 }
 0x953   : > { %8192 = shalt.err (!%p8189_p13)
}
 0x954   : > { %s8258_s13 = smov 128   ;;  %s8259_s6 = smov 8  }
 0x955   : > { %7580 = dma.vmem_to_hbm [thread:$0]  (%p11670_p12), %s11469_s26, 4096, %s11467_s16, %s5663_s28, %s8258_s13, %s8258_s13, %s8259_s6  }
 0x956 PF: > { %s5691_s18 = sand.u32 1, %s8231_s21   ;;  %p11671_p0 = scmp.ne.s32.totalorder %s11578_s17, 0 }
 0x957   : > { %p11672_p2 = scmp.ge.s32.totalorder %s8243_s24, 2  ;;  %s5692_s4 = scalar_lea.sflag [#allocation5], %s5691_s18 }
 0x959   : > { %p7606_p8 = pnand %p11672_p2, %p11671_p0 }
 0x95b   : > { %8226 = dma.done.wait (!%p7606_p8), %s5692_s4, 4096  }
 0x95c   : > { %8228 = vsyncadd (!%p7606_p8), %s5692_s4, 4294963200  ;;  %p32_p4 = scmp.ge.s32.totalorder %s8539_s29, 4   ;;  %s11673_s21 = smov %s8235_s22 }
 0x95d   : > { %s11674_s22 = smov %s8239_s23  ;;  %s11675_s23 = smov %s8550_s8 }
 0x95e   : > { %s11676_s24 = smov %s8539_s29  ;;  %34 = sbr.rel (!%p32_p4) target bundleno = 18 (0x12), region = 158 }
 0x965   :  { %5697 = vsyncpa [#allocation4], 1 }
 0x966   :  { %5699 = vsyncpa [#allocation4 + $0x1], 1 }
 0x967   :  { %5700 = vsyncpa [#allocation7], 1 }
 0x968   :  { %5701 = vsyncpa [#allocation10], 1 }
 0x969   :  { %5702 = vsyncpa [#allocation13], 1 }
 0x96a   :  { %5703 = vsyncpa [#allocation5], 1 }
 0x96b   :  { %5705 = vsyncpa [#allocation5 + $0x1], 1 }

</bundles_post_ra>
